<compile_context>
chip_gen: v6e
topology: v6e:2x2x1
jax: 0.10.0
libtpu: 0.0.40
codegen_flags: <defaults>
</compile_context>

<pallas_src>
import math

import jax
import jax.numpy as jnp
from jax.experimental import pallas as pl
from jax.experimental.pallas import tpu as pltpu


# ------------------------------ tiling config --------------------------------

MAX_TM = 4096             # max lane tile (cols) for the plain GEMM / affine path
ROW_MAX_COLS = 16384      # max lane tile (cols) for the row-tap conv path
A_TILE_BYTES = 4 * 2**20  # target A-operand tile bytes in the row-tap conv path


def _default_vmem_limit():
    try:
        cap = int(pltpu.get_tpu_info().vmem_capacity_bytes)
        return min(100 * 2**20, int(0.7 * cap))
    except Exception:
        return 48 * 2**20


VMEM_LIMIT = _default_vmem_limit()


def _cdiv(a, b):
    return -(-a // b)


def _round_up(a, b):
    return _cdiv(a, b) * b


def _tile_m(m):
    """Lane tiling for (C, M) arrays: multiple of 128, <= MAX_TM, and >= 2
    tiles whenever M can be split (so v7x's second TensorCore gets work)."""
    mp = _round_up(m, 128)
    tm = min(MAX_TM, max(128, 128 * ((mp // 128 + 1) // 2)))
    mp = _round_up(mp, tm)
    return tm, mp


def _pick_rows(wl, nr, k):
    """Rows-per-tile q and tile count g for the row-tap conv path.

    q*wl (the lane tile) is always a multiple of 128; the A tile (k, q*wl)
    targets ~A_TILE_BYTES; rows are balanced over >= 2 tiles when splittable."""
    qa = 128 // math.gcd(wl, 128)            # min rows making q*wl % 128 == 0
    cols_cap = max(qa * wl, min(ROW_MAX_COLS, A_TILE_BYTES // (2 * k)))
    q = qa * max(1, cols_cap // (qa * wl))
    g = _cdiv(nr, q)
    if g == 1 and nr > qa:                   # give v7x's second core work
        g = 2
    q = qa * _cdiv(_cdiv(nr, g), qa)         # balance rows evenly across tiles
    g = _cdiv(nr, q)
    return q, g


# ----------------------------- kernel helpers ---------------------------------

def _apply_act(y, act):
    if act == "relu":
        return jnp.maximum(y, 0.0)
    if act == "sigmoid":
        ey = jnp.exp(-jnp.abs(y))
        return jnp.where(y >= 0.0, 1.0 / (1.0 + ey), ey / (1.0 + ey))
    return y


def _emit(o_ref, ssum_ref, ssq_ref, y, mask):
    """Store the bf16 activation + masked per-channel partial (sum, sum^2)."""
    o_ref[...] = y.astype(o_ref.dtype)
    ym = y * mask                                 # mask is 0/1 f32
    ssum_ref[...] = jnp.sum(ym, axis=1, keepdims=True)[None]
    ssq_ref[...] = jnp.sum(ym * y, axis=1, keepdims=True)[None]


# ------------------------------ Pallas kernels --------------------------------

def _conv_rows_kernel(kw, dil, act, use_res):
    """y = act(sum_j shift_{j*dil}(W_j @ A) + b [+ res]); emits masked stats.

    A holds only the kh ROW taps (row-only im2col); the kw COLUMN taps are
    gathered in-kernel: because rows are laid out at the conv's padded width,
    a conv output column x needs A column x + j*dil — a uniform lane shift
    (wrapped values land only in garbage columns that the mask excludes)."""
    def kernel(w_ref, a_ref, b_ref, m_ref, *rest):
        rest = list(rest)
        r_ref = rest.pop(0) if use_res else None
        o_ref, ssum_ref, ssq_ref = rest

        a = a_ref[...]                                           # (K, tm) bf16
        acc = jnp.dot(w_ref[0], a, preferred_element_type=jnp.float32)
        for j in range(1, kw):
            y = jnp.dot(w_ref[j], a, preferred_element_type=jnp.float32)
            jd = j * dil
            acc = acc + jnp.concatenate([y[:, jd:], y[:, :jd]], axis=1)
        acc = acc + b_ref[...]
        if use_res:
            acc = acc + r_ref[...].astype(jnp.float32)
        y = _apply_act(acc, act)
        _emit(o_ref, ssum_ref, ssq_ref, y, m_ref[...])
    return kernel


def _mm_kernel(act):
    """y = act(W @ A + b); emits masked stats (full-im2col stride-2 convs)."""
    def kernel(w_ref, a_ref, b_ref, m_ref, o_ref, ssum_ref, ssq_ref):
        y = jnp.dot(w_ref[...], a_ref[...], preferred_element_type=jnp.float32)
        y = _apply_act(y + b_ref[...], act)
        _emit(o_ref, ssum_ref, ssq_ref, y, m_ref[...])
    return kernel


def _affine_kernel(act):
    """y = act(x * scale + shift) per channel; emits masked stats."""
    def kernel(x_ref, s_ref, b_ref, m_ref, o_ref, ssum_ref, ssq_ref):
        y = _apply_act(x_ref[...].astype(jnp.float32) * s_ref[...] + b_ref[...], act)
        _emit(o_ref, ssum_ref, ssq_ref, y, m_ref[...])
    return kernel


# ----------------------------- kernel wrappers ---------------------------------

def _stats_finalize(ssum, ssq):
    return jnp.concatenate([jnp.sum(ssum, axis=0), jnp.sum(ssq, axis=0)], axis=1)


def affine_act(x, scale, shift, act="relu"):
    """x: (C, M) bf16 -> act(x*scale+shift) bf16; also per-channel [sum, sum^2]."""
    c, m = x.shape
    tm, mp = _tile_m(m)
    if mp != m:
        x = jnp.pad(x, ((0, 0), (0, mp - m)))
    g = mp // tm
    valid = (jnp.arange(mp) < m).astype(jnp.float32).reshape(1, mp)
    y, ssum, ssq = pl.pallas_call(
        _affine_kernel(act),
        out_shape=(jax.ShapeDtypeStruct((c, mp), jnp.bfloat16),
                   jax.ShapeDtypeStruct((g, c, 1), jnp.float32),
                   jax.ShapeDtypeStruct((g, c, 1), jnp.float32)),
        grid=(g,),
        in_specs=[pl.BlockSpec((c, tm), lambda i: (0, i)),
                  pl.BlockSpec((c, 1), lambda i: (0, 0)),
                  pl.BlockSpec((c, 1), lambda i: (0, 0)),
                  pl.BlockSpec((1, tm), lambda i: (0, i))],
        out_specs=(pl.BlockSpec((c, tm), lambda i: (0, i)),
                   pl.BlockSpec((1, c, 1), lambda i: (i, 0, 0)),
                   pl.BlockSpec((1, c, 1), lambda i: (i, 0, 0))),
        compiler_params=pltpu.CompilerParams(
            dimension_semantics=("parallel",), vmem_limit_bytes=VMEM_LIMIT),
    )(x.astype(jnp.bfloat16),
      scale.reshape(c, 1).astype(jnp.float32),
      shift.reshape(c, 1).astype(jnp.float32), valid)
    if mp != m:
        y = y[:, :m]
    return y, _stats_finalize(ssum, ssq)


def matmul_fused(a, w, bias=None, act="none"):
    """a: (K, M) bf16, w: (Cout, K) bf16 -> (Cout, M) bf16 + [sum, sum^2]."""
    k, m = a.shape
    cout = w.shape[0]
    tm, mp = _tile_m(m)
    if mp != m:
        a = jnp.pad(a, ((0, 0), (0, mp - m)))
    g = mp // tm
    b = (bias if bias is not None else jnp.zeros((cout,), jnp.float32))
    b = b.reshape(cout, 1).astype(jnp.float32)
    valid = (jnp.arange(mp) < m).astype(jnp.float32).reshape(1, mp)
    y, ssum, ssq = pl.pallas_call(
        _mm_kernel(act),
        out_shape=(jax.ShapeDtypeStruct((cout, mp), jnp.bfloat16),
                   jax.ShapeDtypeStruct((g, cout, 1), jnp.float32),
                   jax.ShapeDtypeStruct((g, cout, 1), jnp.float32)),
        grid=(g,),
        in_specs=[pl.BlockSpec((cout, k), lambda i: (0, 0)),
                  pl.BlockSpec((k, tm), lambda i: (0, i)),
                  pl.BlockSpec((cout, 1), lambda i: (0, 0)),
                  pl.BlockSpec((1, tm), lambda i: (0, i))],
        out_specs=(pl.BlockSpec((cout, tm), lambda i: (0, i)),
                   pl.BlockSpec((1, cout, 1), lambda i: (i, 0, 0)),
                   pl.BlockSpec((1, cout, 1), lambda i: (i, 0, 0))),
        compiler_params=pltpu.CompilerParams(
            dimension_semantics=("parallel",), vmem_limit_bytes=VMEM_LIMIT),
    )(w, a, b, valid)
    if mp != m:
        y = y[:, :m]
    return y, _stats_finalize(ssum, ssq)


# --------------------------- convolution wrappers ------------------------------

def conv2d_rows(x, w_oihw, bias=None, dilation=1, pad=0, pad_mode="zero",
                act="none", res=None):
    """Stride-1 'same' Conv2d on channel-major bf16 activations via the
    row-only-im2col + in-kernel-column-tap Pallas GEMM.

    x: (Cin, N, H, W) bf16.  w_oihw: PyTorch Conv2d weight (Cout, Cin, kh, kw).
    Requires (k-1)*dilation == 2*pad (true for every stride-1 conv here).
    Returns (Cout, N, H, W) bf16 and per-channel [sum, sum^2] of the output."""
    cout, cin, kh, kw = w_oihw.shape
    c, n, h, w = x.shape
    assert c == cin
    assert (kh - 1) * dilation == 2 * pad and (kw - 1) * dilation == 2 * pad
    mode = "reflect" if pad_mode == "reflect" else "constant"
    xp = jnp.pad(x.astype(jnp.bfloat16),
                 ((0, 0), (0, 0), (pad, pad), (pad, pad)), mode=mode)
    wl = w + 2 * pad                               # row-wide layout width
    oh, ow = h, w

    # row-only im2col: only the kh row taps are materialized (kh-fold blow-up)
    rows = [xp[:, :, i * dilation:i * dilation + oh, :] for i in range(kh)]
    a = jnp.stack(rows, axis=0).reshape(kh * cin, n * oh, wl)
    k, nr = kh * cin, n * oh
    q, g = _pick_rows(wl, nr, k)
    nrp = q * g
    if nrp != nr:
        a = jnp.pad(a, ((0, 0), (0, nrp - nr), (0, 0)))
    tm = q * wl
    mp = nrp * wl
    a = a.reshape(k, mp)

    # per-column-tap weights, K ordered (row-tap, channel)
    wt = jnp.transpose(w_oihw, (3, 0, 2, 1)).reshape(kw, cout, k).astype(jnp.bfloat16)
    b = (bias if bias is not None else jnp.zeros((cout,), jnp.float32))
    b = b.reshape(cout, 1).astype(jnp.float32)
    # 0/1 mask of valid output columns (excludes per-row garbage + padded rows)
    valid = ((jnp.arange(nrp) < nr)[:, None] &
             (jnp.arange(wl) < ow)[None, :]).astype(jnp.float32).reshape(1, mp)

    inputs = [wt, a, b, valid]
    in_specs = [pl.BlockSpec((kw, cout, k), lambda i: (0, 0, 0)),
                pl.BlockSpec((k, tm), lambda i: (0, i)),
                pl.BlockSpec((cout, 1), lambda i: (0, 0)),
                pl.BlockSpec((1, tm), lambda i: (0, i))]
    if res is not None:
        r = jnp.pad(res.astype(jnp.bfloat16).reshape(cout, nr, ow),
                    ((0, 0), (0, nrp - nr), (0, wl - ow))).reshape(cout, mp)
        inputs.append(r)
        in_specs.append(pl.BlockSpec((cout, tm), lambda i: (0, i)))

    y, ssum, ssq = pl.pallas_call(
        _conv_rows_kernel(kw, dilation, act, res is not None),
        out_shape=(jax.ShapeDtypeStruct((cout, mp), jnp.bfloat16),
                   jax.ShapeDtypeStruct((g, cout, 1), jnp.float32),
                   jax.ShapeDtypeStruct((g, cout, 1), jnp.float32)),
        grid=(g,),
        in_specs=in_specs,
        out_specs=(pl.BlockSpec((cout, tm), lambda i: (0, i)),
                   pl.BlockSpec((1, cout, 1), lambda i: (i, 0, 0)),
                   pl.BlockSpec((1, cout, 1), lambda i: (i, 0, 0))),
        compiler_params=pltpu.CompilerParams(
            dimension_semantics=("parallel",), vmem_limit_bytes=VMEM_LIMIT),
    )(*inputs)

    y = y.reshape(cout, nrp, wl)[:, :nr, :ow].reshape(cout, n, oh, ow)
    return y, _stats_finalize(ssum, ssq)


def _im2col(xp, kh, kw, stride):
    """xp: (C, N, Hp, Wp) -> (kh*kw*C, N*OH*OW), K ordered (tap, channel)."""
    c, n, hp, wp = xp.shape
    oh = (hp - kh) // stride + 1
    ow = (wp - kw) // stride + 1
    taps = []
    for i in range(kh):
        for j in range(kw):
            taps.append(xp[:, :, i:i + (oh - 1) * stride + 1:stride,
                              j:j + (ow - 1) * stride + 1:stride])
    a = jnp.stack(taps, axis=0).reshape(kh * kw * c, n * oh * ow)
    return a, (n, oh, ow)


def conv2d_s2(x, w_oihw):
    """Conv2d(k=4, stride=2, padding=1, bias=False) via full im2col + GEMM."""
    cout, cin = w_oihw.shape[0], w_oihw.shape[1]
    xp = jnp.pad(x.astype(jnp.bfloat16), ((0, 0), (0, 0), (1, 1), (1, 1)))
    a, (n, oh, ow) = _im2col(xp, 4, 4, 2)
    w2 = jnp.transpose(w_oihw, (0, 2, 3, 1)).reshape(cout, 16 * cin)
    y, sums = matmul_fused(a, w2.astype(jnp.bfloat16))
    return y.reshape(cout, n, oh, ow), sums


# Sub-pixel decomposition of ConvTranspose2d(k=4, stride=2, padding=1):
#   output row 2i   uses x[i-1]*w[3] + x[i]*w[1]   -> 3-tap kernel [w3, w1, 0]
#   output row 2i+1 uses x[i]*w[2]   + x[i+1]*w[0] -> 3-tap kernel [0, w2, w0]
_SUBK = {0: ([3, 1, 0], (1.0, 1.0, 0.0)),
         1: ([0, 2, 0], (0.0, 1.0, 1.0))}


def _convT_to_conv3x3(w_iohw):
    """(Cin, Cout, 4, 4) transpose-conv weight -> (4*Cout, Cin, 3, 3) conv
    weight; output-channel group p = (dy, dx) produces that output parity."""
    subs = []
    for dy in (0, 1):
        iy, my = _SUBK[dy]
        for dx in (0, 1):
            ix, mx = _SUBK[dx]
            sub = w_iohw[:, :, iy, :][:, :, :, ix]               # (Cin, Cout, 3, 3)
            mask = (jnp.asarray(my, jnp.float32).reshape(3, 1) *
                    jnp.asarray(mx, jnp.float32).reshape(1, 3))
            subs.append(jnp.transpose(sub * mask, (1, 0, 2, 3)))  # (Cout, Cin, 3, 3)
    return jnp.concatenate(subs, axis=0)


def conv_transpose2d(x, w_iohw):
    """ConvTranspose2d(k=4, stride=2, padding=1, bias=False) via one stride-1
    3x3 conv producing all 4 output parities, recomposed by transpose+reshape."""
    cin, cout = w_iohw.shape[:2]
    _, n, h, w = x.shape
    wc = _convT_to_conv3x3(w_iohw)
    y4, sums4 = conv2d_rows(x, wc, pad=1, pad_mode="zero")        # (4*Cout, N, h, w)
    y4 = y4.reshape(2, 2, cout, n, h, w)
    out = jnp.transpose(y4, (2, 3, 4, 0, 5, 1)).reshape(cout, n, 2 * h, 2 * w)
    sums = jnp.sum(sums4.reshape(4, cout, 2), axis=0)
    return out, sums


# ------------------------------ BatchNorm glue ---------------------------------

def bn_scale_shift(gamma, beta, sums, count, eps=1e-5):
    mean = sums[:, 0] / count
    var = jnp.maximum(sums[:, 1] / count - mean * mean, 0.0)      # biased variance
    scale = gamma / jnp.sqrt(var + eps)
    shift = beta - mean * scale
    return scale, shift


def bn_relu_apply(y, sums, gamma, beta, eps=1e-5):
    c = y.shape[0]
    scale, shift = bn_scale_shift(gamma, beta, sums, y.size // c, eps)
    t, tsums = affine_act(y.reshape(c, -1), scale, shift, "relu")
    return t.reshape(y.shape), tsums


# -------------------------------- model forward --------------------------------

def mr_encoder_decoder(params, x_nchw, dilation=2, eps=1e-5):
    x = jnp.transpose(x_nchw, (1, 0, 2, 3)).astype(jnp.bfloat16)   # NCHW -> C,N,H,W

    # ---- encoder ----
    y, s = conv2d_rows(x, params["e1_w"], pad=3, pad_mode="reflect")       # 7x7
    y, _ = bn_relu_apply(y, s, params["e1_g"], params["e1_b"], eps)
    y, s = conv2d_s2(y, params["e2_w"])                                    # 4x4 /2
    y, _ = bn_relu_apply(y, s, params["e2_g"], params["e2_b"], eps)
    y, s = conv2d_s2(y, params["e3_w"])                                    # 4x4 /2
    y, s = bn_relu_apply(y, s, params["e3_g"], params["e3_b"], eps)        # -> block 1

    # ---- middle: pre-activation residual blocks ----
    for blk in params["middle"]:
        c = y.shape[0]
        sc1, sh1 = bn_scale_shift(blk["bn1_g"], blk["bn1_b"], s, y.size // c, eps)
        h0, _ = affine_act(y.reshape(c, -1), sc1, sh1, "relu")
        h0 = h0.reshape(y.shape)
        h1, s1 = conv2d_rows(h0, blk["c1_w"], blk["c1_b"], dilation=dilation,
                             pad=dilation, pad_mode="reflect")
        sc2, sh2 = bn_scale_shift(blk["bn2_g"], blk["bn2_b"], s1,
                                  h1.size // h1.shape[0], eps)
        h2, _ = affine_act(h1.reshape(h1.shape[0], -1), sc2, sh2, "relu")
        h2 = h2.reshape(h1.shape)
        y, s = conv2d_rows(h2, blk["c2_w"], blk["c2_b"], pad=1,
                           pad_mode="reflect", res=y)     # residual add in-kernel

    # ---- decoder ----
    y, s = conv_transpose2d(y, params["d1_w"])                              # x2
    y, _ = bn_relu_apply(y, s, params["d1_g"], params["d1_b"], eps)
    y, s = conv_transpose2d(y, params["d2_w"])                              # x2
    y, _ = bn_relu_apply(y, s, params["d2_g"], params["d2_b"], eps)
    y, _ = conv2d_rows(y, params["d3_w"], params["d3_b"], pad=3,
                       pad_mode="reflect", act="sigmoid")                   # 7x7 + sigmoid
    return jnp.transpose(y.astype(jnp.float32), (1, 0, 2, 3))               # -> NCHW


# ------------------------------- parameter setup --------------------------------

def init_params(key, nf=8, residual_blocks=2):
    ks = iter(jax.random.split(key, 128))

    def w(shape, s=0.1):
        return (s * jax.random.normal(next(ks), shape)).astype(jnp.float32)

    p = dict(
        e1_w=w((nf, 2, 7, 7)),          e1_g=1.0 + w((nf,)),      e1_b=w((nf,)),
        e2_w=w((2 * nf, nf, 4, 4)),     e2_g=1.0 + w((2 * nf,)),  e2_b=w((2 * nf,)),
        e3_w=w((4 * nf, 2 * nf, 4, 4)), e3_g=1.0 + w((4 * nf,)),  e3_b=w((4 * nf,)),
        # ConvTranspose2d weights in PyTorch layout (Cin, Cout, kh, kw)
        d1_w=w((4 * nf, 2 * nf, 4, 4)), d1_g=1.0 + w((2 * nf,)),  d1_b=w((2 * nf,)),
        d2_w=w((2 * nf, nf, 4, 4)),     d2_g=1.0 + w((nf,)),      d2_b=w((nf,)),
        d3_w=w((1, nf, 7, 7)),          d3_b=w((1,)),
        middle=[],
    )
    dim = 4 * nf
    for _ in range(residual_blocks):
        p["middle"].append(dict(
            bn1_g=1.0 + w((dim,)), bn1_b=w((dim,)),
            c1_w=w((dim, dim, 3, 3)), c1_b=w((dim,)),
            bn2_g=1.0 + w((dim,)), bn2_b=w((dim,)),
            c2_w=w((dim, dim, 3, 3)), c2_b=w((dim,)),
        ))
    return p


if __name__ == "__main__":
    key = jax.random.PRNGKey(0)
    pkey, xkey = jax.random.split(key)

    nf, residual_blocks, dilation = 8, 2, 2            # small synthetic config
    params = init_params(pkey, nf=nf, residual_blocks=residual_blocks)

    x = jax.random.normal(xkey, (2, 2, 16, 16), dtype=jnp.float32)  # NCHW, Cin=2

    fwd = jax.jit(lambda p, xx: mr_encoder_decoder(p, xx, dilation=dilation))
    out = jax.block_until_ready(fwd(params, x))

    assert out.shape == (2, 1, 16, 16), out.shape
    assert bool(jnp.all(jnp.isfinite(out)))
    assert bool(jnp.all((out >= 0.0) & (out <= 1.0)))   # sigmoid range
    print("KERNEL_OK")
</pallas_src>

<mosaic_0001>
module attributes {stable_mosaic.version = 11 : i64} {
  func.func @kernel(%arg0: i32, %arg1: memref<7x8x14xbf16, #tpu.memory_space<vmem>>, %arg2: memref<14x1408xbf16, #tpu.memory_space<vmem>>, %arg3: memref<8x1xf32, #tpu.memory_space<vmem>>, %arg4: memref<1x1408xf32, #tpu.memory_space<vmem>>, %arg5: memref<8x1408xbf16, #tpu.memory_space<vmem>>, %arg6: memref<1x8x1xf32, #tpu.memory_space<vmem>>, %arg7: memref<1x8x1xf32, #tpu.memory_space<vmem>>) attributes {dimension_semantics = [#tpu.dimension_semantics<parallel>], iteration_bounds = array<i64: 1>, scalar_prefetch = 0 : i64, scratch_operands = 0 : i64, tpu.core_type = #tpu.core_type<tc>, window_params = [{pipeline_mode = #tpu.pipeline_mode<synchronous>, transform_indices = @transform_0, window_bounds = array<i64: 7, 8, 14>}, {transform_indices = @transform_1, window_bounds = array<i64: 14, 1408>}, {pipeline_mode = #tpu.pipeline_mode<synchronous>, transform_indices = @transform_2, window_bounds = array<i64: 8, 1>}, {transform_indices = @transform_3, window_bounds = array<i64: 1, 1408>}, {transform_indices = @transform_4, window_bounds = array<i64: 8, 1408>}, {transform_indices = @transform_5, window_bounds = array<i64: 1, 8, 1>}, {transform_indices = @transform_6, window_bounds = array<i64: 1, 8, 1>}]} {
    %c0 = arith.constant 0 : index
    %c0_0 = arith.constant 0 : index
    %0 = vector.load %arg2[%c0, %c0_0] : memref<14x1408xbf16, #tpu.memory_space<vmem>>, vector<14x1408xbf16>
    %c0_1 = arith.constant 0 : index
    %c0_2 = arith.constant 0 : index
    %c0_3 = arith.constant 0 : index
    %1 = vector.load %arg1[%c0_1, %c0_2, %c0_3] : memref<7x8x14xbf16, #tpu.memory_space<vmem>>, vector<1x8x14xbf16>
    %2 = vector.shape_cast %1 : vector<1x8x14xbf16> to vector<8x14xbf16>
    %cst = arith.constant dense<0.000000e+00> : vector<8x1408xf32>
    %3 = tpu.matmul %2, %0, %cst {dimension_numbers = #tpu.dot_dimension_numbers<[1], [0], [0], [1], [0, 0, 1, 1], [], []>} : vector<8x14xbf16>, vector<14x1408xbf16>, vector<8x1408xf32> -> vector<8x1408xf32>
    %c1 = arith.constant 1 : index
    %c0_4 = arith.constant 0 : index
    %c0_5 = arith.constant 0 : index
    %4 = vector.load %arg1[%c1, %c0_4, %c0_5] : memref<7x8x14xbf16, #tpu.memory_space<vmem>>, vector<1x8x14xbf16>
    %5 = vector.shape_cast %4 : vector<1x8x14xbf16> to vector<8x14xbf16>
    %cst_6 = arith.constant dense<0.000000e+00> : vector<8x1408xf32>
    %6 = tpu.matmul %5, %0, %cst_6 {dimension_numbers = #tpu.dot_dimension_numbers<[1], [0], [0], [1], [0, 0, 1, 1], [], []>} : vector<8x14xbf16>, vector<14x1408xbf16>, vector<8x1408xf32> -> vector<8x1408xf32>
    %7 = vector.extract_strided_slice %6 {offsets = [0, 1], sizes = [8, 1407], strides = [1, 1]} : vector<8x1408xf32> to vector<8x1407xf32>
    %8 = vector.extract_strided_slice %6 {offsets = [0, 0], sizes = [8, 1], strides = [1, 1]} : vector<8x1408xf32> to vector<8x1xf32>
    %9 = tpu.concatenate %7, %8 in 1 : vector<8x1407xf32>, vector<8x1xf32> -> vector<8x1408xf32>
    %10 = arith.addf %3, %9 : vector<8x1408xf32>
    %c2 = arith.constant 2 : index
    %c0_7 = arith.constant 0 : index
    %c0_8 = arith.constant 0 : index
    %11 = vector.load %arg1[%c2, %c0_7, %c0_8] : memref<7x8x14xbf16, #tpu.memory_space<vmem>>, vector<1x8x14xbf16>
    %12 = vector.shape_cast %11 : vector<1x8x14xbf16> to vector<8x14xbf16>
    %cst_9 = arith.constant dense<0.000000e+00> : vector<8x1408xf32>
    %13 = tpu.matmul %12, %0, %cst_9 {dimension_numbers = #tpu.dot_dimension_numbers<[1], [0], [0], [1], [0, 0, 1, 1], [], []>} : vector<8x14xbf16>, vector<14x1408xbf16>, vector<8x1408xf32> -> vector<8x1408xf32>
    %14 = vector.extract_strided_slice %13 {offsets = [0, 2], sizes = [8, 1406], strides = [1, 1]} : vector<8x1408xf32> to vector<8x1406xf32>
    %15 = vector.extract_strided_slice %13 {offsets = [0, 0], sizes = [8, 2], strides = [1, 1]} : vector<8x1408xf32> to vector<8x2xf32>
    %16 = tpu.concatenate %14, %15 in 1 : vector<8x1406xf32>, vector<8x2xf32> -> vector<8x1408xf32>
    %17 = arith.addf %10, %16 : vector<8x1408xf32>
    %c3 = arith.constant 3 : index
    %c0_10 = arith.constant 0 : index
    %c0_11 = arith.constant 0 : index
    %18 = vector.load %arg1[%c3, %c0_10, %c0_11] : memref<7x8x14xbf16, #tpu.memory_space<vmem>>, vector<1x8x14xbf16>
    %19 = vector.shape_cast %18 : vector<1x8x14xbf16> to vector<8x14xbf16>
    %cst_12 = arith.constant dense<0.000000e+00> : vector<8x1408xf32>
    %20 = tpu.matmul %19, %0, %cst_12 {dimension_numbers = #tpu.dot_dimension_numbers<[1], [0], [0], [1], [0, 0, 1, 1], [], []>} : vector<8x14xbf16>, vector<14x1408xbf16>, vector<8x1408xf32> -> vector<8x1408xf32>
    %21 = vector.extract_strided_slice %20 {offsets = [0, 3], sizes = [8, 1405], strides = [1, 1]} : vector<8x1408xf32> to vector<8x1405xf32>
    %22 = vector.extract_strided_slice %20 {offsets = [0, 0], sizes = [8, 3], strides = [1, 1]} : vector<8x1408xf32> to vector<8x3xf32>
    %23 = tpu.concatenate %21, %22 in 1 : vector<8x1405xf32>, vector<8x3xf32> -> vector<8x1408xf32>
    %24 = arith.addf %17, %23 : vector<8x1408xf32>
    %c4 = arith.constant 4 : index
    %c0_13 = arith.constant 0 : index
    %c0_14 = arith.constant 0 : index
    %25 = vector.load %arg1[%c4, %c0_13, %c0_14] : memref<7x8x14xbf16, #tpu.memory_space<vmem>>, vector<1x8x14xbf16>
    %26 = vector.shape_cast %25 : vector<1x8x14xbf16> to vector<8x14xbf16>
    %cst_15 = arith.constant dense<0.000000e+00> : vector<8x1408xf32>
    %27 = tpu.matmul %26, %0, %cst_15 {dimension_numbers = #tpu.dot_dimension_numbers<[1], [0], [0], [1], [0, 0, 1, 1], [], []>} : vector<8x14xbf16>, vector<14x1408xbf16>, vector<8x1408xf32> -> vector<8x1408xf32>
    %28 = vector.extract_strided_slice %27 {offsets = [0, 4], sizes = [8, 1404], strides = [1, 1]} : vector<8x1408xf32> to vector<8x1404xf32>
    %29 = vector.extract_strided_slice %27 {offsets = [0, 0], sizes = [8, 4], strides = [1, 1]} : vector<8x1408xf32> to vector<8x4xf32>
    %30 = tpu.concatenate %28, %29 in 1 : vector<8x1404xf32>, vector<8x4xf32> -> vector<8x1408xf32>
    %31 = arith.addf %24, %30 : vector<8x1408xf32>
    %c5 = arith.constant 5 : index
    %c0_16 = arith.constant 0 : index
    %c0_17 = arith.constant 0 : index
    %32 = vector.load %arg1[%c5, %c0_16, %c0_17] : memref<7x8x14xbf16, #tpu.memory_space<vmem>>, vector<1x8x14xbf16>
    %33 = vector.shape_cast %32 : vector<1x8x14xbf16> to vector<8x14xbf16>
    %cst_18 = arith.constant dense<0.000000e+00> : vector<8x1408xf32>
    %34 = tpu.matmul %33, %0, %cst_18 {dimension_numbers = #tpu.dot_dimension_numbers<[1], [0], [0], [1], [0, 0, 1, 1], [], []>} : vector<8x14xbf16>, vector<14x1408xbf16>, vector<8x1408xf32> -> vector<8x1408xf32>
    %35 = vector.extract_strided_slice %34 {offsets = [0, 5], sizes = [8, 1403], strides = [1, 1]} : vector<8x1408xf32> to vector<8x1403xf32>
    %36 = vector.extract_strided_slice %34 {offsets = [0, 0], sizes = [8, 5], strides = [1, 1]} : vector<8x1408xf32> to vector<8x5xf32>
    %37 = tpu.concatenate %35, %36 in 1 : vector<8x1403xf32>, vector<8x5xf32> -> vector<8x1408xf32>
    %38 = arith.addf %31, %37 : vector<8x1408xf32>
    %c6 = arith.constant 6 : index
    %c0_19 = arith.constant 0 : index
    %c0_20 = arith.constant 0 : index
    %39 = vector.load %arg1[%c6, %c0_19, %c0_20] : memref<7x8x14xbf16, #tpu.memory_space<vmem>>, vector<1x8x14xbf16>
    %40 = vector.shape_cast %39 : vector<1x8x14xbf16> to vector<8x14xbf16>
    %cst_21 = arith.constant dense<0.000000e+00> : vector<8x1408xf32>
    %41 = tpu.matmul %40, %0, %cst_21 {dimension_numbers = #tpu.dot_dimension_numbers<[1], [0], [0], [1], [0, 0, 1, 1], [], []>} : vector<8x14xbf16>, vector<14x1408xbf16>, vector<8x1408xf32> -> vector<8x1408xf32>
    %42 = vector.extract_strided_slice %41 {offsets = [0, 6], sizes = [8, 1402], strides = [1, 1]} : vector<8x1408xf32> to vector<8x1402xf32>
    %43 = vector.extract_strided_slice %41 {offsets = [0, 0], sizes = [8, 6], strides = [1, 1]} : vector<8x1408xf32> to vector<8x6xf32>
    %44 = tpu.concatenate %42, %43 in 1 : vector<8x1402xf32>, vector<8x6xf32> -> vector<8x1408xf32>
    %45 = arith.addf %38, %44 : vector<8x1408xf32>
    %c0_22 = arith.constant 0 : index
    %c0_23 = arith.constant 0 : index
    %46 = vector.load %arg3[%c0_22, %c0_23] : memref<8x1xf32, #tpu.memory_space<vmem>>, vector<8x1xf32>
    %47 = vector.broadcast %46 : vector<8x1xf32> to vector<8x1408xf32>
    %48 = arith.addf %45, %47 : vector<8x1408xf32>
    %c0_24 = arith.constant 0 : index
    %c0_25 = arith.constant 0 : index
    %49 = vector.load %arg4[%c0_24, %c0_25] : memref<1x1408xf32, #tpu.memory_space<vmem>>, vector<1x1408xf32>
    %50 = arith.truncf %48 : vector<8x1408xf32> to vector<8x1408xbf16>
    %c0_26 = arith.constant 0 : index
    %c0_27 = arith.constant 0 : index
    %51 = vector.load %arg5[%c0_26, %c0_27] : memref<8x1408xbf16, #tpu.memory_space<vmem>>, vector<8x1408xbf16>
    tpu.vector_store %arg5[%c0_26, %c0_27], %50 {strides = array<i32>} : memref<8x1408xbf16, #tpu.memory_space<vmem>>, vector<8x1408xbf16>,
    %52 = vector.broadcast %49 : vector<1x1408xf32> to vector<8x1408xf32>
    %53 = arith.mulf %48, %52 : vector<8x1408xf32>
    %cst_28 = arith.constant dense<0.000000e+00> : vector<8xf32>
    %54 = vector.multi_reduction <add>, %53, %cst_28 [1] : vector<8x1408xf32> to vector<8xf32>
    %55 = vector.shape_cast %54 : vector<8xf32> to vector<8x1xf32>
    %56 = vector.shape_cast %55 : vector<8x1xf32> to vector<1x8x1xf32>
    %c0_29 = arith.constant 0 : index
    %c0_30 = arith.constant 0 : index
    %c0_31 = arith.constant 0 : index
    %57 = vector.load %arg6[%c0_29, %c0_30, %c0_31] : memref<1x8x1xf32, #tpu.memory_space<vmem>>, vector<1x8x1xf32>
    tpu.vector_store %arg6[%c0_29, %c0_30, %c0_31], %56 {strides = array<i32>} : memref<1x8x1xf32, #tpu.memory_space<vmem>>, vector<1x8x1xf32>,
    %58 = arith.mulf %53, %48 : vector<8x1408xf32>
    %cst_32 = arith.constant dense<0.000000e+00> : vector<8xf32>
    %59 = vector.multi_reduction <add>, %58, %cst_32 [1] : vector<8x1408xf32> to vector<8xf32>
    %60 = vector.shape_cast %59 : vector<8xf32> to vector<8x1xf32>
    %61 = vector.shape_cast %60 : vector<8x1xf32> to vector<1x8x1xf32>
    %c0_33 = arith.constant 0 : index
    %c0_34 = arith.constant 0 : index
    %c0_35 = arith.constant 0 : index
    %62 = vector.load %arg7[%c0_33, %c0_34, %c0_35] : memref<1x8x1xf32, #tpu.memory_space<vmem>>, vector<1x8x1xf32>
    tpu.vector_store %arg7[%c0_33, %c0_34, %c0_35], %61 {strides = array<i32>} : memref<1x8x1xf32, #tpu.memory_space<vmem>>, vector<1x8x1xf32>,
    return
  }
  func.func @transform_0(%arg0: i32) -> (i32, i32, i32) {
    %c0_i32 = arith.constant 0 : i32
    %c0_i32_0 = arith.constant 0 : i32
    %c0_i32_1 = arith.constant 0 : i32
    %c0_i32_2 = arith.constant 0 : i32
    return %c0_i32, %c0_i32_0, %c0_i32_1 : i32, i32, i32
  }
  func.func @transform_1(%arg0: i32) -> (i32, i32) {
    %c0_i32 = arith.constant 0 : i32
    %c0_i32_0 = arith.constant 0 : i32
    return %c0_i32, %arg0 : i32, i32
  }
  func.func @transform_2(%arg0: i32) -> (i32, i32) {
    %c0_i32 = arith.constant 0 : i32
    %c0_i32_0 = arith.constant 0 : i32
    %c0_i32_1 = arith.constant 0 : i32
    return %c0_i32, %c0_i32_0 : i32, i32
  }
  func.func @transform_3(%arg0: i32) -> (i32, i32) {
    %c0_i32 = arith.constant 0 : i32
    %c0_i32_0 = arith.constant 0 : i32
    return %c0_i32, %arg0 : i32, i32
  }
  func.func @transform_4(%arg0: i32) -> (i32, i32) {
    %c0_i32 = arith.constant 0 : i32
    %c0_i32_0 = arith.constant 0 : i32
    return %c0_i32, %arg0 : i32, i32
  }
  func.func @transform_5(%arg0: i32) -> (i32, i32, i32) {
    %c0_i32 = arith.constant 0 : i32
    %c0_i32_0 = arith.constant 0 : i32
    %c0_i32_1 = arith.constant 0 : i32
    return %arg0, %c0_i32, %c0_i32_0 : i32, i32, i32
  }
  func.func @transform_6(%arg0: i32) -> (i32, i32, i32) {
    %c0_i32 = arith.constant 0 : i32
    %c0_i32_0 = arith.constant 0 : i32
    %c0_i32_1 = arith.constant 0 : i32
    return %arg0, %c0_i32, %c0_i32_0 : i32, i32, i32
  }
}

module attributes {stable_mosaic.version = 11 : i64} {
  func.func @kernel(%arg0: i32, %arg1: memref<8x256xbf16, #tpu.memory_space<vmem>>, %arg2: memref<8x1xf32, #tpu.memory_space<vmem>>, %arg3: memref<8x1xf32, #tpu.memory_space<vmem>>, %arg4: memref<1x256xf32, #tpu.memory_space<vmem>>, %arg5: memref<8x256xbf16, #tpu.memory_space<vmem>>, %arg6: memref<1x8x1xf32, #tpu.memory_space<vmem>>, %arg7: memref<1x8x1xf32, #tpu.memory_space<vmem>>) attributes {dimension_semantics = [#tpu.dimension_semantics<parallel>], iteration_bounds = array<i64: 2>, scalar_prefetch = 0 : i64, scratch_operands = 0 : i64, tpu.core_type = #tpu.core_type<tc>, window_params = [{transform_indices = @transform_0, window_bounds = array<i64: 8, 256>}, {pipeline_mode = #tpu.pipeline_mode<synchronous>, transform_indices = @transform_1, window_bounds = array<i64: 8, 1>}, {pipeline_mode = #tpu.pipeline_mode<synchronous>, transform_indices = @transform_2, window_bounds = array<i64: 8, 1>}, {transform_indices = @transform_3, window_bounds = array<i64: 1, 256>}, {transform_indices = @transform_4, window_bounds = array<i64: 8, 256>}, {transform_indices = @transform_5, window_bounds = array<i64: 1, 8, 1>}, {transform_indices = @transform_6, window_bounds = array<i64: 1, 8, 1>}]} {
    %c0 = arith.constant 0 : index
    %c0_0 = arith.constant 0 : index
    %0 = vector.load %arg1[%c0, %c0_0] : memref<8x256xbf16, #tpu.memory_space<vmem>>, vector<8x256xbf16>
    %1 = arith.extf %0 : vector<8x256xbf16> to vector<8x256xf32>
    %c0_1 = arith.constant 0 : index
    %c0_2 = arith.constant 0 : index
    %2 = vector.load %arg2[%c0_1, %c0_2] : memref<8x1xf32, #tpu.memory_space<vmem>>, vector<8x1xf32>
    %3 = vector.broadcast %2 : vector<8x1xf32> to vector<8x256xf32>
    %4 = arith.mulf %1, %3 : vector<8x256xf32>
    %c0_3 = arith.constant 0 : index
    %c0_4 = arith.constant 0 : index
    %5 = vector.load %arg3[%c0_3, %c0_4] : memref<8x1xf32, #tpu.memory_space<vmem>>, vector<8x1xf32>
    %6 = vector.broadcast %5 : vector<8x1xf32> to vector<8x256xf32>
    %7 = arith.addf %4, %6 : vector<8x256xf32>
    %cst = arith.constant 0.000000e+00 : f32
    %8 = vector.broadcast %cst : f32 to vector<8x256xf32>
    %9 = arith.maximumf %7, %8 : vector<8x256xf32>
    %c0_5 = arith.constant 0 : index
    %c0_6 = arith.constant 0 : index
    %10 = vector.load %arg4[%c0_5, %c0_6] : memref<1x256xf32, #tpu.memory_space<vmem>>, vector<1x256xf32>
    %11 = arith.truncf %9 : vector<8x256xf32> to vector<8x256xbf16>
    %c0_7 = arith.constant 0 : index
    %c0_8 = arith.constant 0 : index
    %12 = vector.load %arg5[%c0_7, %c0_8] : memref<8x256xbf16, #tpu.memory_space<vmem>>, vector<8x256xbf16>
    tpu.vector_store %arg5[%c0_7, %c0_8], %11 {strides = array<i32>} : memref<8x256xbf16, #tpu.memory_space<vmem>>, vector<8x256xbf16>,
    %13 = vector.broadcast %10 : vector<1x256xf32> to vector<8x256xf32>
    %14 = arith.mulf %9, %13 : vector<8x256xf32>
    %cst_9 = arith.constant dense<0.000000e+00> : vector<8xf32>
    %15 = vector.multi_reduction <add>, %14, %cst_9 [1] : vector<8x256xf32> to vector<8xf32>
    %16 = vector.shape_cast %15 : vector<8xf32> to vector<8x1xf32>
    %17 = vector.shape_cast %16 : vector<8x1xf32> to vector<1x8x1xf32>
    %c0_10 = arith.constant 0 : index
    %c0_11 = arith.constant 0 : index
    %c0_12 = arith.constant 0 : index
    %18 = vector.load %arg6[%c0_10, %c0_11, %c0_12] : memref<1x8x1xf32, #tpu.memory_space<vmem>>, vector<1x8x1xf32>
    tpu.vector_store %arg6[%c0_10, %c0_11, %c0_12], %17 {strides = array<i32>} : memref<1x8x1xf32, #tpu.memory_space<vmem>>, vector<1x8x1xf32>,
    %19 = arith.mulf %14, %9 : vector<8x256xf32>
    %cst_13 = arith.constant dense<0.000000e+00> : vector<8xf32>
    %20 = vector.multi_reduction <add>, %19, %cst_13 [1] : vector<8x256xf32> to vector<8xf32>
    %21 = vector.shape_cast %20 : vector<8xf32> to vector<8x1xf32>
    %22 = vector.shape_cast %21 : vector<8x1xf32> to vector<1x8x1xf32>
    %c0_14 = arith.constant 0 : index
    %c0_15 = arith.constant 0 : index
    %c0_16 = arith.constant 0 : index
    %23 = vector.load %arg7[%c0_14, %c0_15, %c0_16] : memref<1x8x1xf32, #tpu.memory_space<vmem>>, vector<1x8x1xf32>
    tpu.vector_store %arg7[%c0_14, %c0_15, %c0_16], %22 {strides = array<i32>} : memref<1x8x1xf32, #tpu.memory_space<vmem>>, vector<1x8x1xf32>,
    return
  }
  func.func @transform_0(%arg0: i32) -> (i32, i32) {
    %c0_i32 = arith.constant 0 : i32
    %c0_i32_0 = arith.constant 0 : i32
    return %c0_i32, %arg0 : i32, i32
  }
  func.func @transform_1(%arg0: i32) -> (i32, i32) {
    %c0_i32 = arith.constant 0 : i32
    %c0_i32_0 = arith.constant 0 : i32
    %c0_i32_1 = arith.constant 0 : i32
    return %c0_i32, %c0_i32_0 : i32, i32
  }
  func.func @transform_2(%arg0: i32) -> (i32, i32) {
    %c0_i32 = arith.constant 0 : i32
    %c0_i32_0 = arith.constant 0 : i32
    %c0_i32_1 = arith.constant 0 : i32
    return %c0_i32, %c0_i32_0 : i32, i32
  }
  func.func @transform_3(%arg0: i32) -> (i32, i32) {
    %c0_i32 = arith.constant 0 : i32
    %c0_i32_0 = arith.constant 0 : i32
    return %c0_i32, %arg0 : i32, i32
  }
  func.func @transform_4(%arg0: i32) -> (i32, i32) {
    %c0_i32 = arith.constant 0 : i32
    %c0_i32_0 = arith.constant 0 : i32
    return %c0_i32, %arg0 : i32, i32
  }
  func.func @transform_5(%arg0: i32) -> (i32, i32, i32) {
    %c0_i32 = arith.constant 0 : i32
    %c0_i32_0 = arith.constant 0 : i32
    %c0_i32_1 = arith.constant 0 : i32
    return %arg0, %c0_i32, %c0_i32_0 : i32, i32, i32
  }
  func.func @transform_6(%arg0: i32) -> (i32, i32, i32) {
    %c0_i32 = arith.constant 0 : i32
    %c0_i32_0 = arith.constant 0 : i32
    %c0_i32_1 = arith.constant 0 : i32
    return %arg0, %c0_i32, %c0_i32_0 : i32, i32, i32
  }
}

module attributes {stable_mosaic.version = 11 : i64} {
  func.func @kernel(%arg0: i32, %arg1: memref<16x128xbf16, #tpu.memory_space<vmem>>, %arg2: memref<128x128xbf16, #tpu.memory_space<vmem>>, %arg3: memref<16x1xf32, #tpu.memory_space<vmem>>, %arg4: memref<1x128xf32, #tpu.memory_space<vmem>>, %arg5: memref<16x128xbf16, #tpu.memory_space<vmem>>, %arg6: memref<1x16x1xf32, #tpu.memory_space<vmem>>, %arg7: memref<1x16x1xf32, #tpu.memory_space<vmem>>) attributes {dimension_semantics = [#tpu.dimension_semantics<parallel>], iteration_bounds = array<i64: 1>, scalar_prefetch = 0 : i64, scratch_operands = 0 : i64, tpu.core_type = #tpu.core_type<tc>, window_params = [{pipeline_mode = #tpu.pipeline_mode<synchronous>, transform_indices = @transform_0, window_bounds = array<i64: 16, 128>}, {transform_indices = @transform_1, window_bounds = array<i64: 128, 128>}, {pipeline_mode = #tpu.pipeline_mode<synchronous>, transform_indices = @transform_2, window_bounds = array<i64: 16, 1>}, {transform_indices = @transform_3, window_bounds = array<i64: 1, 128>}, {transform_indices = @transform_4, window_bounds = array<i64: 16, 128>}, {transform_indices = @transform_5, window_bounds = array<i64: 1, 16, 1>}, {transform_indices = @transform_6, window_bounds = array<i64: 1, 16, 1>}]} {
    %c0 = arith.constant 0 : index
    %c0_0 = arith.constant 0 : index
    %0 = vector.load %arg1[%c0, %c0_0] : memref<16x128xbf16, #tpu.memory_space<vmem>>, vector<16x128xbf16>
    %c0_1 = arith.constant 0 : index
    %c0_2 = arith.constant 0 : index
    %1 = vector.load %arg2[%c0_1, %c0_2] : memref<128x128xbf16, #tpu.memory_space<vmem>>, vector<128x128xbf16>
    %cst = arith.constant dense<0.000000e+00> : vector<16x128xf32>
    %2 = tpu.matmul %0, %1, %cst {dimension_numbers = #tpu.dot_dimension_numbers<[1], [0], [0], [1], [0, 0, 1, 1], [], []>} : vector<16x128xbf16>, vector<128x128xbf16>, vector<16x128xf32> -> vector<16x128xf32>
    %c0_3 = arith.constant 0 : index
    %c0_4 = arith.constant 0 : index
    %3 = vector.load %arg3[%c0_3, %c0_4] : memref<16x1xf32, #tpu.memory_space<vmem>>, vector<16x1xf32>
    %4 = vector.broadcast %3 : vector<16x1xf32> to vector<16x128xf32>
    %5 = arith.addf %2, %4 : vector<16x128xf32>
    %c0_5 = arith.constant 0 : index
    %c0_6 = arith.constant 0 : index
    %6 = vector.load %arg4[%c0_5, %c0_6] : memref<1x128xf32, #tpu.memory_space<vmem>>, vector<1x128xf32>
    %7 = arith.truncf %5 : vector<16x128xf32> to vector<16x128xbf16>
    %c0_7 = arith.constant 0 : index
    %c0_8 = arith.constant 0 : index
    %8 = vector.load %arg5[%c0_7, %c0_8] : memref<16x128xbf16, #tpu.memory_space<vmem>>, vector<16x128xbf16>
    tpu.vector_store %arg5[%c0_7, %c0_8], %7 {strides = array<i32>} : memref<16x128xbf16, #tpu.memory_space<vmem>>, vector<16x128xbf16>,
    %9 = vector.broadcast %6 : vector<1x128xf32> to vector<16x128xf32>
    %10 = arith.mulf %5, %9 : vector<16x128xf32>
    %cst_9 = arith.constant dense<0.000000e+00> : vector<16xf32>
    %11 = vector.multi_reduction <add>, %10, %cst_9 [1] : vector<16x128xf32> to vector<16xf32>
    %12 = vector.shape_cast %11 : vector<16xf32> to vector<16x1xf32>
    %13 = vector.shape_cast %12 : vector<16x1xf32> to vector<1x16x1xf32>
    %c0_10 = arith.constant 0 : index
    %c0_11 = arith.constant 0 : index
    %c0_12 = arith.constant 0 : index
    %14 = vector.load %arg6[%c0_10, %c0_11, %c0_12] : memref<1x16x1xf32, #tpu.memory_space<vmem>>, vector<1x16x1xf32>
    tpu.vector_store %arg6[%c0_10, %c0_11, %c0_12], %13 {strides = array<i32>} : memref<1x16x1xf32, #tpu.memory_space<vmem>>, vector<1x16x1xf32>,
    %15 = arith.mulf %10, %5 : vector<16x128xf32>
    %cst_13 = arith.constant dense<0.000000e+00> : vector<16xf32>
    %16 = vector.multi_reduction <add>, %15, %cst_13 [1] : vector<16x128xf32> to vector<16xf32>
    %17 = vector.shape_cast %16 : vector<16xf32> to vector<16x1xf32>
    %18 = vector.shape_cast %17 : vector<16x1xf32> to vector<1x16x1xf32>
    %c0_14 = arith.constant 0 : index
    %c0_15 = arith.constant 0 : index
    %c0_16 = arith.constant 0 : index
    %19 = vector.load %arg7[%c0_14, %c0_15, %c0_16] : memref<1x16x1xf32, #tpu.memory_space<vmem>>, vector<1x16x1xf32>
    tpu.vector_store %arg7[%c0_14, %c0_15, %c0_16], %18 {strides = array<i32>} : memref<1x16x1xf32, #tpu.memory_space<vmem>>, vector<1x16x1xf32>,
    return
  }
  func.func @transform_0(%arg0: i32) -> (i32, i32) {
    %c0_i32 = arith.constant 0 : i32
    %c0_i32_0 = arith.constant 0 : i32
    %c0_i32_1 = arith.constant 0 : i32
    return %c0_i32, %c0_i32_0 : i32, i32
  }
  func.func @transform_1(%arg0: i32) -> (i32, i32) {
    %c0_i32 = arith.constant 0 : i32
    %c0_i32_0 = arith.constant 0 : i32
    return %c0_i32, %arg0 : i32, i32
  }
  func.func @transform_2(%arg0: i32) -> (i32, i32) {
    %c0_i32 = arith.constant 0 : i32
    %c0_i32_0 = arith.constant 0 : i32
    %c0_i32_1 = arith.constant 0 : i32
    return %c0_i32, %c0_i32_0 : i32, i32
  }
  func.func @transform_3(%arg0: i32) -> (i32, i32) {
    %c0_i32 = arith.constant 0 : i32
    %c0_i32_0 = arith.constant 0 : i32
    return %c0_i32, %arg0 : i32, i32
  }
  func.func @transform_4(%arg0: i32) -> (i32, i32) {
    %c0_i32 = arith.constant 0 : i32
    %c0_i32_0 = arith.constant 0 : i32
    return %c0_i32, %arg0 : i32, i32
  }
  func.func @transform_5(%arg0: i32) -> (i32, i32, i32) {
    %c0_i32 = arith.constant 0 : i32
    %c0_i32_0 = arith.constant 0 : i32
    %c0_i32_1 = arith.constant 0 : i32
    return %arg0, %c0_i32, %c0_i32_0 : i32, i32, i32
  }
  func.func @transform_6(%arg0: i32) -> (i32, i32, i32) {
    %c0_i32 = arith.constant 0 : i32
    %c0_i32_0 = arith.constant 0 : i32
    %c0_i32_1 = arith.constant 0 : i32
    return %arg0, %c0_i32, %c0_i32_0 : i32, i32, i32
  }
}

module attributes {stable_mosaic.version = 11 : i64} {
  func.func @kernel(%arg0: i32, %arg1: memref<16x128xbf16, #tpu.memory_space<vmem>>, %arg2: memref<16x1xf32, #tpu.memory_space<vmem>>, %arg3: memref<16x1xf32, #tpu.memory_space<vmem>>, %arg4: memref<1x128xf32, #tpu.memory_space<vmem>>, %arg5: memref<16x128xbf16, #tpu.memory_space<vmem>>, %arg6: memref<1x16x1xf32, #tpu.memory_space<vmem>>, %arg7: memref<1x16x1xf32, #tpu.memory_space<vmem>>) attributes {dimension_semantics = [#tpu.dimension_semantics<parallel>], iteration_bounds = array<i64: 1>, scalar_prefetch = 0 : i64, scratch_operands = 0 : i64, tpu.core_type = #tpu.core_type<tc>, window_params = [{transform_indices = @transform_0, window_bounds = array<i64: 16, 128>}, {pipeline_mode = #tpu.pipeline_mode<synchronous>, transform_indices = @transform_1, window_bounds = array<i64: 16, 1>}, {pipeline_mode = #tpu.pipeline_mode<synchronous>, transform_indices = @transform_2, window_bounds = array<i64: 16, 1>}, {transform_indices = @transform_3, window_bounds = array<i64: 1, 128>}, {transform_indices = @transform_4, window_bounds = array<i64: 16, 128>}, {transform_indices = @transform_5, window_bounds = array<i64: 1, 16, 1>}, {transform_indices = @transform_6, window_bounds = array<i64: 1, 16, 1>}]} {
    %c0 = arith.constant 0 : index
    %c0_0 = arith.constant 0 : index
    %0 = vector.load %arg1[%c0, %c0_0] : memref<16x128xbf16, #tpu.memory_space<vmem>>, vector<16x128xbf16>
    %1 = arith.extf %0 : vector<16x128xbf16> to vector<16x128xf32>
    %c0_1 = arith.constant 0 : index
    %c0_2 = arith.constant 0 : index
    %2 = vector.load %arg2[%c0_1, %c0_2] : memref<16x1xf32, #tpu.memory_space<vmem>>, vector<16x1xf32>
    %3 = vector.broadcast %2 : vector<16x1xf32> to vector<16x128xf32>
    %4 = arith.mulf %1, %3 : vector<16x128xf32>
    %c0_3 = arith.constant 0 : index
    %c0_4 = arith.constant 0 : index
    %5 = vector.load %arg3[%c0_3, %c0_4] : memref<16x1xf32, #tpu.memory_space<vmem>>, vector<16x1xf32>
    %6 = vector.broadcast %5 : vector<16x1xf32> to vector<16x128xf32>
    %7 = arith.addf %4, %6 : vector<16x128xf32>
    %cst = arith.constant 0.000000e+00 : f32
    %8 = vector.broadcast %cst : f32 to vector<16x128xf32>
    %9 = arith.maximumf %7, %8 : vector<16x128xf32>
    %c0_5 = arith.constant 0 : index
    %c0_6 = arith.constant 0 : index
    %10 = vector.load %arg4[%c0_5, %c0_6] : memref<1x128xf32, #tpu.memory_space<vmem>>, vector<1x128xf32>
    %11 = arith.truncf %9 : vector<16x128xf32> to vector<16x128xbf16>
    %c0_7 = arith.constant 0 : index
    %c0_8 = arith.constant 0 : index
    %12 = vector.load %arg5[%c0_7, %c0_8] : memref<16x128xbf16, #tpu.memory_space<vmem>>, vector<16x128xbf16>
    tpu.vector_store %arg5[%c0_7, %c0_8], %11 {strides = array<i32>} : memref<16x128xbf16, #tpu.memory_space<vmem>>, vector<16x128xbf16>,
    %13 = vector.broadcast %10 : vector<1x128xf32> to vector<16x128xf32>
    %14 = arith.mulf %9, %13 : vector<16x128xf32>
    %cst_9 = arith.constant dense<0.000000e+00> : vector<16xf32>
    %15 = vector.multi_reduction <add>, %14, %cst_9 [1] : vector<16x128xf32> to vector<16xf32>
    %16 = vector.shape_cast %15 : vector<16xf32> to vector<16x1xf32>
    %17 = vector.shape_cast %16 : vector<16x1xf32> to vector<1x16x1xf32>
    %c0_10 = arith.constant 0 : index
    %c0_11 = arith.constant 0 : index
    %c0_12 = arith.constant 0 : index
    %18 = vector.load %arg6[%c0_10, %c0_11, %c0_12] : memref<1x16x1xf32, #tpu.memory_space<vmem>>, vector<1x16x1xf32>
    tpu.vector_store %arg6[%c0_10, %c0_11, %c0_12], %17 {strides = array<i32>} : memref<1x16x1xf32, #tpu.memory_space<vmem>>, vector<1x16x1xf32>,
    %19 = arith.mulf %14, %9 : vector<16x128xf32>
    %cst_13 = arith.constant dense<0.000000e+00> : vector<16xf32>
    %20 = vector.multi_reduction <add>, %19, %cst_13 [1] : vector<16x128xf32> to vector<16xf32>
    %21 = vector.shape_cast %20 : vector<16xf32> to vector<16x1xf32>
    %22 = vector.shape_cast %21 : vector<16x1xf32> to vector<1x16x1xf32>
    %c0_14 = arith.constant 0 : index
    %c0_15 = arith.constant 0 : index
    %c0_16 = arith.constant 0 : index
    %23 = vector.load %arg7[%c0_14, %c0_15, %c0_16] : memref<1x16x1xf32, #tpu.memory_space<vmem>>, vector<1x16x1xf32>
    tpu.vector_store %arg7[%c0_14, %c0_15, %c0_16], %22 {strides = array<i32>} : memref<1x16x1xf32, #tpu.memory_space<vmem>>, vector<1x16x1xf32>,
    return
  }
  func.func @transform_0(%arg0: i32) -> (i32, i32) {
    %c0_i32 = arith.constant 0 : i32
    %c0_i32_0 = arith.constant 0 : i32
    return %c0_i32, %arg0 : i32, i32
  }
  func.func @transform_1(%arg0: i32) -> (i32, i32) {
    %c0_i32 = arith.constant 0 : i32
    %c0_i32_0 = arith.constant 0 : i32
    %c0_i32_1 = arith.constant 0 : i32
    return %c0_i32, %c0_i32_0 : i32, i32
  }
  func.func @transform_2(%arg0: i32) -> (i32, i32) {
    %c0_i32 = arith.constant 0 : i32
    %c0_i32_0 = arith.constant 0 : i32
    %c0_i32_1 = arith.constant 0 : i32
    return %c0_i32, %c0_i32_0 : i32, i32
  }
  func.func @transform_3(%arg0: i32) -> (i32, i32) {
    %c0_i32 = arith.constant 0 : i32
    %c0_i32_0 = arith.constant 0 : i32
    return %c0_i32, %arg0 : i32, i32
  }
  func.func @transform_4(%arg0: i32) -> (i32, i32) {
    %c0_i32 = arith.constant 0 : i32
    %c0_i32_0 = arith.constant 0 : i32
    return %c0_i32, %arg0 : i32, i32
  }
  func.func @transform_5(%arg0: i32) -> (i32, i32, i32) {
    %c0_i32 = arith.constant 0 : i32
    %c0_i32_0 = arith.constant 0 : i32
    %c0_i32_1 = arith.constant 0 : i32
    return %arg0, %c0_i32, %c0_i32_0 : i32, i32, i32
  }
  func.func @transform_6(%arg0: i32) -> (i32, i32, i32) {
    %c0_i32 = arith.constant 0 : i32
    %c0_i32_0 = arith.constant 0 : i32
    %c0_i32_1 = arith.constant 0 : i32
    return %arg0, %c0_i32, %c0_i32_0 : i32, i32, i32
  }
}

module attributes {stable_mosaic.version = 11 : i64} {
  func.func @kernel(%arg0: i32, %arg1: memref<32x256xbf16, #tpu.memory_space<vmem>>, %arg2: memref<256x128xbf16, #tpu.memory_space<vmem>>, %arg3: memref<32x1xf32, #tpu.memory_space<vmem>>, %arg4: memref<1x128xf32, #tpu.memory_space<vmem>>, %arg5: memref<32x128xbf16, #tpu.memory_space<vmem>>, %arg6: memref<1x32x1xf32, #tpu.memory_space<vmem>>, %arg7: memref<1x32x1xf32, #tpu.memory_space<vmem>>) attributes {dimension_semantics = [#tpu.dimension_semantics<parallel>], iteration_bounds = array<i64: 1>, scalar_prefetch = 0 : i64, scratch_operands = 0 : i64, tpu.core_type = #tpu.core_type<tc>, window_params = [{pipeline_mode = #tpu.pipeline_mode<synchronous>, transform_indices = @transform_0, window_bounds = array<i64: 32, 256>}, {transform_indices = @transform_1, window_bounds = array<i64: 256, 128>}, {pipeline_mode = #tpu.pipeline_mode<synchronous>, transform_indices = @transform_2, window_bounds = array<i64: 32, 1>}, {transform_indices = @transform_3, window_bounds = array<i64: 1, 128>}, {transform_indices = @transform_4, window_bounds = array<i64: 32, 128>}, {transform_indices = @transform_5, window_bounds = array<i64: 1, 32, 1>}, {transform_indices = @transform_6, window_bounds = array<i64: 1, 32, 1>}]} {
    %c0 = arith.constant 0 : index
    %c0_0 = arith.constant 0 : index
    %0 = vector.load %arg1[%c0, %c0_0] : memref<32x256xbf16, #tpu.memory_space<vmem>>, vector<32x256xbf16>
    %c0_1 = arith.constant 0 : index
    %c0_2 = arith.constant 0 : index
    %1 = vector.load %arg2[%c0_1, %c0_2] : memref<256x128xbf16, #tpu.memory_space<vmem>>, vector<256x128xbf16>
    %cst = arith.constant dense<0.000000e+00> : vector<32x128xf32>
    %2 = tpu.matmul %0, %1, %cst {dimension_numbers = #tpu.dot_dimension_numbers<[1], [0], [0], [1], [0, 0, 1, 1], [], []>} : vector<32x256xbf16>, vector<256x128xbf16>, vector<32x128xf32> -> vector<32x128xf32>
    %c0_3 = arith.constant 0 : index
    %c0_4 = arith.constant 0 : index
    %3 = vector.load %arg3[%c0_3, %c0_4] : memref<32x1xf32, #tpu.memory_space<vmem>>, vector<32x1xf32>
    %4 = vector.broadcast %3 : vector<32x1xf32> to vector<32x128xf32>
    %5 = arith.addf %2, %4 : vector<32x128xf32>
    %c0_5 = arith.constant 0 : index
    %c0_6 = arith.constant 0 : index
    %6 = vector.load %arg4[%c0_5, %c0_6] : memref<1x128xf32, #tpu.memory_space<vmem>>, vector<1x128xf32>
    %7 = arith.truncf %5 : vector<32x128xf32> to vector<32x128xbf16>
    %c0_7 = arith.constant 0 : index
    %c0_8 = arith.constant 0 : index
    %8 = vector.load %arg5[%c0_7, %c0_8] : memref<32x128xbf16, #tpu.memory_space<vmem>>, vector<32x128xbf16>
    tpu.vector_store %arg5[%c0_7, %c0_8], %7 {strides = array<i32>} : memref<32x128xbf16, #tpu.memory_space<vmem>>, vector<32x128xbf16>,
    %9 = vector.broadcast %6 : vector<1x128xf32> to vector<32x128xf32>
    %10 = arith.mulf %5, %9 : vector<32x128xf32>
    %cst_9 = arith.constant dense<0.000000e+00> : vector<32xf32>
    %11 = vector.multi_reduction <add>, %10, %cst_9 [1] : vector<32x128xf32> to vector<32xf32>
    %12 = vector.shape_cast %11 : vector<32xf32> to vector<32x1xf32>
    %13 = vector.shape_cast %12 : vector<32x1xf32> to vector<1x32x1xf32>
    %c0_10 = arith.constant 0 : index
    %c0_11 = arith.constant 0 : index
    %c0_12 = arith.constant 0 : index
    %14 = vector.load %arg6[%c0_10, %c0_11, %c0_12] : memref<1x32x1xf32, #tpu.memory_space<vmem>>, vector<1x32x1xf32>
    tpu.vector_store %arg6[%c0_10, %c0_11, %c0_12], %13 {strides = array<i32>} : memref<1x32x1xf32, #tpu.memory_space<vmem>>, vector<1x32x1xf32>,
    %15 = arith.mulf %10, %5 : vector<32x128xf32>
    %cst_13 = arith.constant dense<0.000000e+00> : vector<32xf32>
    %16 = vector.multi_reduction <add>, %15, %cst_13 [1] : vector<32x128xf32> to vector<32xf32>
    %17 = vector.shape_cast %16 : vector<32xf32> to vector<32x1xf32>
    %18 = vector.shape_cast %17 : vector<32x1xf32> to vector<1x32x1xf32>
    %c0_14 = arith.constant 0 : index
    %c0_15 = arith.constant 0 : index
    %c0_16 = arith.constant 0 : index
    %19 = vector.load %arg7[%c0_14, %c0_15, %c0_16] : memref<1x32x1xf32, #tpu.memory_space<vmem>>, vector<1x32x1xf32>
    tpu.vector_store %arg7[%c0_14, %c0_15, %c0_16], %18 {strides = array<i32>} : memref<1x32x1xf32, #tpu.memory_space<vmem>>, vector<1x32x1xf32>,
    return
  }
  func.func @transform_0(%arg0: i32) -> (i32, i32) {
    %c0_i32 = arith.constant 0 : i32
    %c0_i32_0 = arith.constant 0 : i32
    %c0_i32_1 = arith.constant 0 : i32
    return %c0_i32, %c0_i32_0 : i32, i32
  }
  func.func @transform_1(%arg0: i32) -> (i32, i32) {
    %c0_i32 = arith.constant 0 : i32
    %c0_i32_0 = arith.constant 0 : i32
    return %c0_i32, %arg0 : i32, i32
  }
  func.func @transform_2(%arg0: i32) -> (i32, i32) {
    %c0_i32 = arith.constant 0 : i32
    %c0_i32_0 = arith.constant 0 : i32
    %c0_i32_1 = arith.constant 0 : i32
    return %c0_i32, %c0_i32_0 : i32, i32
  }
  func.func @transform_3(%arg0: i32) -> (i32, i32) {
    %c0_i32 = arith.constant 0 : i32
    %c0_i32_0 = arith.constant 0 : i32
    return %c0_i32, %arg0 : i32, i32
  }
  func.func @transform_4(%arg0: i32) -> (i32, i32) {
    %c0_i32 = arith.constant 0 : i32
    %c0_i32_0 = arith.constant 0 : i32
    return %c0_i32, %arg0 : i32, i32
  }
  func.func @transform_5(%arg0: i32) -> (i32, i32, i32) {
    %c0_i32 = arith.constant 0 : i32
    %c0_i32_0 = arith.constant 0 : i32
    %c0_i32_1 = arith.constant 0 : i32
    return %arg0, %c0_i32, %c0_i32_0 : i32, i32, i32
  }
  func.func @transform_6(%arg0: i32) -> (i32, i32, i32) {
    %c0_i32 = arith.constant 0 : i32
    %c0_i32_0 = arith.constant 0 : i32
    %c0_i32_1 = arith.constant 0 : i32
    return %arg0, %c0_i32, %c0_i32_0 : i32, i32, i32
  }
}

module attributes {stable_mosaic.version = 11 : i64} {
  func.func @kernel(%arg0: i32, %arg1: memref<32x128xbf16, #tpu.memory_space<vmem>>, %arg2: memref<32x1xf32, #tpu.memory_space<vmem>>, %arg3: memref<32x1xf32, #tpu.memory_space<vmem>>, %arg4: memref<1x128xf32, #tpu.memory_space<vmem>>, %arg5: memref<32x128xbf16, #tpu.memory_space<vmem>>, %arg6: memref<1x32x1xf32, #tpu.memory_space<vmem>>, %arg7: memref<1x32x1xf32, #tpu.memory_space<vmem>>) attributes {dimension_semantics = [#tpu.dimension_semantics<parallel>], iteration_bounds = array<i64: 1>, scalar_prefetch = 0 : i64, scratch_operands = 0 : i64, tpu.core_type = #tpu.core_type<tc>, window_params = [{transform_indices = @transform_0, window_bounds = array<i64: 32, 128>}, {pipeline_mode = #tpu.pipeline_mode<synchronous>, transform_indices = @transform_1, window_bounds = array<i64: 32, 1>}, {pipeline_mode = #tpu.pipeline_mode<synchronous>, transform_indices = @transform_2, window_bounds = array<i64: 32, 1>}, {transform_indices = @transform_3, window_bounds = array<i64: 1, 128>}, {transform_indices = @transform_4, window_bounds = array<i64: 32, 128>}, {transform_indices = @transform_5, window_bounds = array<i64: 1, 32, 1>}, {transform_indices = @transform_6, window_bounds = array<i64: 1, 32, 1>}]} {
    %c0 = arith.constant 0 : index
    %c0_0 = arith.constant 0 : index
    %0 = vector.load %arg1[%c0, %c0_0] : memref<32x128xbf16, #tpu.memory_space<vmem>>, vector<32x128xbf16>
    %1 = arith.extf %0 : vector<32x128xbf16> to vector<32x128xf32>
    %c0_1 = arith.constant 0 : index
    %c0_2 = arith.constant 0 : index
    %2 = vector.load %arg2[%c0_1, %c0_2] : memref<32x1xf32, #tpu.memory_space<vmem>>, vector<32x1xf32>
    %3 = vector.broadcast %2 : vector<32x1xf32> to vector<32x128xf32>
    %4 = arith.mulf %1, %3 : vector<32x128xf32>
    %c0_3 = arith.constant 0 : index
    %c0_4 = arith.constant 0 : index
    %5 = vector.load %arg3[%c0_3, %c0_4] : memref<32x1xf32, #tpu.memory_space<vmem>>, vector<32x1xf32>
    %6 = vector.broadcast %5 : vector<32x1xf32> to vector<32x128xf32>
    %7 = arith.addf %4, %6 : vector<32x128xf32>
    %cst = arith.constant 0.000000e+00 : f32
    %8 = vector.broadcast %cst : f32 to vector<32x128xf32>
    %9 = arith.maximumf %7, %8 : vector<32x128xf32>
    %c0_5 = arith.constant 0 : index
    %c0_6 = arith.constant 0 : index
    %10 = vector.load %arg4[%c0_5, %c0_6] : memref<1x128xf32, #tpu.memory_space<vmem>>, vector<1x128xf32>
    %11 = arith.truncf %9 : vector<32x128xf32> to vector<32x128xbf16>
    %c0_7 = arith.constant 0 : index
    %c0_8 = arith.constant 0 : index
    %12 = vector.load %arg5[%c0_7, %c0_8] : memref<32x128xbf16, #tpu.memory_space<vmem>>, vector<32x128xbf16>
    tpu.vector_store %arg5[%c0_7, %c0_8], %11 {strides = array<i32>} : memref<32x128xbf16, #tpu.memory_space<vmem>>, vector<32x128xbf16>,
    %13 = vector.broadcast %10 : vector<1x128xf32> to vector<32x128xf32>
    %14 = arith.mulf %9, %13 : vector<32x128xf32>
    %cst_9 = arith.constant dense<0.000000e+00> : vector<32xf32>
    %15 = vector.multi_reduction <add>, %14, %cst_9 [1] : vector<32x128xf32> to vector<32xf32>
    %16 = vector.shape_cast %15 : vector<32xf32> to vector<32x1xf32>
    %17 = vector.shape_cast %16 : vector<32x1xf32> to vector<1x32x1xf32>
    %c0_10 = arith.constant 0 : index
    %c0_11 = arith.constant 0 : index
    %c0_12 = arith.constant 0 : index
    %18 = vector.load %arg6[%c0_10, %c0_11, %c0_12] : memref<1x32x1xf32, #tpu.memory_space<vmem>>, vector<1x32x1xf32>
    tpu.vector_store %arg6[%c0_10, %c0_11, %c0_12], %17 {strides = array<i32>} : memref<1x32x1xf32, #tpu.memory_space<vmem>>, vector<1x32x1xf32>,
    %19 = arith.mulf %14, %9 : vector<32x128xf32>
    %cst_13 = arith.constant dense<0.000000e+00> : vector<32xf32>
    %20 = vector.multi_reduction <add>, %19, %cst_13 [1] : vector<32x128xf32> to vector<32xf32>
    %21 = vector.shape_cast %20 : vector<32xf32> to vector<32x1xf32>
    %22 = vector.shape_cast %21 : vector<32x1xf32> to vector<1x32x1xf32>
    %c0_14 = arith.constant 0 : index
    %c0_15 = arith.constant 0 : index
    %c0_16 = arith.constant 0 : index
    %23 = vector.load %arg7[%c0_14, %c0_15, %c0_16] : memref<1x32x1xf32, #tpu.memory_space<vmem>>, vector<1x32x1xf32>
    tpu.vector_store %arg7[%c0_14, %c0_15, %c0_16], %22 {strides = array<i32>} : memref<1x32x1xf32, #tpu.memory_space<vmem>>, vector<1x32x1xf32>,
    return
  }
  func.func @transform_0(%arg0: i32) -> (i32, i32) {
    %c0_i32 = arith.constant 0 : i32
    %c0_i32_0 = arith.constant 0 : i32
    return %c0_i32, %arg0 : i32, i32
  }
  func.func @transform_1(%arg0: i32) -> (i32, i32) {
    %c0_i32 = arith.constant 0 : i32
    %c0_i32_0 = arith.constant 0 : i32
    %c0_i32_1 = arith.constant 0 : i32
    return %c0_i32, %c0_i32_0 : i32, i32
  }
  func.func @transform_2(%arg0: i32) -> (i32, i32) {
    %c0_i32 = arith.constant 0 : i32
    %c0_i32_0 = arith.constant 0 : i32
    %c0_i32_1 = arith.constant 0 : i32
    return %c0_i32, %c0_i32_0 : i32, i32
  }
  func.func @transform_3(%arg0: i32) -> (i32, i32) {
    %c0_i32 = arith.constant 0 : i32
    %c0_i32_0 = arith.constant 0 : i32
    return %c0_i32, %arg0 : i32, i32
  }
  func.func @transform_4(%arg0: i32) -> (i32, i32) {
    %c0_i32 = arith.constant 0 : i32
    %c0_i32_0 = arith.constant 0 : i32
    return %c0_i32, %arg0 : i32, i32
  }
  func.func @transform_5(%arg0: i32) -> (i32, i32, i32) {
    %c0_i32 = arith.constant 0 : i32
    %c0_i32_0 = arith.constant 0 : i32
    %c0_i32_1 = arith.constant 0 : i32
    return %arg0, %c0_i32, %c0_i32_0 : i32, i32, i32
  }
  func.func @transform_6(%arg0: i32) -> (i32, i32, i32) {
    %c0_i32 = arith.constant 0 : i32
    %c0_i32_0 = arith.constant 0 : i32
    %c0_i32_1 = arith.constant 0 : i32
    return %arg0, %c0_i32, %c0_i32_0 : i32, i32, i32
  }
}

module attributes {stable_mosaic.version = 11 : i64} {
  func.func @kernel(%arg0: i32, %arg1: memref<32x128xbf16, #tpu.memory_space<vmem>>, %arg2: memref<32x1xf32, #tpu.memory_space<vmem>>, %arg3: memref<32x1xf32, #tpu.memory_space<vmem>>, %arg4: memref<1x128xf32, #tpu.memory_space<vmem>>, %arg5: memref<32x128xbf16, #tpu.memory_space<vmem>>, %arg6: memref<1x32x1xf32, #tpu.memory_space<vmem>>, %arg7: memref<1x32x1xf32, #tpu.memory_space<vmem>>) attributes {dimension_semantics = [#tpu.dimension_semantics<parallel>], iteration_bounds = array<i64: 1>, scalar_prefetch = 0 : i64, scratch_operands = 0 : i64, tpu.core_type = #tpu.core_type<tc>, window_params = [{transform_indices = @transform_0, window_bounds = array<i64: 32, 128>}, {pipeline_mode = #tpu.pipeline_mode<synchronous>, transform_indices = @transform_1, window_bounds = array<i64: 32, 1>}, {pipeline_mode = #tpu.pipeline_mode<synchronous>, transform_indices = @transform_2, window_bounds = array<i64: 32, 1>}, {transform_indices = @transform_3, window_bounds = array<i64: 1, 128>}, {transform_indices = @transform_4, window_bounds = array<i64: 32, 128>}, {transform_indices = @transform_5, window_bounds = array<i64: 1, 32, 1>}, {transform_indices = @transform_6, window_bounds = array<i64: 1, 32, 1>}]} {
    %c0 = arith.constant 0 : index
    %c0_0 = arith.constant 0 : index
    %0 = vector.load %arg1[%c0, %c0_0] : memref<32x128xbf16, #tpu.memory_space<vmem>>, vector<32x128xbf16>
    %1 = arith.extf %0 : vector<32x128xbf16> to vector<32x128xf32>
    %c0_1 = arith.constant 0 : index
    %c0_2 = arith.constant 0 : index
    %2 = vector.load %arg2[%c0_1, %c0_2] : memref<32x1xf32, #tpu.memory_space<vmem>>, vector<32x1xf32>
    %3 = vector.broadcast %2 : vector<32x1xf32> to vector<32x128xf32>
    %4 = arith.mulf %1, %3 : vector<32x128xf32>
    %c0_3 = arith.constant 0 : index
    %c0_4 = arith.constant 0 : index
    %5 = vector.load %arg3[%c0_3, %c0_4] : memref<32x1xf32, #tpu.memory_space<vmem>>, vector<32x1xf32>
    %6 = vector.broadcast %5 : vector<32x1xf32> to vector<32x128xf32>
    %7 = arith.addf %4, %6 : vector<32x128xf32>
    %cst = arith.constant 0.000000e+00 : f32
    %8 = vector.broadcast %cst : f32 to vector<32x128xf32>
    %9 = arith.maximumf %7, %8 : vector<32x128xf32>
    %c0_5 = arith.constant 0 : index
    %c0_6 = arith.constant 0 : index
    %10 = vector.load %arg4[%c0_5, %c0_6] : memref<1x128xf32, #tpu.memory_space<vmem>>, vector<1x128xf32>
    %11 = arith.truncf %9 : vector<32x128xf32> to vector<32x128xbf16>
    %c0_7 = arith.constant 0 : index
    %c0_8 = arith.constant 0 : index
    %12 = vector.load %arg5[%c0_7, %c0_8] : memref<32x128xbf16, #tpu.memory_space<vmem>>, vector<32x128xbf16>
    tpu.vector_store %arg5[%c0_7, %c0_8], %11 {strides = array<i32>} : memref<32x128xbf16, #tpu.memory_space<vmem>>, vector<32x128xbf16>,
    %13 = vector.broadcast %10 : vector<1x128xf32> to vector<32x128xf32>
    %14 = arith.mulf %9, %13 : vector<32x128xf32>
    %cst_9 = arith.constant dense<0.000000e+00> : vector<32xf32>
    %15 = vector.multi_reduction <add>, %14, %cst_9 [1] : vector<32x128xf32> to vector<32xf32>
    %16 = vector.shape_cast %15 : vector<32xf32> to vector<32x1xf32>
    %17 = vector.shape_cast %16 : vector<32x1xf32> to vector<1x32x1xf32>
    %c0_10 = arith.constant 0 : index
    %c0_11 = arith.constant 0 : index
    %c0_12 = arith.constant 0 : index
    %18 = vector.load %arg6[%c0_10, %c0_11, %c0_12] : memref<1x32x1xf32, #tpu.memory_space<vmem>>, vector<1x32x1xf32>
    tpu.vector_store %arg6[%c0_10, %c0_11, %c0_12], %17 {strides = array<i32>} : memref<1x32x1xf32, #tpu.memory_space<vmem>>, vector<1x32x1xf32>,
    %19 = arith.mulf %14, %9 : vector<32x128xf32>
    %cst_13 = arith.constant dense<0.000000e+00> : vector<32xf32>
    %20 = vector.multi_reduction <add>, %19, %cst_13 [1] : vector<32x128xf32> to vector<32xf32>
    %21 = vector.shape_cast %20 : vector<32xf32> to vector<32x1xf32>
    %22 = vector.shape_cast %21 : vector<32x1xf32> to vector<1x32x1xf32>
    %c0_14 = arith.constant 0 : index
    %c0_15 = arith.constant 0 : index
    %c0_16 = arith.constant 0 : index
    %23 = vector.load %arg7[%c0_14, %c0_15, %c0_16] : memref<1x32x1xf32, #tpu.memory_space<vmem>>, vector<1x32x1xf32>
    tpu.vector_store %arg7[%c0_14, %c0_15, %c0_16], %22 {strides = array<i32>} : memref<1x32x1xf32, #tpu.memory_space<vmem>>, vector<1x32x1xf32>,
    return
  }
  func.func @transform_0(%arg0: i32) -> (i32, i32) {
    %c0_i32 = arith.constant 0 : i32
    %c0_i32_0 = arith.constant 0 : i32
    return %c0_i32, %arg0 : i32, i32
  }
  func.func @transform_1(%arg0: i32) -> (i32, i32) {
    %c0_i32 = arith.constant 0 : i32
    %c0_i32_0 = arith.constant 0 : i32
    %c0_i32_1 = arith.constant 0 : i32
    return %c0_i32, %c0_i32_0 : i32, i32
  }
  func.func @transform_2(%arg0: i32) -> (i32, i32) {
    %c0_i32 = arith.constant 0 : i32
    %c0_i32_0 = arith.constant 0 : i32
    %c0_i32_1 = arith.constant 0 : i32
    return %c0_i32, %c0_i32_0 : i32, i32
  }
  func.func @transform_3(%arg0: i32) -> (i32, i32) {
    %c0_i32 = arith.constant 0 : i32
    %c0_i32_0 = arith.constant 0 : i32
    return %c0_i32, %arg0 : i32, i32
  }
  func.func @transform_4(%arg0: i32) -> (i32, i32) {
    %c0_i32 = arith.constant 0 : i32
    %c0_i32_0 = arith.constant 0 : i32
    return %c0_i32, %arg0 : i32, i32
  }
  func.func @transform_5(%arg0: i32) -> (i32, i32, i32) {
    %c0_i32 = arith.constant 0 : i32
    %c0_i32_0 = arith.constant 0 : i32
    %c0_i32_1 = arith.constant 0 : i32
    return %arg0, %c0_i32, %c0_i32_0 : i32, i32, i32
  }
  func.func @transform_6(%arg0: i32) -> (i32, i32, i32) {
    %c0_i32 = arith.constant 0 : i32
    %c0_i32_0 = arith.constant 0 : i32
    %c0_i32_1 = arith.constant 0 : i32
    return %arg0, %c0_i32, %c0_i32_0 : i32, i32, i32
  }
}

module attributes {stable_mosaic.version = 11 : i64} {
  func.func @kernel(%arg0: i32, %arg1: memref<3x32x96xbf16, #tpu.memory_space<vmem>>, %arg2: memref<96x128xbf16, #tpu.memory_space<vmem>>, %arg3: memref<32x1xf32, #tpu.memory_space<vmem>>, %arg4: memref<1x128xf32, #tpu.memory_space<vmem>>, %arg5: memref<32x128xbf16, #tpu.memory_space<vmem>>, %arg6: memref<1x32x1xf32, #tpu.memory_space<vmem>>, %arg7: memref<1x32x1xf32, #tpu.memory_space<vmem>>) attributes {dimension_semantics = [#tpu.dimension_semantics<parallel>], iteration_bounds = array<i64: 1>, scalar_prefetch = 0 : i64, scratch_operands = 0 : i64, tpu.core_type = #tpu.core_type<tc>, window_params = [{pipeline_mode = #tpu.pipeline_mode<synchronous>, transform_indices = @transform_0, window_bounds = array<i64: 3, 32, 96>}, {transform_indices = @transform_1, window_bounds = array<i64: 96, 128>}, {pipeline_mode = #tpu.pipeline_mode<synchronous>, transform_indices = @transform_2, window_bounds = array<i64: 32, 1>}, {transform_indices = @transform_3, window_bounds = array<i64: 1, 128>}, {transform_indices = @transform_4, window_bounds = array<i64: 32, 128>}, {transform_indices = @transform_5, window_bounds = array<i64: 1, 32, 1>}, {transform_indices = @transform_6, window_bounds = array<i64: 1, 32, 1>}]} {
    %c0 = arith.constant 0 : index
    %c0_0 = arith.constant 0 : index
    %0 = vector.load %arg2[%c0, %c0_0] : memref<96x128xbf16, #tpu.memory_space<vmem>>, vector<96x128xbf16>
    %c0_1 = arith.constant 0 : index
    %c0_2 = arith.constant 0 : index
    %c0_3 = arith.constant 0 : index
    %1 = vector.load %arg1[%c0_1, %c0_2, %c0_3] : memref<3x32x96xbf16, #tpu.memory_space<vmem>>, vector<1x32x96xbf16>
    %2 = vector.shape_cast %1 : vector<1x32x96xbf16> to vector<32x96xbf16>
    %cst = arith.constant dense<0.000000e+00> : vector<32x128xf32>
    %3 = tpu.matmul %2, %0, %cst {dimension_numbers = #tpu.dot_dimension_numbers<[1], [0], [0], [1], [0, 0, 1, 1], [], []>} : vector<32x96xbf16>, vector<96x128xbf16>, vector<32x128xf32> -> vector<32x128xf32>
    %c1 = arith.constant 1 : index
    %c0_4 = arith.constant 0 : index
    %c0_5 = arith.constant 0 : index
    %4 = vector.load %arg1[%c1, %c0_4, %c0_5] : memref<3x32x96xbf16, #tpu.memory_space<vmem>>, vector<1x32x96xbf16>
    %5 = vector.shape_cast %4 : vector<1x32x96xbf16> to vector<32x96xbf16>
    %cst_6 = arith.constant dense<0.000000e+00> : vector<32x128xf32>
    %6 = tpu.matmul %5, %0, %cst_6 {dimension_numbers = #tpu.dot_dimension_numbers<[1], [0], [0], [1], [0, 0, 1, 1], [], []>} : vector<32x96xbf16>, vector<96x128xbf16>, vector<32x128xf32> -> vector<32x128xf32>
    %7 = vector.extract_strided_slice %6 {offsets = [0, 2], sizes = [32, 126], strides = [1, 1]} : vector<32x128xf32> to vector<32x126xf32>
    %8 = vector.extract_strided_slice %6 {offsets = [0, 0], sizes = [32, 2], strides = [1, 1]} : vector<32x128xf32> to vector<32x2xf32>
    %9 = tpu.concatenate %7, %8 in 1 : vector<32x126xf32>, vector<32x2xf32> -> vector<32x128xf32>
    %10 = arith.addf %3, %9 : vector<32x128xf32>
    %c2 = arith.constant 2 : index
    %c0_7 = arith.constant 0 : index
    %c0_8 = arith.constant 0 : index
    %11 = vector.load %arg1[%c2, %c0_7, %c0_8] : memref<3x32x96xbf16, #tpu.memory_space<vmem>>, vector<1x32x96xbf16>
    %12 = vector.shape_cast %11 : vector<1x32x96xbf16> to vector<32x96xbf16>
    %cst_9 = arith.constant dense<0.000000e+00> : vector<32x128xf32>
    %13 = tpu.matmul %12, %0, %cst_9 {dimension_numbers = #tpu.dot_dimension_numbers<[1], [0], [0], [1], [0, 0, 1, 1], [], []>} : vector<32x96xbf16>, vector<96x128xbf16>, vector<32x128xf32> -> vector<32x128xf32>
    %14 = vector.extract_strided_slice %13 {offsets = [0, 4], sizes = [32, 124], strides = [1, 1]} : vector<32x128xf32> to vector<32x124xf32>
    %15 = vector.extract_strided_slice %13 {offsets = [0, 0], sizes = [32, 4], strides = [1, 1]} : vector<32x128xf32> to vector<32x4xf32>
    %16 = tpu.concatenate %14, %15 in 1 : vector<32x124xf32>, vector<32x4xf32> -> vector<32x128xf32>
    %17 = arith.addf %10, %16 : vector<32x128xf32>
    %c0_10 = arith.constant 0 : index
    %c0_11 = arith.constant 0 : index
    %18 = vector.load %arg3[%c0_10, %c0_11] : memref<32x1xf32, #tpu.memory_space<vmem>>, vector<32x1xf32>
    %19 = vector.broadcast %18 : vector<32x1xf32> to vector<32x128xf32>
    %20 = arith.addf %17, %19 : vector<32x128xf32>
    %c0_12 = arith.constant 0 : index
    %c0_13 = arith.constant 0 : index
    %21 = vector.load %arg4[%c0_12, %c0_13] : memref<1x128xf32, #tpu.memory_space<vmem>>, vector<1x128xf32>
    %22 = arith.truncf %20 : vector<32x128xf32> to vector<32x128xbf16>
    %c0_14 = arith.constant 0 : index
    %c0_15 = arith.constant 0 : index
    %23 = vector.load %arg5[%c0_14, %c0_15] : memref<32x128xbf16, #tpu.memory_space<vmem>>, vector<32x128xbf16>
    tpu.vector_store %arg5[%c0_14, %c0_15], %22 {strides = array<i32>} : memref<32x128xbf16, #tpu.memory_space<vmem>>, vector<32x128xbf16>,
    %24 = vector.broadcast %21 : vector<1x128xf32> to vector<32x128xf32>
    %25 = arith.mulf %20, %24 : vector<32x128xf32>
    %cst_16 = arith.constant dense<0.000000e+00> : vector<32xf32>
    %26 = vector.multi_reduction <add>, %25, %cst_16 [1] : vector<32x128xf32> to vector<32xf32>
    %27 = vector.shape_cast %26 : vector<32xf32> to vector<32x1xf32>
    %28 = vector.shape_cast %27 : vector<32x1xf32> to vector<1x32x1xf32>
    %c0_17 = arith.constant 0 : index
    %c0_18 = arith.constant 0 : index
    %c0_19 = arith.constant 0 : index
    %29 = vector.load %arg6[%c0_17, %c0_18, %c0_19] : memref<1x32x1xf32, #tpu.memory_space<vmem>>, vector<1x32x1xf32>
    tpu.vector_store %arg6[%c0_17, %c0_18, %c0_19], %28 {strides = array<i32>} : memref<1x32x1xf32, #tpu.memory_space<vmem>>, vector<1x32x1xf32>,
    %30 = arith.mulf %25, %20 : vector<32x128xf32>
    %cst_20 = arith.constant dense<0.000000e+00> : vector<32xf32>
    %31 = vector.multi_reduction <add>, %30, %cst_20 [1] : vector<32x128xf32> to vector<32xf32>
    %32 = vector.shape_cast %31 : vector<32xf32> to vector<32x1xf32>
    %33 = vector.shape_cast %32 : vector<32x1xf32> to vector<1x32x1xf32>
    %c0_21 = arith.constant 0 : index
    %c0_22 = arith.constant 0 : index
    %c0_23 = arith.constant 0 : index
    %34 = vector.load %arg7[%c0_21, %c0_22, %c0_23] : memref<1x32x1xf32, #tpu.memory_space<vmem>>, vector<1x32x1xf32>
    tpu.vector_store %arg7[%c0_21, %c0_22, %c0_23], %33 {strides = array<i32>} : memref<1x32x1xf32, #tpu.memory_space<vmem>>, vector<1x32x1xf32>,
    return
  }
  func.func @transform_0(%arg0: i32) -> (i32, i32, i32) {
    %c0_i32 = arith.constant 0 : i32
    %c0_i32_0 = arith.constant 0 : i32
    %c0_i32_1 = arith.constant 0 : i32
    %c0_i32_2 = arith.constant 0 : i32
    return %c0_i32, %c0_i32_0, %c0_i32_1 : i32, i32, i32
  }
  func.func @transform_1(%arg0: i32) -> (i32, i32) {
    %c0_i32 = arith.constant 0 : i32
    %c0_i32_0 = arith.constant 0 : i32
    return %c0_i32, %arg0 : i32, i32
  }
  func.func @transform_2(%arg0: i32) -> (i32, i32) {
    %c0_i32 = arith.constant 0 : i32
    %c0_i32_0 = arith.constant 0 : i32
    %c0_i32_1 = arith.constant 0 : i32
    return %c0_i32, %c0_i32_0 : i32, i32
  }
  func.func @transform_3(%arg0: i32) -> (i32, i32) {
    %c0_i32 = arith.constant 0 : i32
    %c0_i32_0 = arith.constant 0 : i32
    return %c0_i32, %arg0 : i32, i32
  }
  func.func @transform_4(%arg0: i32) -> (i32, i32) {
    %c0_i32 = arith.constant 0 : i32
    %c0_i32_0 = arith.constant 0 : i32
    return %c0_i32, %arg0 : i32, i32
  }
  func.func @transform_5(%arg0: i32) -> (i32, i32, i32) {
    %c0_i32 = arith.constant 0 : i32
    %c0_i32_0 = arith.constant 0 : i32
    %c0_i32_1 = arith.constant 0 : i32
    return %arg0, %c0_i32, %c0_i32_0 : i32, i32, i32
  }
  func.func @transform_6(%arg0: i32) -> (i32, i32, i32) {
    %c0_i32 = arith.constant 0 : i32
    %c0_i32_0 = arith.constant 0 : i32
    %c0_i32_1 = arith.constant 0 : i32
    return %arg0, %c0_i32, %c0_i32_0 : i32, i32, i32
  }
}

module attributes {stable_mosaic.version = 11 : i64} {
  func.func @kernel(%arg0: i32, %arg1: memref<3x32x96xbf16, #tpu.memory_space<vmem>>, %arg2: memref<96x384xbf16, #tpu.memory_space<vmem>>, %arg3: memref<32x1xf32, #tpu.memory_space<vmem>>, %arg4: memref<1x384xf32, #tpu.memory_space<vmem>>, %arg5: memref<32x384xbf16, #tpu.memory_space<vmem>>, %arg6: memref<32x384xbf16, #tpu.memory_space<vmem>>, %arg7: memref<1x32x1xf32, #tpu.memory_space<vmem>>, %arg8: memref<1x32x1xf32, #tpu.memory_space<vmem>>) attributes {dimension_semantics = [#tpu.dimension_semantics<parallel>], iteration_bounds = array<i64: 1>, scalar_prefetch = 0 : i64, scratch_operands = 0 : i64, tpu.core_type = #tpu.core_type<tc>, window_params = [{pipeline_mode = #tpu.pipeline_mode<synchronous>, transform_indices = @transform_0, window_bounds = array<i64: 3, 32, 96>}, {transform_indices = @transform_1, window_bounds = array<i64: 96, 384>}, {pipeline_mode = #tpu.pipeline_mode<synchronous>, transform_indices = @transform_2, window_bounds = array<i64: 32, 1>}, {transform_indices = @transform_3, window_bounds = array<i64: 1, 384>}, {transform_indices = @transform_4, window_bounds = array<i64: 32, 384>}, {transform_indices = @transform_5, window_bounds = array<i64: 32, 384>}, {transform_indices = @transform_6, window_bounds = array<i64: 1, 32, 1>}, {transform_indices = @transform_7, window_bounds = array<i64: 1, 32, 1>}]} {
    %c0 = arith.constant 0 : index
    %c0_0 = arith.constant 0 : index
    %0 = vector.load %arg2[%c0, %c0_0] : memref<96x384xbf16, #tpu.memory_space<vmem>>, vector<96x384xbf16>
    %c0_1 = arith.constant 0 : index
    %c0_2 = arith.constant 0 : index
    %c0_3 = arith.constant 0 : index
    %1 = vector.load %arg1[%c0_1, %c0_2, %c0_3] : memref<3x32x96xbf16, #tpu.memory_space<vmem>>, vector<1x32x96xbf16>
    %2 = vector.shape_cast %1 : vector<1x32x96xbf16> to vector<32x96xbf16>
    %cst = arith.constant dense<0.000000e+00> : vector<32x384xf32>
    %3 = tpu.matmul %2, %0, %cst {dimension_numbers = #tpu.dot_dimension_numbers<[1], [0], [0], [1], [0, 0, 1, 1], [], []>} : vector<32x96xbf16>, vector<96x384xbf16>, vector<32x384xf32> -> vector<32x384xf32>
    %c1 = arith.constant 1 : index
    %c0_4 = arith.constant 0 : index
    %c0_5 = arith.constant 0 : index
    %4 = vector.load %arg1[%c1, %c0_4, %c0_5] : memref<3x32x96xbf16, #tpu.memory_space<vmem>>, vector<1x32x96xbf16>
    %5 = vector.shape_cast %4 : vector<1x32x96xbf16> to vector<32x96xbf16>
    %cst_6 = arith.constant dense<0.000000e+00> : vector<32x384xf32>
    %6 = tpu.matmul %5, %0, %cst_6 {dimension_numbers = #tpu.dot_dimension_numbers<[1], [0], [0], [1], [0, 0, 1, 1], [], []>} : vector<32x96xbf16>, vector<96x384xbf16>, vector<32x384xf32> -> vector<32x384xf32>
    %7 = vector.extract_strided_slice %6 {offsets = [0, 1], sizes = [32, 383], strides = [1, 1]} : vector<32x384xf32> to vector<32x383xf32>
    %8 = vector.extract_strided_slice %6 {offsets = [0, 0], sizes = [32, 1], strides = [1, 1]} : vector<32x384xf32> to vector<32x1xf32>
    %9 = tpu.concatenate %7, %8 in 1 : vector<32x383xf32>, vector<32x1xf32> -> vector<32x384xf32>
    %10 = arith.addf %3, %9 : vector<32x384xf32>
    %c2 = arith.constant 2 : index
    %c0_7 = arith.constant 0 : index
    %c0_8 = arith.constant 0 : index
    %11 = vector.load %arg1[%c2, %c0_7, %c0_8] : memref<3x32x96xbf16, #tpu.memory_space<vmem>>, vector<1x32x96xbf16>
    %12 = vector.shape_cast %11 : vector<1x32x96xbf16> to vector<32x96xbf16>
    %cst_9 = arith.constant dense<0.000000e+00> : vector<32x384xf32>
    %13 = tpu.matmul %12, %0, %cst_9 {dimension_numbers = #tpu.dot_dimension_numbers<[1], [0], [0], [1], [0, 0, 1, 1], [], []>} : vector<32x96xbf16>, vector<96x384xbf16>, vector<32x384xf32> -> vector<32x384xf32>
    %14 = vector.extract_strided_slice %13 {offsets = [0, 2], sizes = [32, 382], strides = [1, 1]} : vector<32x384xf32> to vector<32x382xf32>
    %15 = vector.extract_strided_slice %13 {offsets = [0, 0], sizes = [32, 2], strides = [1, 1]} : vector<32x384xf32> to vector<32x2xf32>
    %16 = tpu.concatenate %14, %15 in 1 : vector<32x382xf32>, vector<32x2xf32> -> vector<32x384xf32>
    %17 = arith.addf %10, %16 : vector<32x384xf32>
    %c0_10 = arith.constant 0 : index
    %c0_11 = arith.constant 0 : index
    %18 = vector.load %arg3[%c0_10, %c0_11] : memref<32x1xf32, #tpu.memory_space<vmem>>, vector<32x1xf32>
    %19 = vector.broadcast %18 : vector<32x1xf32> to vector<32x384xf32>
    %20 = arith.addf %17, %19 : vector<32x384xf32>
    %c0_12 = arith.constant 0 : index
    %c0_13 = arith.constant 0 : index
    %21 = vector.load %arg5[%c0_12, %c0_13] : memref<32x384xbf16, #tpu.memory_space<vmem>>, vector<32x384xbf16>
    %22 = arith.extf %21 : vector<32x384xbf16> to vector<32x384xf32>
    %23 = arith.addf %20, %22 : vector<32x384xf32>
    %c0_14 = arith.constant 0 : index
    %c0_15 = arith.constant 0 : index
    %24 = vector.load %arg4[%c0_14, %c0_15] : memref<1x384xf32, #tpu.memory_space<vmem>>, vector<1x384xf32>
    %25 = arith.truncf %23 : vector<32x384xf32> to vector<32x384xbf16>
    %c0_16 = arith.constant 0 : index
    %c0_17 = arith.constant 0 : index
    %26 = vector.load %arg6[%c0_16, %c0_17] : memref<32x384xbf16, #tpu.memory_space<vmem>>, vector<32x384xbf16>
    tpu.vector_store %arg6[%c0_16, %c0_17], %25 {strides = array<i32>} : memref<32x384xbf16, #tpu.memory_space<vmem>>, vector<32x384xbf16>,
    %27 = vector.broadcast %24 : vector<1x384xf32> to vector<32x384xf32>
    %28 = arith.mulf %23, %27 : vector<32x384xf32>
    %cst_18 = arith.constant dense<0.000000e+00> : vector<32xf32>
    %29 = vector.multi_reduction <add>, %28, %cst_18 [1] : vector<32x384xf32> to vector<32xf32>
    %30 = vector.shape_cast %29 : vector<32xf32> to vector<32x1xf32>
    %31 = vector.shape_cast %30 : vector<32x1xf32> to vector<1x32x1xf32>
    %c0_19 = arith.constant 0 : index
    %c0_20 = arith.constant 0 : index
    %c0_21 = arith.constant 0 : index
    %32 = vector.load %arg7[%c0_19, %c0_20, %c0_21] : memref<1x32x1xf32, #tpu.memory_space<vmem>>, vector<1x32x1xf32>
    tpu.vector_store %arg7[%c0_19, %c0_20, %c0_21], %31 {strides = array<i32>} : memref<1x32x1xf32, #tpu.memory_space<vmem>>, vector<1x32x1xf32>,
    %33 = arith.mulf %28, %23 : vector<32x384xf32>
    %cst_22 = arith.constant dense<0.000000e+00> : vector<32xf32>
    %34 = vector.multi_reduction <add>, %33, %cst_22 [1] : vector<32x384xf32> to vector<32xf32>
    %35 = vector.shape_cast %34 : vector<32xf32> to vector<32x1xf32>
    %36 = vector.shape_cast %35 : vector<32x1xf32> to vector<1x32x1xf32>
    %c0_23 = arith.constant 0 : index
    %c0_24 = arith.constant 0 : index
    %c0_25 = arith.constant 0 : index
    %37 = vector.load %arg8[%c0_23, %c0_24, %c0_25] : memref<1x32x1xf32, #tpu.memory_space<vmem>>, vector<1x32x1xf32>
    tpu.vector_store %arg8[%c0_23, %c0_24, %c0_25], %36 {strides = array<i32>} : memref<1x32x1xf32, #tpu.memory_space<vmem>>, vector<1x32x1xf32>,
    return
  }
  func.func @transform_0(%arg0: i32) -> (i32, i32, i32) {
    %c0_i32 = arith.constant 0 : i32
    %c0_i32_0 = arith.constant 0 : i32
    %c0_i32_1 = arith.constant 0 : i32
    %c0_i32_2 = arith.constant 0 : i32
    return %c0_i32, %c0_i32_0, %c0_i32_1 : i32, i32, i32
  }
  func.func @transform_1(%arg0: i32) -> (i32, i32) {
    %c0_i32 = arith.constant 0 : i32
    %c0_i32_0 = arith.constant 0 : i32
    return %c0_i32, %arg0 : i32, i32
  }
  func.func @transform_2(%arg0: i32) -> (i32, i32) {
    %c0_i32 = arith.constant 0 : i32
    %c0_i32_0 = arith.constant 0 : i32
    %c0_i32_1 = arith.constant 0 : i32
    return %c0_i32, %c0_i32_0 : i32, i32
  }
  func.func @transform_3(%arg0: i32) -> (i32, i32) {
    %c0_i32 = arith.constant 0 : i32
    %c0_i32_0 = arith.constant 0 : i32
    return %c0_i32, %arg0 : i32, i32
  }
  func.func @transform_4(%arg0: i32) -> (i32, i32) {
    %c0_i32 = arith.constant 0 : i32
    %c0_i32_0 = arith.constant 0 : i32
    return %c0_i32, %arg0 : i32, i32
  }
  func.func @transform_5(%arg0: i32) -> (i32, i32) {
    %c0_i32 = arith.constant 0 : i32
    %c0_i32_0 = arith.constant 0 : i32
    return %c0_i32, %arg0 : i32, i32
  }
  func.func @transform_6(%arg0: i32) -> (i32, i32, i32) {
    %c0_i32 = arith.constant 0 : i32
    %c0_i32_0 = arith.constant 0 : i32
    %c0_i32_1 = arith.constant 0 : i32
    return %arg0, %c0_i32, %c0_i32_0 : i32, i32, i32
  }
  func.func @transform_7(%arg0: i32) -> (i32, i32, i32) {
    %c0_i32 = arith.constant 0 : i32
    %c0_i32_0 = arith.constant 0 : i32
    %c0_i32_1 = arith.constant 0 : i32
    return %arg0, %c0_i32, %c0_i32_0 : i32, i32, i32
  }
}

module attributes {stable_mosaic.version = 11 : i64} {
  func.func @kernel(%arg0: i32, %arg1: memref<3x32x96xbf16, #tpu.memory_space<vmem>>, %arg2: memref<96x384xbf16, #tpu.memory_space<vmem>>, %arg3: memref<32x1xf32, #tpu.memory_space<vmem>>, %arg4: memref<1x384xf32, #tpu.memory_space<vmem>>, %arg5: memref<32x384xbf16, #tpu.memory_space<vmem>>, %arg6: memref<32x384xbf16, #tpu.memory_space<vmem>>, %arg7: memref<1x32x1xf32, #tpu.memory_space<vmem>>, %arg8: memref<1x32x1xf32, #tpu.memory_space<vmem>>) attributes {dimension_semantics = [#tpu.dimension_semantics<parallel>], iteration_bounds = array<i64: 1>, scalar_prefetch = 0 : i64, scratch_operands = 0 : i64, tpu.core_type = #tpu.core_type<tc>, window_params = [{pipeline_mode = #tpu.pipeline_mode<synchronous>, transform_indices = @transform_0, window_bounds = array<i64: 3, 32, 96>}, {transform_indices = @transform_1, window_bounds = array<i64: 96, 384>}, {pipeline_mode = #tpu.pipeline_mode<synchronous>, transform_indices = @transform_2, window_bounds = array<i64: 32, 1>}, {transform_indices = @transform_3, window_bounds = array<i64: 1, 384>}, {transform_indices = @transform_4, window_bounds = array<i64: 32, 384>}, {transform_indices = @transform_5, window_bounds = array<i64: 32, 384>}, {transform_indices = @transform_6, window_bounds = array<i64: 1, 32, 1>}, {transform_indices = @transform_7, window_bounds = array<i64: 1, 32, 1>}]} {
    %c0 = arith.constant 0 : index
    %c0_0 = arith.constant 0 : index
    %0 = vector.load %arg2[%c0, %c0_0] : memref<96x384xbf16, #tpu.memory_space<vmem>>, vector<96x384xbf16>
    %c0_1 = arith.constant 0 : index
    %c0_2 = arith.constant 0 : index
    %c0_3 = arith.constant 0 : index
    %1 = vector.load %arg1[%c0_1, %c0_2, %c0_3] : memref<3x32x96xbf16, #tpu.memory_space<vmem>>, vector<1x32x96xbf16>
    %2 = vector.shape_cast %1 : vector<1x32x96xbf16> to vector<32x96xbf16>
    %cst = arith.constant dense<0.000000e+00> : vector<32x384xf32>
    %3 = tpu.matmul %2, %0, %cst {dimension_numbers = #tpu.dot_dimension_numbers<[1], [0], [0], [1], [0, 0, 1, 1], [], []>} : vector<32x96xbf16>, vector<96x384xbf16>, vector<32x384xf32> -> vector<32x384xf32>
    %c1 = arith.constant 1 : index
    %c0_4 = arith.constant 0 : index
    %c0_5 = arith.constant 0 : index
    %4 = vector.load %arg1[%c1, %c0_4, %c0_5] : memref<3x32x96xbf16, #tpu.memory_space<vmem>>, vector<1x32x96xbf16>
    %5 = vector.shape_cast %4 : vector<1x32x96xbf16> to vector<32x96xbf16>
    %cst_6 = arith.constant dense<0.000000e+00> : vector<32x384xf32>
    %6 = tpu.matmul %5, %0, %cst_6 {dimension_numbers = #tpu.dot_dimension_numbers<[1], [0], [0], [1], [0, 0, 1, 1], [], []>} : vector<32x96xbf16>, vector<96x384xbf16>, vector<32x384xf32> -> vector<32x384xf32>
    %7 = vector.extract_strided_slice %6 {offsets = [0, 1], sizes = [32, 383], strides = [1, 1]} : vector<32x384xf32> to vector<32x383xf32>
    %8 = vector.extract_strided_slice %6 {offsets = [0, 0], sizes = [32, 1], strides = [1, 1]} : vector<32x384xf32> to vector<32x1xf32>
    %9 = tpu.concatenate %7, %8 in 1 : vector<32x383xf32>, vector<32x1xf32> -> vector<32x384xf32>
    %10 = arith.addf %3, %9 : vector<32x384xf32>
    %c2 = arith.constant 2 : index
    %c0_7 = arith.constant 0 : index
    %c0_8 = arith.constant 0 : index
    %11 = vector.load %arg1[%c2, %c0_7, %c0_8] : memref<3x32x96xbf16, #tpu.memory_space<vmem>>, vector<1x32x96xbf16>
    %12 = vector.shape_cast %11 : vector<1x32x96xbf16> to vector<32x96xbf16>
    %cst_9 = arith.constant dense<0.000000e+00> : vector<32x384xf32>
    %13 = tpu.matmul %12, %0, %cst_9 {dimension_numbers = #tpu.dot_dimension_numbers<[1], [0], [0], [1], [0, 0, 1, 1], [], []>} : vector<32x96xbf16>, vector<96x384xbf16>, vector<32x384xf32> -> vector<32x384xf32>
    %14 = vector.extract_strided_slice %13 {offsets = [0, 2], sizes = [32, 382], strides = [1, 1]} : vector<32x384xf32> to vector<32x382xf32>
    %15 = vector.extract_strided_slice %13 {offsets = [0, 0], sizes = [32, 2], strides = [1, 1]} : vector<32x384xf32> to vector<32x2xf32>
    %16 = tpu.concatenate %14, %15 in 1 : vector<32x382xf32>, vector<32x2xf32> -> vector<32x384xf32>
    %17 = arith.addf %10, %16 : vector<32x384xf32>
    %c0_10 = arith.constant 0 : index
    %c0_11 = arith.constant 0 : index
    %18 = vector.load %arg3[%c0_10, %c0_11] : memref<32x1xf32, #tpu.memory_space<vmem>>, vector<32x1xf32>
    %19 = vector.broadcast %18 : vector<32x1xf32> to vector<32x384xf32>
    %20 = arith.addf %17, %19 : vector<32x384xf32>
    %c0_12 = arith.constant 0 : index
    %c0_13 = arith.constant 0 : index
    %21 = vector.load %arg5[%c0_12, %c0_13] : memref<32x384xbf16, #tpu.memory_space<vmem>>, vector<32x384xbf16>
    %22 = arith.extf %21 : vector<32x384xbf16> to vector<32x384xf32>
    %23 = arith.addf %20, %22 : vector<32x384xf32>
    %c0_14 = arith.constant 0 : index
    %c0_15 = arith.constant 0 : index
    %24 = vector.load %arg4[%c0_14, %c0_15] : memref<1x384xf32, #tpu.memory_space<vmem>>, vector<1x384xf32>
    %25 = arith.truncf %23 : vector<32x384xf32> to vector<32x384xbf16>
    %c0_16 = arith.constant 0 : index
    %c0_17 = arith.constant 0 : index
    %26 = vector.load %arg6[%c0_16, %c0_17] : memref<32x384xbf16, #tpu.memory_space<vmem>>, vector<32x384xbf16>
    tpu.vector_store %arg6[%c0_16, %c0_17], %25 {strides = array<i32>} : memref<32x384xbf16, #tpu.memory_space<vmem>>, vector<32x384xbf16>,
    %27 = vector.broadcast %24 : vector<1x384xf32> to vector<32x384xf32>
    %28 = arith.mulf %23, %27 : vector<32x384xf32>
    %cst_18 = arith.constant dense<0.000000e+00> : vector<32xf32>
    %29 = vector.multi_reduction <add>, %28, %cst_18 [1] : vector<32x384xf32> to vector<32xf32>
    %30 = vector.shape_cast %29 : vector<32xf32> to vector<32x1xf32>
    %31 = vector.shape_cast %30 : vector<32x1xf32> to vector<1x32x1xf32>
    %c0_19 = arith.constant 0 : index
    %c0_20 = arith.constant 0 : index
    %c0_21 = arith.constant 0 : index
    %32 = vector.load %arg7[%c0_19, %c0_20, %c0_21] : memref<1x32x1xf32, #tpu.memory_space<vmem>>, vector<1x32x1xf32>
    tpu.vector_store %arg7[%c0_19, %c0_20, %c0_21], %31 {strides = array<i32>} : memref<1x32x1xf32, #tpu.memory_space<vmem>>, vector<1x32x1xf32>,
    %33 = arith.mulf %28, %23 : vector<32x384xf32>
    %cst_22 = arith.constant dense<0.000000e+00> : vector<32xf32>
    %34 = vector.multi_reduction <add>, %33, %cst_22 [1] : vector<32x384xf32> to vector<32xf32>
    %35 = vector.shape_cast %34 : vector<32xf32> to vector<32x1xf32>
    %36 = vector.shape_cast %35 : vector<32x1xf32> to vector<1x32x1xf32>
    %c0_23 = arith.constant 0 : index
    %c0_24 = arith.constant 0 : index
    %c0_25 = arith.constant 0 : index
    %37 = vector.load %arg8[%c0_23, %c0_24, %c0_25] : memref<1x32x1xf32, #tpu.memory_space<vmem>>, vector<1x32x1xf32>
    tpu.vector_store %arg8[%c0_23, %c0_24, %c0_25], %36 {strides = array<i32>} : memref<1x32x1xf32, #tpu.memory_space<vmem>>, vector<1x32x1xf32>,
    return
  }
  func.func @transform_0(%arg0: i32) -> (i32, i32, i32) {
    %c0_i32 = arith.constant 0 : i32
    %c0_i32_0 = arith.constant 0 : i32
    %c0_i32_1 = arith.constant 0 : i32
    %c0_i32_2 = arith.constant 0 : i32
    return %c0_i32, %c0_i32_0, %c0_i32_1 : i32, i32, i32
  }
  func.func @transform_1(%arg0: i32) -> (i32, i32) {
    %c0_i32 = arith.constant 0 : i32
    %c0_i32_0 = arith.constant 0 : i32
    return %c0_i32, %arg0 : i32, i32
  }
  func.func @transform_2(%arg0: i32) -> (i32, i32) {
    %c0_i32 = arith.constant 0 : i32
    %c0_i32_0 = arith.constant 0 : i32
    %c0_i32_1 = arith.constant 0 : i32
    return %c0_i32, %c0_i32_0 : i32, i32
  }
  func.func @transform_3(%arg0: i32) -> (i32, i32) {
    %c0_i32 = arith.constant 0 : i32
    %c0_i32_0 = arith.constant 0 : i32
    return %c0_i32, %arg0 : i32, i32
  }
  func.func @transform_4(%arg0: i32) -> (i32, i32) {
    %c0_i32 = arith.constant 0 : i32
    %c0_i32_0 = arith.constant 0 : i32
    return %c0_i32, %arg0 : i32, i32
  }
  func.func @transform_5(%arg0: i32) -> (i32, i32) {
    %c0_i32 = arith.constant 0 : i32
    %c0_i32_0 = arith.constant 0 : i32
    return %c0_i32, %arg0 : i32, i32
  }
  func.func @transform_6(%arg0: i32) -> (i32, i32, i32) {
    %c0_i32 = arith.constant 0 : i32
    %c0_i32_0 = arith.constant 0 : i32
    %c0_i32_1 = arith.constant 0 : i32
    return %arg0, %c0_i32, %c0_i32_0 : i32, i32, i32
  }
  func.func @transform_7(%arg0: i32) -> (i32, i32, i32) {
    %c0_i32 = arith.constant 0 : i32
    %c0_i32_0 = arith.constant 0 : i32
    %c0_i32_1 = arith.constant 0 : i32
    return %arg0, %c0_i32, %c0_i32_0 : i32, i32, i32
  }
}

module attributes {stable_mosaic.version = 11 : i64} {
  func.func @kernel(%arg0: i32, %arg1: memref<3x64x96xbf16, #tpu.memory_space<vmem>>, %arg2: memref<96x384xbf16, #tpu.memory_space<vmem>>, %arg3: memref<64x1xf32, #tpu.memory_space<vmem>>, %arg4: memref<1x384xf32, #tpu.memory_space<vmem>>, %arg5: memref<64x384xbf16, #tpu.memory_space<vmem>>, %arg6: memref<1x64x1xf32, #tpu.memory_space<vmem>>, %arg7: memref<1x64x1xf32, #tpu.memory_space<vmem>>) attributes {dimension_semantics = [#tpu.dimension_semantics<parallel>], iteration_bounds = array<i64: 1>, scalar_prefetch = 0 : i64, scratch_operands = 0 : i64, tpu.core_type = #tpu.core_type<tc>, window_params = [{pipeline_mode = #tpu.pipeline_mode<synchronous>, transform_indices = @transform_0, window_bounds = array<i64: 3, 64, 96>}, {transform_indices = @transform_1, window_bounds = array<i64: 96, 384>}, {pipeline_mode = #tpu.pipeline_mode<synchronous>, transform_indices = @transform_2, window_bounds = array<i64: 64, 1>}, {transform_indices = @transform_3, window_bounds = array<i64: 1, 384>}, {transform_indices = @transform_4, window_bounds = array<i64: 64, 384>}, {transform_indices = @transform_5, window_bounds = array<i64: 1, 64, 1>}, {transform_indices = @transform_6, window_bounds = array<i64: 1, 64, 1>}]} {
    %c0 = arith.constant 0 : index
    %c0_0 = arith.constant 0 : index
    %0 = vector.load %arg2[%c0, %c0_0] : memref<96x384xbf16, #tpu.memory_space<vmem>>, vector<96x384xbf16>
    %c0_1 = arith.constant 0 : index
    %c0_2 = arith.constant 0 : index
    %c0_3 = arith.constant 0 : index
    %1 = vector.load %arg1[%c0_1, %c0_2, %c0_3] : memref<3x64x96xbf16, #tpu.memory_space<vmem>>, vector<1x64x96xbf16>
    %2 = vector.shape_cast %1 : vector<1x64x96xbf16> to vector<64x96xbf16>
    %cst = arith.constant dense<0.000000e+00> : vector<64x384xf32>
    %3 = tpu.matmul %2, %0, %cst {dimension_numbers = #tpu.dot_dimension_numbers<[1], [0], [0], [1], [0, 0, 1, 1], [], []>} : vector<64x96xbf16>, vector<96x384xbf16>, vector<64x384xf32> -> vector<64x384xf32>
    %c1 = arith.constant 1 : index
    %c0_4 = arith.constant 0 : index
    %c0_5 = arith.constant 0 : index
    %4 = vector.load %arg1[%c1, %c0_4, %c0_5] : memref<3x64x96xbf16, #tpu.memory_space<vmem>>, vector<1x64x96xbf16>
    %5 = vector.shape_cast %4 : vector<1x64x96xbf16> to vector<64x96xbf16>
    %cst_6 = arith.constant dense<0.000000e+00> : vector<64x384xf32>
    %6 = tpu.matmul %5, %0, %cst_6 {dimension_numbers = #tpu.dot_dimension_numbers<[1], [0], [0], [1], [0, 0, 1, 1], [], []>} : vector<64x96xbf16>, vector<96x384xbf16>, vector<64x384xf32> -> vector<64x384xf32>
    %7 = vector.extract_strided_slice %6 {offsets = [0, 1], sizes = [64, 383], strides = [1, 1]} : vector<64x384xf32> to vector<64x383xf32>
    %8 = vector.extract_strided_slice %6 {offsets = [0, 0], sizes = [64, 1], strides = [1, 1]} : vector<64x384xf32> to vector<64x1xf32>
    %9 = tpu.concatenate %7, %8 in 1 : vector<64x383xf32>, vector<64x1xf32> -> vector<64x384xf32>
    %10 = arith.addf %3, %9 : vector<64x384xf32>
    %c2 = arith.constant 2 : index
    %c0_7 = arith.constant 0 : index
    %c0_8 = arith.constant 0 : index
    %11 = vector.load %arg1[%c2, %c0_7, %c0_8] : memref<3x64x96xbf16, #tpu.memory_space<vmem>>, vector<1x64x96xbf16>
    %12 = vector.shape_cast %11 : vector<1x64x96xbf16> to vector<64x96xbf16>
    %cst_9 = arith.constant dense<0.000000e+00> : vector<64x384xf32>
    %13 = tpu.matmul %12, %0, %cst_9 {dimension_numbers = #tpu.dot_dimension_numbers<[1], [0], [0], [1], [0, 0, 1, 1], [], []>} : vector<64x96xbf16>, vector<96x384xbf16>, vector<64x384xf32> -> vector<64x384xf32>
    %14 = vector.extract_strided_slice %13 {offsets = [0, 2], sizes = [64, 382], strides = [1, 1]} : vector<64x384xf32> to vector<64x382xf32>
    %15 = vector.extract_strided_slice %13 {offsets = [0, 0], sizes = [64, 2], strides = [1, 1]} : vector<64x384xf32> to vector<64x2xf32>
    %16 = tpu.concatenate %14, %15 in 1 : vector<64x382xf32>, vector<64x2xf32> -> vector<64x384xf32>
    %17 = arith.addf %10, %16 : vector<64x384xf32>
    %c0_10 = arith.constant 0 : index
    %c0_11 = arith.constant 0 : index
    %18 = vector.load %arg3[%c0_10, %c0_11] : memref<64x1xf32, #tpu.memory_space<vmem>>, vector<64x1xf32>
    %19 = vector.broadcast %18 : vector<64x1xf32> to vector<64x384xf32>
    %20 = arith.addf %17, %19 : vector<64x384xf32>
    %c0_12 = arith.constant 0 : index
    %c0_13 = arith.constant 0 : index
    %21 = vector.load %arg4[%c0_12, %c0_13] : memref<1x384xf32, #tpu.memory_space<vmem>>, vector<1x384xf32>
    %22 = arith.truncf %20 : vector<64x384xf32> to vector<64x384xbf16>
    %c0_14 = arith.constant 0 : index
    %c0_15 = arith.constant 0 : index
    %23 = vector.load %arg5[%c0_14, %c0_15] : memref<64x384xbf16, #tpu.memory_space<vmem>>, vector<64x384xbf16>
    tpu.vector_store %arg5[%c0_14, %c0_15], %22 {strides = array<i32>} : memref<64x384xbf16, #tpu.memory_space<vmem>>, vector<64x384xbf16>,
    %24 = vector.broadcast %21 : vector<1x384xf32> to vector<64x384xf32>
    %25 = arith.mulf %20, %24 : vector<64x384xf32>
    %cst_16 = arith.constant dense<0.000000e+00> : vector<64xf32>
    %26 = vector.multi_reduction <add>, %25, %cst_16 [1] : vector<64x384xf32> to vector<64xf32>
    %27 = vector.shape_cast %26 : vector<64xf32> to vector<64x1xf32>
    %28 = vector.shape_cast %27 : vector<64x1xf32> to vector<1x64x1xf32>
    %c0_17 = arith.constant 0 : index
    %c0_18 = arith.constant 0 : index
    %c0_19 = arith.constant 0 : index
    %29 = vector.load %arg6[%c0_17, %c0_18, %c0_19] : memref<1x64x1xf32, #tpu.memory_space<vmem>>, vector<1x64x1xf32>
    tpu.vector_store %arg6[%c0_17, %c0_18, %c0_19], %28 {strides = array<i32>} : memref<1x64x1xf32, #tpu.memory_space<vmem>>, vector<1x64x1xf32>,
    %30 = arith.mulf %25, %20 : vector<64x384xf32>
    %cst_20 = arith.constant dense<0.000000e+00> : vector<64xf32>
    %31 = vector.multi_reduction <add>, %30, %cst_20 [1] : vector<64x384xf32> to vector<64xf32>
    %32 = vector.shape_cast %31 : vector<64xf32> to vector<64x1xf32>
    %33 = vector.shape_cast %32 : vector<64x1xf32> to vector<1x64x1xf32>
    %c0_21 = arith.constant 0 : index
    %c0_22 = arith.constant 0 : index
    %c0_23 = arith.constant 0 : index
    %34 = vector.load %arg7[%c0_21, %c0_22, %c0_23] : memref<1x64x1xf32, #tpu.memory_space<vmem>>, vector<1x64x1xf32>
    tpu.vector_store %arg7[%c0_21, %c0_22, %c0_23], %33 {strides = array<i32>} : memref<1x64x1xf32, #tpu.memory_space<vmem>>, vector<1x64x1xf32>,
    return
  }
  func.func @transform_0(%arg0: i32) -> (i32, i32, i32) {
    %c0_i32 = arith.constant 0 : i32
    %c0_i32_0 = arith.constant 0 : i32
    %c0_i32_1 = arith.constant 0 : i32
    %c0_i32_2 = arith.constant 0 : i32
    return %c0_i32, %c0_i32_0, %c0_i32_1 : i32, i32, i32
  }
  func.func @transform_1(%arg0: i32) -> (i32, i32) {
    %c0_i32 = arith.constant 0 : i32
    %c0_i32_0 = arith.constant 0 : i32
    return %c0_i32, %arg0 : i32, i32
  }
  func.func @transform_2(%arg0: i32) -> (i32, i32) {
    %c0_i32 = arith.constant 0 : i32
    %c0_i32_0 = arith.constant 0 : i32
    %c0_i32_1 = arith.constant 0 : i32
    return %c0_i32, %c0_i32_0 : i32, i32
  }
  func.func @transform_3(%arg0: i32) -> (i32, i32) {
    %c0_i32 = arith.constant 0 : i32
    %c0_i32_0 = arith.constant 0 : i32
    return %c0_i32, %arg0 : i32, i32
  }
  func.func @transform_4(%arg0: i32) -> (i32, i32) {
    %c0_i32 = arith.constant 0 : i32
    %c0_i32_0 = arith.constant 0 : i32
    return %c0_i32, %arg0 : i32, i32
  }
  func.func @transform_5(%arg0: i32) -> (i32, i32, i32) {
    %c0_i32 = arith.constant 0 : i32
    %c0_i32_0 = arith.constant 0 : i32
    %c0_i32_1 = arith.constant 0 : i32
    return %arg0, %c0_i32, %c0_i32_0 : i32, i32, i32
  }
  func.func @transform_6(%arg0: i32) -> (i32, i32, i32) {
    %c0_i32 = arith.constant 0 : i32
    %c0_i32_0 = arith.constant 0 : i32
    %c0_i32_1 = arith.constant 0 : i32
    return %arg0, %c0_i32, %c0_i32_0 : i32, i32, i32
  }
}

module attributes {stable_mosaic.version = 11 : i64} {
  func.func @kernel(%arg0: i32, %arg1: memref<3x32x48xbf16, #tpu.memory_space<vmem>>, %arg2: memref<48x640xbf16, #tpu.memory_space<vmem>>, %arg3: memref<32x1xf32, #tpu.memory_space<vmem>>, %arg4: memref<1x640xf32, #tpu.memory_space<vmem>>, %arg5: memref<32x640xbf16, #tpu.memory_space<vmem>>, %arg6: memref<1x32x1xf32, #tpu.memory_space<vmem>>, %arg7: memref<1x32x1xf32, #tpu.memory_space<vmem>>) attributes {dimension_semantics = [#tpu.dimension_semantics<parallel>], iteration_bounds = array<i64: 1>, scalar_prefetch = 0 : i64, scratch_operands = 0 : i64, tpu.core_type = #tpu.core_type<tc>, window_params = [{pipeline_mode = #tpu.pipeline_mode<synchronous>, transform_indices = @transform_0, window_bounds = array<i64: 3, 32, 48>}, {transform_indices = @transform_1, window_bounds = array<i64: 48, 640>}, {pipeline_mode = #tpu.pipeline_mode<synchronous>, transform_indices = @transform_2, window_bounds = array<i64: 32, 1>}, {transform_indices = @transform_3, window_bounds = array<i64: 1, 640>}, {transform_indices = @transform_4, window_bounds = array<i64: 32, 640>}, {transform_indices = @transform_5, window_bounds = array<i64: 1, 32, 1>}, {transform_indices = @transform_6, window_bounds = array<i64: 1, 32, 1>}]} {
    %c0 = arith.constant 0 : index
    %c0_0 = arith.constant 0 : index
    %0 = vector.load %arg2[%c0, %c0_0] : memref<48x640xbf16, #tpu.memory_space<vmem>>, vector<48x640xbf16>
    %c0_1 = arith.constant 0 : index
    %c0_2 = arith.constant 0 : index
    %c0_3 = arith.constant 0 : index
    %1 = vector.load %arg1[%c0_1, %c0_2, %c0_3] : memref<3x32x48xbf16, #tpu.memory_space<vmem>>, vector<1x32x48xbf16>
    %2 = vector.shape_cast %1 : vector<1x32x48xbf16> to vector<32x48xbf16>
    %cst = arith.constant dense<0.000000e+00> : vector<32x640xf32>
    %3 = tpu.matmul %2, %0, %cst {dimension_numbers = #tpu.dot_dimension_numbers<[1], [0], [0], [1], [0, 0, 1, 1], [], []>} : vector<32x48xbf16>, vector<48x640xbf16>, vector<32x640xf32> -> vector<32x640xf32>
    %c1 = arith.constant 1 : index
    %c0_4 = arith.constant 0 : index
    %c0_5 = arith.constant 0 : index
    %4 = vector.load %arg1[%c1, %c0_4, %c0_5] : memref<3x32x48xbf16, #tpu.memory_space<vmem>>, vector<1x32x48xbf16>
    %5 = vector.shape_cast %4 : vector<1x32x48xbf16> to vector<32x48xbf16>
    %cst_6 = arith.constant dense<0.000000e+00> : vector<32x640xf32>
    %6 = tpu.matmul %5, %0, %cst_6 {dimension_numbers = #tpu.dot_dimension_numbers<[1], [0], [0], [1], [0, 0, 1, 1], [], []>} : vector<32x48xbf16>, vector<48x640xbf16>, vector<32x640xf32> -> vector<32x640xf32>
    %7 = vector.extract_strided_slice %6 {offsets = [0, 1], sizes = [32, 639], strides = [1, 1]} : vector<32x640xf32> to vector<32x639xf32>
    %8 = vector.extract_strided_slice %6 {offsets = [0, 0], sizes = [32, 1], strides = [1, 1]} : vector<32x640xf32> to vector<32x1xf32>
    %9 = tpu.concatenate %7, %8 in 1 : vector<32x639xf32>, vector<32x1xf32> -> vector<32x640xf32>
    %10 = arith.addf %3, %9 : vector<32x640xf32>
    %c2 = arith.constant 2 : index
    %c0_7 = arith.constant 0 : index
    %c0_8 = arith.constant 0 : index
    %11 = vector.load %arg1[%c2, %c0_7, %c0_8] : memref<3x32x48xbf16, #tpu.memory_space<vmem>>, vector<1x32x48xbf16>
    %12 = vector.shape_cast %11 : vector<1x32x48xbf16> to vector<32x48xbf16>
    %cst_9 = arith.constant dense<0.000000e+00> : vector<32x640xf32>
    %13 = tpu.matmul %12, %0, %cst_9 {dimension_numbers = #tpu.dot_dimension_numbers<[1], [0], [0], [1], [0, 0, 1, 1], [], []>} : vector<32x48xbf16>, vector<48x640xbf16>, vector<32x640xf32> -> vector<32x640xf32>
    %14 = vector.extract_strided_slice %13 {offsets = [0, 2], sizes = [32, 638], strides = [1, 1]} : vector<32x640xf32> to vector<32x638xf32>
    %15 = vector.extract_strided_slice %13 {offsets = [0, 0], sizes = [32, 2], strides = [1, 1]} : vector<32x640xf32> to vector<32x2xf32>
    %16 = tpu.concatenate %14, %15 in 1 : vector<32x638xf32>, vector<32x2xf32> -> vector<32x640xf32>
    %17 = arith.addf %10, %16 : vector<32x640xf32>
    %c0_10 = arith.constant 0 : index
    %c0_11 = arith.constant 0 : index
    %18 = vector.load %arg3[%c0_10, %c0_11] : memref<32x1xf32, #tpu.memory_space<vmem>>, vector<32x1xf32>
    %19 = vector.broadcast %18 : vector<32x1xf32> to vector<32x640xf32>
    %20 = arith.addf %17, %19 : vector<32x640xf32>
    %c0_12 = arith.constant 0 : index
    %c0_13 = arith.constant 0 : index
    %21 = vector.load %arg4[%c0_12, %c0_13] : memref<1x640xf32, #tpu.memory_space<vmem>>, vector<1x640xf32>
    %22 = arith.truncf %20 : vector<32x640xf32> to vector<32x640xbf16>
    %c0_14 = arith.constant 0 : index
    %c0_15 = arith.constant 0 : index
    %23 = vector.load %arg5[%c0_14, %c0_15] : memref<32x640xbf16, #tpu.memory_space<vmem>>, vector<32x640xbf16>
    tpu.vector_store %arg5[%c0_14, %c0_15], %22 {strides = array<i32>} : memref<32x640xbf16, #tpu.memory_space<vmem>>, vector<32x640xbf16>,
    %24 = vector.broadcast %21 : vector<1x640xf32> to vector<32x640xf32>
    %25 = arith.mulf %20, %24 : vector<32x640xf32>
    %cst_16 = arith.constant dense<0.000000e+00> : vector<32xf32>
    %26 = vector.multi_reduction <add>, %25, %cst_16 [1] : vector<32x640xf32> to vector<32xf32>
    %27 = vector.shape_cast %26 : vector<32xf32> to vector<32x1xf32>
    %28 = vector.shape_cast %27 : vector<32x1xf32> to vector<1x32x1xf32>
    %c0_17 = arith.constant 0 : index
    %c0_18 = arith.constant 0 : index
    %c0_19 = arith.constant 0 : index
    %29 = vector.load %arg6[%c0_17, %c0_18, %c0_19] : memref<1x32x1xf32, #tpu.memory_space<vmem>>, vector<1x32x1xf32>
    tpu.vector_store %arg6[%c0_17, %c0_18, %c0_19], %28 {strides = array<i32>} : memref<1x32x1xf32, #tpu.memory_space<vmem>>, vector<1x32x1xf32>,
    %30 = arith.mulf %25, %20 : vector<32x640xf32>
    %cst_20 = arith.constant dense<0.000000e+00> : vector<32xf32>
    %31 = vector.multi_reduction <add>, %30, %cst_20 [1] : vector<32x640xf32> to vector<32xf32>
    %32 = vector.shape_cast %31 : vector<32xf32> to vector<32x1xf32>
    %33 = vector.shape_cast %32 : vector<32x1xf32> to vector<1x32x1xf32>
    %c0_21 = arith.constant 0 : index
    %c0_22 = arith.constant 0 : index
    %c0_23 = arith.constant 0 : index
    %34 = vector.load %arg7[%c0_21, %c0_22, %c0_23] : memref<1x32x1xf32, #tpu.memory_space<vmem>>, vector<1x32x1xf32>
    tpu.vector_store %arg7[%c0_21, %c0_22, %c0_23], %33 {strides = array<i32>} : memref<1x32x1xf32, #tpu.memory_space<vmem>>, vector<1x32x1xf32>,
    return
  }
  func.func @transform_0(%arg0: i32) -> (i32, i32, i32) {
    %c0_i32 = arith.constant 0 : i32
    %c0_i32_0 = arith.constant 0 : i32
    %c0_i32_1 = arith.constant 0 : i32
    %c0_i32_2 = arith.constant 0 : i32
    return %c0_i32, %c0_i32_0, %c0_i32_1 : i32, i32, i32
  }
  func.func @transform_1(%arg0: i32) -> (i32, i32) {
    %c0_i32 = arith.constant 0 : i32
    %c0_i32_0 = arith.constant 0 : i32
    return %c0_i32, %arg0 : i32, i32
  }
  func.func @transform_2(%arg0: i32) -> (i32, i32) {
    %c0_i32 = arith.constant 0 : i32
    %c0_i32_0 = arith.constant 0 : i32
    %c0_i32_1 = arith.constant 0 : i32
    return %c0_i32, %c0_i32_0 : i32, i32
  }
  func.func @transform_3(%arg0: i32) -> (i32, i32) {
    %c0_i32 = arith.constant 0 : i32
    %c0_i32_0 = arith.constant 0 : i32
    return %c0_i32, %arg0 : i32, i32
  }
  func.func @transform_4(%arg0: i32) -> (i32, i32) {
    %c0_i32 = arith.constant 0 : i32
    %c0_i32_0 = arith.constant 0 : i32
    return %c0_i32, %arg0 : i32, i32
  }
  func.func @transform_5(%arg0: i32) -> (i32, i32, i32) {
    %c0_i32 = arith.constant 0 : i32
    %c0_i32_0 = arith.constant 0 : i32
    %c0_i32_1 = arith.constant 0 : i32
    return %arg0, %c0_i32, %c0_i32_0 : i32, i32, i32
  }
  func.func @transform_6(%arg0: i32) -> (i32, i32, i32) {
    %c0_i32 = arith.constant 0 : i32
    %c0_i32_0 = arith.constant 0 : i32
    %c0_i32_1 = arith.constant 0 : i32
    return %arg0, %c0_i32, %c0_i32_0 : i32, i32, i32
  }
}

module attributes {stable_mosaic.version = 11 : i64} {
  func.func @kernel(%arg0: i32, %arg1: memref<7x1x56xbf16, #tpu.memory_space<vmem>>, %arg2: memref<56x1408xbf16, #tpu.memory_space<vmem>>, %arg3: memref<1x1xf32, #tpu.memory_space<vmem>>, %arg4: memref<1x1408xf32, #tpu.memory_space<vmem>>, %arg5: memref<1x1408xbf16, #tpu.memory_space<vmem>>, %arg6: memref<1x1x1xf32, #tpu.memory_space<vmem>>, %arg7: memref<1x1x1xf32, #tpu.memory_space<vmem>>) attributes {dimension_semantics = [#tpu.dimension_semantics<parallel>], iteration_bounds = array<i64: 1>, scalar_prefetch = 0 : i64, scratch_operands = 0 : i64, tpu.core_type = #tpu.core_type<tc>, window_params = [{pipeline_mode = #tpu.pipeline_mode<synchronous>, transform_indices = @transform_0, window_bounds = array<i64: 7, 1, 56>}, {transform_indices = @transform_1, window_bounds = array<i64: 56, 1408>}, {pipeline_mode = #tpu.pipeline_mode<synchronous>, transform_indices = @transform_2, window_bounds = array<i64: 1, 1>}, {transform_indices = @transform_3, window_bounds = array<i64: 1, 1408>}, {transform_indices = @transform_4, window_bounds = array<i64: 1, 1408>}, {transform_indices = @transform_5, window_bounds = array<i64: 1, 1, 1>}, {transform_indices = @transform_6, window_bounds = array<i64: 1, 1, 1>}]} {
    %c0 = arith.constant 0 : index
    %c0_0 = arith.constant 0 : index
    %0 = vector.load %arg2[%c0, %c0_0] : memref<56x1408xbf16, #tpu.memory_space<vmem>>, vector<56x1408xbf16>
    %c0_1 = arith.constant 0 : index
    %c0_2 = arith.constant 0 : index
    %c0_3 = arith.constant 0 : index
    %1 = vector.load %arg1[%c0_1, %c0_2, %c0_3] : memref<7x1x56xbf16, #tpu.memory_space<vmem>>, vector<1x1x56xbf16>
    %2 = vector.shape_cast %1 : vector<1x1x56xbf16> to vector<1x56xbf16>
    %cst = arith.constant dense<0.000000e+00> : vector<1x1408xf32>
    %3 = tpu.matmul %2, %0, %cst {dimension_numbers = #tpu.dot_dimension_numbers<[1], [0], [0], [1], [0, 0, 1, 1], [], []>} : vector<1x56xbf16>, vector<56x1408xbf16>, vector<1x1408xf32> -> vector<1x1408xf32>
    %c1 = arith.constant 1 : index
    %c0_4 = arith.constant 0 : index
    %c0_5 = arith.constant 0 : index
    %4 = vector.load %arg1[%c1, %c0_4, %c0_5] : memref<7x1x56xbf16, #tpu.memory_space<vmem>>, vector<1x1x56xbf16>
    %5 = vector.shape_cast %4 : vector<1x1x56xbf16> to vector<1x56xbf16>
    %cst_6 = arith.constant dense<0.000000e+00> : vector<1x1408xf32>
    %6 = tpu.matmul %5, %0, %cst_6 {dimension_numbers = #tpu.dot_dimension_numbers<[1], [0], [0], [1], [0, 0, 1, 1], [], []>} : vector<1x56xbf16>, vector<56x1408xbf16>, vector<1x1408xf32> -> vector<1x1408xf32>
    %7 = vector.extract_strided_slice %6 {offsets = [0, 1], sizes = [1, 1407], strides = [1, 1]} : vector<1x1408xf32> to vector<1x1407xf32>
    %8 = vector.extract_strided_slice %6 {offsets = [0, 0], sizes = [1, 1], strides = [1, 1]} : vector<1x1408xf32> to vector<1x1xf32>
    %9 = tpu.concatenate %7, %8 in 1 : vector<1x1407xf32>, vector<1x1xf32> -> vector<1x1408xf32>
    %10 = arith.addf %3, %9 : vector<1x1408xf32>
    %c2 = arith.constant 2 : index
    %c0_7 = arith.constant 0 : index
    %c0_8 = arith.constant 0 : index
    %11 = vector.load %arg1[%c2, %c0_7, %c0_8] : memref<7x1x56xbf16, #tpu.memory_space<vmem>>, vector<1x1x56xbf16>
    %12 = vector.shape_cast %11 : vector<1x1x56xbf16> to vector<1x56xbf16>
    %cst_9 = arith.constant dense<0.000000e+00> : vector<1x1408xf32>
    %13 = tpu.matmul %12, %0, %cst_9 {dimension_numbers = #tpu.dot_dimension_numbers<[1], [0], [0], [1], [0, 0, 1, 1], [], []>} : vector<1x56xbf16>, vector<56x1408xbf16>, vector<1x1408xf32> -> vector<1x1408xf32>
    %14 = vector.extract_strided_slice %13 {offsets = [0, 2], sizes = [1, 1406], strides = [1, 1]} : vector<1x1408xf32> to vector<1x1406xf32>
    %15 = vector.extract_strided_slice %13 {offsets = [0, 0], sizes = [1, 2], strides = [1, 1]} : vector<1x1408xf32> to vector<1x2xf32>
    %16 = tpu.concatenate %14, %15 in 1 : vector<1x1406xf32>, vector<1x2xf32> -> vector<1x1408xf32>
    %17 = arith.addf %10, %16 : vector<1x1408xf32>
    %c3 = arith.constant 3 : index
    %c0_10 = arith.constant 0 : index
    %c0_11 = arith.constant 0 : index
    %18 = vector.load %arg1[%c3, %c0_10, %c0_11] : memref<7x1x56xbf16, #tpu.memory_space<vmem>>, vector<1x1x56xbf16>
    %19 = vector.shape_cast %18 : vector<1x1x56xbf16> to vector<1x56xbf16>
    %cst_12 = arith.constant dense<0.000000e+00> : vector<1x1408xf32>
    %20 = tpu.matmul %19, %0, %cst_12 {dimension_numbers = #tpu.dot_dimension_numbers<[1], [0], [0], [1], [0, 0, 1, 1], [], []>} : vector<1x56xbf16>, vector<56x1408xbf16>, vector<1x1408xf32> -> vector<1x1408xf32>
    %21 = vector.extract_strided_slice %20 {offsets = [0, 3], sizes = [1, 1405], strides = [1, 1]} : vector<1x1408xf32> to vector<1x1405xf32>
    %22 = vector.extract_strided_slice %20 {offsets = [0, 0], sizes = [1, 3], strides = [1, 1]} : vector<1x1408xf32> to vector<1x3xf32>
    %23 = tpu.concatenate %21, %22 in 1 : vector<1x1405xf32>, vector<1x3xf32> -> vector<1x1408xf32>
    %24 = arith.addf %17, %23 : vector<1x1408xf32>
    %c4 = arith.constant 4 : index
    %c0_13 = arith.constant 0 : index
    %c0_14 = arith.constant 0 : index
    %25 = vector.load %arg1[%c4, %c0_13, %c0_14] : memref<7x1x56xbf16, #tpu.memory_space<vmem>>, vector<1x1x56xbf16>
    %26 = vector.shape_cast %25 : vector<1x1x56xbf16> to vector<1x56xbf16>
    %cst_15 = arith.constant dense<0.000000e+00> : vector<1x1408xf32>
    %27 = tpu.matmul %26, %0, %cst_15 {dimension_numbers = #tpu.dot_dimension_numbers<[1], [0], [0], [1], [0, 0, 1, 1], [], []>} : vector<1x56xbf16>, vector<56x1408xbf16>, vector<1x1408xf32> -> vector<1x1408xf32>
    %28 = vector.extract_strided_slice %27 {offsets = [0, 4], sizes = [1, 1404], strides = [1, 1]} : vector<1x1408xf32> to vector<1x1404xf32>
    %29 = vector.extract_strided_slice %27 {offsets = [0, 0], sizes = [1, 4], strides = [1, 1]} : vector<1x1408xf32> to vector<1x4xf32>
    %30 = tpu.concatenate %28, %29 in 1 : vector<1x1404xf32>, vector<1x4xf32> -> vector<1x1408xf32>
    %31 = arith.addf %24, %30 : vector<1x1408xf32>
    %c5 = arith.constant 5 : index
    %c0_16 = arith.constant 0 : index
    %c0_17 = arith.constant 0 : index
    %32 = vector.load %arg1[%c5, %c0_16, %c0_17] : memref<7x1x56xbf16, #tpu.memory_space<vmem>>, vector<1x1x56xbf16>
    %33 = vector.shape_cast %32 : vector<1x1x56xbf16> to vector<1x56xbf16>
    %cst_18 = arith.constant dense<0.000000e+00> : vector<1x1408xf32>
    %34 = tpu.matmul %33, %0, %cst_18 {dimension_numbers = #tpu.dot_dimension_numbers<[1], [0], [0], [1], [0, 0, 1, 1], [], []>} : vector<1x56xbf16>, vector<56x1408xbf16>, vector<1x1408xf32> -> vector<1x1408xf32>
    %35 = vector.extract_strided_slice %34 {offsets = [0, 5], sizes = [1, 1403], strides = [1, 1]} : vector<1x1408xf32> to vector<1x1403xf32>
    %36 = vector.extract_strided_slice %34 {offsets = [0, 0], sizes = [1, 5], strides = [1, 1]} : vector<1x1408xf32> to vector<1x5xf32>
    %37 = tpu.concatenate %35, %36 in 1 : vector<1x1403xf32>, vector<1x5xf32> -> vector<1x1408xf32>
    %38 = arith.addf %31, %37 : vector<1x1408xf32>
    %c6 = arith.constant 6 : index
    %c0_19 = arith.constant 0 : index
    %c0_20 = arith.constant 0 : index
    %39 = vector.load %arg1[%c6, %c0_19, %c0_20] : memref<7x1x56xbf16, #tpu.memory_space<vmem>>, vector<1x1x56xbf16>
    %40 = vector.shape_cast %39 : vector<1x1x56xbf16> to vector<1x56xbf16>
    %cst_21 = arith.constant dense<0.000000e+00> : vector<1x1408xf32>
    %41 = tpu.matmul %40, %0, %cst_21 {dimension_numbers = #tpu.dot_dimension_numbers<[1], [0], [0], [1], [0, 0, 1, 1], [], []>} : vector<1x56xbf16>, vector<56x1408xbf16>, vector<1x1408xf32> -> vector<1x1408xf32>
    %42 = vector.extract_strided_slice %41 {offsets = [0, 6], sizes = [1, 1402], strides = [1, 1]} : vector<1x1408xf32> to vector<1x1402xf32>
    %43 = vector.extract_strided_slice %41 {offsets = [0, 0], sizes = [1, 6], strides = [1, 1]} : vector<1x1408xf32> to vector<1x6xf32>
    %44 = tpu.concatenate %42, %43 in 1 : vector<1x1402xf32>, vector<1x6xf32> -> vector<1x1408xf32>
    %45 = arith.addf %38, %44 : vector<1x1408xf32>
    %c0_22 = arith.constant 0 : index
    %c0_23 = arith.constant 0 : index
    %46 = vector.load %arg3[%c0_22, %c0_23] : memref<1x1xf32, #tpu.memory_space<vmem>>, vector<1x1xf32>
    %47 = vector.broadcast %46 : vector<1x1xf32> to vector<1x1408xf32>
    %48 = arith.addf %45, %47 : vector<1x1408xf32>
    %49 = math.absf %48 : vector<1x1408xf32>
    %cst_24 = arith.constant 0.000000e+00 : f32
    %50 = vector.broadcast %cst_24 : f32 to vector<1x1408xf32>
    %51 = arith.subf %50, %49 : vector<1x1408xf32>
    %52 = math.exp %51 : vector<1x1408xf32>
    %cst_25 = arith.constant 0.000000e+00 : f32
    %53 = vector.broadcast %cst_25 : f32 to vector<1x1408xf32>
    %54 = arith.cmpf oge, %48, %53 : vector<1x1408xf32>
    %cst_26 = arith.constant 1.000000e+00 : f32
    %55 = vector.broadcast %cst_26 : f32 to vector<1x1408xf32>
    %56 = arith.addf %55, %52 : vector<1x1408xf32>
    %cst_27 = arith.constant 1.000000e+00 : f32
    %57 = vector.broadcast %cst_27 : f32 to vector<1x1408xf32>
    %58 = arith.divf %57, %56 : vector<1x1408xf32>
    %cst_28 = arith.constant 1.000000e+00 : f32
    %59 = vector.broadcast %cst_28 : f32 to vector<1x1408xf32>
    %60 = arith.addf %59, %52 : vector<1x1408xf32>
    %61 = arith.divf %52, %60 : vector<1x1408xf32>
    %62 = arith.select %54, %58, %61 : vector<1x1408xi1>, vector<1x1408xf32>
    %c0_29 = arith.constant 0 : index
    %c0_30 = arith.constant 0 : index
    %63 = vector.load %arg4[%c0_29, %c0_30] : memref<1x1408xf32, #tpu.memory_space<vmem>>, vector<1x1408xf32>
    %64 = arith.truncf %62 : vector<1x1408xf32> to vector<1x1408xbf16>
    %c0_31 = arith.constant 0 : index
    %c0_32 = arith.constant 0 : index
    %65 = vector.load %arg5[%c0_31, %c0_32] : memref<1x1408xbf16, #tpu.memory_space<vmem>>, vector<1x1408xbf16>
    tpu.vector_store %arg5[%c0_31, %c0_32], %64 {strides = array<i32>} : memref<1x1408xbf16, #tpu.memory_space<vmem>>, vector<1x1408xbf16>,
    %66 = arith.mulf %62, %63 : vector<1x1408xf32>
    %cst_33 = arith.constant dense<0.000000e+00> : vector<1xf32>
    %67 = vector.multi_reduction <add>, %66, %cst_33 [1] : vector<1x1408xf32> to vector<1xf32>
    %68 = vector.shape_cast %67 : vector<1xf32> to vector<1x1xf32>
    %69 = vector.shape_cast %68 : vector<1x1xf32> to vector<1x1x1xf32>
    %c0_34 = arith.constant 0 : index
    %c0_35 = arith.constant 0 : index
    %c0_36 = arith.constant 0 : index
    %70 = vector.load %arg6[%c0_34, %c0_35, %c0_36] : memref<1x1x1xf32, #tpu.memory_space<vmem>>, vector<1x1x1xf32>
    tpu.vector_store %arg6[%c0_34, %c0_35, %c0_36], %69 {strides = array<i32>} : memref<1x1x1xf32, #tpu.memory_space<vmem>>, vector<1x1x1xf32>,
    %71 = arith.mulf %66, %62 : vector<1x1408xf32>
    %cst_37 = arith.constant dense<0.000000e+00> : vector<1xf32>
    %72 = vector.multi_reduction <add>, %71, %cst_37 [1] : vector<1x1408xf32> to vector<1xf32>
    %73 = vector.shape_cast %72 : vector<1xf32> to vector<1x1xf32>
    %74 = vector.shape_cast %73 : vector<1x1xf32> to vector<1x1x1xf32>
    %c0_38 = arith.constant 0 : index
    %c0_39 = arith.constant 0 : index
    %c0_40 = arith.constant 0 : index
    %75 = vector.load %arg7[%c0_38, %c0_39, %c0_40] : memref<1x1x1xf32, #tpu.memory_space<vmem>>, vector<1x1x1xf32>
    tpu.vector_store %arg7[%c0_38, %c0_39, %c0_40], %74 {strides = array<i32>} : memref<1x1x1xf32, #tpu.memory_space<vmem>>, vector<1x1x1xf32>,
    return
  }
  func.func @transform_0(%arg0: i32) -> (i32, i32, i32) {
    %c0_i32 = arith.constant 0 : i32
    %c0_i32_0 = arith.constant 0 : i32
    %c0_i32_1 = arith.constant 0 : i32
    %c0_i32_2 = arith.constant 0 : i32
    return %c0_i32, %c0_i32_0, %c0_i32_1 : i32, i32, i32
  }
  func.func @transform_1(%arg0: i32) -> (i32, i32) {
    %c0_i32 = arith.constant 0 : i32
    %c0_i32_0 = arith.constant 0 : i32
    return %c0_i32, %arg0 : i32, i32
  }
  func.func @transform_2(%arg0: i32) -> (i32, i32) {
    %c0_i32 = arith.constant 0 : i32
    %c0_i32_0 = arith.constant 0 : i32
    %c0_i32_1 = arith.constant 0 : i32
    return %c0_i32, %c0_i32_0 : i32, i32
  }
  func.func @transform_3(%arg0: i32) -> (i32, i32) {
    %c0_i32 = arith.constant 0 : i32
    %c0_i32_0 = arith.constant 0 : i32
    return %c0_i32, %arg0 : i32, i32
  }
  func.func @transform_4(%arg0: i32) -> (i32, i32) {
    %c0_i32 = arith.constant 0 : i32
    %c0_i32_0 = arith.constant 0 : i32
    return %c0_i32, %arg0 : i32, i32
  }
  func.func @transform_5(%arg0: i32) -> (i32, i32, i32) {
    %c0_i32 = arith.constant 0 : i32
    %c0_i32_0 = arith.constant 0 : i32
    %c0_i32_1 = arith.constant 0 : i32
    return %arg0, %c0_i32, %c0_i32_0 : i32, i32, i32
  }
  func.func @transform_6(%arg0: i32) -> (i32, i32, i32) {
    %c0_i32 = arith.constant 0 : i32
    %c0_i32_0 = arith.constant 0 : i32
    %c0_i32_1 = arith.constant 0 : i32
    return %arg0, %c0_i32, %c0_i32_0 : i32, i32, i32
  }
}

</mosaic_0001>

<bundles_post_ra>
// kernel: _lambda_.20
= control target key start
LH: loop header
LB: loop body
LE: loop exit
PB: predicated region body
PF: predicated region fallthrough
CT: control target
= control target key end

     0   :  { %12 = vsyncpa [#allocation3], 0  ;;  %s857_s0 = inlined_call_operand.vmem [shape: bf16[8,512], index: 0, kind: input, shape index: {}]   ;;  %s858_s1 = inlined_call_operand.vmem [shape: f32[8,1], index: 1, kind: input, shape index: {}]   ;;  %s859_s2 = inlined_call_operand.vmem [shape: f32[8,1], index: 2, kind: input, shape index: {}]   ;;  %s860_s3 = inlined_call_operand.vmem [shape: f32[1,512], index: 3, kind: input, shape index: {}]   ;;  %s861_s4 = inlined_call_operand.vmem [shape: bf16[8,512], index: 4, kind: output, shape index: {0}]   ;;  %s862_s5 = inlined_call_operand.hbm [shape: f32[2,8,1], index: 5, kind: output, shape index: {1}]   ;;  %s863_s6 = inlined_call_operand.hbm [shape: f32[2,8,1], index: 6, kind: output, shape index: {2}]  }
   0x1   :  { %14 = vsyncpa [#allocation3 + $0x1], 0 }
   0x2   :  { %15 = vsyncpa [#allocation5], 0 }
   0x3   :  { %17 = vsyncpa [#allocation5 + $0x1], 0  ;;  %s711_s21 = smov 0   ;;  %s713_s22 = smov 0  }
   0x4   :  { %s715_s23 = smov 0   ;;  %s717_s24 = smov 0  }
   0x5 LB: > { %s732_s25 = sadd.s32 4294967295, %s671_s24   ;;  %s516_s26 = sadd.s32 4294967294, %s671_s24   ;;  %s671_s24 = sphi %s717_s24, %s871_s24   ;;  %s667_s23 = sphi %s715_s23, %s870_s23   ;;  %s663_s22 = sphi %s713_s22, %s869_s22   ;;  %s659_s21 = sphi %s711_s21, %s868_s21  }
   0x6   : > { %s736_s27 = sadd.s32 1, %s671_s24   ;;  %s150_s28 = sadd.s32 1, %s667_s23 }
   0x7   : > { %s147_s29 = ssub.s32 %s671_s24, %s736_s27  ;;  %p160_p0 = scmp.ne.s32.totalorder %s667_s23, %s663_s22 }
   0x8   : > { %p148_p1 = scmp.eq.s32.totalorder %s147_s29, 0  ;;  %p161_p2 = scmp.eq.s32.totalorder %s732_s25, 1 }
   0x9   : > { %p166_p3 = scmp.ne.s32.totalorder %s663_s22, %s659_s21  ;;  %p167_p4 = scmp.eq.s32.totalorder %s516_s26, 1 }
   0xa   : > { %s747_s30 = scalar_select %p148_p1, %s667_s23, %s150_s28  }
   0xb   : > { %p749_p5 = por %p161_p2, %p160_p0  ;;  %p753_p6 = por %p167_p4, %p166_p3 }
   0xc   : > { %p519_p7 = scmp.ge.s32.totalorder %s671_s24, 1  ;;  %p234_p8 = scmp.lt.s32.totalorder %s671_s24, 3 }
   0xe   : > { %p235_p9 = pnand %p519_p7, %p234_p8 }
   0xf   : > { %s522_s13 = sshll.u32 (!%p235_p9), %s732_s25, 1  ;;  %s776_s9 = sand.u32 (!%p235_p9), 1, %s663_s22  }
  0x10   : > { %238 = sbr.rel (%p235_p9) target bundleno = 333 (0x14d), region = 36  ;;  %p279_p10 = scmp.lt.s32.totalorder (!%p235_p9), %s522_s13, 3 }
  0x11   : > { %s520_s10 = sshll.u32 (!%p235_p9), %s776_s9, 3  ;;  %s864_s11 = sshll.u32 (!%p235_p9), %s732_s25, 7 }
  0x12   : > { %s270_s12 = scalar_lea.vmem (!%p235_p9), [#allocation2], %s520_s10  ;;  %s785_s16 = scalar_lea.hbm (!%p235_p9), %s862_s5, %s864_s11 }
  0x13   : > { %s356_s19 = scalar_lea.sflag (!%p235_p9), [#allocation3], %s776_s9  ;;  %s674_s26 = smov (!%p235_p9), [#allocation2]  }
  0x14   : > { %s585_s28 = sshll.u32 (!%p235_p9), %s674_s26, 4  ;;  %s586_s28 = int_to_ptr.vmem [resolvable:$false] %s585_s28 }
  0x15   : > { %v298_v0 = vld [vmem:[%s858_s1] sm:$0xff]  ;;  %v673_v1 = vmov 0   ;;  %s873_s13 = smov (!%p279_p10, %s522_s13), 3  ;;  %v327_v3 = vlaneseq  ;;  %vm342_vm0 = vcmask 7168  }
  0x16   : > { %580 = vset.pattern.permute.xlu0 %v673_v1  ;;  %v306_v2 = vld [vmem:[%s859_s2] sm:$0xff]  ;;  %s523_s14 = sshll.u32 %s873_s13, 2  ;;  %s287_s20 = scalar_lea.vmem %s860_s3, %s873_s13 }
  0x17   : > { %301 = vperm.xlu0 %580, %v298_v0   ;;  %s282_s17 = scalar_lea.vmem %s857_s0, %s523_s14  ;;  %v328_v5 = vshrl.u32 %v327_v3, 7  ;;  %v316_v11 = vld [vmem:[%s287_s20] sm:$0x3]  ;;  %s293_s29 = scalar_lea.vmem %s861_s4, %s523_s14 }
  0x18   : > { %v295_v4 = vld [vmem:[%s282_s17] sm:$0xff]  ;;  %s378_s13 = sshll.u32 %s270_s12, 4  ;;  %s789_s17 = scalar_lea.vmem [#allocation4], %s520_s10  ;;  %s787_s13 = int_to_ptr.vmem [resolvable:$true] %s378_s13 }
  0x19   : > { %v296_v6 = vunpack.c.l.bf16 %v295_v4  ;;  %v297_v7 = vunpack.c.h.bf16 %v295_v4  ;;  %v329_v9 = vsub.s32 0, %v328_v5  ;;  %v333_v10 = vsub.s32 1, %v328_v5  ;;  %s391_s18 = sshll.u32 %s789_s17, 4  ;;  %s581_s20 = scalar_lea.vmem %s787_s13, 128  ;;  %s392_s18 = int_to_ptr.vmem [resolvable:$true] %s391_s18 }
  0x1a   : > { %p582_p11 = scmp.ne.s32.totalorder %s787_s13, %s581_s20  ;;  %p588_p0 = scmp.lt.s32.totalorder %s787_s13, %s586_s28 }
  0x1b   : > { %309 = vperm.xlu0 %580, %v306_v2   ;;  %v330_v17 = vrot.slane %v316_v11, %v329_v9  ;;  %v334_v18 = vrot.slane %v316_v11, %v333_v10 }
  0x1c   : > { %p583_p12 = pnand %p582_p11, %p749_p5 }
  0x1e   : > { %p584_p13 = pneg %p583_p12 }
  0x92   : > { %v302_v8 = vpop.permute.xlu0 %301 }
  0x93   : > { %v304_v12 = vmul.f32 %v302_v8, %v296_v6  ;;  %v305_v13 = vmul.f32 %v302_v8, %v297_v7 }
  0x96   : > { %v310_v14 = vpop.permute.xlu0 %309 }
  0x97   : > { %v312_v15 = vadd.f32 %v310_v14, %v304_v12  ;;  %v313_v16 = vadd.f32 %v310_v14, %v305_v13 }
  0x99   : > { %v314_v19 = vmax.f32 %v312_v15, 0.0  ;;  %v315_v20 = vmax.f32 %v313_v16, 0.0 }
  0x9b   : > { %v534_v21 = vpack.c.bf16 %v315_v20, %v314_v19  ;;  %v337_v22 = vmul.f32 %v330_v17, %v314_v19  ;;  %v338_v23 = vmul.f32 %v334_v18, %v315_v20 }
  0x9d   : > { %325 = vst [vmem:[%s293_s29] sm:$0xff] %v534_v21  ;;  %v339_v24 = vadd.f32 %v338_v23, %v337_v22  ;;  %v344_v25 = vmul.f32 %v337_v22, %v314_v19  ;;  %v345_v26 = vmul.f32 %v338_v23, %v315_v20  ;;  %s587_s29 = scalar_lea.vmem %s586_s28, 256 }
  0x9e   : > { %p589_p1 = scmp.lt.s32.totalorder %s587_s29, %s581_s20 }
  0x9f   : > { %340 = vadd.xlane.f32.xlu1 %v339_v24  ;;  %v346_v27 = vadd.f32 %v345_v26, %v344_v25 }
  0xa0   : > { %p590_p2 = por %p589_p1, %p588_p0 }
  0xa2   : > { %p591_p3 = pnand %p590_p2, %p584_p13 }
  0xa3   : > { %347 = vadd.xlane.f32.xlu1 %v346_v27 }
 0x128   : > { %v341_v28 = vpop.xlane.xlu1 %340 }
 0x129   : > { %343 = vst.msk [vmem:[%s270_s12] sm:$0xff] %vm342_vm0, %v341_v28 }
 0x12a   : > { %594 = shalt.err (!%p591_p3)
}
 0x12b   : > { %s595_s10 = scalar_lea.hbm %s785_s16, 128  ;;  %s599_s15 = scalar_lea.hbm %s862_s5, 256 }
 0x12c   : > { %p596_p4 = scmp.ne.s32.totalorder %s785_s16, %s595_s10  ;;  %p600_p9 = scmp.lt.s32.totalorder %s785_s16, %s862_s5 }
 0x12d   : > { %p601_p10 = scmp.lt.s32.totalorder %s599_s15, %s595_s10 }
 0x12e   : > { %p597_p7 = pnand %p596_p4, %p749_p5 }
 0x12f   : > { %p602_p11 = por %p601_p10, %p600_p9 }
 0x130   : > { %p598_p8 = pneg %p597_p7 }
 0x132   : > { %p603_p12 = pnand %p602_p11, %p598_p8 }
 0x134   : > { %606 = shalt.err (!%p603_p12)
}
 0x135   : > { %535 = dma.vmem_to_hbm [thread:$0]  (%p749_p5), %s787_s13, 128, %s785_s16, %s356_s19   ;;  %v348_v29 = vpop.xlane.xlu1 %347 }
 0x136   : > { %s867_s20 = sshll.u32 %s732_s25, 7  ;;  %349 = vst.msk [vmem:[%s789_s17] sm:$0xff] %vm342_vm0, %v348_v29  ;;  %s361_s11 = scalar_lea.sflag [#allocation5], %s776_s9 }
 0x137   : > { %s819_s12 = scalar_lea.hbm %s863_s6, %s867_s20  ;;  %s607_s10 = scalar_lea.vmem %s392_s18, 128 }
 0x138   : > { %p608_p13 = scmp.ne.s32.totalorder %s392_s18, %s607_s10  ;;  %s675_s14 = smov [#allocation4]  }
 0x139   : > { %s611_s15 = sshll.u32 %s675_s14, 4  ;;  %s612_s15 = int_to_ptr.vmem [resolvable:$false] %s611_s15 }
 0x13a   : > { %p609_p0 = pnand %p608_p13, %p749_p5  ;;  %s613_s13 = scalar_lea.vmem %s612_s15, 256 }
 0x13b   : > { %p614_p2 = scmp.lt.s32.totalorder %s392_s18, %s612_s15  ;;  %p615_p3 = scmp.lt.s32.totalorder %s613_s13, %s607_s10 }
 0x13c   : > { %p610_p1 = pneg %p609_p0 }
 0x13d   : > { %p616_p4 = por %p615_p3, %p614_p2 }
 0x13f   : > { %p617_p7 = pnand %p616_p4, %p610_p1 }
 0x141   : > { %620 = shalt.err (!%p617_p7)
}
 0x142   : > { %s621_s25 = scalar_lea.hbm %s819_s12, 128  ;;  %s625_s17 = scalar_lea.hbm %s863_s6, 256 }
 0x143   : > { %p622_p8 = scmp.ne.s32.totalorder %s819_s12, %s621_s25  ;;  %p626_p11 = scmp.lt.s32.totalorder %s819_s12, %s863_s6 }
 0x144   : > { %p627_p12 = scmp.lt.s32.totalorder %s625_s17, %s621_s25 }
 0x145   : > { %p623_p9 = pnand %p622_p8, %p749_p5 }
 0x146   : > { %p628_p13 = por %p627_p12, %p626_p11 }
 0x147   : > { %p624_p10 = pneg %p623_p9 }
 0x149   : > { %p629_p0 = pnand %p628_p13, %p624_p10 }
 0x14b   : > { %632 = shalt.err (!%p629_p0)
}
 0x14c   : > { %536 = dma.vmem_to_hbm [thread:$0]  (%p749_p5), %s392_s18, 128, %s819_s12, %s361_s11  }
 0x14d PF: > { %p546_p1 = scmp.ge.s32.totalorder %s671_s24, 2  ;;  %s411_s20 = sand.u32 1, %s659_s21  }
 0x14e   : > { %s412_s28 = scalar_lea.sflag [#allocation3], %s411_s20 }
 0x14f   : > { %p540_p2 = pnand %p546_p1, %p753_p6 }
 0x151   : > { %p541_p3 = pneg %p540_p2 }
 0x153   : > { %650 = dma.done.wait (%p541_p3), %s412_s28, 128  }
 0x154   : > { %652 = vsyncadd (%p541_p3), %s412_s28, 4294967168  ;;  %s421_s29 = scalar_lea.sflag [#allocation5], %s411_s20 }
 0x155   : > { %654 = dma.done.wait (%p541_p3), %s421_s29, 128  }
 0x156   : > { %656 = vsyncadd (%p541_p3), %s421_s29, 4294967168  ;;  %p20_p5 = scmp.ge.s32.totalorder %s736_s27, 4   ;;  %s868_s21 = smov %s663_s22 }
 0x157   : > { %s869_s22 = smov %s667_s23  ;;  %s870_s23 = smov %s747_s30 }
 0x158   : > { %s871_s24 = smov %s736_s27  ;;  %22 = sbr.rel (!%p20_p5) target bundleno = 5 (0x5), region = 103 }
 0x15d   :  { %426 = vsyncpa [#allocation3], 1 }
 0x15e   :  { %428 = vsyncpa [#allocation3 + $0x1], 1 }
 0x15f   :  { %429 = vsyncpa [#allocation5], 1 }
 0x160   :  { %431 = vsyncpa [#allocation5 + $0x1], 1 }

// kernel: _lambda_.19
= control target key start
LH: loop header
LB: loop body
LE: loop exit
PB: predicated region body
PF: predicated region fallthrough
CT: control target
= control target key end

     0   :  { %vm85_vm0 = vcmask 1046528   ;;  %v2636_v1 = vmov 0   ;;  %vm81_vm1 = vcmask 113664   ;;  %v2637_v17 = vmov 0.0   ;;  %s2640_s9 = smov 126   ;;  %s2641_s10 = smov 125   ;;  %s3365_s1 = inlined_call_operand.vmem [shape: bf16[14,1408], index: 1, kind: input, shape index: {}]   ;;  %s3366_s0 = inlined_call_operand.vmem [shape: bf16[7,8,14], index: 0, kind: input, shape index: {}]   ;;  %s3367_s2 = inlined_call_operand.vmem [shape: f32[8,1], index: 2, kind: input, shape index: {}]   ;;  %s3368_s3 = inlined_call_operand.vmem [shape: f32[1,1408], index: 3, kind: input, shape index: {}]   ;;  %s3369_s4 = inlined_call_operand.vmem [shape: bf16[8,1408], index: 4, kind: output, shape index: {0}]   ;;  %s3370_s5 = inlined_call_operand.vmem [shape: f32[1,8,1], index: 5, kind: output, shape index: {1}]   ;;  %s3371_s6 = inlined_call_operand.vmem [shape: f32[1,8,1], index: 6, kind: output, shape index: {2}]  }
   0x1   :  { %v2683_v0 = vld [vmem:[%s3365_s1 + $0x4] ss:$44 sps:$4 sm:$0x7f]   ;;  %151 = vmatprep.mubr.bf16.mxu0 %v2636_v1  ;;  %192 = vmatprep.mubr.bf16.mxu1 %v2636_v1  ;;  %v2690_v2 = vld [vmem:[%s3365_s1 + $0xc] ss:$44 sps:$4 sm:$0x7f]  }
   0x2   :  { %2618 = vset.pattern.permute.xlu1 %v2636_v1  ;;  %2619 = vset.pattern.permute.xlu0 %v2636_v1  ;;  %v2624_v3 = vld [vmem:[%s3365_s1] ss:$44 sps:$4 sm:$0x7f]   ;;  %v2625_v4 = vld [vmem:[%s3365_s1 + $0x8] ss:$44 sps:$4 sm:$0x7f]  }
   0x3   :  { %2459 = vmatprep.subr.msk.bf16.mxu0 %vm85_vm0, %v2683_v0  ;;  %2461 = vmatprep.subr.msk.bf16.mxu1 %vm85_vm0, %v2690_v2  ;;  %v2447_v5 = vld [vmem:[%s3366_s0 + $0x4] sm:$0xf]  ;;  %v2708_v6 = vsel %vm85_vm0, %v2624_v3, 0  ;;  %v2711_v7 = vsel %vm85_vm0, %v2625_v4, 0  ;;  %vm2638_vm2 = vmmov 0   ;;  %s2642_s11 = smov 124  }
   0x4   :  { %v2716_v8 = vld [vmem:[%s3365_s1 + $0x14] ss:$44 sps:$4 sm:$0x7f]   ;;  %134 = vmatpush1.bf16.msra.mxu0 %v2708_v6  ;;  %175 = vmatpush1.bf16.msra.mxu1 %v2711_v7  ;;  %v2628_v9 = vld [vmem:[%s3365_s1 + $0x10] ss:$44 sps:$4 sm:$0x7f]  }
   0x5   :  { %2463 = vmatprep.subr.msk.bf16.mxu0 %vm85_vm0, %v2716_v8  ;;  %v2728_v10 = vld [vmem:[%s3365_s1 + $0x1c] ss:$44 sps:$4 sm:$0x7f]   ;;  %v2631_v11 = vld [vmem:[%s3365_s1 + $0x18] ss:$44 sps:$4 sm:$0x7f]  }
   0x6   :  { %v2734_v12 = vsel %vm85_vm0, %v2628_v9, 0  ;;  %v2739_v13 = vld [vmem:[%s3365_s1 + $0x24] ss:$44 sps:$4 sm:$0x7f]   ;;  %v2744_v14 = vsel %vm85_vm0, %v2631_v11, 0  ;;  %2465 = vmatprep.subr.msk.bf16.mxu1 %vm85_vm0, %v2728_v10  ;;  %vm397_vm3 = vcmask 1039360  }
   0x7   :  { %2460 = vmatmul.mubr.msk.bf16.vlgmr.msra.gmra.mxu0 %vm81_vm1, %v2447_v5  ;;  %2462 = vmatmul.mubr.msk.bf16.vlgmr.msra.gmra.mxu1 %vm81_vm1, %v2447_v5  ;;  %v2634_v15 = vld [vmem:[%s3365_s1 + $0x20] ss:$44 sps:$4 sm:$0x7f]   ;;  %v2635_v16 = vld [vmem:[%s3365_s1 + $0x28] ss:$44 sps:$4 sm:$0x7f]  }
   0x8   :  { %216 = vmatpush1.bf16.msra.mxu0 %v2734_v12  ;;  %257 = vmatpush1.bf16.msra.mxu1 %v2744_v14  ;;  %v2762_v18 = vsel %vm85_vm0, %v2634_v15, 0  ;;  %v2765_v19 = vsel %vm85_vm0, %v2635_v16, 0  ;;  %v33_v20 = vld [vmem:[%s3366_s0] sm:$0xf]  ;;  %v2481_v22 = vld [vmem:[%s3366_s0 + $0x8] sm:$0xf] }
   0x9   :  { %233 = vmatprep.mubr.bf16.mxu0 %v2636_v1  ;;  %274 = vmatprep.mubr.bf16.mxu1 %v2636_v1  ;;  %v2259_v21 = vld [vmem:[%s3367_s2] sm:$0xff]  ;;  %v2493_v23 = vld [vmem:[%s3366_s0 + $0xc] sm:$0xf]  ;;  %v2505_v24 = vld [vmem:[%s3366_s0 + $0x10] sm:$0xf]  ;;  %s2643_s12 = smov 123  }
   0xa   :  { %2467 = vmatprep.subr.msk.bf16.mxu0 %vm85_vm0, %v2739_v13  ;;  %2567 = vmatprep.subr.bf16.mxu1 %v2637_v17  ;;  %v2517_v25 = vld [vmem:[%s3366_s0 + $0x14] sm:$0xf]  ;;  %v2529_v26 = vld [vmem:[%s3366_s0 + $0x18] sm:$0xf]  ;;  %s2639_s0 = smov 127   ;;  %s2644_s13 = smov 122  }
   0xb   :  { %2262 = vperm.xlu1 %2618, %v2259_v21   ;;  %vm952_vm4 = vcmask 1031168   ;;  %vm1270_vm5 = vcmask 1022976   ;;  %vm1588_vm6 = vcmask 1014784   ;;  %vm1906_vm7 = vcmask 1006592  }
   0xc   :  { %vm2224_vm8 = vcmask 998400   ;;  %vm2409_vm9 = vcmask 7168  }
   0xf   :  { %2464 = vmatmul.mubr.msk.bf16.vlgmr.msra.gmra.mxu0 %vm81_vm1, %v2447_v5  ;;  %2466 = vmatmul.mubr.msk.bf16.vlgmr.msra.gmra.mxu1 %vm81_vm1, %v2447_v5 }
  0x10   :  { %298 = vmatpush1.bf16.msra.mxu0 %v2762_v18  ;;  %2568 = vmatpush3.bf16.msra.mxu1 %v2765_v19 }
  0x11   :  { %315 = vmatprep.mubr.bf16.mxu0 %v2636_v1  ;;  %2569 = vmatprep.mubr.msk.bf16.mxu1 %vm2638_vm2, %v2637_v17 }
  0x12   :  { %2470 = vmatprep.subr.msk.bf16.mxu0 %vm85_vm0, %v2683_v0  ;;  %2472 = vmatprep.subr.msk.bf16.mxu1 %vm85_vm0, %v2690_v2 }
  0x17   :  { %2468 = vmatmul.mubr.msk.bf16.vlgmr.msra.gmra.mxu0 %vm81_vm1, %v2447_v5  ;;  %2570 = vmatmul.mubr.msk.bf16.vlgmr.msra.gmra.mxu1 %vm81_vm1, %v2447_v5 }
  0x18   :  { %439 = vmatpush1.bf16.msra.mxu0 %v2708_v6  ;;  %480 = vmatpush1.bf16.msra.mxu1 %v2711_v7 }
  0x19   :  { %456 = vmatprep.mubr.bf16.mxu0 %v2636_v1  ;;  %497 = vmatprep.mubr.bf16.mxu1 %v2636_v1 }
  0x1a   :  { %2474 = vmatprep.subr.msk.bf16.mxu0 %vm85_vm0, %v2716_v8  ;;  %2476 = vmatprep.subr.msk.bf16.mxu1 %vm85_vm0, %v2728_v10 }
  0x1f   :  { %2471 = vmatmul.mubr.msk.bf16.vlgmr.msra.gmra.mxu0 %vm81_vm1, %v33_v20  ;;  %2473 = vmatmul.mubr.msk.bf16.vlgmr.msra.gmra.mxu1 %vm81_vm1, %v33_v20 }
  0x20   :  { %521 = vmatpush1.bf16.msra.mxu0 %v2734_v12  ;;  %562 = vmatpush1.bf16.msra.mxu1 %v2744_v14 }
  0x21   :  { %538 = vmatprep.mubr.bf16.mxu0 %v2636_v1  ;;  %579 = vmatprep.mubr.bf16.mxu1 %v2636_v1 }
  0x22   :  { %2478 = vmatprep.subr.msk.bf16.mxu0 %vm85_vm0, %v2739_v13  ;;  %2573 = vmatprep.subr.bf16.mxu1 %v2637_v17 }
  0x27   :  { %2475 = vmatmul.mubr.msk.bf16.vlgmr.msra.gmra.mxu0 %vm81_vm1, %v33_v20  ;;  %2477 = vmatmul.mubr.msk.bf16.vlgmr.msra.gmra.mxu1 %vm81_vm1, %v33_v20 }
  0x28   :  { %603 = vmatpush1.bf16.msra.mxu0 %v2762_v18  ;;  %2574 = vmatpush3.bf16.msra.mxu1 %v2765_v19 }
  0x29   :  { %620 = vmatprep.mubr.bf16.mxu0 %v2636_v1  ;;  %2575 = vmatprep.mubr.msk.bf16.mxu1 %vm2638_vm2, %v2637_v17 }
  0x2a   :  { %2482 = vmatprep.subr.msk.bf16.mxu0 %vm85_vm0, %v2683_v0  ;;  %2484 = vmatprep.subr.msk.bf16.mxu1 %vm85_vm0, %v2690_v2 }
  0x2f   :  { %2479 = vmatmul.mubr.msk.bf16.vlgmr.msra.gmra.mxu0 %vm81_vm1, %v33_v20  ;;  %2576 = vmatmul.mubr.msk.bf16.vlgmr.msra.gmra.mxu1 %vm81_vm1, %v33_v20 }
  0x30   :  { %689 = vmatpush1.bf16.msra.mxu0 %v2708_v6  ;;  %730 = vmatpush1.bf16.msra.mxu1 %v2711_v7 }
  0x31   :  { %706 = vmatprep.mubr.bf16.mxu0 %v2636_v1  ;;  %747 = vmatprep.mubr.bf16.mxu1 %v2636_v1 }
  0x32   :  { %2486 = vmatprep.subr.msk.bf16.mxu0 %vm85_vm0, %v2716_v8  ;;  %2488 = vmatprep.subr.msk.bf16.mxu1 %vm85_vm0, %v2728_v10 }
  0x37   :  { %2483 = vmatmul.mubr.msk.bf16.vlgmr.msra.gmra.mxu0 %vm81_vm1, %v2481_v22  ;;  %2485 = vmatmul.mubr.msk.bf16.vlgmr.msra.gmra.mxu1 %vm81_vm1, %v2481_v22 }
  0x38   :  { %771 = vmatpush1.bf16.msra.mxu0 %v2734_v12  ;;  %812 = vmatpush1.bf16.msra.mxu1 %v2744_v14 }
  0x39   :  { %788 = vmatprep.mubr.bf16.mxu0 %v2636_v1  ;;  %829 = vmatprep.mubr.bf16.mxu1 %v2636_v1 }
  0x3a   :  { %2490 = vmatprep.subr.msk.bf16.mxu0 %vm85_vm0, %v2739_v13  ;;  %2579 = vmatprep.subr.bf16.mxu1 %v2637_v17 }
  0x3f   :  { %2487 = vmatmul.mubr.msk.bf16.vlgmr.msra.gmra.mxu0 %vm81_vm1, %v2481_v22  ;;  %2489 = vmatmul.mubr.msk.bf16.vlgmr.msra.gmra.mxu1 %vm81_vm1, %v2481_v22 }
  0x40   :  { %853 = vmatpush1.bf16.msra.mxu0 %v2762_v18  ;;  %2580 = vmatpush3.bf16.msra.mxu1 %v2765_v19 }
  0x41   :  { %870 = vmatprep.mubr.bf16.mxu0 %v2636_v1  ;;  %2581 = vmatprep.mubr.msk.bf16.mxu1 %vm2638_vm2, %v2637_v17 }
  0x42   :  { %2494 = vmatprep.subr.msk.bf16.mxu0 %vm85_vm0, %v2683_v0  ;;  %2496 = vmatprep.subr.msk.bf16.mxu1 %vm85_vm0, %v2690_v2 }
  0x47   :  { %2491 = vmatmul.mubr.msk.bf16.vlgmr.msra.gmra.mxu0 %vm81_vm1, %v2481_v22  ;;  %2582 = vmatmul.mubr.msk.bf16.vlgmr.msra.gmra.mxu1 %vm81_vm1, %v2481_v22 }
  0x48   :  { %1007 = vmatpush1.bf16.msra.mxu0 %v2708_v6  ;;  %1048 = vmatpush1.bf16.msra.mxu1 %v2711_v7 }
  0x49   :  { %1024 = vmatprep.mubr.bf16.mxu0 %v2636_v1  ;;  %1065 = vmatprep.mubr.bf16.mxu1 %v2636_v1 }
  0x4a   :  { %2498 = vmatprep.subr.msk.bf16.mxu0 %vm85_vm0, %v2716_v8  ;;  %2500 = vmatprep.subr.msk.bf16.mxu1 %vm85_vm0, %v2728_v10 }
  0x4f   :  { %2495 = vmatmul.mubr.msk.bf16.vlgmr.msra.gmra.mxu0 %vm81_vm1, %v2493_v23  ;;  %2497 = vmatmul.mubr.msk.bf16.vlgmr.msra.gmra.mxu1 %vm81_vm1, %v2493_v23 }
  0x50   :  { %1089 = vmatpush1.bf16.msra.mxu0 %v2734_v12  ;;  %1130 = vmatpush1.bf16.msra.mxu1 %v2744_v14 }
  0x51   :  { %1106 = vmatprep.mubr.bf16.mxu0 %v2636_v1  ;;  %1147 = vmatprep.mubr.bf16.mxu1 %v2636_v1 }
  0x52   :  { %2502 = vmatprep.subr.msk.bf16.mxu0 %vm85_vm0, %v2739_v13  ;;  %2585 = vmatprep.subr.bf16.mxu1 %v2637_v17 }
  0x57   :  { %2499 = vmatmul.mubr.msk.bf16.vlgmr.msra.gmra.mxu0 %vm81_vm1, %v2493_v23  ;;  %2501 = vmatmul.mubr.msk.bf16.vlgmr.msra.gmra.mxu1 %vm81_vm1, %v2493_v23 }
  0x58   :  { %1171 = vmatpush1.bf16.msra.mxu0 %v2762_v18  ;;  %2586 = vmatpush3.bf16.msra.mxu1 %v2765_v19 }
  0x59   :  { %1188 = vmatprep.mubr.bf16.mxu0 %v2636_v1  ;;  %2587 = vmatprep.mubr.msk.bf16.mxu1 %vm2638_vm2, %v2637_v17 }
  0x5a   :  { %2506 = vmatprep.subr.msk.bf16.mxu0 %vm85_vm0, %v2683_v0  ;;  %2508 = vmatprep.subr.msk.bf16.mxu1 %vm85_vm0, %v2690_v2 }
  0x5f   :  { %2503 = vmatmul.mubr.msk.bf16.vlgmr.msra.gmra.mxu0 %vm81_vm1, %v2493_v23  ;;  %2588 = vmatmul.mubr.msk.bf16.vlgmr.msra.gmra.mxu1 %vm81_vm1, %v2493_v23 }
  0x60   :  { %1325 = vmatpush1.bf16.msra.mxu0 %v2708_v6  ;;  %1366 = vmatpush1.bf16.msra.mxu1 %v2711_v7 }
  0x61   :  { %1342 = vmatprep.mubr.bf16.mxu0 %v2636_v1  ;;  %1383 = vmatprep.mubr.bf16.mxu1 %v2636_v1 }
  0x62   :  { %2510 = vmatprep.subr.msk.bf16.mxu0 %vm85_vm0, %v2716_v8  ;;  %2512 = vmatprep.subr.msk.bf16.mxu1 %vm85_vm0, %v2728_v10 }
  0x67   :  { %2507 = vmatmul.mubr.msk.bf16.vlgmr.msra.gmra.mxu0 %vm81_vm1, %v2505_v24  ;;  %2509 = vmatmul.mubr.msk.bf16.vlgmr.msra.gmra.mxu1 %vm81_vm1, %v2505_v24 }
  0x68   :  { %1407 = vmatpush1.bf16.msra.mxu0 %v2734_v12  ;;  %1448 = vmatpush1.bf16.msra.mxu1 %v2744_v14 }
  0x69   :  { %1424 = vmatprep.mubr.bf16.mxu0 %v2636_v1  ;;  %1465 = vmatprep.mubr.bf16.mxu1 %v2636_v1 }
  0x6a   :  { %2514 = vmatprep.subr.msk.bf16.mxu0 %vm85_vm0, %v2739_v13  ;;  %2591 = vmatprep.subr.bf16.mxu1 %v2637_v17 }
  0x6f   :  { %2511 = vmatmul.mubr.msk.bf16.vlgmr.msra.gmra.mxu0 %vm81_vm1, %v2505_v24  ;;  %2513 = vmatmul.mubr.msk.bf16.vlgmr.msra.gmra.mxu1 %vm81_vm1, %v2505_v24 }
  0x70   :  { %1489 = vmatpush1.bf16.msra.mxu0 %v2762_v18  ;;  %2592 = vmatpush3.bf16.msra.mxu1 %v2765_v19 }
  0x71   :  { %1506 = vmatprep.mubr.bf16.mxu0 %v2636_v1  ;;  %2593 = vmatprep.mubr.msk.bf16.mxu1 %vm2638_vm2, %v2637_v17 }
  0x72   :  { %2518 = vmatprep.subr.msk.bf16.mxu0 %vm85_vm0, %v2683_v0  ;;  %2520 = vmatprep.subr.msk.bf16.mxu1 %vm85_vm0, %v2690_v2 }
  0x77   :  { %2515 = vmatmul.mubr.msk.bf16.vlgmr.msra.gmra.mxu0 %vm81_vm1, %v2505_v24  ;;  %2594 = vmatmul.mubr.msk.bf16.vlgmr.msra.gmra.mxu1 %vm81_vm1, %v2505_v24 }
  0x78   :  { %1643 = vmatpush1.bf16.msra.mxu0 %v2708_v6  ;;  %1684 = vmatpush1.bf16.msra.mxu1 %v2711_v7 }
  0x79   :  { %1660 = vmatprep.mubr.bf16.mxu0 %v2636_v1  ;;  %1701 = vmatprep.mubr.bf16.mxu1 %v2636_v1 }
  0x7a   :  { %2522 = vmatprep.subr.msk.bf16.mxu0 %vm85_vm0, %v2716_v8  ;;  %2524 = vmatprep.subr.msk.bf16.mxu1 %vm85_vm0, %v2728_v10 }
  0x7f   :  { %2519 = vmatmul.mubr.msk.bf16.vlgmr.msra.gmra.mxu0 %vm81_vm1, %v2517_v25  ;;  %2521 = vmatmul.mubr.msk.bf16.vlgmr.msra.gmra.mxu1 %vm81_vm1, %v2517_v25 }
  0x80   :  { %1725 = vmatpush1.bf16.msra.mxu0 %v2734_v12  ;;  %1766 = vmatpush1.bf16.msra.mxu1 %v2744_v14 }
  0x81   :  { %1742 = vmatprep.mubr.bf16.mxu0 %v2636_v1  ;;  %1783 = vmatprep.mubr.bf16.mxu1 %v2636_v1 }
  0x82   :  { %2526 = vmatprep.subr.msk.bf16.mxu0 %vm85_vm0, %v2739_v13  ;;  %2597 = vmatprep.subr.bf16.mxu1 %v2637_v17 }
  0x87   :  { %2523 = vmatmul.mubr.msk.bf16.vlgmr.msra.gmra.mxu0 %vm81_vm1, %v2517_v25  ;;  %2525 = vmatmul.mubr.msk.bf16.vlgmr.msra.gmra.mxu1 %vm81_vm1, %v2517_v25 }
  0x88   :  { %1807 = vmatpush1.bf16.msra.mxu0 %v2762_v18  ;;  %2598 = vmatpush3.bf16.msra.mxu1 %v2765_v19 }
  0x89   :  { %1824 = vmatprep.mubr.bf16.mxu0 %v2636_v1  ;;  %2599 = vmatprep.mubr.msk.bf16.mxu1 %vm2638_vm2, %v2637_v17 }
  0x8a   :  { %2530 = vmatprep.subr.msk.bf16.mxu0 %vm85_vm0, %v2683_v0  ;;  %2532 = vmatprep.subr.msk.bf16.mxu1 %vm85_vm0, %v2690_v2 }
  0x8f   :  { %2527 = vmatmul.mubr.msk.bf16.vlgmr.msra.gmra.mxu0 %vm81_vm1, %v2517_v25  ;;  %2600 = vmatmul.mubr.msk.bf16.vlgmr.msra.gmra.mxu1 %vm81_vm1, %v2517_v25 }
  0x90   :  { %1961 = vmatpush1.bf16.msra.mxu0 %v2708_v6  ;;  %2002 = vmatpush1.bf16.msra.mxu1 %v2711_v7 }
  0x91   :  { %1978 = vmatprep.mubr.bf16.mxu0 %v2636_v1  ;;  %2019 = vmatprep.mubr.bf16.mxu1 %v2636_v1 }
  0x92   :  { %2534 = vmatprep.subr.msk.bf16.mxu0 %vm85_vm0, %v2716_v8  ;;  %2536 = vmatprep.subr.msk.bf16.mxu1 %vm85_vm0, %v2728_v10 }
  0x97   :  { %2531 = vmatmul.mubr.msk.bf16.vlgmr.msra.gmra.mxu0 %vm81_vm1, %v2529_v26  ;;  %2533 = vmatmul.mubr.msk.bf16.vlgmr.msra.gmra.mxu1 %vm81_vm1, %v2529_v26 }
  0x98   :  { %2043 = vmatpush1.bf16.msra.mxu0 %v2734_v12  ;;  %2084 = vmatpush1.bf16.msra.mxu1 %v2744_v14 }
  0x99   :  { %2060 = vmatprep.mubr.bf16.mxu0 %v2636_v1  ;;  %2101 = vmatprep.mubr.bf16.mxu1 %v2636_v1 }
  0x9a   :  { %2538 = vmatprep.subr.msk.bf16.mxu0 %vm85_vm0, %v2739_v13  ;;  %2603 = vmatprep.subr.bf16.mxu1 %v2637_v17 }
  0x9f   :  { %2535 = vmatmul.mubr.msk.bf16.vlgmr.msra.gmra.mxu0 %vm81_vm1, %v2529_v26  ;;  %2537 = vmatmul.mubr.msk.bf16.vlgmr.msra.gmra.mxu1 %vm81_vm1, %v2529_v26 }
  0xa0   :  { %2125 = vmatpush1.bf16.msra.mxu0 %v2762_v18  ;;  %2142 = vmatprep.mubr.bf16.mxu0 %v2636_v1 }
  0xa1   :  { %2604 = vmatpush3.bf16.msra.mxu1 %v2765_v19  ;;  %2605 = vmatprep.mubr.msk.bf16.mxu1 %vm2638_vm2, %v2637_v17 }
  0xa7   :  { %2539 = vmatmul.mubr.msk.bf16.vlgmr.msra.gmra.mxu0 %vm81_vm1, %v2529_v26  ;;  %2606 = vmatmul.mubr.msk.bf16.vlgmr.msra.gmra.mxu1 %vm81_vm1, %v2529_v26 }
  0xc7   :  { %v153_v27 = vpop.f32.mrf.mxu0  ;;  %v194_v28 = vpop.f32.mrf.mxu1 }
  0xc8   :  { %379 = vrot.lane.b32.xlu1 %v194_v28, %s2639_s0  ;;  %375 = vrot.lane.b32.xlu0 %v153_v27, %s2639_s0 }
  0xc9   :  { %v155_v29 = vpop.f32.mrf.mxu0  ;;  %v196_v30 = vpop.f32.mrf.mxu1 }
  0xcb   :  { %v157_v31 = vpop.f32.mrf.mxu0  ;;  %v198_v32 = vpop.f32.mrf.mxu1 }
  0xcc   :  { %381 = vrot.lane.b32.xlu1 %v196_v30, %s2639_s0  ;;  %377 = vrot.lane.b32.xlu0 %v155_v29, %s2639_s0 }
  0xcd   :  { %v158_v33 = vpop.f32.mrf.mxu0  ;;  %v199_v34 = vpop.f32.mrf.mxu1 }
  0xcf   :  { %v235_v35 = vpop.f32.mrf.mxu0  ;;  %v276_v36 = vpop.f32.mrf.mxu1 }
  0xd0   :  { %387 = vrot.lane.b32.xlu0 %v276_v36, %s2639_s0  ;;  %383 = vrot.lane.b32.xlu1 %v235_v35, %s2639_s0 }
  0xd1   :  { %v237_v37 = vpop.f32.mrf.mxu0  ;;  %v278_v38 = vpop.f32.mrf.mxu1 }
  0xd3   :  { %v239_v39 = vpop.f32.mrf.mxu0  ;;  %v280_v40 = vpop.f32.mrf.mxu1 }
  0xd4   :  { %385 = vrot.lane.b32.xlu0 %v237_v37, %s2639_s0 }
  0xd5   :  { %v240_v41 = vpop.f32.mrf.mxu0  ;;  %v281_v42 = vpop.f32.mrf.mxu1 }
  0xd7   :  { %v317_v43 = vpop.f32.mrf.mxu0  ;;  %v358_v44 = vpop.f32.mrf.mxu1 }
  0xd8   :  { %389 = vrot.lane.b32.xlu0 %v278_v38, %s2639_s0 }
  0xd9   :  { %v319_v45 = vpop.f32.mrf.mxu0  ;;  %v2571_v46 = vpop.f32.mrf.mxu1 }
  0xdb   :  { %v321_v47 = vpop.f32.mrf.mxu0  ;;  %v361_v48 = vpop.f32.mrf.mxu1 }
  0xdc   :  { %391 = vrot.lane.b32.xlu0 %v317_v43, %s2639_s0 }
  0xdd   :  { %v322_v49 = vpop.f32.mrf.mxu0  ;;  %v2572_v50 = vpop.f32.mrf.mxu1 }
  0xdf   :  { %v2986_v51 = vpop.f32.mrf.mxu0  ;;  %v2988_v52 = vpop.f32.mrf.mxu1 }
  0xe0   :  { %395 = vrot.lane.b32.xlu0 %v358_v44, %s2639_s0 }
  0xe1   :  { %v2991_v53 = vpop.f32.mrf.mxu0  ;;  %v2993_v54 = vpop.f32.mrf.mxu1 }
  0xe3   :  { %v462_v55 = vpop.f32.mrf.mxu0  ;;  %v503_v56 = vpop.f32.mrf.mxu1 }
  0xe4   :  { %393 = vrot.lane.b32.xlu0 %v319_v45, %s2639_s0 }
  0xe5   :  { %v463_v57 = vpop.f32.mrf.mxu0  ;;  %v504_v58 = vpop.f32.mrf.mxu1 }
  0xe7   :  { %v2996_v59 = vpop.f32.mrf.mxu0  ;;  %v2998_v60 = vpop.f32.mrf.mxu1 }
  0xe9   :  { %v3000_v61 = vpop.f32.mrf.mxu0  ;;  %v3002_v62 = vpop.f32.mrf.mxu1 }
  0xeb   :  { %v544_v63 = vpop.f32.mrf.mxu0  ;;  %v585_v0 = vpop.f32.mrf.mxu1 }
  0xed   :  { %v545_v1 = vpop.f32.mrf.mxu0  ;;  %v586_v2 = vpop.f32.mrf.mxu1 }
  0xef   :  { %v3004_v3 = vpop.f32.mrf.mxu0  ;;  %v3006_v4 = vpop.f32.mrf.mxu1 }
  0xf1   :  { %v3008_v5 = vpop.f32.mrf.mxu0  ;;  %v2577_v6 = vpop.f32.mrf.mxu1 }
  0xf3   :  { %v626_v7 = vpop.f32.mrf.mxu0  ;;  %v666_v8 = vpop.f32.mrf.mxu1 }
  0xf5   :  { %v627_v9 = vpop.f32.mrf.mxu0  ;;  %v2578_v10 = vpop.f32.mrf.mxu1 }
  0xf7   :  { %v708_v11 = vpop.f32.mrf.mxu0  ;;  %v749_v12 = vpop.f32.mrf.mxu1 }
  0xf8   :  { %930 = vrot.lane.b32.xlu0 %v708_v11, %s2640_s9 }
  0xf9   :  { %v710_v13 = vpop.f32.mrf.mxu0  ;;  %v751_v14 = vpop.f32.mrf.mxu1 }
  0xfa   :  { %932 = vrot.lane.b32.xlu1 %v710_v13, %s2640_s9 }
  0xfb   :  { %v712_v15 = vpop.f32.mrf.mxu0  ;;  %v753_v16 = vpop.f32.mrf.mxu1 }
  0xfc   :  { %934 = vrot.lane.b32.xlu0 %v749_v12, %s2640_s9 }
  0xfd   :  { %v713_v17 = vpop.f32.mrf.mxu0  ;;  %v754_v18 = vpop.f32.mrf.mxu1 }
  0xff   :  { %v790_v19 = vpop.f32.mrf.mxu0  ;;  %v831_v20 = vpop.f32.mrf.mxu1 }
 0x100   :  { %936 = vrot.lane.b32.xlu0 %v751_v14, %s2640_s9  ;;  %938 = vrot.lane.b32.xlu1 %v790_v19, %s2640_s9 }
 0x101   :  { %v792_v21 = vpop.f32.mrf.mxu0  ;;  %v833_v22 = vpop.f32.mrf.mxu1 }
 0x103   :  { %v794_v23 = vpop.f32.mrf.mxu0  ;;  %v835_v24 = vpop.f32.mrf.mxu1 }
 0x104   :  { %942 = vrot.lane.b32.xlu1 %v831_v20, %s2640_s9  ;;  %v3037_v20 = vpop.permute.xlu1 %2262 }
 0x105   :  { %v795_v25 = vpop.f32.mrf.mxu0  ;;  %v836_v26 = vpop.f32.mrf.mxu1 }
 0x107   :  { %v872_v27 = vpop.f32.mrf.mxu0  ;;  %v913_v28 = vpop.f32.mrf.mxu1 }
 0x108   :  { %950 = vrot.lane.b32.xlu0 %v913_v28, %s2640_s9  ;;  %940 = vrot.lane.b32.xlu1 %v792_v21, %s2640_s9 }
 0x109   :  { %v874_v29 = vpop.f32.mrf.mxu0  ;;  %v2583_v30 = vpop.f32.mrf.mxu1 }
 0x10b   :  { %v876_v31 = vpop.f32.mrf.mxu0  ;;  %v916_v32 = vpop.f32.mrf.mxu1 }
 0x10c   :  { %944 = vrot.lane.b32.xlu1 %v833_v22, %s2640_s9 }
 0x10d   :  { %v877_v33 = vpop.f32.mrf.mxu0  ;;  %v2584_v34 = vpop.f32.mrf.mxu1 }
 0x10f   :  { %v1026_v35 = vpop.f32.mrf.mxu0  ;;  %v1067_v36 = vpop.f32.mrf.mxu1 }
 0x110   :  { %946 = vrot.lane.b32.xlu1 %v872_v27, %s2640_s9 }
 0x111   :  { %v1028_v37 = vpop.f32.mrf.mxu0  ;;  %v1069_v38 = vpop.f32.mrf.mxu1 }
 0x112   :  { %1250 = vrot.lane.b32.xlu0 %v1028_v37, %s2641_s10 }
 0x113   :  { %v1030_v39 = vpop.f32.mrf.mxu0  ;;  %v1071_v40 = vpop.f32.mrf.mxu1 }
 0x114   :  { %948 = vrot.lane.b32.xlu1 %v874_v29, %s2640_s9 }
 0x115   :  { %v1031_v41 = vpop.f32.mrf.mxu0  ;;  %v1072_v42 = vpop.f32.mrf.mxu1 }
 0x116   :  { %1254 = vrot.lane.b32.xlu0 %v1069_v38, %s2641_s10 }
 0x117   :  { %v1108_v43 = vpop.f32.mrf.mxu0  ;;  %v1149_v44 = vpop.f32.mrf.mxu1 }
 0x118   :  { %1248 = vrot.lane.b32.xlu1 %v1026_v35, %s2641_s10 }
 0x119   :  { %v1110_v45 = vpop.f32.mrf.mxu0  ;;  %v1151_v46 = vpop.f32.mrf.mxu1 }
 0x11a   :  { %1256 = vrot.lane.b32.xlu0 %v1108_v43, %s2641_s10 }
 0x11b   :  { %v1112_v47 = vpop.f32.mrf.mxu0  ;;  %v1153_v48 = vpop.f32.mrf.mxu1 }
 0x11c   :  { %1252 = vrot.lane.b32.xlu1 %v1067_v36, %s2641_s10 }
 0x11d   :  { %v1113_v49 = vpop.f32.mrf.mxu0  ;;  %v1154_v50 = vpop.f32.mrf.mxu1 }
 0x11e   :  { %1260 = vrot.lane.b32.xlu0 %v1149_v44, %s2641_s10 }
 0x11f   :  { %v1190_v55 = vpop.f32.mrf.mxu0  ;;  %v1231_v56 = vpop.f32.mrf.mxu1 }
 0x120   :  { %1268 = vrot.lane.b32.xlu1 %v1231_v56, %s2641_s10 }
 0x121   :  { %v1192_v57 = vpop.f32.mrf.mxu0  ;;  %v2589_v58 = vpop.f32.mrf.mxu1 }
 0x122   :  { %1258 = vrot.lane.b32.xlu0 %v1110_v45, %s2641_s10 }
 0x123   :  { %v1194_v63 = vpop.f32.mrf.mxu0  ;;  %v1234_v0 = vpop.f32.mrf.mxu1 }
 0x124   :  { %1266 = vrot.lane.b32.xlu1 %v1192_v57, %s2641_s10 }
 0x125   :  { %v1195_v1 = vpop.f32.mrf.mxu0  ;;  %v2590_v2 = vpop.f32.mrf.mxu1 }
 0x126   :  { %1262 = vrot.lane.b32.xlu0 %v1151_v46, %s2641_s10 }
 0x127   :  { %v1344_v6 = vpop.f32.mrf.mxu0  ;;  %v1385_v7 = vpop.f32.mrf.mxu1 }
 0x128   :  { %1566 = vrot.lane.b32.xlu1 %v1344_v6, %s2642_s11 }
 0x129   :  { %v1346_v8 = vpop.f32.mrf.mxu0  ;;  %v1387_v9 = vpop.f32.mrf.mxu1 }
 0x12a   :  { %1264 = vrot.lane.b32.xlu0 %v1190_v55, %s2641_s10 }
 0x12b   :  { %v1348_v10 = vpop.f32.mrf.mxu0  ;;  %v1389_v11 = vpop.f32.mrf.mxu1 }
 0x12c   :  { %1570 = vrot.lane.b32.xlu1 %v1385_v7, %s2642_s11 }
 0x12d   :  { %v1349_v12 = vpop.f32.mrf.mxu0  ;;  %v1390_v13 = vpop.f32.mrf.mxu1 }
 0x12e   :  { %1568 = vrot.lane.b32.xlu0 %v1346_v8, %s2642_s11 }
 0x12f   :  { %v1426_v14 = vpop.f32.mrf.mxu0  ;;  %v1467_v15 = vpop.f32.mrf.mxu1 }
 0x130   :  { %1572 = vrot.lane.b32.xlu1 %v1387_v9, %s2642_s11 }
 0x131   :  { %v1428_v16 = vpop.f32.mrf.mxu0  ;;  %v1469_v17 = vpop.f32.mrf.mxu1 }
 0x133   :  { %v1430_v18 = vpop.f32.mrf.mxu0  ;;  %v1471_v19 = vpop.f32.mrf.mxu1 }
 0x134   :  { %1574 = vrot.lane.b32.xlu1 %v1426_v14, %s2642_s11 }
 0x135   :  { %v1431_v21 = vpop.f32.mrf.mxu0  ;;  %v1472_v22 = vpop.f32.mrf.mxu1 }
 0x137   :  { %v1508_v23 = vpop.f32.mrf.mxu0  ;;  %v1549_v24 = vpop.f32.mrf.mxu1 }
 0x138   :  { %1578 = vrot.lane.b32.xlu1 %v1467_v15, %s2642_s11  ;;  %1582 = vrot.lane.b32.xlu0 %v1508_v23, %s2642_s11 }
 0x139   :  { %v1510_v25 = vpop.f32.mrf.mxu0  ;;  %v2595_v26 = vpop.f32.mrf.mxu1 }
 0x13a   :  { %v380_v27 = vpop.permute.xlu1 %379  ;;  %v376_v28 = vpop.permute.xlu0 %375 }
 0x13b   :  { %v1512_v29 = vpop.f32.mrf.mxu0  ;;  %v1552_v30 = vpop.f32.mrf.mxu1 }
 0x13c   :  { %1576 = vrot.lane.b32.xlu1 %v1428_v16, %s2642_s11  ;;  %1584 = vrot.lane.b32.xlu0 %v1510_v25, %s2642_s11 }
 0x13d   :  { %v1513_v31 = vpop.f32.mrf.mxu0  ;;  %v2596_v32 = vpop.f32.mrf.mxu1 }
 0x13e   :  { %v382_v33 = vpop.permute.xlu1 %381  ;;  %v378_v34 = vpop.permute.xlu0 %377 }
 0x13f   :  { %v3044_v35 = vsel %vm397_vm3, %v380_v27, %v382_v33  ;;  %v3047_v36 = vsel %vm397_vm3, %v376_v28, %v378_v34  ;;  %v3050_v37 = vsel %vm397_vm3, %v378_v34, %v380_v27  ;;  %v1662_v38 = vpop.f32.mrf.mxu0  ;;  %v1703_v39 = vpop.f32.mrf.mxu1 }
 0x140   :  { %1580 = vrot.lane.b32.xlu1 %v1469_v17, %s2642_s11  ;;  %1884 = vrot.lane.b32.xlu0 %v1662_v38, %s2643_s12 }
 0x141   :  { %v1664_v40 = vpop.f32.mrf.mxu0  ;;  %v1705_v41 = vpop.f32.mrf.mxu1 }
 0x142   :  { %v388_v42 = vpop.permute.xlu0 %387  ;;  %v384_v43 = vpop.permute.xlu1 %383 }
 0x143   :  { %v3055_v44 = vsel %vm397_vm3, %v382_v33, %v384_v43  ;;  %v1666_v45 = vpop.f32.mrf.mxu0  ;;  %v1707_v46 = vpop.f32.mrf.mxu1 }
 0x144   :  { %1586 = vrot.lane.b32.xlu1 %v1549_v24, %s2642_s11  ;;  %1888 = vrot.lane.b32.xlu0 %v1703_v39, %s2643_s12 }
 0x145   :  { %v1667_v47 = vpop.f32.mrf.mxu0  ;;  %v1708_v48 = vpop.f32.mrf.mxu1 }
 0x146   :  { %v386_v49 = vpop.permute.xlu0 %385 }
 0x147   :  { %v3060_v50 = vsel %vm397_vm3, %v384_v43, %v386_v49  ;;  %v3063_v55 = vsel %vm397_vm3, %v386_v49, %v388_v42  ;;  %v1744_v56 = vpop.f32.mrf.mxu0  ;;  %v1785_v57 = vpop.f32.mrf.mxu1 }
 0x148   :  { %1890 = vrot.lane.b32.xlu0 %v1705_v41, %s2643_s12  ;;  %1886 = vrot.lane.b32.xlu1 %v1664_v40, %s2643_s12 }
 0x149   :  { %v1746_v58 = vpop.f32.mrf.mxu0  ;;  %v1787_v63 = vpop.f32.mrf.mxu1 }
 0x14a   :  { %v390_v0 = vpop.permute.xlu0 %389 }
 0x14b   :  { %v3068_v1 = vsel %vm397_vm3, %v388_v42, %v390_v0  ;;  %v1748_v2 = vpop.f32.mrf.mxu0  ;;  %v1789_v6 = vpop.f32.mrf.mxu1 }
 0x14c   :  { %1898 = vrot.lane.b32.xlu1 %v1787_v63, %s2643_s12  ;;  %1892 = vrot.lane.b32.xlu0 %v1744_v56, %s2643_s12 }
 0x14d   :  { %v1749_v7 = vpop.f32.mrf.mxu0  ;;  %v1790_v8 = vpop.f32.mrf.mxu1 }
 0x14e   :  { %v392_v9 = vpop.permute.xlu0 %391  ;;  %v461_v7 = vadd.f32 %v2991_v53, %v3050_v37 }
 0x14f   :  { %v3073_v10 = vsel %vm397_vm3, %v390_v0, %v392_v9  ;;  %v1826_v11 = vpop.f32.mrf.mxu0  ;;  %v1867_v12 = vpop.f32.mrf.mxu1 }
 0x150   :  { %1896 = vrot.lane.b32.xlu0 %v1785_v57, %s2643_s12  ;;  %1900 = vrot.lane.b32.xlu1 %v1826_v11, %s2643_s12 }
 0x151   :  { %v1828_v13 = vpop.f32.mrf.mxu0  ;;  %v2601_v14 = vpop.f32.mrf.mxu1 }
 0x152   :  { %v396_v15 = vpop.permute.xlu0 %395 }
 0x153   :  { %v3078_v16 = vsel %vm397_vm3, %v396_v15, %v376_v28  ;;  %v1830_v17 = vpop.f32.mrf.mxu0  ;;  %v1870_v18 = vpop.f32.mrf.mxu1 }
 0x154   :  { %1894 = vrot.lane.b32.xlu0 %v1746_v58, %s2643_s12  ;;  %v459_v58 = vadd.f32 %v2986_v51, %v3047_v36  ;;  %v500_v51 = vadd.f32 %v2988_v52, %v3044_v35  ;;  %v502_v36 = vadd.f32 %v2993_v54, %v3055_v44  ;;  %v664_v52 = vadd.f32 %v3006_v4, %v3078_v16 }
 0x155   :  { %v1831_v19 = vpop.f32.mrf.mxu0  ;;  %v2602_v21 = vpop.f32.mrf.mxu1  ;;  %v584_v4 = vadd.f32 %v3002_v62, %v3073_v10 }
 0x156   :  { %v394_v22 = vpop.permute.xlu0 %393  ;;  %v541_v19 = vadd.f32 %v2996_v59, %v3060_v50  ;;  %v543_v21 = vadd.f32 %v3000_v61, %v3063_v55  ;;  %v582_v59 = vadd.f32 %v2998_v60, %v3068_v1 }
 0x157   :  { %v3082_v23 = vsel %vm397_vm3, %v392_v9, %v394_v22  ;;  %v3085_v24 = vsel %vm397_vm3, %v394_v22, %v396_v15  ;;  %v1980_v25 = vpop.f32.mrf.mxu0  ;;  %v2021_v26 = vpop.f32.mrf.mxu1 }
 0x158   :  { %1902 = vrot.lane.b32.xlu0 %v1828_v13, %s2643_s12  ;;  %2202 = vrot.lane.b32.xlu1 %v1980_v25, %s2644_s13  ;;  %v625_v60 = vadd.f32 %v3008_v5, %v3085_v24 }
 0x159   :  { %v1982_v27 = vpop.f32.mrf.mxu0  ;;  %v2023_v28 = vpop.f32.mrf.mxu1 }
 0x15b   :  { %v1984_v29 = vpop.f32.mrf.mxu0  ;;  %v2025_v30 = vpop.f32.mrf.mxu1 }
 0x15c   :  { %2206 = vrot.lane.b32.xlu1 %v2021_v26, %s2644_s13  ;;  %2204 = vrot.lane.b32.xlu0 %v1982_v27, %s2644_s13 }
 0x15d   :  { %v1985_v31 = vpop.f32.mrf.mxu0  ;;  %v2026_v32 = vpop.f32.mrf.mxu1 }
 0x15e   :  { %v623_v32 = vadd.f32 %v3004_v3, %v3082_v23 }
 0x15f   :  { %v2062_v33 = vpop.f32.mrf.mxu0  ;;  %v2103_v34 = vpop.f32.mrf.mxu1 }
 0x160   :  { %2208 = vrot.lane.b32.xlu1 %v2023_v28, %s2644_s13  ;;  %2214 = vrot.lane.b32.xlu0 %v2103_v34, %s2644_s13 }
 0x161   :  { %v2064_v38 = vpop.f32.mrf.mxu0  ;;  %v2105_v39 = vpop.f32.mrf.mxu1 }
 0x163   :  { %v2066_v40 = vpop.f32.mrf.mxu0  ;;  %v2107_v41 = vpop.f32.mrf.mxu1 }
 0x164   :  { %2216 = vrot.lane.b32.xlu0 %v2105_v39, %s2644_s13  ;;  %2210 = vrot.lane.b32.xlu1 %v2062_v33, %s2644_s13 }
 0x165   :  { %v2067_v42 = vpop.f32.mrf.mxu0  ;;  %v2108_v43 = vpop.f32.mrf.mxu1 }
 0x167   :  { %v2144_v45 = vpop.f32.mrf.mxu0  ;;  %v2185_v46 = vpop.f32.mrf.mxu1 }
 0x168   :  { %1904 = vrot.lane.b32.xlu0 %v1867_v12, %s2643_s12  ;;  %2212 = vrot.lane.b32.xlu1 %v2064_v38, %s2644_s13 }
 0x169   :  { %v2146_v47 = vpop.f32.mrf.mxu0  ;;  %v2607_v48 = vpop.f32.mrf.mxu1 }
 0x16a   :  { %v931_v49 = vpop.permute.xlu0 %930 }
 0x16b   :  { %v2148_v56 = vpop.f32.mrf.mxu0  ;;  %v2188_v57 = vpop.f32.mrf.mxu1 }
 0x16c   :  { %v933_v63 = vpop.permute.xlu1 %932  ;;  %2222 = vrot.lane.b32.xlu0 %v2185_v46, %s2644_s13  ;;  %2218 = vrot.lane.b32.xlu1 %v2144_v45, %s2644_s13 }
 0x16d   :  { %v953_v0 = vsel %vm952_vm4, %v931_v49, %v933_v63  ;;  %v2149_v2 = vpop.f32.mrf.mxu0  ;;  %v2608_v6 = vpop.f32.mrf.mxu1 }
 0x16e   :  { %v3104_v8 = vadd.f32 %v953_v0, %v459_v58  ;;  %v935_v9 = vpop.permute.xlu0 %934 }
 0x16f   :  { %v954_v11 = vsel %vm952_vm4, %v933_v63, %v935_v9 }
 0x170   :  { %v3107_v12 = vadd.f32 %v954_v11, %v461_v7  ;;  %2220 = vrot.lane.b32.xlu1 %v2146_v47, %s2644_s13 }
 0x172   :  { %v937_v13 = vpop.permute.xlu0 %936  ;;  %v939_v14 = vpop.permute.xlu1 %938 }
 0x173   :  { %v955_v15 = vsel %vm952_vm4, %v935_v9, %v937_v13  ;;  %v956_v53 = vsel %vm952_vm4, %v937_v13, %v939_v14 }
 0x174   :  { %v978_v37 = vadd.f32 %v955_v15, %v500_v51  ;;  %v979_v17 = vadd.f32 %v956_v53, %v502_v36 }
 0x176   :  { %v943_v18 = vpop.permute.xlu1 %942 }
 0x17a   :  { %v951_v35 = vpop.permute.xlu0 %950  ;;  %v941_v54 = vpop.permute.xlu1 %940 }
 0x17b   :  { %v975_v44 = vsel %vm952_vm4, %v951_v35, %v931_v49  ;;  %v957_v22 = vsel %vm952_vm4, %v939_v14, %v941_v54  ;;  %v958_v25 = vsel %vm952_vm4, %v941_v54, %v943_v18 }
 0x17c   :  { %v986_v26 = vadd.f32 %v975_v44, %v664_v52  ;;  %v980_v27 = vadd.f32 %v957_v22, %v541_v19  ;;  %v3125_v28 = vadd.f32 %v958_v25, %v543_v21  ;;  %v2331_v44 = vlaneseq }
 0x17e   :  { %v945_v50 = vpop.permute.xlu1 %944 }
 0x17f   :  { %v959_v61 = vsel %vm952_vm4, %v943_v18, %v945_v50 }
 0x180   :  { %v982_v55 = vadd.f32 %v959_v61, %v582_v59 }
 0x182   :  { %v947_v16 = vpop.permute.xlu1 %946 }
 0x183   :  { %v960_v29 = vsel %vm952_vm4, %v945_v50, %v947_v16 }
 0x184   :  { %v3133_v30 = vadd.f32 %v960_v29, %v584_v4  ;;  %v3135_v31 = vpop.permute.xlu0 %1250 }
 0x186   :  { %v949_v1 = vpop.permute.xlu1 %948 }
 0x187   :  { %v961_v33 = vsel %vm952_vm4, %v947_v16, %v949_v1  ;;  %v962_v34 = vsel %vm952_vm4, %v949_v1, %v951_v35 }
 0x188   :  { %v984_v38 = vadd.f32 %v961_v33, %v623_v32  ;;  %v985_v62 = vadd.f32 %v962_v34, %v625_v60  ;;  %v1255_v10 = vpop.permute.xlu0 %1254 }
 0x18a   :  { %v1249_v39 = vpop.permute.xlu1 %1248 }
 0x18b   :  { %v1271_v1 = vsel %vm1270_vm5, %v1249_v39, %v3135_v31 }
 0x18c   :  { %v1257_v40 = vpop.permute.xlu0 %1256 }
 0x18d   :  { %v1274_v41 = vsel %vm1270_vm5, %v1255_v10, %v1257_v40 }
 0x18e   :  { %v3144_v42 = vadd.f32 %v1274_v41, %v979_v17  ;;  %v1253_v43 = vpop.permute.xlu1 %1252 }
 0x18f   :  { %v1273_v3 = vsel %vm1270_vm5, %v1253_v43, %v1255_v10  ;;  %v1272_v33 = vsel %vm1270_vm5, %v3135_v31, %v1253_v43  ;;  %v1294_v31 = vadd.f32 %v1271_v1, %v3104_v8  ;;  %v3237_v8 = vld [vmem:[%s3368_s3 + $0x8] sm:$0x7] }
 0x190   :  { %v3147_v23 = vadd.f32 %v1273_v3, %v978_v37  ;;  %v3149_v5 = vpop.permute.xlu0 %1260  ;;  %v1295_v43 = vadd.f32 %v1272_v33, %v3107_v12 }
 0x192   :  { %v1269_v24 = vpop.permute.xlu1 %1268 }
 0x193   :  { %v1293_v45 = vsel %vm1270_vm5, %v1269_v24, %v1249_v39 }
 0x194   :  { %v3152_v46 = vadd.f32 %v1293_v45, %v986_v26  ;;  %v1259_v47 = vpop.permute.xlu0 %1258  ;;  %v3187_v26 = vshrl.u32 %v2331_v44, 7 }
 0x195   :  { %v1275_v48 = vsel %vm1270_vm5, %v1257_v40, %v1259_v47  ;;  %v1276_v45 = vsel %vm1270_vm5, %v1259_v47, %v3149_v5 }
 0x196   :  { %v3155_v49 = vadd.f32 %v1275_v48, %v980_v27  ;;  %v1267_v56 = vpop.permute.xlu1 %1266  ;;  %v2333_v59 = vsub.s32 0, %v3187_v26  ;;  %v2337_v50 = vsub.s32 1, %v3187_v26  ;;  %v2341_v61 = vsub.s32 2, %v3187_v26 }
 0x197   :  { %v1280_v57 = vsel %vm1270_vm5, %v1267_v56, %v1269_v24  ;;  %v2345_v4 = vsub.s32 3, %v3187_v26  ;;  %v2357_v16 = vsub.s32 6, %v3187_v26  ;;  %v2349_v60 = vsub.s32 4, %v3187_v26 }
 0x198   :  { %v3158_v58 = vadd.f32 %v1280_v57, %v985_v62  ;;  %v1263_v63 = vpop.permute.xlu0 %1262  ;;  %v2353_v34 = vsub.s32 5, %v3187_v26  ;;  %v3251_v1 = vrot.slane %v3237_v8, %v2337_v50 }
 0x199   :  { %v1277_v0 = vsel %vm1270_vm5, %v3149_v5, %v1263_v63 }
 0x19a   :  { %v3162_v2 = vadd.f32 %v1277_v0, %v982_v55  ;;  %v3164_v6 = vpop.permute.xlu1 %1566  ;;  %v2276_v55 = vld [vmem:[%s3368_s3] sm:$0xff] }
 0x19b   :  { %v2334_v62 = vrot.slane %v2276_v55, %v2333_v59  ;;  %v2338_v10 = vrot.slane %v2276_v55, %v2337_v50  ;;  %v3212_v40 = vrot.slane %v2276_v55, %v2341_v61  ;;  %v3217_v39 = vrot.slane %v2276_v55, %v2345_v4 }
 0x19c   :  { %v1265_v7 = vpop.permute.xlu0 %1264  ;;  %v3219_v24 = vrot.slane %v2276_v55, %v2357_v16  ;;  %v3229_v57 = vrot.slane %v2276_v55, %v2349_v60  ;;  %v3239_v12 = vrot.slane %v2276_v55, %v2353_v34  ;;  %v3245_v4 = vrot.slane %v3237_v8, %v2333_v59 }
 0x19d   :  { %v1279_v9 = vsel %vm1270_vm5, %v1265_v7, %v1267_v56  ;;  %v1278_v5 = vsel %vm1270_vm5, %v1263_v63, %v1265_v7  ;;  %v1299_v16 = vadd.f32 %v1276_v45, %v3125_v28 }
 0x19e   :  { %v3167_v11 = vadd.f32 %v1279_v9, %v984_v38  ;;  %v1571_v51 = vpop.permute.xlu1 %1570  ;;  %v2361_v38 = vsub.s32 7, %v3187_v26  ;;  %v1301_v59 = vadd.f32 %v1278_v5, %v3133_v30 }
 0x1a0   :  { %v1569_v13 = vpop.permute.xlu0 %1568 }
 0x1a1   :  { %v1589_v41 = vsel %vm1588_vm6, %v3164_v6, %v1569_v13  ;;  %v1590_v3 = vsel %vm1588_vm6, %v1569_v13, %v1571_v51  ;;  %v3241_v13 = vrot.slane %v2276_v55, %v2361_v38 }
 0x1a2   :  { %v1573_v36 = vpop.permute.xlu1 %1572  ;;  %v1612_v47 = vadd.f32 %v1589_v41, %v1294_v31  ;;  %v1613_v44 = vadd.f32 %v1590_v3, %v1295_v43 }
 0x1a6   :  { %v1575_v14 = vpop.permute.xlu1 %1574 }
 0x1a7   :  { %v1592_v60 = vsel %vm1588_vm6, %v1573_v36, %v1575_v14 }
 0x1a8   :  { %v1615_v3 = vadd.f32 %v1592_v60, %v3144_v42 }
 0x1aa   :  { %v3169_v15 = vpop.permute.xlu1 %1578  ;;  %v3171_v53 = vpop.permute.xlu0 %1582 }
 0x1ae   :  { %v1577_v37 = vpop.permute.xlu1 %1576  ;;  %v3173_v17 = vpop.permute.xlu0 %1584 }
 0x1af   :  { %v1593_v33 = vsel %vm1588_vm6, %v1575_v14, %v1577_v37  ;;  %v1594_v55 = vsel %vm1588_vm6, %v1577_v37, %v3169_v15  ;;  %v1597_v14 = vsel %vm1588_vm6, %v3171_v53, %v3173_v17 }
 0x1b0   :  { %v1616_v30 = vadd.f32 %v1593_v33, %v3155_v49  ;;  %v1617_v31 = vadd.f32 %v1594_v55, %v1299_v16  ;;  %v3277_v42 = vadd.f32 %v1597_v14, %v3167_v11 }
 0x1b2   :  { %v3175_v18 = vpop.permute.xlu1 %1580  ;;  %v3177_v19 = vpop.permute.xlu0 %1884 }
 0x1b3   :  { %v1596_v49 = vsel %vm1588_vm6, %v3175_v18, %v3171_v53 }
 0x1b6   :  { %v3179_v21 = vpop.permute.xlu1 %1586  ;;  %v1889_v52 = vpop.permute.xlu0 %1888 }
 0x1b7   :  { %v1598_v11 = vsel %vm1588_vm6, %v3173_v17, %v3179_v21 }
 0x1b8   :  { %v1621_v14 = vadd.f32 %v1598_v11, %v3158_v58 }
 0x1ba   :  { %v3181_v35 = vpop.permute.xlu0 %1890  ;;  %v1887_v54 = vpop.permute.xlu1 %1886 }
 0x1bb   :  { %v1907_v0 = vsel %vm1906_vm7, %v3177_v19, %v1887_v54  ;;  %v1908_v9 = vsel %vm1906_vm7, %v1887_v54, %v1889_v52  ;;  %v1591_v54 = vsel %vm1588_vm6, %v1571_v51, %v1573_v36  ;;  %v1909_v28 = vsel %vm1906_vm7, %v1889_v52, %v3181_v35 }
 0x1bc   :  { %v1930_v63 = vadd.f32 %v1907_v0, %v1612_v47  ;;  %v1931_v7 = vadd.f32 %v1908_v9, %v1613_v44  ;;  %v1614_v50 = vadd.f32 %v1591_v54, %v3147_v23  ;;  %v1595_v52 = vsel %vm1588_vm6, %v3169_v15, %v3175_v18 }
 0x1bd   :  { %v1618_v60 = vadd.f32 %v1595_v52, %v3162_v2 }
 0x1be   :  { %v3183_v22 = vpop.permute.xlu0 %1892  ;;  %v3185_v25 = vpop.permute.xlu1 %1898  ;;  %v1932_v43 = vadd.f32 %v1909_v28, %v1614_v50  ;;  %v1611_v50 = vsel %vm1588_vm6, %v3179_v21, %v3164_v6 }
 0x1bf   :  { %v1910_v23 = vsel %vm1906_vm7, %v3181_v35, %v3183_v22  ;;  %v1622_v21 = vadd.f32 %v1611_v50, %v3152_v46 }
 0x1c0   :  { %v1933_v33 = vadd.f32 %v1910_v23, %v1615_v3 }
 0x1c2   :  { %v3189_v27 = vpop.permute.xlu0 %1896  ;;  %v3199_v29 = vpop.permute.xlu1 %1900 }
 0x1c3   :  { %v1913_v15 = vsel %vm1906_vm7, %v3189_v27, %v3185_v25 }
 0x1c6   :  { %v3201_v32 = vpop.permute.xlu0 %1894 }
 0x1c7   :  { %v1911_v53 = vsel %vm1906_vm7, %v3183_v22, %v3201_v32  ;;  %v1912_v22 = vsel %vm1906_vm7, %v3201_v32, %v3189_v27 }
 0x1ca   :  { %v3225_v48 = vpop.permute.xlu0 %1902  ;;  %v3227_v56 = vpop.permute.xlu1 %2202 }
 0x1ce   :  { %v2207_v34 = vpop.permute.xlu1 %2206  ;;  %v2205_v38 = vpop.permute.xlu0 %2204 }
 0x1cf   :  { %v2225_v51 = vsel %vm2224_vm8, %v3227_v56, %v2205_v38  ;;  %v2226_v36 = vsel %vm2224_vm8, %v2205_v38, %v2207_v34 }
 0x1d0   :  { %v2248_v37 = vadd.f32 %v2225_v51, %v1930_v63  ;;  %v2249_v41 = vadd.f32 %v2226_v36, %v1931_v7  ;;  %v1619_v7 = vadd.f32 %v1596_v49, %v1301_v59  ;;  %v1914_v59 = vsel %vm1906_vm7, %v3185_v25, %v3199_v29 }
 0x1d2   :  { %v2265_v45 = vadd.f32 %v3037_v20, %v2248_v37  ;;  %v2266_v0 = vadd.f32 %v3037_v20, %v2249_v41  ;;  %v2209_v9 = vpop.permute.xlu1 %2208  ;;  %v2215_v5 = vpop.permute.xlu0 %2214  ;;  %v1934_v37 = vadd.f32 %v1911_v53, %v1616_v30 }
 0x1d3   :  { %v2227_v47 = vsel %vm2224_vm8, %v2207_v34, %v2209_v9  ;;  %v1936_v34 = vadd.f32 %v1913_v15, %v1618_v60 }
 0x1d4   :  { %v2547_v35 = vpack.c.bf16 %v2266_v0, %v2265_v45  ;;  %v2250_v44 = vadd.f32 %v2227_v47, %v1932_v43  ;;  %v2386_v16 = vmul.f32 %v2334_v62, %v2265_v45  ;;  %v2387_v54 = vmul.f32 %v2338_v10, %v2266_v0 }
 0x1d6   :  { %2323 = vst [vmem:[%s3369_s4] sm:$0xff] %v2547_v35  ;;  %v2267_v18 = vadd.f32 %v3037_v20, %v2250_v44  ;;  %v2217_v55 = vpop.permute.xlu0 %2216  ;;  %v2211_v62 = vpop.permute.xlu1 %2210  ;;  %v2397_v10 = vadd.f32 %v2387_v54, %v2386_v16  ;;  %v2411_v63 = vmul.f32 %v2386_v16, %v2265_v45  ;;  %v2412_v2 = vmul.f32 %v2387_v54, %v2266_v0 }
 0x1d7   :  { %v2231_v17 = vsel %vm2224_vm8, %v2215_v5, %v2217_v55  ;;  %v2228_v38 = vsel %vm2224_vm8, %v2209_v9, %v2211_v62  ;;  %v1937_v45 = vadd.f32 %v1914_v59, %v1619_v7  ;;  %v1915_v0 = vsel %vm1906_vm7, %v3199_v29, %v3225_v48 }
 0x1d8   :  { %v2251_v28 = vadd.f32 %v2228_v38, %v1933_v33  ;;  %v2388_v51 = vmul.f32 %v3212_v40, %v2267_v18  ;;  %v2422_v36 = vadd.f32 %v2412_v2, %v2411_v63  ;;  %v2254_v41 = vadd.f32 %v2231_v17, %v1936_v34 }
 0x1d9   :  { %v1935_v40 = vadd.f32 %v1912_v22, %v1617_v31  ;;  %v2374_v59 = vrot.slane %v3237_v8, %v2341_v61 }
 0x1da   :  { %v2268_v3 = vadd.f32 %v3037_v20, %v2251_v28  ;;  %v1905_v52 = vpop.permute.xlu0 %1904  ;;  %v2213_v27 = vpop.permute.xlu1 %2212  ;;  %v2398_v32 = vadd.f32 %v2397_v10, %v2388_v51  ;;  %v2413_v43 = vmul.f32 %v2388_v51, %v2267_v18  ;;  %v2271_v15 = vadd.f32 %v3037_v20, %v2254_v41 }
 0x1db   :  { %v1929_v23 = vsel %vm1906_vm7, %v1905_v52, %v3177_v19  ;;  %v2229_v6 = vsel %vm2224_vm8, %v2211_v62, %v2213_v27  ;;  %v2230_v58 = vsel %vm2224_vm8, %v2213_v27, %v2215_v5  ;;  %v1916_v46 = vsel %vm1906_vm7, %v3225_v48, %v1905_v52 }
 0x1dc   :  { %v2548_v25 = vpack.c.bf16 %v2268_v3, %v2267_v18  ;;  %v2252_v30 = vadd.f32 %v2229_v6, %v1934_v37  ;;  %v2253_v9 = vadd.f32 %v2230_v58, %v1935_v40  ;;  %v2389_v49 = vmul.f32 %v3217_v39, %v2268_v3 }
 0x1dd   :  { %v2423_v31 = vadd.f32 %v2422_v36, %v2413_v43  ;;  %v1940_v19 = vadd.f32 %v1929_v23, %v1622_v21  ;;  %v1938_v48 = vadd.f32 %v1915_v0, %v3277_v42  ;;  %v1939_v53 = vadd.f32 %v1916_v46, %v1621_v14 }
 0x1de   :  { %2324 = vst [vmem:[%s3369_s4 + $0x8] sm:$0xff] %v2548_v25  ;;  %v2269_v5 = vadd.f32 %v3037_v20, %v2252_v30  ;;  %v2223_v47 = vpop.permute.xlu0 %2222  ;;  %v2219_v35 = vpop.permute.xlu1 %2218  ;;  %v2270_v29 = vadd.f32 %v3037_v20, %v2253_v9  ;;  %v2399_v16 = vadd.f32 %v2398_v32, %v2389_v49  ;;  %v2414_v33 = vmul.f32 %v2389_v49, %v2268_v3 }
 0x1df   :  { %v2247_v39 = vsel %vm2224_vm8, %v2223_v47, %v3227_v56  ;;  %v2232_v44 = vsel %vm2224_vm8, %v2217_v55, %v2219_v35  ;;  %v2392_v42 = vmul.f32 %v3219_v24, %v2271_v15 }
 0x1e0   :  { %v2258_v54 = vadd.f32 %v2247_v39, %v1940_v19  ;;  %v2255_v60 = vadd.f32 %v2232_v44, %v1937_v45  ;;  %v2390_v11 = vmul.f32 %v3229_v57, %v2269_v5  ;;  %v2549_v18 = vpack.c.bf16 %v2270_v29, %v2269_v5 }
 0x1e1   :  { %v2391_v62 = vmul.f32 %v3239_v12, %v2270_v29  ;;  %v2424_v34 = vadd.f32 %v2423_v31, %v2414_v33  ;;  %v2417_v37 = vmul.f32 %v2392_v42, %v2271_v15 }
 0x1e2   :  { %v2275_v10 = vadd.f32 %v3037_v20, %v2258_v54  ;;  %v2272_v63 = vadd.f32 %v3037_v20, %v2255_v60  ;;  %v2221_v2 = vpop.permute.xlu1 %2220  ;;  %v2400_v56 = vadd.f32 %v2399_v16, %v2390_v11  ;;  %v2415_v7 = vmul.f32 %v2390_v11, %v2269_v5  ;;  %2325 = vst [vmem:[%s3369_s4 + $0x10] sm:$0xff] %v2549_v18 }
 0x1e3   :  { %v2233_v57 = vsel %vm2224_vm8, %v2219_v35, %v2221_v2  ;;  %v2234_v55 = vsel %vm2224_vm8, %v2221_v2, %v2223_v47  ;;  %v2416_v36 = vmul.f32 %v2391_v62, %v2270_v29 }
 0x1e4   :  { %v2552_v17 = vpack.c.bf16 %v2275_v10, %v2275_v10  ;;  %v2550_v12 = vpack.c.bf16 %v2272_v63, %v2271_v15  ;;  %v2256_v38 = vadd.f32 %v2233_v57, %v1938_v48  ;;  %v2257_v22 = vadd.f32 %v2234_v55, %v1939_v53 }
 0x1e5   :  { %v2393_v28 = vmul.f32 %v3241_v13, %v2272_v63  ;;  %v2401_v51 = vadd.f32 %v2400_v56, %v2391_v62  ;;  %v2425_v50 = vadd.f32 %v2424_v34, %v2415_v7  ;;  %v2396_v23 = vmul.f32 %v2374_v59, %v2275_v10 }
 0x1e6   :  { %2328 = vst [vmem:[%s3369_s4 + $0x28] sm:$0xf] %v2552_v17  ;;  %2326 = vst [vmem:[%s3369_s4 + $0x18] sm:$0xff] %v2550_v12  ;;  %v2273_v24 = vadd.f32 %v3037_v20, %v2256_v38  ;;  %v2274_v14 = vadd.f32 %v3037_v20, %v2257_v22 }
 0x1e7   :  { %v2402_v13 = vadd.f32 %v2401_v51, %v2392_v42  ;;  %v2426_v41 = vadd.f32 %v2425_v50, %v2416_v36  ;;  %v2418_v43 = vmul.f32 %v2393_v28, %v2272_v63  ;;  %v2421_v45 = vmul.f32 %v2396_v23, %v2275_v10 }
 0x1e8   :  { %v2551_v3 = vpack.c.bf16 %v2274_v14, %v2273_v24  ;;  %v2394_v52 = vmul.f32 %v3245_v4, %v2273_v24  ;;  %v2395_v27 = vmul.f32 %v3251_v1, %v2274_v14 }
 0x1e9   :  { %v2403_v32 = vadd.f32 %v2402_v13, %v2393_v28  ;;  %v2427_v40 = vadd.f32 %v2426_v41, %v2417_v37 }
 0x1ea   :  { %2327 = vst [vmem:[%s3369_s4 + $0x20] sm:$0xff] %v2551_v3  ;;  %v2419_v20 = vmul.f32 %v2394_v52, %v2273_v24  ;;  %v2420_v8 = vmul.f32 %v2395_v27, %v2274_v14 }
 0x1eb   :  { %v2404_v26 = vadd.f32 %v2403_v32, %v2394_v52  ;;  %v2428_v6 = vadd.f32 %v2427_v40, %v2418_v43 }
 0x1ed   :  { %v2405_v61 = vadd.f32 %v2404_v26, %v2395_v27  ;;  %v2429_v58 = vadd.f32 %v2428_v6, %v2419_v20 }
 0x1ef   :  { %v2406_v21 = vadd.f32 %v2405_v61, %v2396_v23  ;;  %v2430_v25 = vadd.f32 %v2429_v58, %v2420_v8 }
 0x1f1   :  { %2407 = vadd.xlane.f32.xlu1 %v2406_v21  ;;  %v2431_v4 = vadd.f32 %v2430_v25, %v2421_v45 }
 0x1f3   :  { %2432 = vadd.xlane.f32.xlu0 %v2431_v4 }
 0x27a   :  { %v2408_v1 = vpop.xlane.xlu1 %2407 }
 0x27b   :  { %2410 = vst.msk [vmem:[%s3370_s5] sm:$0xff] %vm2409_vm9, %v2408_v1 }
 0x27c   :  { %v2433_v30 = vpop.xlane.xlu0 %2432 }
 0x27d   :  { %2434 = vst.msk [vmem:[%s3371_s6] sm:$0xff] %vm2409_vm9, %v2433_v30 }

// kernel: _lambda_.22
= control target key start
LH: loop header
LB: loop body
LE: loop exit
PB: predicated region body
PF: predicated region fallthrough
CT: control target
= control target key end

     0   :  { %12 = vsyncpa [#allocation3], 0  ;;  %v191_v2 = vmov 0   ;;  %s262_s0 = inlined_call_operand.vmem [shape: bf16[16,128], index: 0, kind: input, shape index: {}]   ;;  %s263_s1 = inlined_call_operand.vmem [shape: f32[16,1], index: 1, kind: input, shape index: {}]   ;;  %s264_s2 = inlined_call_operand.vmem [shape: f32[16,1], index: 2, kind: input, shape index: {}]   ;;  %s265_s3 = inlined_call_operand.vmem [shape: f32[1,128], index: 3, kind: input, shape index: {}]   ;;  %s266_s4 = inlined_call_operand.vmem [shape: bf16[16,128], index: 4, kind: output, shape index: {0}]   ;;  %s267_s5 = inlined_call_operand.hbm [shape: f32[1,16,1], index: 5, kind: output, shape index: {1}]   ;;  %s268_s6 = inlined_call_operand.hbm [shape: f32[1,16,1], index: 6, kind: output, shape index: {2}]  }
   0x1   :  { %v40_v0 = vld [vmem:[%s264_s2] sm:$0xff]  ;;  %146 = vset.pattern.permute.xlu1 %v191_v2  ;;  %145 = vset.pattern.permute.xlu0 %v191_v2 }
   0x2   :  { %v26_v1 = vld [vmem:[%s263_s1] sm:$0xff] }
   0x3   :  { %13 = vsyncpa [#allocation5], 0  ;;  %44 = vperm.xlu1 %146, %v40_v0   ;;  %30 = vperm.xlu0 %145, %v26_v1   ;;  %v41_v3 = vld [vmem:[%s264_s2 + $0x8] sm:$0xff]  ;;  %v132_v5 = vld [vmem:[%s262_s0] sm:$0xff]   ;;  %vm79_vm0 = vcmask 7168   ;;  %s192_s2 = smov [#allocation2]  }
   0x4   :  { %v27_v4 = vld [vmem:[%s263_s1 + $0x8] sm:$0xff]  ;;  %v133_v6 = vunpack.c.l.bf16 %v132_v5  ;;  %v134_v10 = vunpack.c.h.bf16 %v132_v5  ;;  %v128_v13 = vld [vmem:[%s265_s3] ss:$0 sm:$0xff]  ;;  %s97_s3 = sshll.u32 %s192_s2, 4  ;;  %s193_s9 = smov [#allocation4]   ;;  %s98_s3 = int_to_ptr.vmem [resolvable:$true] %s97_s3 }
   0x5   :  { %s109_s10 = sshll.u32 %s193_s9, 4  ;;  %p152_p1 = scmp.lt.s32.totalorder %s98_s3, %s98_s3  ;;  %s110_s10 = int_to_ptr.vmem [resolvable:$true] %s109_s10 }
   0x7   :  { %49 = vperm.xlu1 %146, %v41_v3   ;;  %35 = vperm.xlu0 %145, %v27_v4  }
  0x7e   :  { %v45_v7 = vpop.permute.xlu1 %44  ;;  %v31_v8 = vpop.permute.xlu0 %30 }
  0x7f   :  { %v38_v9 = vmul.f32 %v133_v6, %v31_v8 }
  0x81   :  { %v52_v11 = vadd.f32 %v45_v7, %v38_v9 }
  0x82   :  { %v36_v12 = vpop.permute.xlu0 %35  ;;  %v50_v16 = vpop.permute.xlu1 %49 }
  0x83   :  { %v54_v14 = vmax.f32 %v52_v11, 0.0  ;;  %v39_v15 = vmul.f32 %v134_v10, %v36_v12 }
  0x85   :  { %v53_v17 = vadd.f32 %v50_v16, %v39_v15  ;;  %v73_v18 = vmul.f32 %v128_v13, %v54_v14 }
  0x87   :  { %v55_v19 = vmax.f32 %v53_v17, 0.0  ;;  %75 = vadd.xlane.f32.xlu0 %v73_v18  ;;  %v82_v22 = vmul.f32 %v73_v18, %v54_v14 }
  0x89   :  { %v138_v20 = vpack.c.bf16 %v55_v19, %v54_v14  ;;  %v74_v21 = vmul.f32 %v128_v13, %v55_v19 }
  0x8b   :  { %139 = vst [vmem:[%s266_s4] sm:$0xff] %v138_v20   ;;  %77 = vadd.xlane.f32.xlu1 %v74_v21  ;;  %84 = vadd.xlane.f32.xlu0 %v82_v22  ;;  %v83_v23 = vmul.f32 %v74_v21, %v55_v19  ;;  %s147_s4 = scalar_lea.vmem %s98_s3, 256 }
  0x8c   :  { %p148_p0 = scmp.ne.s32.totalorder %s98_s3, %s147_s4  ;;  %p153_p2 = scmp.lt.s32.totalorder %s147_s4, %s147_s4 }
  0x8e   :  { %p154_p3 = por %p153_p2, %p152_p1 }
  0x8f   :  { %86 = vadd.xlane.f32.xlu0 %v83_v23 }
  0x90   :  { %p155_p4 = pnand %p154_p3, %p148_p0 }
 0x110   :  { %v76_v24 = vpop.xlane.xlu0 %75 }
 0x111   :  { %80 = vst.msk [vmem:[#allocation2] sm:$0xff] %vm79_vm0, %v76_v24 }
 0x114   :  { %v78_v25 = vpop.xlane.xlu1 %77  ;;  %v85_v26 = vpop.xlane.xlu0 %84 }
 0x115   :  { %81 = vst.msk [vmem:[#allocation2 + $0x8] sm:$0xff] %vm79_vm0, %v78_v25  ;;  %88 = vst.msk [vmem:[#allocation4] sm:$0xff] %vm79_vm0, %v85_v26 }
 0x116   :  { %158 = shalt.err (!%p155_p4)
}
 0x117   :  { %s194_s11 = smov 128   ;;  %s195_s12 = smov 8  }
 0x118   :  { %103 = dma.vmem_to_hbm [thread:$0]  %s98_s3, 256, %s267_s5, [#allocation3], %s194_s11, %s194_s11, %s195_s12   ;;  %v87_v27 = vpop.xlane.xlu0 %86 }
 0x119   :  { %89 = vst.msk [vmem:[#allocation4 + $0x8] sm:$0xff] %vm79_vm0, %v87_v27  ;;  %s167_s15 = scalar_lea.vmem %s110_s10, 256  ;;  %p172_p6 = scmp.lt.s32.totalorder %s110_s10, %s110_s10 }
 0x11a   :  { %p168_p5 = scmp.ne.s32.totalorder %s110_s10, %s167_s15  ;;  %p173_p7 = scmp.lt.s32.totalorder %s167_s15, %s167_s15 }
 0x11c   :  { %p174_p8 = por %p173_p7, %p172_p6 }
 0x11e   :  { %p175_p9 = pnand %p174_p8, %p168_p5 }
 0x120   :  { %178 = shalt.err (!%p175_p9)
}
 0x121   :  { %115 = dma.vmem_to_hbm [thread:$0]  %s110_s10, 256, %s268_s6, [#allocation5], %s194_s11, %s194_s11, %s195_s12  }
 0x122   :  { %187 = dma.done.wait [#allocation3], 256  }
 0x123   :  { %188 = vsyncadd [#allocation3], 4294967040 }
 0x124   :  { %189 = dma.done.wait [#allocation5], 256  }
 0x125   :  { %190 = vsyncadd [#allocation5], 4294967040 }
 0x126   :  { %124 = vsyncpa [#allocation3], 1 }
 0x127   :  { %125 = vsyncpa [#allocation5], 1 }

// kernel: _lambda_.21
= control target key start
LH: loop header
LB: loop body
LE: loop exit
PB: predicated region body
PF: predicated region fallthrough
CT: control target
= control target key end

     0   :  { %v253_v0 = vmov 0.0   ;;  %vm254_vm0 = vmmov 0   ;;  %v255_v2 = vmov 0   ;;  %vm169_vm1 = vcmask 7168   ;;  %s342_s1 = inlined_call_operand.vmem [shape: bf16[128,128], index: 1, kind: input, shape index: {}]   ;;  %s343_s2 = inlined_call_operand.vmem [shape: f32[16,1], index: 2, kind: input, shape index: {}]   ;;  %s344_s0 = inlined_call_operand.vmem [shape: bf16[16,128], index: 0, kind: input, shape index: {}]   ;;  %s345_s3 = inlined_call_operand.vmem [shape: f32[1,128], index: 3, kind: input, shape index: {}]   ;;  %s346_s4 = inlined_call_operand.vmem [shape: bf16[16,128], index: 4, kind: output, shape index: {0}]   ;;  %s347_s5 = inlined_call_operand.vmem [shape: f32[1,16,1], index: 5, kind: output, shape index: {1}]   ;;  %s348_s6 = inlined_call_operand.vmem [shape: f32[1,16,1], index: 6, kind: output, shape index: {2}]  }
   0x1   :  { %220 = vmatprep.subr.bf16.mxu0 %v253_v0  ;;  %v244_v1 = vld [vmem:[%s342_s1 + $0x38] sm:$0xff]   ;;  %236 = vmatprep.mubr.msk.bf16.mxu0 %vm254_vm0, %v253_v0  ;;  %v245_v3 = vld [vmem:[%s342_s1 + $0x30] sm:$0xff]   ;;  %v246_v4 = vld [vmem:[%s342_s1 + $0x28] sm:$0xff]  }
   0x2   :  { %243 = vset.pattern.permute.xlu0 %v255_v2  ;;  %221 = vmatpush3.bf16.msra.mxu0 %v244_v1  ;;  %v39_v5 = vld [vmem:[%s343_s2] sm:$0xff]  ;;  %v40_v7 = vld [vmem:[%s343_s2 + $0x8] sm:$0xff]  ;;  %v248_v8 = vld [vmem:[%s342_s1 + $0x18] sm:$0xff]  }
   0x3   :  { %222 = vmatprep.subr.bf16.mxu0 %v253_v0  ;;  %v247_v6 = vld [vmem:[%s342_s1 + $0x20] sm:$0xff]   ;;  %43 = vperm.xlu0 %243, %v39_v5   ;;  %v249_v9 = vld [vmem:[%s342_s1 + $0x10] sm:$0xff]   ;;  %v250_v10 = vld [vmem:[%s342_s1 + $0x8] sm:$0xff]  }
   0x4   :  { %v251_v11 = vld [vmem:[%s342_s1] sm:$0xff]  }
   0x5   :  { %v252_v12 = vld [vmem:[%s344_s0] sm:$0xff]  }
   0x6   :  { %223 = vmatpush3.bf16.msra.mxu0 %v245_v3  ;;  %v203_v15 = vld [vmem:[%s345_s3] ss:$0 sm:$0xff] }
   0x7   :  { %224 = vmatprep.subr.bf16.mxu0 %v253_v0  ;;  %48 = vperm.xlu0 %243, %v40_v7  }
   0xa   :  { %225 = vmatpush3.bf16.msra.mxu0 %v246_v4 }
   0xb   :  { %226 = vmatprep.subr.bf16.mxu0 %v253_v0 }
   0xe   :  { %227 = vmatpush3.bf16.msra.mxu0 %v247_v6 }
   0xf   :  { %228 = vmatprep.subr.bf16.mxu0 %v253_v0 }
  0x12   :  { %229 = vmatpush3.bf16.msra.mxu0 %v248_v8 }
  0x13   :  { %230 = vmatprep.subr.bf16.mxu0 %v253_v0 }
  0x16   :  { %231 = vmatpush3.bf16.msra.mxu0 %v249_v9 }
  0x17   :  { %232 = vmatprep.subr.bf16.mxu0 %v253_v0 }
  0x1a   :  { %233 = vmatpush3.bf16.msra.mxu0 %v250_v10 }
  0x1b   :  { %234 = vmatprep.subr.bf16.mxu0 %v253_v0 }
  0x1e   :  { %235 = vmatpush3.bf16.msra.mxu0 %v251_v11 }
  0x21   :  { %237 = vmatmul.mubr.bf16.vlgmr.msra.gmra.mxu0 %v252_v12 }
  0x7e   :  { %v44_v13 = vpop.permute.xlu0 %43 }
  0x82   :  { %v49_v19 = vpop.permute.xlu0 %48 }
  0xe1   :  { %v139_v14 = vpop.f32.mrf.mxu0 }
  0xe2   :  { %v140_v16 = vadd.f32 %v139_v14, %v44_v13 }
  0xe3   :  { %v238_v17 = vpop.f32.mrf.mxu0 }
  0xe4   :  { %v163_v18 = vmul.f32 %v203_v15, %v140_v16 }
  0xe5   :  { %v142_v20 = vpop.f32.mrf.mxu0 }
  0xe6   :  { %v143_v21 = vadd.f32 %v142_v20, %v49_v19  ;;  %165 = vadd.xlane.f32.xlu1 %v163_v18  ;;  %v172_v22 = vmul.f32 %v163_v18, %v140_v16 }
  0xe7   :  { %v239_v23 = vpop.f32.mrf.mxu0 }
  0xe8   :  { %v209_v24 = vpack.c.bf16 %v143_v21, %v140_v16  ;;  %174 = vadd.xlane.f32.xlu0 %v172_v22  ;;  %v164_v25 = vmul.f32 %v203_v15, %v143_v21 }
  0xea   :  { %210 = vst [vmem:[%s346_s4] sm:$0xff] %v209_v24   ;;  %167 = vadd.xlane.f32.xlu1 %v164_v25  ;;  %v173_v26 = vmul.f32 %v164_v25, %v143_v21 }
  0xee   :  { %176 = vadd.xlane.f32.xlu1 %v173_v26 }
 0x16f   :  { %v166_v27 = vpop.xlane.xlu1 %165 }
 0x170   :  { %170 = vst.msk [vmem:[%s347_s5] sm:$0xff] %vm169_vm1, %v166_v27 }
 0x171   :  { %v175_v28 = vpop.xlane.xlu0 %174 }
 0x172   :  { %178 = vst.msk [vmem:[%s348_s6] sm:$0xff] %vm169_vm1, %v175_v28 }
 0x173   :  { %v168_v29 = vpop.xlane.xlu1 %167 }
 0x174   :  { %171 = vst.msk [vmem:[%s347_s5 + $0x8] sm:$0xff] %vm169_vm1, %v168_v29 }
 0x177   :  { %v177_v30 = vpop.xlane.xlu1 %176 }
 0x178   :  { %179 = vst.msk [vmem:[%s348_s6 + $0x8] sm:$0xff] %vm169_vm1, %v177_v30 }

// kernel: _lambda_.23
= control target key start
LH: loop header
LB: loop body
LE: loop exit
PB: predicated region body
PF: predicated region fallthrough
CT: control target
= control target key end

     0   :  { %v427_v1 = vmov 0   ;;  %vm285_vm0 = vcmask 7168   ;;  %s576_s1 = inlined_call_operand.vmem [shape: bf16[256,128], index: 1, kind: input, shape index: {}]   ;;  %s577_s0 = inlined_call_operand.vmem [shape: bf16[32,256], index: 0, kind: input, shape index: {}]   ;;  %s578_s2 = inlined_call_operand.vmem [shape: f32[32,1], index: 2, kind: input, shape index: {}]   ;;  %s579_s3 = inlined_call_operand.vmem [shape: f32[1,128], index: 3, kind: input, shape index: {}]   ;;  %s580_s4 = inlined_call_operand.vmem [shape: bf16[32,128], index: 4, kind: output, shape index: {0}]   ;;  %s581_s5 = inlined_call_operand.vmem [shape: f32[1,32,1], index: 5, kind: output, shape index: {1}]   ;;  %s582_s6 = inlined_call_operand.vmem [shape: f32[1,32,1], index: 6, kind: output, shape index: {2}]  }
   0x1   :  { %v405_v0 = vld [vmem:[%s576_s1 + $0x78] sm:$0xff]   ;;  %403 = vset.pattern.permute.xlu0 %v427_v1  ;;  %404 = vset.pattern.permute.xlu1 %v427_v1  ;;  %v407_v3 = vld [vmem:[%s576_s1 + $0x70] sm:$0xff]   ;;  %v409_v5 = vld [vmem:[%s576_s1 + $0x68] sm:$0xff]  }
   0x2   :  { %v406_v2 = vld [vmem:[%s576_s1 + $0x38] sm:$0xff]   ;;  %358 = vmatprep.subr.bf16.mxu0 %v405_v0  ;;  %386 = vmatprep.subr.bf16.mxu1 %v405_v0  ;;  %v408_v4 = vld [vmem:[%s576_s1 + $0x30] sm:$0xff]   ;;  %v410_v6 = vld [vmem:[%s576_s1 + $0x28] sm:$0xff]  }
   0x3   :  { %359 = vmatpush3.bf16.msra.mxu0 %v406_v2  ;;  %394 = vmatpush3.bf16.msra.mxu1 %v406_v2  ;;  %v411_v7 = vld [vmem:[%s576_s1 + $0x60] sm:$0xff]   ;;  %v413_v9 = vld [vmem:[%s576_s1 + $0x58] sm:$0xff]   ;;  %v415_v11 = vld [vmem:[%s576_s1 + $0x50] sm:$0xff]  }
   0x4   :  { %360 = vmatprep.subr.bf16.mxu0 %v407_v3  ;;  %387 = vmatprep.subr.bf16.mxu1 %v407_v3  ;;  %v412_v8 = vld [vmem:[%s576_s1 + $0x20] sm:$0xff]   ;;  %v414_v10 = vld [vmem:[%s576_s1 + $0x18] sm:$0xff]   ;;  %v416_v14 = vld [vmem:[%s576_s1 + $0x10] sm:$0xff]  }
   0x5   :  { %v423_v12 = vld [vmem:[%s577_s0 + $0x4] ss:$8 sps:$4 sm:$0xff]   ;;  %v426_v13 = vld [vmem:[%s577_s0 + $0x14] ss:$8 sps:$4 sm:$0xff]   ;;  %v421_v23 = vld [vmem:[%s577_s0] ss:$8 sps:$4 sm:$0xff]  }
   0x6   :  { %v57_v15 = vld [vmem:[%s578_s2] sm:$0xff]  ;;  %v59_v16 = vld [vmem:[%s578_s2 + $0x10] sm:$0xff]  ;;  %v417_v17 = vld [vmem:[%s576_s1 + $0x48] sm:$0xff]   ;;  %229 = vmatprep.mubr.bf16.mxu0 %v423_v12  ;;  %237 = vmatprep.mubr.bf16.mxu1 %v426_v13 }
   0x7   :  { %361 = vmatpush3.bf16.msra.mxu0 %v408_v4  ;;  %395 = vmatpush3.bf16.msra.mxu1 %v408_v4  ;;  %v418_v18 = vld [vmem:[%s576_s1 + $0x8] sm:$0xff]   ;;  %v60_v20 = vld [vmem:[%s578_s2 + $0x18] sm:$0xff]  ;;  %v419_v21 = vld [vmem:[%s576_s1 + $0x40] sm:$0xff]  }
   0x8   :  { %362 = vmatprep.subr.bf16.mxu0 %v409_v5  ;;  %388 = vmatprep.subr.bf16.mxu1 %v409_v5  ;;  %v58_v19 = vld [vmem:[%s578_s2 + $0x8] sm:$0xff]  ;;  %v420_v22 = vld [vmem:[%s576_s1] sm:$0xff]   ;;  %v424_v24 = vld [vmem:[%s577_s0 + $0x10] ss:$8 sps:$4 sm:$0xff]  }
   0x9   :  { %63 = vperm.xlu0 %403, %v57_v15   ;;  %73 = vperm.xlu1 %404, %v59_v16   ;;  %v342_v35 = vld [vmem:[%s579_s3] ss:$0 sm:$0xff] }
   0xb   :  { %363 = vmatpush3.bf16.msra.mxu0 %v410_v6  ;;  %396 = vmatpush3.bf16.msra.mxu1 %v410_v6 }
   0xc   :  { %364 = vmatprep.subr.bf16.mxu0 %v411_v7  ;;  %389 = vmatprep.subr.bf16.mxu1 %v411_v7 }
   0xd   :  { %68 = vperm.xlu0 %403, %v58_v19   ;;  %78 = vperm.xlu1 %404, %v60_v20  }
   0xf   :  { %365 = vmatpush3.bf16.msra.mxu0 %v412_v8  ;;  %397 = vmatpush3.bf16.msra.mxu1 %v412_v8 }
  0x10   :  { %366 = vmatprep.subr.bf16.mxu0 %v413_v9  ;;  %390 = vmatprep.subr.bf16.mxu1 %v413_v9 }
  0x13   :  { %367 = vmatpush3.bf16.msra.mxu0 %v414_v10  ;;  %398 = vmatpush3.bf16.msra.mxu1 %v414_v10 }
  0x14   :  { %368 = vmatprep.subr.bf16.mxu0 %v415_v11  ;;  %391 = vmatprep.subr.bf16.mxu1 %v415_v11 }
  0x17   :  { %369 = vmatpush3.bf16.msra.mxu0 %v416_v14  ;;  %399 = vmatpush3.bf16.msra.mxu1 %v416_v14 }
  0x18   :  { %370 = vmatprep.subr.bf16.mxu0 %v417_v17  ;;  %392 = vmatprep.subr.bf16.mxu1 %v417_v17 }
  0x1b   :  { %371 = vmatpush3.bf16.msra.mxu0 %v418_v18  ;;  %400 = vmatpush3.bf16.msra.mxu1 %v418_v18 }
  0x1c   :  { %372 = vmatprep.subr.bf16.mxu0 %v419_v21  ;;  %393 = vmatprep.subr.bf16.mxu1 %v419_v21 }
  0x1f   :  { %373 = vmatpush3.bf16.msra.mxu0 %v420_v22  ;;  %401 = vmatpush3.bf16.msra.mxu1 %v420_v22 }
  0x22   :  { %230 = vmatmul.mubr.bf16.vlgmr.msra.gmra.mxu0 %v421_v23  ;;  %238 = vmatmul.mubr.bf16.vlgmr.msra.gmra.mxu1 %v424_v24 }
  0x84   :  { %v74_v25 = vpop.permute.xlu1 %73  ;;  %v64_v28 = vpop.permute.xlu0 %63 }
  0x88   :  { %v79_v37 = vpop.permute.xlu1 %78  ;;  %v69_v44 = vpop.permute.xlu0 %68 }
  0xe2   :  { %v374_v26 = vpop.f32.mrf.mxu0  ;;  %v380_v27 = vpop.f32.mrf.mxu1 }
  0xe4   :  { %v375_v29 = vpop.f32.mrf.mxu0  ;;  %v381_v30 = vpop.f32.mrf.mxu1 }
  0xe5   :  { %v376_v31 = vadd.f32 %v375_v29, %v374_v26  ;;  %v382_v32 = vadd.f32 %v381_v30, %v380_v27 }
  0xe6   :  { %v377_v33 = vpop.f32.mrf.mxu0  ;;  %v383_v34 = vpop.f32.mrf.mxu1 }
  0xe7   :  { %v232_v36 = vadd.f32 %v376_v31, %v64_v28  ;;  %v240_v40 = vadd.f32 %v382_v32, %v74_v25 }
  0xe8   :  { %v378_v38 = vpop.f32.mrf.mxu0  ;;  %v384_v39 = vpop.f32.mrf.mxu1 }
  0xe9   :  { %v379_v41 = vadd.f32 %v378_v38, %v377_v33  ;;  %v385_v42 = vadd.f32 %v384_v39, %v383_v34  ;;  %v273_v43 = vmul.f32 %v342_v35, %v232_v36  ;;  %v275_v50 = vmul.f32 %v342_v35, %v240_v40 }
  0xeb   :  { %v235_v45 = vadd.f32 %v379_v41, %v69_v44  ;;  %v243_v46 = vadd.f32 %v385_v42, %v79_v37  ;;  %277 = vadd.xlane.f32.xlu0 %v273_v43  ;;  %v290_v47 = vmul.f32 %v273_v43, %v232_v36  ;;  %v292_v53 = vmul.f32 %v275_v50, %v240_v40 }
  0xed   :  { %v350_v48 = vpack.c.bf16 %v235_v45, %v232_v36  ;;  %v355_v49 = vpack.c.bf16 %v243_v46, %v240_v40  ;;  %294 = vadd.xlane.f32.xlu1 %v290_v47  ;;  %v274_v51 = vmul.f32 %v342_v35, %v235_v45  ;;  %v276_v52 = vmul.f32 %v342_v35, %v243_v46 }
  0xef   :  { %351 = vst [vmem:[%s580_s4] sm:$0xff] %v350_v48   ;;  %357 = vst [vmem:[%s580_s4 + $0x8] sm:$0xff] %v355_v49   ;;  %281 = vadd.xlane.f32.xlu0 %v275_v50  ;;  %v291_v54 = vmul.f32 %v274_v51, %v235_v45  ;;  %v293_v55 = vmul.f32 %v276_v52, %v243_v46 }
  0xf1   :  { %279 = vadd.xlane.f32.xlu1 %v274_v51 }
  0xf3   :  { %283 = vadd.xlane.f32.xlu0 %v276_v52 }
  0xf5   :  { %298 = vadd.xlane.f32.xlu1 %v292_v53 }
  0xf7   :  { %296 = vadd.xlane.f32.xlu0 %v291_v54 }
  0xfb   :  { %300 = vadd.xlane.f32.xlu0 %v293_v55 }
 0x174   :  { %v278_v56 = vpop.xlane.xlu0 %277 }
 0x175   :  { %286 = vst.msk [vmem:[%s581_s5] sm:$0xff] %vm285_vm0, %v278_v56 }
 0x176   :  { %v295_v57 = vpop.xlane.xlu1 %294 }
 0x177   :  { %302 = vst.msk [vmem:[%s582_s6] sm:$0xff] %vm285_vm0, %v295_v57 }
 0x178   :  { %v282_v58 = vpop.xlane.xlu0 %281 }
 0x179   :  { %288 = vst.msk [vmem:[%s581_s5 + $0x10] sm:$0xff] %vm285_vm0, %v282_v58 }
 0x17a   :  { %v280_v59 = vpop.xlane.xlu1 %279 }
 0x17b   :  { %287 = vst.msk [vmem:[%s581_s5 + $0x8] sm:$0xff] %vm285_vm0, %v280_v59 }
 0x17c   :  { %v284_v60 = vpop.xlane.xlu0 %283 }
 0x17d   :  { %289 = vst.msk [vmem:[%s581_s5 + $0x18] sm:$0xff] %vm285_vm0, %v284_v60 }
 0x17e   :  { %v299_v61 = vpop.xlane.xlu1 %298 }
 0x17f   :  { %304 = vst.msk [vmem:[%s582_s6 + $0x10] sm:$0xff] %vm285_vm0, %v299_v61 }
 0x180   :  { %v297_v62 = vpop.xlane.xlu0 %296 }
 0x181   :  { %303 = vst.msk [vmem:[%s582_s6 + $0x8] sm:$0xff] %vm285_vm0, %v297_v62 }
 0x184   :  { %v301_v63 = vpop.xlane.xlu0 %300 }
 0x185   :  { %305 = vst.msk [vmem:[%s582_s6 + $0x18] sm:$0xff] %vm285_vm0, %v301_v63 }

// kernel: _lambda_.25
= control target key start
LH: loop header
LB: loop body
LE: loop exit
PB: predicated region body
PF: predicated region fallthrough
CT: control target
= control target key end

     0   :  { %12 = vsyncpa [#allocation3], 0  ;;  %v266_v2 = vmov 0   ;;  %s359_s0 = inlined_call_operand.vmem [shape: bf16[32,128], index: 0, kind: input, shape index: {}]   ;;  %s360_s1 = inlined_call_operand.vmem [shape: f32[32,1], index: 1, kind: input, shape index: {}]   ;;  %s361_s2 = inlined_call_operand.vmem [shape: f32[32,1], index: 2, kind: input, shape index: {}]   ;;  %s362_s3 = inlined_call_operand.vmem [shape: f32[1,128], index: 3, kind: input, shape index: {}]   ;;  %s363_s4 = inlined_call_operand.vmem [shape: bf16[32,128], index: 4, kind: output, shape index: {0}]   ;;  %s364_s5 = inlined_call_operand.hbm [shape: f32[1,32,1], index: 5, kind: output, shape index: {1}]   ;;  %s365_s6 = inlined_call_operand.hbm [shape: f32[1,32,1], index: 6, kind: output, shape index: {2}]  }
   0x1   :  { %v32_v0 = vld [vmem:[%s360_s1 + $0x10] sm:$0xff]  ;;  %v30_v1 = vld [vmem:[%s360_s1] sm:$0xff]  ;;  %221 = vset.pattern.permute.xlu1 %v266_v2  ;;  %220 = vset.pattern.permute.xlu0 %v266_v2  ;;  %v33_v3 = vld [vmem:[%s360_s1 + $0x18] sm:$0xff] }
   0x2   :  { %46 = vperm.xlu1 %221, %v32_v0   ;;  %36 = vperm.xlu0 %220, %v30_v1   ;;  %v31_v4 = vld [vmem:[%s360_s1 + $0x8] sm:$0xff] }
   0x3   :  { %13 = vsyncpa [#allocation5], 0  ;;  %v59_v5 = vld [vmem:[%s361_s2 + $0x8] sm:$0xff]  ;;  %v58_v6 = vld [vmem:[%s361_s2] sm:$0xff]  ;;  %vm129_vm0 = vcmask 7168   ;;  %s267_s19 = smov [#allocation2]  }
   0x4   :  { %v61_v7 = vld [vmem:[%s361_s2 + $0x18] sm:$0xff]  ;;  %v60_v8 = vld [vmem:[%s361_s2 + $0x10] sm:$0xff]  ;;  %v196_v11 = vld [vmem:[%s359_s0] sm:$0xff]  }
   0x5   :  { %v197_v12 = vunpack.c.l.bf16 %v196_v11  ;;  %v198_v13 = vunpack.c.h.bf16 %v196_v11  ;;  %v213_v14 = vld [vmem:[%s359_s0 + $0x8] sm:$0xff]   ;;  %v190_v25 = vld [vmem:[%s362_s3] ss:$0 sm:$0xff] }
   0x6   :  { %51 = vperm.xlu1 %221, %v33_v3   ;;  %41 = vperm.xlu0 %220, %v31_v4   ;;  %v201_v17 = vunpack.c.l.bf16 %v213_v14  ;;  %v202_v19 = vunpack.c.h.bf16 %v213_v14 }
   0xa   :  { %69 = vperm.xlu1 %221, %v59_v5   ;;  %64 = vperm.xlu0 %220, %v58_v6  }
   0xe   :  { %79 = vperm.xlu1 %221, %v61_v7   ;;  %74 = vperm.xlu0 %220, %v60_v8  }
  0x7d   :  { %v47_v9 = vpop.permute.xlu1 %46  ;;  %v37_v10 = vpop.permute.xlu0 %36 }
  0x7e   :  { %v54_v18 = vmul.f32 %v197_v12, %v37_v10  ;;  %v56_v26 = vmul.f32 %v201_v17, %v47_v9 }
  0x81   :  { %v52_v15 = vpop.permute.xlu1 %51  ;;  %v42_v16 = vpop.permute.xlu0 %41 }
  0x82   :  { %v55_v20 = vmul.f32 %v198_v13, %v42_v16  ;;  %v57_v27 = vmul.f32 %v202_v19, %v52_v15 }
  0x85   :  { %v70_v21 = vpop.permute.xlu1 %69  ;;  %v65_v22 = vpop.permute.xlu0 %64 }
  0x86   :  { %v83_v23 = vadd.f32 %v70_v21, %v55_v20  ;;  %v82_v24 = vadd.f32 %v65_v22, %v54_v18 }
  0x88   :  { %v87_v28 = vmax.f32 %v83_v23, 0.0  ;;  %v86_v29 = vmax.f32 %v82_v24, 0.0 }
  0x89   :  { %v80_v30 = vpop.permute.xlu1 %79  ;;  %v75_v31 = vpop.permute.xlu0 %74 }
  0x8a   :  { %v206_v32 = vpack.c.bf16 %v87_v28, %v86_v29  ;;  %v85_v33 = vadd.f32 %v80_v30, %v57_v27  ;;  %v84_v34 = vadd.f32 %v75_v31, %v56_v26  ;;  %v118_v35 = vmul.f32 %v190_v25, %v87_v28 }
  0x8b   :  { %v117_v36 = vmul.f32 %v190_v25, %v86_v29 }
  0x8c   :  { %207 = vst [vmem:[%s363_s4] sm:$0xff] %v206_v32   ;;  %v89_v37 = vmax.f32 %v85_v33, 0.0  ;;  %v88_v38 = vmax.f32 %v84_v34, 0.0  ;;  %123 = vadd.xlane.f32.xlu1 %v118_v35  ;;  %v135_v44 = vmul.f32 %v118_v35, %v87_v28 }
  0x8d   :  { %121 = vadd.xlane.f32.xlu0 %v117_v36  ;;  %v134_v41 = vmul.f32 %v117_v36, %v86_v29 }
  0x8e   :  { %v211_v39 = vpack.c.bf16 %v89_v37, %v88_v38  ;;  %v119_v40 = vmul.f32 %v190_v25, %v88_v38  ;;  %v120_v43 = vmul.f32 %v190_v25, %v89_v37 }
  0x90   :  { %214 = vst [vmem:[%s363_s4 + $0x8] sm:$0xff] %v211_v39   ;;  %138 = vadd.xlane.f32.xlu1 %v134_v41  ;;  %v136_v42 = vmul.f32 %v119_v40, %v88_v38  ;;  %v137_v45 = vmul.f32 %v120_v43, %v89_v37  ;;  %s157_s4 = sshll.u32 %s267_s19, 4  ;;  %s158_s4 = int_to_ptr.vmem [resolvable:$true] %s157_s4 }
  0x91   :  { %125 = vadd.xlane.f32.xlu0 %v119_v40  ;;  %s222_s20 = scalar_lea.vmem %s158_s4, 512  ;;  %p227_p1 = scmp.lt.s32.totalorder %s158_s4, %s158_s4 }
  0x92   :  { %p223_p0 = scmp.ne.s32.totalorder %s158_s4, %s222_s20  ;;  %p228_p2 = scmp.lt.s32.totalorder %s222_s20, %s222_s20 }
  0x94   :  { %142 = vadd.xlane.f32.xlu1 %v136_v42  ;;  %p229_p3 = por %p228_p2, %p227_p1 }
  0x95   :  { %127 = vadd.xlane.f32.xlu0 %v120_v43 }
  0x96   :  { %p230_p4 = pnand %p229_p3, %p223_p0 }
  0x99   :  { %140 = vadd.xlane.f32.xlu0 %v135_v44 }
  0x9d   :  { %144 = vadd.xlane.f32.xlu0 %v137_v45 }
 0x115   :  { %v124_v46 = vpop.xlane.xlu1 %123 }
 0x116   :  { %131 = vst.msk [vmem:[#allocation2 + $0x8] sm:$0xff] %vm129_vm0, %v124_v46  ;;  %v122_v47 = vpop.xlane.xlu0 %121 }
 0x117   :  { %130 = vst.msk [vmem:[#allocation2] sm:$0xff] %vm129_vm0, %v122_v47 }
 0x119   :  { %v139_v48 = vpop.xlane.xlu1 %138 }
 0x11a   :  { %v126_v49 = vpop.xlane.xlu0 %125  ;;  %146 = vst.msk [vmem:[#allocation4] sm:$0xff] %vm129_vm0, %v139_v48 }
 0x11b   :  { %132 = vst.msk [vmem:[#allocation2 + $0x10] sm:$0xff] %vm129_vm0, %v126_v49 }
 0x11d   :  { %v143_v50 = vpop.xlane.xlu1 %142 }
 0x11e   :  { %v128_v51 = vpop.xlane.xlu0 %127  ;;  %148 = vst.msk [vmem:[#allocation4 + $0x10] sm:$0xff] %vm129_vm0, %v143_v50 }
 0x11f   :  { %133 = vst.msk [vmem:[#allocation2 + $0x18] sm:$0xff] %vm129_vm0, %v128_v51 }
 0x120   :  { %233 = shalt.err (!%p230_p4)
}
 0x121   :  { %s268_s21 = smov 128   ;;  %s269_s22 = smov 8  }
 0x122   :  { %163 = dma.vmem_to_hbm [thread:$0]  %s158_s4, 512, %s364_s5, [#allocation3], %s268_s21, %s268_s21, %s269_s22   ;;  %v141_v52 = vpop.xlane.xlu0 %140 }
 0x123   :  { %s270_s25 = smov [#allocation4]   ;;  %147 = vst.msk [vmem:[#allocation4 + $0x8] sm:$0xff] %vm129_vm0, %v141_v52 }
 0x124   :  { %s169_s26 = sshll.u32 %s270_s25, 4  ;;  %s170_s26 = int_to_ptr.vmem [resolvable:$true] %s169_s26 }
 0x125   :  { %s242_s27 = scalar_lea.vmem %s170_s26, 512  ;;  %p247_p6 = scmp.lt.s32.totalorder %s170_s26, %s170_s26 }
 0x126   :  { %v145_v53 = vpop.xlane.xlu0 %144  ;;  %p243_p5 = scmp.ne.s32.totalorder %s170_s26, %s242_s27  ;;  %p248_p7 = scmp.lt.s32.totalorder %s242_s27, %s242_s27 }
 0x127   :  { %149 = vst.msk [vmem:[#allocation4 + $0x18] sm:$0xff] %vm129_vm0, %v145_v53 }
 0x128   :  { %p249_p8 = por %p248_p7, %p247_p6 }
 0x12a   :  { %p250_p9 = pnand %p249_p8, %p243_p5 }
 0x12c   :  { %253 = shalt.err (!%p250_p9)
}
 0x12d   :  { %175 = dma.vmem_to_hbm [thread:$0]  %s170_s26, 512, %s365_s6, [#allocation5], %s268_s21, %s268_s21, %s269_s22  }
 0x12e   :  { %262 = dma.done.wait [#allocation3], 512  }
 0x12f   :  { %263 = vsyncadd [#allocation3], 4294966784 }
 0x130   :  { %264 = dma.done.wait [#allocation5], 512  }
 0x131   :  { %265 = vsyncadd [#allocation5], 4294966784 }
 0x132   :  { %184 = vsyncpa [#allocation3], 1 }
 0x133   :  { %185 = vsyncpa [#allocation5], 1 }

// kernel: _lambda_.24
= control target key start
LH: loop header
LB: loop body
LE: loop exit
PB: predicated region body
PF: predicated region fallthrough
CT: control target
= control target key end

     0   :  { %v192_v0 = vmov 0   ;;  %vm127_vm0 = vcmask 7168   ;;  %s299_s1 = inlined_call_operand.vmem [shape: f32[32,1], index: 1, kind: input, shape index: {}]   ;;  %s300_s2 = inlined_call_operand.vmem [shape: f32[32,1], index: 2, kind: input, shape index: {}]   ;;  %s301_s0 = inlined_call_operand.vmem [shape: bf16[32,128], index: 0, kind: input, shape index: {}]   ;;  %s302_s3 = inlined_call_operand.vmem [shape: f32[1,128], index: 3, kind: input, shape index: {}]   ;;  %s303_s4 = inlined_call_operand.vmem [shape: bf16[32,128], index: 4, kind: output, shape index: {0}]   ;;  %s304_s5 = inlined_call_operand.vmem [shape: f32[1,32,1], index: 5, kind: output, shape index: {1}]   ;;  %s305_s6 = inlined_call_operand.vmem [shape: f32[1,32,1], index: 6, kind: output, shape index: {2}]  }
   0x1   :  { %191 = vset.pattern.permute.xlu1 %v192_v0  ;;  %190 = vset.pattern.permute.xlu0 %v192_v0  ;;  %v30_v1 = vld [vmem:[%s299_s1 + $0x10] sm:$0xff]  ;;  %v28_v2 = vld [vmem:[%s299_s1] sm:$0xff]  ;;  %v31_v3 = vld [vmem:[%s299_s1 + $0x18] sm:$0xff] }
   0x2   :  { %44 = vperm.xlu1 %191, %v30_v1   ;;  %34 = vperm.xlu0 %190, %v28_v2   ;;  %v29_v4 = vld [vmem:[%s299_s1 + $0x8] sm:$0xff]  ;;  %v56_v6 = vld [vmem:[%s300_s2] sm:$0xff]  ;;  %v59_v7 = vld [vmem:[%s300_s2 + $0x18] sm:$0xff] }
   0x3   :  { %v57_v5 = vld [vmem:[%s300_s2 + $0x8] sm:$0xff]  ;;  %v58_v8 = vld [vmem:[%s300_s2 + $0x10] sm:$0xff]  ;;  %v170_v11 = vld [vmem:[%s301_s0] sm:$0xff]  }
   0x4   :  { %v171_v12 = vunpack.c.l.bf16 %v170_v11  ;;  %v172_v13 = vunpack.c.h.bf16 %v170_v11  ;;  %v187_v14 = vld [vmem:[%s301_s0 + $0x8] sm:$0xff]   ;;  %v164_v25 = vld [vmem:[%s302_s3] ss:$0 sm:$0xff] }
   0x5   :  { %v175_v17 = vunpack.c.l.bf16 %v187_v14  ;;  %v176_v19 = vunpack.c.h.bf16 %v187_v14 }
   0x6   :  { %49 = vperm.xlu1 %191, %v31_v3   ;;  %39 = vperm.xlu0 %190, %v29_v4  }
   0xa   :  { %67 = vperm.xlu1 %191, %v57_v5   ;;  %62 = vperm.xlu0 %190, %v56_v6  }
   0xe   :  { %77 = vperm.xlu1 %191, %v59_v7   ;;  %72 = vperm.xlu0 %190, %v58_v8  }
  0x7d   :  { %v45_v9 = vpop.permute.xlu1 %44  ;;  %v35_v10 = vpop.permute.xlu0 %34 }
  0x7e   :  { %v52_v18 = vmul.f32 %v171_v12, %v35_v10  ;;  %v54_v26 = vmul.f32 %v175_v17, %v45_v9 }
  0x81   :  { %v50_v15 = vpop.permute.xlu1 %49  ;;  %v40_v16 = vpop.permute.xlu0 %39 }
  0x82   :  { %v53_v20 = vmul.f32 %v172_v13, %v40_v16  ;;  %v55_v27 = vmul.f32 %v176_v19, %v50_v15 }
  0x85   :  { %v68_v21 = vpop.permute.xlu1 %67  ;;  %v63_v22 = vpop.permute.xlu0 %62 }
  0x86   :  { %v81_v23 = vadd.f32 %v68_v21, %v53_v20  ;;  %v80_v24 = vadd.f32 %v63_v22, %v52_v18 }
  0x88   :  { %v85_v28 = vmax.f32 %v81_v23, 0.0  ;;  %v84_v29 = vmax.f32 %v80_v24, 0.0 }
  0x89   :  { %v78_v30 = vpop.permute.xlu1 %77  ;;  %v73_v31 = vpop.permute.xlu0 %72 }
  0x8a   :  { %v180_v32 = vpack.c.bf16 %v85_v28, %v84_v29  ;;  %v83_v33 = vadd.f32 %v78_v30, %v55_v27  ;;  %v82_v34 = vadd.f32 %v73_v31, %v54_v26  ;;  %v116_v35 = vmul.f32 %v164_v25, %v85_v28 }
  0x8b   :  { %v115_v36 = vmul.f32 %v164_v25, %v84_v29 }
  0x8c   :  { %181 = vst [vmem:[%s303_s4] sm:$0xff] %v180_v32   ;;  %v87_v37 = vmax.f32 %v83_v33, 0.0  ;;  %v86_v38 = vmax.f32 %v82_v34, 0.0  ;;  %121 = vadd.xlane.f32.xlu1 %v116_v35  ;;  %v133_v44 = vmul.f32 %v116_v35, %v85_v28 }
  0x8d   :  { %119 = vadd.xlane.f32.xlu0 %v115_v36  ;;  %v132_v41 = vmul.f32 %v115_v36, %v84_v29 }
  0x8e   :  { %v185_v39 = vpack.c.bf16 %v87_v37, %v86_v38  ;;  %v117_v40 = vmul.f32 %v164_v25, %v86_v38  ;;  %v118_v43 = vmul.f32 %v164_v25, %v87_v37 }
  0x90   :  { %188 = vst [vmem:[%s303_s4 + $0x8] sm:$0xff] %v185_v39   ;;  %136 = vadd.xlane.f32.xlu1 %v132_v41  ;;  %v134_v42 = vmul.f32 %v117_v40, %v86_v38  ;;  %v135_v45 = vmul.f32 %v118_v43, %v87_v37 }
  0x91   :  { %123 = vadd.xlane.f32.xlu0 %v117_v40 }
  0x94   :  { %140 = vadd.xlane.f32.xlu1 %v134_v42 }
  0x95   :  { %125 = vadd.xlane.f32.xlu0 %v118_v43 }
  0x99   :  { %138 = vadd.xlane.f32.xlu0 %v133_v44 }
  0x9d   :  { %142 = vadd.xlane.f32.xlu0 %v135_v45 }
 0x115   :  { %v122_v46 = vpop.xlane.xlu1 %121 }
 0x116   :  { %129 = vst.msk [vmem:[%s304_s5 + $0x8] sm:$0xff] %vm127_vm0, %v122_v46  ;;  %v120_v47 = vpop.xlane.xlu0 %119 }
 0x117   :  { %128 = vst.msk [vmem:[%s304_s5] sm:$0xff] %vm127_vm0, %v120_v47 }
 0x119   :  { %v137_v48 = vpop.xlane.xlu1 %136 }
 0x11a   :  { %v124_v49 = vpop.xlane.xlu0 %123  ;;  %144 = vst.msk [vmem:[%s305_s6] sm:$0xff] %vm127_vm0, %v137_v48 }
 0x11b   :  { %130 = vst.msk [vmem:[%s304_s5 + $0x10] sm:$0xff] %vm127_vm0, %v124_v49 }
 0x11d   :  { %v141_v50 = vpop.xlane.xlu1 %140 }
 0x11e   :  { %v126_v51 = vpop.xlane.xlu0 %125  ;;  %146 = vst.msk [vmem:[%s305_s6 + $0x10] sm:$0xff] %vm127_vm0, %v141_v50 }
 0x11f   :  { %131 = vst.msk [vmem:[%s304_s5 + $0x18] sm:$0xff] %vm127_vm0, %v126_v51 }
 0x122   :  { %v139_v52 = vpop.xlane.xlu0 %138 }
 0x123   :  { %145 = vst.msk [vmem:[%s305_s6 + $0x8] sm:$0xff] %vm127_vm0, %v139_v52 }
 0x126   :  { %v143_v53 = vpop.xlane.xlu0 %142 }
 0x127   :  { %147 = vst.msk [vmem:[%s305_s6 + $0x18] sm:$0xff] %vm127_vm0, %v143_v53 }

// kernel: _lambda_.26
= control target key start
LH: loop header
LB: loop body
LE: loop exit
PB: predicated region body
PF: predicated region fallthrough
CT: control target
= control target key end

     0   :  { %v550_v1 = vmov 0   ;;  %vm88_vm0 = vcmask 785408   ;;  %s551_s27 = smov 126   ;;  %s552_s28 = smov 124   ;;  %vm382_vm1 = vcmask 7168   ;;  %s683_s1 = inlined_call_operand.vmem [shape: bf16[96,128], index: 1, kind: input, shape index: {}]   ;;  %s684_s0 = inlined_call_operand.vmem [shape: bf16[3,32,96], index: 0, kind: input, shape index: {}]   ;;  %s685_s2 = inlined_call_operand.vmem [shape: f32[32,1], index: 2, kind: input, shape index: {}]   ;;  %s686_s3 = inlined_call_operand.vmem [shape: f32[1,128], index: 3, kind: input, shape index: {}]   ;;  %s687_s4 = inlined_call_operand.vmem [shape: bf16[32,128], index: 4, kind: output, shape index: {0}]   ;;  %s688_s6 = inlined_call_operand.vmem [shape: f32[1,32,1], index: 6, kind: output, shape index: {2}]   ;;  %s689_s5 = inlined_call_operand.vmem [shape: f32[1,32,1], index: 5, kind: output, shape index: {1}]  }
   0x1   :  { %v538_v0 = vld [vmem:[%s683_s1 + $0x28] sm:$0xff]   ;;  %536 = vset.pattern.permute.xlu0 %v550_v1  ;;  %537 = vset.pattern.permute.xlu1 %v550_v1  ;;  %v539_v2 = vld [vmem:[%s683_s1 + $0x20] sm:$0xff]   ;;  %v540_v3 = vld [vmem:[%s683_s1 + $0x18] sm:$0xff]  }
   0x2   :  { %485 = vmatprep.subr.bf16.mxu0 %v538_v0  ;;  %501 = vmatprep.subr.bf16.mxu1 %v538_v0  ;;  %v544_v4 = vld [vmem:[%s684_s0 + $0x10] sm:$0xff]   ;;  %v548_v6 = vld [vmem:[%s684_s0] sm:$0xff]   ;;  %v542_v7 = vld [vmem:[%s683_s1 + $0x8] sm:$0xff]  }
   0x3   :  { %486 = vmatpush3.bf16.msra.mxu0 %v538_v0  ;;  %502 = vmatpush3.bf16.msra.mxu1 %v538_v0  ;;  %v541_v5 = vld [vmem:[%s683_s1 + $0x10] sm:$0xff]   ;;  %v315_v8 = vld [vmem:[%s685_s2] sm:$0xff]  ;;  %v316_v10 = vld [vmem:[%s685_s2 + $0x8] sm:$0xff] }
   0x4   :  { %487 = vmatprep.subr.bf16.mxu0 %v539_v2  ;;  %503 = vmatprep.subr.bf16.mxu1 %v539_v2  ;;  %v317_v9 = vld [vmem:[%s685_s2 + $0x10] sm:$0xff]  ;;  %v318_v11 = vld [vmem:[%s685_s2 + $0x18] sm:$0xff]  ;;  %v543_v12 = vld [vmem:[%s683_s1] sm:$0xff]  }
   0x5   :  { %497 = vmatprep.mubr.msk.bf16.mxu0 %vm88_vm0, %v544_v4  ;;  %513 = vmatprep.mubr.msk.bf16.mxu1 %vm88_vm0, %v548_v6  ;;  %v545_v13 = vld [vmem:[%s684_s0 + $0x18] sm:$0xff]   ;;  %v549_v14 = vld [vmem:[%s684_s0 + $0x8] sm:$0xff]   ;;  %v546_v15 = vld [vmem:[%s684_s0 + $0x20] sm:$0xff]  }
   0x6   :  { %321 = vperm.xlu0 %536, %v315_v8   ;;  %331 = vperm.xlu1 %537, %v317_v9   ;;  %v547_v16 = vld [vmem:[%s684_s0 + $0x28] sm:$0xff]   ;;  %v445_v40 = vld [vmem:[%s686_s3] ss:$0 sm:$0xff] }
   0x7   :  { %488 = vmatpush3.bf16.msra.mxu0 %v539_v2  ;;  %504 = vmatpush3.bf16.msra.mxu1 %v539_v2 }
   0x8   :  { %489 = vmatprep.subr.bf16.mxu0 %v540_v3  ;;  %505 = vmatprep.subr.bf16.mxu1 %v540_v3 }
   0xa   :  { %326 = vperm.xlu0 %536, %v316_v10   ;;  %336 = vperm.xlu1 %537, %v318_v11  }
   0xb   :  { %490 = vmatpush3.bf16.msra.mxu0 %v540_v3  ;;  %506 = vmatpush3.bf16.msra.mxu1 %v540_v3 }
   0xc   :  { %491 = vmatprep.subr.bf16.mxu0 %v541_v5  ;;  %507 = vmatprep.subr.bf16.mxu1 %v541_v5 }
   0xf   :  { %492 = vmatpush3.bf16.msra.mxu0 %v541_v5  ;;  %508 = vmatpush3.bf16.msra.mxu1 %v541_v5 }
  0x10   :  { %493 = vmatprep.subr.bf16.mxu0 %v542_v7  ;;  %509 = vmatprep.subr.bf16.mxu1 %v542_v7 }
  0x13   :  { %494 = vmatpush3.bf16.msra.mxu0 %v542_v7  ;;  %510 = vmatpush3.bf16.msra.mxu1 %v542_v7 }
  0x14   :  { %495 = vmatprep.subr.bf16.mxu0 %v543_v12  ;;  %511 = vmatprep.subr.bf16.mxu1 %v543_v12 }
  0x17   :  { %496 = vmatpush3.bf16.msra.mxu0 %v543_v12  ;;  %512 = vmatpush3.bf16.msra.mxu1 %v543_v12 }
  0x18   :  { %517 = vmatprep.subr.bf16.mxu0 %v538_v0 }
  0x1a   :  { %498 = vmatmul.mubr.msk.bf16.vlgmr.msra.gmra.mxu0 %vm88_vm0, %v545_v13  ;;  %514 = vmatmul.mubr.msk.bf16.vlgmr.msra.gmra.mxu1 %vm88_vm0, %v549_v14 }
  0x1b   :  { %518 = vmatpush3.bf16.msra.mxu0 %v538_v0  ;;  %529 = vmatprep.mubr.msk.bf16.mxu0 %vm88_vm0, %v546_v15 }
  0x1c   :  { %519 = vmatprep.subr.bf16.mxu0 %v539_v2 }
  0x1f   :  { %520 = vmatpush3.bf16.msra.mxu0 %v539_v2 }
  0x20   :  { %521 = vmatprep.subr.bf16.mxu0 %v540_v3 }
  0x23   :  { %522 = vmatpush3.bf16.msra.mxu0 %v540_v3 }
  0x24   :  { %523 = vmatprep.subr.bf16.mxu0 %v541_v5 }
  0x27   :  { %524 = vmatpush3.bf16.msra.mxu0 %v541_v5 }
  0x28   :  { %525 = vmatprep.subr.bf16.mxu0 %v542_v7 }
  0x2b   :  { %526 = vmatpush3.bf16.msra.mxu0 %v542_v7 }
  0x2c   :  { %527 = vmatprep.subr.bf16.mxu0 %v543_v12 }
  0x2f   :  { %528 = vmatpush3.bf16.msra.mxu0 %v543_v12 }
  0x32   :  { %530 = vmatmul.mubr.msk.bf16.vlgmr.msra.gmra.mxu0 %vm88_vm0, %v547_v16 }
  0x81   :  { %v322_v25 = vpop.permute.xlu0 %321  ;;  %v332_v26 = vpop.permute.xlu1 %331 }
  0x85   :  { %v327_v27 = vpop.permute.xlu0 %326  ;;  %v337_v28 = vpop.permute.xlu1 %336 }
  0xda   :  { %v499_v17 = vpop.f32.mrf.mxu0  ;;  %v515_v29 = vpop.f32.mrf.mxu1 }
  0xdb   :  { %152 = vrot.lane.b32.xlu0 %v499_v17, %s551_s27 }
  0xdc   :  { %v129_v18 = vpop.f32.mrf.mxu0  ;;  %v210_v31 = vpop.f32.mrf.mxu1 }
  0xde   :  { %v500_v19 = vpop.f32.mrf.mxu0  ;;  %v516_v34 = vpop.f32.mrf.mxu1 }
  0xdf   :  { %148 = vrot.lane.b32.xlu0 %v129_v18, %s551_s27  ;;  %154 = vrot.lane.b32.xlu1 %v500_v19, %s551_s27 }
  0xe0   :  { %v132_v20 = vpop.f32.mrf.mxu0  ;;  %v213_v36 = vpop.f32.mrf.mxu1 }
  0xe3   :  { %150 = vrot.lane.b32.xlu1 %v132_v20, %s551_s27 }
  0xf2   :  { %v531_v21 = vpop.f32.mrf.mxu0 }
  0xf4   :  { %v280_v22 = vpop.f32.mrf.mxu0 }
  0xf5   :  { %299 = vrot.lane.b32.xlu0 %v280_v22, %s552_s28 }
  0xf6   :  { %v532_v23 = vpop.f32.mrf.mxu0 }
  0xf8   :  { %v283_v24 = vpop.f32.mrf.mxu0 }
  0xf9   :  { %303 = vrot.lane.b32.xlu0 %v531_v21, %s552_s28  ;;  %301 = vrot.lane.b32.xlu1 %v283_v24, %s552_s28 }
  0xfd   :  { %305 = vrot.lane.b32.xlu1 %v532_v23, %s552_s28 }
 0x14d   :  { %v153_v30 = vpop.permute.xlu0 %152 }
 0x14e   :  { %v219_v41 = vadd.f32 %v515_v29, %v153_v30 }
 0x151   :  { %v155_v32 = vpop.permute.xlu1 %154  ;;  %v149_v33 = vpop.permute.xlu0 %148 }
 0x152   :  { %v211_v35 = vadd.f32 %v210_v31, %v149_v33  ;;  %v222_v49 = vadd.f32 %v516_v34, %v155_v32 }
 0x155   :  { %v151_v37 = vpop.permute.xlu1 %150 }
 0x156   :  { %v214_v42 = vadd.f32 %v213_v36, %v151_v37 }
 0x167   :  { %v300_v38 = vpop.permute.xlu0 %299 }
 0x168   :  { %v311_v39 = vadd.f32 %v300_v38, %v211_v35 }
 0x16a   :  { %v339_v43 = vadd.f32 %v322_v25, %v311_v39 }
 0x16b   :  { %v304_v44 = vpop.permute.xlu0 %303  ;;  %v302_v45 = vpop.permute.xlu1 %301 }
 0x16c   :  { %v313_v46 = vadd.f32 %v304_v44, %v219_v41  ;;  %v312_v47 = vadd.f32 %v302_v45, %v214_v42  ;;  %v370_v48 = vmul.f32 %v445_v40, %v339_v43 }
 0x16e   :  { %v341_v50 = vadd.f32 %v332_v26, %v313_v46  ;;  %v340_v51 = vadd.f32 %v327_v27, %v312_v47  ;;  %v387_v52 = vmul.f32 %v370_v48, %v339_v43 }
 0x16f   :  { %v306_v53 = vpop.permute.xlu1 %305 }
 0x170   :  { %v453_v54 = vpack.c.bf16 %v340_v51, %v339_v43  ;;  %v314_v55 = vadd.f32 %v306_v53, %v222_v49  ;;  %391 = vadd.xlane.f32.xlu1 %v387_v52  ;;  %v372_v56 = vmul.f32 %v445_v40, %v341_v50  ;;  %v371_v58 = vmul.f32 %v445_v40, %v340_v51 }
 0x172   :  { %454 = vst [vmem:[%s687_s4] sm:$0xff] %v453_v54   ;;  %v342_v57 = vadd.f32 %v337_v28, %v314_v55  ;;  %378 = vadd.xlane.f32.xlu0 %v372_v56  ;;  %v389_v60 = vmul.f32 %v372_v56, %v341_v50  ;;  %v388_v62 = vmul.f32 %v371_v58, %v340_v51 }
 0x174   :  { %v458_v59 = vpack.c.bf16 %v342_v57, %v341_v50  ;;  %376 = vadd.xlane.f32.xlu1 %v371_v58  ;;  %v373_v61 = vmul.f32 %v445_v40, %v342_v57 }
 0x176   :  { %460 = vst [vmem:[%s687_s4 + $0x8] sm:$0xff] %v458_v59   ;;  %374 = vadd.xlane.f32.xlu0 %v370_v48  ;;  %v390_v63 = vmul.f32 %v373_v61, %v342_v57 }
 0x178   :  { %395 = vadd.xlane.f32.xlu1 %v389_v60 }
 0x17a   :  { %380 = vadd.xlane.f32.xlu0 %v373_v61 }
 0x17e   :  { %393 = vadd.xlane.f32.xlu0 %v388_v62 }
 0x182   :  { %397 = vadd.xlane.f32.xlu0 %v390_v63 }
 0x1f9   :  { %v392_v0 = vpop.xlane.xlu1 %391 }
 0x1fa   :  { %399 = vst.msk [vmem:[%s688_s6] sm:$0xff] %vm382_vm1, %v392_v0 }
 0x1fb   :  { %v379_v1 = vpop.xlane.xlu0 %378 }
 0x1fc   :  { %385 = vst.msk [vmem:[%s689_s5 + $0x10] sm:$0xff] %vm382_vm1, %v379_v1 }
 0x1fd   :  { %v377_v2 = vpop.xlane.xlu1 %376 }
 0x1fe   :  { %384 = vst.msk [vmem:[%s689_s5 + $0x8] sm:$0xff] %vm382_vm1, %v377_v2 }
 0x1ff   :  { %v375_v3 = vpop.xlane.xlu0 %374 }
 0x200   :  { %383 = vst.msk [vmem:[%s689_s5] sm:$0xff] %vm382_vm1, %v375_v3 }
 0x201   :  { %v396_v4 = vpop.xlane.xlu1 %395 }
 0x202   :  { %401 = vst.msk [vmem:[%s688_s6 + $0x10] sm:$0xff] %vm382_vm1, %v396_v4 }
 0x203   :  { %v381_v5 = vpop.xlane.xlu0 %380 }
 0x204   :  { %386 = vst.msk [vmem:[%s689_s5 + $0x18] sm:$0xff] %vm382_vm1, %v381_v5 }
 0x207   :  { %v394_v6 = vpop.xlane.xlu0 %393 }
 0x208   :  { %400 = vst.msk [vmem:[%s688_s6 + $0x8] sm:$0xff] %vm382_vm1, %v394_v6 }
 0x20b   :  { %v398_v7 = vpop.xlane.xlu0 %397 }
 0x20c   :  { %402 = vst.msk [vmem:[%s688_s6 + $0x18] sm:$0xff] %vm382_vm1, %v398_v7 }

// kernel: _lambda_.28
= control target key start
LH: loop header
LB: loop body
LE: loop exit
PB: predicated region body
PF: predicated region fallthrough
CT: control target
= control target key end

     0   :  { %v1032_v1 = vmov 0   ;;  %vm163_vm0 = vcmask 785408   ;;  %s1033_s9 = smov 127   ;;  %vm308_vm1 = vcmask 1039360   ;;  %vm614_vm2 = vcmask 1031168   ;;  %s1512_s1 = inlined_call_operand.vmem [shape: bf16[96,384], index: 1, kind: input, shape index: {}]   ;;  %s1513_s0 = inlined_call_operand.vmem [shape: bf16[3,32,96], index: 0, kind: input, shape index: {}]   ;;  %s1514_s2 = inlined_call_operand.vmem [shape: f32[32,1], index: 2, kind: input, shape index: {}]   ;;  %s1515_s4 = inlined_call_operand.vmem [shape: bf16[32,384], index: 4, kind: input, shape index: {}]   ;;  %s1516_s3 = inlined_call_operand.vmem [shape: f32[1,384], index: 3, kind: input, shape index: {}]   ;;  %s1517_s5 = inlined_call_operand.vmem [shape: bf16[32,384], index: 5, kind: output, shape index: {0}]   ;;  %s1518_s6 = inlined_call_operand.vmem [shape: f32[1,32,1], index: 6, kind: output, shape index: {1}]   ;;  %s1519_s7 = inlined_call_operand.vmem [shape: f32[1,32,1], index: 7, kind: output, shape index: {2}]  }
   0x1   :  { %v1078_v0 = vld [vmem:[%s1512_s1 + $0x7c] ss:$12 sps:$4 sm:$0xff]   ;;  %202 = vmatprep.mubr.bf16.mxu0 %v1032_v1  ;;  %1000 = vset.pattern.permute.xlu0 %v1032_v1  ;;  %v1085_v2 = vld [vmem:[%s1512_s1 + $0x80] ss:$12 sps:$4 sm:$0xff]   ;;  %v1092_v3 = vld [vmem:[%s1512_s1 + $0x78] ss:$12 sps:$4 sm:$0xff]  }
   0x2   :  { %1001 = vset.pattern.permute.xlu1 %v1032_v1  ;;  %174 = vmatprep.subr.bf16.mxu0 %v1078_v0  ;;  %v1098_v4 = vld [vmem:[%s1512_s1 + $0x64] ss:$12 sps:$4 sm:$0xff]   ;;  %v1105_v5 = vld [vmem:[%s1512_s1 + $0x68] ss:$12 sps:$4 sm:$0xff]   ;;  %v1110_v6 = vld [vmem:[%s1512_s1 + $0x60] ss:$12 sps:$4 sm:$0xff]  }
   0x3   :  { %949 = vmatprep.subr.bf16.mxu1 %v1085_v2  ;;  %175 = vmatpush1.bf16.msra.mxu0 %v1092_v3  ;;  %v1116_v7 = vld [vmem:[%s1512_s1 + $0x4c] ss:$12 sps:$4 sm:$0xff]   ;;  %v1122_v8 = vld [vmem:[%s1512_s1 + $0x50] ss:$12 sps:$4 sm:$0xff]   ;;  %v1127_v9 = vld [vmem:[%s1512_s1 + $0x48] ss:$12 sps:$4 sm:$0xff]  }
   0x4   :  { %950 = vmatpush3.bf16.msra.mxu1 %v1085_v2  ;;  %176 = vmatprep.subr.bf16.mxu0 %v1098_v4  ;;  %v1134_v10 = vld [vmem:[%s1512_s1 + $0x34] ss:$12 sps:$4 sm:$0xff]   ;;  %v1141_v11 = vld [vmem:[%s1512_s1 + $0x38] ss:$12 sps:$4 sm:$0xff]   ;;  %v1148_v12 = vld [vmem:[%s1512_s1 + $0x30] ss:$12 sps:$4 sm:$0xff]  }
   0x5   :  { %951 = vmatprep.subr.bf16.mxu1 %v1105_v5  ;;  %v1155_v13 = vld [vmem:[%s1512_s1 + $0x1c] ss:$12 sps:$4 sm:$0xff]   ;;  %v1160_v14 = vld [vmem:[%s1512_s1 + $0x20] ss:$12 sps:$4 sm:$0xff]   ;;  %v1026_v15 = vld [vmem:[%s1513_s0 + $0x10] sm:$0xff]   ;;  %vm816_vm3 = vcmask 7168  }
   0x6   :  { %v1168_v16 = vld [vmem:[%s1512_s1 + $0x18] ss:$12 sps:$4 sm:$0xff]   ;;  %v1182_v18 = vld [vmem:[%s1512_s1 + $0x8] ss:$12 sps:$4 sm:$0xff]   ;;  %961 = vmatprep.mubr.msk.bf16.mxu1 %vm163_vm0, %v1026_v15  ;;  %v1190_v19 = vld [vmem:[%s1512_s1] ss:$12 sps:$4 sm:$0xff]  }
   0x7   :  { %177 = vmatpush1.bf16.msra.mxu0 %v1110_v6  ;;  %v1175_v17 = vld [vmem:[%s1512_s1 + $0x4] ss:$12 sps:$4 sm:$0xff]   ;;  %v656_v21 = vld [vmem:[%s1514_s2 + $0x8] sm:$0xff]  ;;  %v1027_v22 = vld [vmem:[%s1513_s0 + $0x18] sm:$0xff]  }
   0x8   :  { %952 = vmatpush3.bf16.msra.mxu1 %v1105_v5  ;;  %178 = vmatprep.subr.bf16.mxu0 %v1116_v7  ;;  %v655_v20 = vld [vmem:[%s1514_s2] sm:$0xff]  ;;  %v658_v23 = vld [vmem:[%s1514_s2 + $0x18] sm:$0xff]  ;;  %v657_v24 = vld [vmem:[%s1514_s2 + $0x10] sm:$0xff] }
   0x9   :  { %953 = vmatprep.subr.bf16.mxu1 %v1122_v8  ;;  %661 = vperm.xlu0 %1000, %v655_v20   ;;  %v1028_v25 = vld [vmem:[%s1513_s0] sm:$0xff]   ;;  %v1029_v26 = vld [vmem:[%s1513_s0 + $0x8] sm:$0xff]  }
   0xa   :  { %666 = vperm.xlu1 %1001, %v656_v21   ;;  %v1030_v27 = vld [vmem:[%s1513_s0 + $0x20] sm:$0xff]   ;;  %v1031_v28 = vld [vmem:[%s1513_s0 + $0x28] sm:$0xff]   ;;  %s1034_s0 = smov 126  }
   0xb   :  { %179 = vmatpush1.bf16.msra.mxu0 %v1127_v9  ;;  %v1331_v21 = vld [vmem:[%s1515_s4 + $0x8] ss:$12 sps:$4 sm:$0xff]  }
   0xc   :  { %954 = vmatpush3.bf16.msra.mxu1 %v1122_v8  ;;  %180 = vmatprep.subr.bf16.mxu0 %v1134_v10 }
   0xd   :  { %955 = vmatprep.subr.bf16.mxu1 %v1141_v11  ;;  %676 = vperm.xlu0 %1000, %v658_v23  }
   0xe   :  { %671 = vperm.xlu1 %1001, %v657_v24  }
   0xf   :  { %181 = vmatpush1.bf16.msra.mxu0 %v1148_v12 }
  0x10   :  { %956 = vmatpush3.bf16.msra.mxu1 %v1141_v11  ;;  %182 = vmatprep.subr.bf16.mxu0 %v1155_v13 }
  0x11   :  { %957 = vmatprep.subr.bf16.mxu1 %v1160_v14 }
  0x13   :  { %183 = vmatpush1.bf16.msra.mxu0 %v1168_v16 }
  0x14   :  { %958 = vmatpush3.bf16.msra.mxu1 %v1160_v14  ;;  %184 = vmatprep.subr.bf16.mxu0 %v1175_v17 }
  0x15   :  { %959 = vmatprep.subr.bf16.mxu1 %v1182_v18 }
  0x17   :  { %185 = vmatpush1.bf16.msra.mxu0 %v1190_v19 }
  0x18   :  { %960 = vmatpush3.bf16.msra.mxu1 %v1182_v18  ;;  %357 = vmatprep.subr.bf16.mxu0 %v1078_v0 }
  0x19   :  { %965 = vmatprep.subr.bf16.mxu1 %v1085_v2 }
  0x1a   :  { %889 = vmatmul.mubr.msk.bf16.vlgmr.msra.gmra.mxu0 %vm163_vm0, %v1026_v15 }
  0x1b   :  { %962 = vmatmul.mubr.msk.bf16.vlgmr.msra.gmra.mxu1 %vm163_vm0, %v1027_v22  ;;  %358 = vmatpush1.bf16.msra.mxu0 %v1092_v3 }
  0x1c   :  { %966 = vmatpush3.bf16.msra.mxu1 %v1085_v2  ;;  %359 = vmatprep.subr.bf16.mxu0 %v1098_v4 }
  0x1d   :  { %967 = vmatprep.subr.bf16.mxu1 %v1105_v5  ;;  %212 = vmatprep.mubr.bf16.mxu0 %v1032_v1 }
  0x1e   :  { %977 = vmatprep.mubr.msk.bf16.mxu1 %vm163_vm0, %v1028_v25 }
  0x1f   :  { %360 = vmatpush1.bf16.msra.mxu0 %v1110_v6 }
  0x20   :  { %968 = vmatpush3.bf16.msra.mxu1 %v1105_v5  ;;  %361 = vmatprep.subr.bf16.mxu0 %v1116_v7 }
  0x21   :  { %969 = vmatprep.subr.bf16.mxu1 %v1122_v8 }
  0x22   :  { %890 = vmatmul.mubr.msk.bf16.gmra.mxu0 %vm163_vm0, %v1027_v22  ;;  %v723_v22 = vld [vmem:[%s1516_s3] sm:$0x7] }
  0x23   :  { %362 = vmatpush1.bf16.msra.mxu0 %v1127_v9  ;;  %385 = vmatprep.mubr.bf16.mxu0 %v1032_v1 }
  0x24   :  { %970 = vmatpush3.bf16.msra.mxu1 %v1122_v8  ;;  %363 = vmatprep.subr.bf16.mxu0 %v1134_v10 }
  0x25   :  { %971 = vmatprep.subr.bf16.mxu1 %v1141_v11 }
  0x27   :  { %364 = vmatpush1.bf16.msra.mxu0 %v1148_v12 }
  0x28   :  { %972 = vmatpush3.bf16.msra.mxu1 %v1141_v11  ;;  %365 = vmatprep.subr.bf16.mxu0 %v1155_v13 }
  0x29   :  { %973 = vmatprep.subr.bf16.mxu1 %v1160_v14 }
  0x2b   :  { %366 = vmatpush1.bf16.msra.mxu0 %v1168_v16 }
  0x2c   :  { %974 = vmatpush3.bf16.msra.mxu1 %v1160_v14  ;;  %367 = vmatprep.subr.bf16.mxu0 %v1175_v17 }
  0x2d   :  { %975 = vmatprep.subr.bf16.mxu1 %v1182_v18 }
  0x2f   :  { %368 = vmatpush1.bf16.msra.mxu0 %v1190_v19 }
  0x30   :  { %976 = vmatpush3.bf16.msra.mxu1 %v1182_v18  ;;  %480 = vmatprep.subr.bf16.mxu0 %v1078_v0 }
  0x31   :  { %981 = vmatprep.subr.bf16.mxu1 %v1085_v2 }
  0x32   :  { %895 = vmatmul.mubr.msk.bf16.vlgmr.msra.gmra.mxu0 %vm163_vm0, %v1028_v25 }
  0x33   :  { %978 = vmatmul.mubr.msk.bf16.vlgmr.msra.gmra.mxu1 %vm163_vm0, %v1029_v26  ;;  %481 = vmatpush1.bf16.msra.mxu0 %v1092_v3 }
  0x34   :  { %982 = vmatpush3.bf16.msra.mxu1 %v1085_v2  ;;  %482 = vmatprep.subr.bf16.mxu0 %v1098_v4 }
  0x35   :  { %983 = vmatprep.subr.bf16.mxu1 %v1105_v5  ;;  %395 = vmatprep.mubr.bf16.mxu0 %v1032_v1 }
  0x36   :  { %993 = vmatprep.mubr.msk.bf16.mxu1 %vm163_vm0, %v1030_v27 }
  0x37   :  { %483 = vmatpush1.bf16.msra.mxu0 %v1110_v6 }
  0x38   :  { %984 = vmatpush3.bf16.msra.mxu1 %v1105_v5  ;;  %484 = vmatprep.subr.bf16.mxu0 %v1116_v7 }
  0x39   :  { %985 = vmatprep.subr.bf16.mxu1 %v1122_v8 }
  0x3a   :  { %896 = vmatmul.mubr.msk.bf16.gmra.mxu0 %vm163_vm0, %v1029_v26 }
  0x3b   :  { %485 = vmatpush1.bf16.msra.mxu0 %v1127_v9  ;;  %508 = vmatprep.mubr.bf16.mxu0 %v1032_v1 }
  0x3c   :  { %986 = vmatpush3.bf16.msra.mxu1 %v1122_v8  ;;  %486 = vmatprep.subr.bf16.mxu0 %v1134_v10 }
  0x3d   :  { %987 = vmatprep.subr.bf16.mxu1 %v1141_v11 }
  0x3f   :  { %487 = vmatpush1.bf16.msra.mxu0 %v1148_v12 }
  0x40   :  { %988 = vmatpush3.bf16.msra.mxu1 %v1141_v11  ;;  %488 = vmatprep.subr.bf16.mxu0 %v1155_v13  ;;  %v773_v13 = vlaneseq }
  0x41   :  { %989 = vmatprep.subr.bf16.mxu1 %v1160_v14 }
  0x43   :  { %489 = vmatpush1.bf16.msra.mxu0 %v1168_v16  ;;  %v774_v16 = vshrl.u32 %v773_v13, 7 }
  0x44   :  { %990 = vmatpush3.bf16.msra.mxu1 %v1160_v14  ;;  %490 = vmatprep.subr.bf16.mxu0 %v1175_v17 }
  0x45   :  { %991 = vmatprep.subr.bf16.mxu1 %v1182_v18  ;;  %v779_v23 = vsub.s32 1, %v774_v16  ;;  %v783_v24 = vsub.s32 2, %v774_v16 }
  0x47   :  { %491 = vmatpush1.bf16.msra.mxu0 %v1190_v19  ;;  %v775_v19 = vsub.s32 0, %v774_v16 }
  0x48   :  { %992 = vmatpush3.bf16.msra.mxu1 %v1182_v18  ;;  %v1326_v18 = vld [vmem:[%s1515_s4] sm:$0xff] }
  0x4a   :  { %905 = vmatmul.mubr.msk.bf16.vlgmr.msra.gmra.mxu0 %vm163_vm0, %v1030_v27  ;;  %v1340_v27 = vld [vmem:[%s1515_s4 + $0xc] sm:$0xff] }
  0x4b   :  { %994 = vmatmul.mubr.msk.bf16.vlgmr.msra.gmra.mxu1 %vm163_vm0, %v1031_v28  ;;  %518 = vmatprep.mubr.bf16.mxu0 %v1032_v1 }
  0x52   :  { %906 = vmatmul.mubr.msk.bf16.gmra.mxu0 %vm163_vm0, %v1031_v28  ;;  %v1345_v28 = vld [vmem:[%s1515_s4 + $0x18] sm:$0xff] }
  0x84   :  { %v1313_v2 = vpop.permute.xlu0 %661 }
  0x85   :  { %v1311_v1 = vpop.permute.xlu1 %666 }
  0x88   :  { %v1317_v4 = vpop.permute.xlu0 %676 }
  0x89   :  { %v1315_v3 = vpop.permute.xlu1 %671 }
  0xda   :  { %v204_v29 = vpop.f32.mrf.mxu0 }
  0xdb   :  { %v963_v30 = vpop.f32.mrf.mxu1  ;;  %284 = vrot.lane.b32.xlu0 %v204_v29, %s1033_s9  ;;  %v699_v29 = vunpack.c.l.bf16 %v1326_v18 }
  0xdc   :  { %v206_v31 = vpop.f32.mrf.mxu0 }
  0xdd   :  { %v257_v32 = vpop.f32.mrf.mxu1 }
  0xde   :  { %288 = vrot.lane.b32.xlu1 %v257_v32, %s1033_s9  ;;  %v208_v33 = vpop.f32.mrf.mxu0  ;;  %v1350_v32 = vrot.slane %v723_v22, %v775_v19 }
  0xdf   :  { %300 = vrot.lane.b32.xlu0 %v963_v30, %s1033_s9  ;;  %v964_v36 = vpop.f32.mrf.mxu1  ;;  %v700_v30 = vunpack.c.h.bf16 %v1326_v18 }
  0xe0   :  { %v210_v34 = vpop.f32.mrf.mxu0 }
  0xe1   :  { %v260_v38 = vpop.f32.mrf.mxu1 }
  0xe2   :  { %290 = vrot.lane.b32.xlu1 %v208_v33, %s1033_s9  ;;  %v214_v35 = vpop.f32.mrf.mxu0 }
  0xe3   :  { %286 = vrot.lane.b32.xlu0 %v206_v31, %s1033_s9  ;;  %v701_v31 = vunpack.c.l.bf16 %v1331_v21 }
  0xe4   :  { %v216_v37 = vpop.f32.mrf.mxu0 }
  0xe6   :  { %306 = vrot.lane.b32.xlu1 %v964_v36, %s1033_s9  ;;  %v218_v39 = vpop.f32.mrf.mxu0  ;;  %v1357_v36 = vld [vmem:[%s1515_s4 + $0x20] ss:$12 sps:$4 sm:$0xff]  }
  0xe7   :  { %292 = vrot.lane.b32.xlu0 %v210_v34, %s1033_s9  ;;  %v710_v19 = vunpack.c.h.bf16 %v1357_v36 }
  0xe8   :  { %v220_v40 = vpop.f32.mrf.mxu0 }
  0xea   :  { %294 = vrot.lane.b32.xlu1 %v260_v38, %s1033_s9  ;;  %v1364_v38 = vrot.slane %v723_v22, %v779_v23 }
  0xeb   :  { %296 = vrot.lane.b32.xlu0 %v214_v35, %s1033_s9  ;;  %v704_v35 = vunpack.c.h.bf16 %v1331_v21 }
  0xee   :  { %298 = vrot.lane.b32.xlu1 %v216_v37, %s1033_s9  ;;  %v1362_v37 = vld [vmem:[%s1515_s4 + $0x24] sm:$0xff] }
  0xef   :  { %304 = vrot.lane.b32.xlu0 %v220_v40, %s1033_s9 }
  0xf2   :  { %302 = vrot.lane.b32.xlu1 %v218_v39, %s1033_s9  ;;  %v1287_v41 = vpop.f32.mrf.mxu0  ;;  %v1366_v39 = vrot.slane %v723_v22, %v783_v24 }
  0xf3   :  { %v1295_v45 = vpop.f32.mrf.mxu1 }
  0xf4   :  { %v1289_v42 = vpop.f32.mrf.mxu0 }
  0xf5   :  { %v1299_v47 = vpop.f32.mrf.mxu1 }
  0xf6   :  { %v1291_v43 = vpop.f32.mrf.mxu0 }
  0xf7   :  { %v1303_v49 = vpop.f32.mrf.mxu1 }
  0xf8   :  { %v1293_v44 = vpop.f32.mrf.mxu0 }
  0xf9   :  { %v1307_v51 = vpop.f32.mrf.mxu1 }
  0xfa   :  { %v1297_v46 = vpop.f32.mrf.mxu0 }
  0xfc   :  { %v1301_v48 = vpop.f32.mrf.mxu0 }
  0xfe   :  { %v1305_v50 = vpop.f32.mrf.mxu0 }
 0x100   :  { %v1309_v52 = vpop.f32.mrf.mxu0 }
 0x10a   :  { %v510_v53 = vpop.f32.mrf.mxu0 }
 0x10b   :  { %v995_v54 = vpop.f32.mrf.mxu1  ;;  %590 = vrot.lane.b32.xlu1 %v510_v53, %s1034_s0  ;;  %v703_v53 = vunpack.c.h.bf16 %v1340_v27 }
 0x10c   :  { %v512_v55 = vpop.f32.mrf.mxu0 }
 0x10d   :  { %v563_v56 = vpop.f32.mrf.mxu1  ;;  %592 = vrot.lane.b32.xlu0 %v512_v55, %s1034_s0 }
 0x10e   :  { %v514_v57 = vpop.f32.mrf.mxu0 }
 0x10f   :  { %606 = vrot.lane.b32.xlu1 %v995_v54, %s1034_s0  ;;  %v996_v58 = vpop.f32.mrf.mxu1  ;;  %v706_v54 = vunpack.c.h.bf16 %v1345_v28 }
 0x110   :  { %v516_v59 = vpop.f32.mrf.mxu0 }
 0x111   :  { %596 = vrot.lane.b32.xlu0 %v514_v57, %s1034_s0  ;;  %v566_v61 = vpop.f32.mrf.mxu1 }
 0x112   :  { %v520_v60 = vpop.f32.mrf.mxu0 }
 0x113   :  { %594 = vrot.lane.b32.xlu1 %v563_v56, %s1034_s0 }
 0x114   :  { %v522_v62 = vpop.f32.mrf.mxu0 }
 0x115   :  { %600 = vrot.lane.b32.xlu0 %v566_v61, %s1034_s0  ;;  %v705_v61 = vunpack.c.l.bf16 %v1345_v28 }
 0x116   :  { %v524_v63 = vpop.f32.mrf.mxu0 }
 0x117   :  { %598 = vrot.lane.b32.xlu1 %v516_v59, %s1034_s0 }
 0x118   :  { %v526_v0 = vpop.f32.mrf.mxu0 }
 0x119   :  { %604 = vrot.lane.b32.xlu0 %v522_v62, %s1034_s0  ;;  %v707_v62 = vunpack.c.l.bf16 %v1357_v36 }
 0x11b   :  { %602 = vrot.lane.b32.xlu1 %v520_v60, %s1034_s0 }
 0x11d   :  { %608 = vrot.lane.b32.xlu0 %v524_v63, %s1034_s0  ;;  %v708_v63 = vunpack.c.l.bf16 %v1362_v37 }
 0x11f   :  { %610 = vrot.lane.b32.xlu1 %v526_v0, %s1034_s0 }
 0x121   :  { %612 = vrot.lane.b32.xlu0 %v996_v58, %s1034_s0 }
 0x14d   :  { %v285_v6 = vpop.permute.xlu0 %284 }
 0x150   :  { %v289_v5 = vpop.permute.xlu1 %288 }
 0x151   :  { %v301_v8 = vpop.permute.xlu0 %300  ;;  %v333_v55 = vsel %vm308_vm1, %v289_v5, %v285_v6 }
 0x154   :  { %v291_v7 = vpop.permute.xlu1 %290 }
 0x155   :  { %v287_v10 = vpop.permute.xlu0 %286 }
 0x156   :  { %v309_v25 = vsel %vm308_vm1, %v285_v6, %v287_v10  ;;  %v310_v56 = vsel %vm308_vm1, %v287_v10, %v289_v5  ;;  %v709_v5 = vunpack.c.h.bf16 %v1362_v37  ;;  %v441_v10 = vadd.f32 %v1299_v47, %v333_v55 }
 0x157   :  { %v388_v33 = vadd.f32 %v1287_v41, %v309_v25  ;;  %v702_v41 = vunpack.c.l.bf16 %v1340_v27  ;;  %v390_v18 = vadd.f32 %v1289_v42, %v310_v56 }
 0x158   :  { %v1319_v9 = vpop.permute.xlu1 %306 }
 0x159   :  { %v293_v12 = vpop.permute.xlu0 %292 }
 0x15a   :  { %v311_v57 = vsel %vm308_vm1, %v291_v7, %v293_v12 }
 0x15c   :  { %v295_v11 = vpop.permute.xlu1 %294 }
 0x15d   :  { %v297_v15 = vpop.permute.xlu0 %296  ;;  %v312_v60 = vsel %vm308_vm1, %v293_v12, %v295_v11  ;;  %v334_v0 = vsel %vm308_vm1, %v295_v11, %v291_v7  ;;  %v392_v12 = vadd.f32 %v1291_v43, %v311_v57 }
 0x15e   :  { %v335_v13 = vsel %vm308_vm1, %v301_v8, %v297_v15  ;;  %v394_v22 = vadd.f32 %v1293_v44, %v312_v60  ;;  %v444_v25 = vadd.f32 %v1307_v51, %v334_v0 }
 0x160   :  { %v299_v14 = vpop.permute.xlu1 %298 }
 0x161   :  { %v305_v20 = vpop.permute.xlu0 %304  ;;  %v313_v23 = vsel %vm308_vm1, %v297_v15, %v299_v14  ;;  %v314_v7 = vsel %vm308_vm1, %v299_v14, %v301_v8 }
 0x162   :  { %v316_v43 = vsel %vm308_vm1, %v305_v20, %v1319_v9  ;;  %v398_v8 = vadd.f32 %v1297_v46, %v313_v23  ;;  %v400_v14 = vadd.f32 %v1301_v48, %v314_v7 }
 0x163   :  { %v404_v57 = vadd.f32 %v1309_v52, %v316_v43 }
 0x164   :  { %v1321_v17 = vpop.permute.xlu1 %302 }
 0x165   :  { %v315_v44 = vsel %vm308_vm1, %v1321_v17, %v305_v20 }
 0x166   :  { %v402_v46 = vadd.f32 %v1305_v50, %v315_v44 }
 0x17d   :  { %v591_v26 = vpop.permute.xlu1 %590 }
 0x17f   :  { %v593_v34 = vpop.permute.xlu0 %592 }
 0x180   :  { %v615_v40 = vsel %vm614_vm2, %v591_v26, %v593_v34 }
 0x181   :  { %v643_v58 = vadd.f32 %v615_v40, %v388_v33  ;;  %v607_v59 = vpop.permute.xlu1 %606  ;;  %v449_v33 = vadd.f32 %v1295_v45, %v335_v13 }
 0x183   :  { %v679_v6 = vadd.f32 %v1313_v2, %v643_v58  ;;  %v597_v16 = vpop.permute.xlu0 %596 }
 0x185   :  { %v711_v11 = vadd.f32 %v699_v29, %v679_v6  ;;  %v595_v24 = vpop.permute.xlu1 %594 }
 0x186   :  { %v616_v47 = vsel %vm614_vm2, %v593_v34, %v595_v24  ;;  %v639_v42 = vsel %vm614_vm2, %v595_v24, %v591_v26  ;;  %v336_v26 = vsel %vm308_vm1, %v1319_v9, %v1321_v17 }
 0x187   :  { %v644_v40 = vadd.f32 %v616_v47, %v390_v18  ;;  %v645_v15 = vadd.f32 %v639_v42, %v441_v10  ;;  %v601_v55 = vpop.permute.xlu0 %600  ;;  %v788_v45 = vmul.f32 %v1350_v32, %v711_v11  ;;  %v452_v17 = vadd.f32 %v1303_v49, %v336_v26 }
 0x188   :  { %v640_v51 = vsel %vm614_vm2, %v601_v55, %v597_v16 }
 0x189   :  { %v680_v29 = vadd.f32 %v1313_v2, %v644_v40  ;;  %v681_v34 = vadd.f32 %v1313_v2, %v645_v15  ;;  %v648_v20 = vadd.f32 %v640_v51, %v444_v25  ;;  %v599_v56 = vpop.permute.xlu1 %598  ;;  %v821_v18 = vmul.f32 %v788_v45, %v711_v11 }
 0x18a   :  { %v617_v48 = vsel %vm614_vm2, %v597_v16, %v599_v56  ;;  %v618_v58 = vsel %vm614_vm2, %v599_v56, %v601_v55 }
 0x18b   :  { %v712_v60 = vadd.f32 %v700_v30, %v680_v29  ;;  %v713_v0 = vadd.f32 %v701_v31, %v681_v34  ;;  %v684_v13 = vadd.f32 %v1311_v1, %v648_v20  ;;  %v646_v6 = vadd.f32 %v617_v48, %v392_v12  ;;  %v605_v9 = vpop.permute.xlu0 %604 }
 0x18c   :  { %v647_v10 = vadd.f32 %v618_v58, %v394_v22  ;;  %v620_v2 = vsel %vm614_vm2, %v605_v9, %v607_v59 }
 0x18d   :  { %v917_v23 = vpack.c.bf16 %v712_v60, %v711_v11  ;;  %v918_v52 = vpack.c.bf16 %v713_v0, %v713_v0  ;;  %v716_v50 = vadd.f32 %v704_v35, %v684_v13  ;;  %v682_v16 = vadd.f32 %v1311_v1, %v646_v6  ;;  %v603_v7 = vpop.permute.xlu1 %602 }
 0x18e   :  { %v683_v30 = vadd.f32 %v1311_v1, %v647_v10  ;;  %v650_v31 = vadd.f32 %v620_v2, %v400_v14  ;;  %v619_v12 = vsel %vm614_vm2, %v603_v7, %v605_v9  ;;  %v641_v24 = vsel %vm614_vm2, %v607_v59, %v603_v7 }
 0x18f   :  { %764 = vst [vmem:[%s1517_s5] sm:$0xff] %v917_v23  ;;  %765 = vst [vmem:[%s1517_s5 + $0x8] sm:$0xf] %v918_v52  ;;  %v920_v49 = vpack.c.bf16 %v716_v50, %v716_v50  ;;  %v714_v21 = vadd.f32 %v702_v41, %v682_v16  ;;  %v649_v35 = vadd.f32 %v619_v12, %v398_v8  ;;  %v609_v1 = vpop.permute.xlu0 %608 }
 0x190   :  { %v651_v22 = vadd.f32 %v641_v24, %v449_v33  ;;  %v715_v11 = vadd.f32 %v703_v53, %v683_v30  ;;  %v686_v59 = vadd.f32 %v1315_v3, %v650_v31  ;;  %v789_v25 = vmul.f32 %v1364_v38, %v712_v60 }
 0x191   :  { %v790_v47 = vmul.f32 %v1366_v39, %v713_v0  ;;  %767 = vst [vmem:[%s1517_s5 + $0x14] sm:$0xf] %v920_v49  ;;  %v685_v42 = vadd.f32 %v1315_v3, %v649_v35  ;;  %v611_v43 = vpop.permute.xlu1 %610  ;;  %v791_v33 = vmul.f32 %v1350_v32, %v714_v21  ;;  %v793_v27 = vmul.f32 %v1366_v39, %v716_v50 }
 0x192   :  { %v687_v41 = vadd.f32 %v1315_v3, %v651_v22  ;;  %v919_v53 = vpack.c.bf16 %v715_v11, %v714_v21  ;;  %v718_v44 = vadd.f32 %v706_v54, %v686_v59  ;;  %v621_v40 = vsel %vm614_vm2, %v609_v1, %v611_v43 }
 0x193   :  { %v800_v15 = vadd.f32 %v789_v25, %v788_v45  ;;  %v717_v55 = vadd.f32 %v705_v61, %v685_v42  ;;  %v652_v14 = vadd.f32 %v621_v40, %v402_v46  ;;  %v613_v3 = vpop.permute.xlu0 %612  ;;  %v822_v51 = vmul.f32 %v789_v25, %v712_v60 }
 0x194   :  { %v719_v8 = vadd.f32 %v707_v62, %v687_v41  ;;  %766 = vst [vmem:[%s1517_s5 + $0xc] sm:$0xff] %v919_v53  ;;  %v622_v26 = vsel %vm614_vm2, %v611_v43, %v613_v3  ;;  %v642_v54 = vsel %vm614_vm2, %v613_v3, %v609_v1  ;;  %v823_v34 = vmul.f32 %v790_v47, %v713_v0 }
 0x195   :  { %v801_v29 = vadd.f32 %v800_v15, %v790_v47  ;;  %v921_v45 = vpack.c.bf16 %v718_v44, %v717_v55  ;;  %v688_v28 = vadd.f32 %v1317_v4, %v652_v14  ;;  %v653_v61 = vadd.f32 %v622_v26, %v404_v57 }
 0x196   :  { %v922_v20 = vpack.c.bf16 %v719_v8, %v719_v8  ;;  %v654_v56 = vadd.f32 %v642_v54, %v452_v17  ;;  %v833_v62 = vadd.f32 %v822_v51, %v821_v18  ;;  %v792_v46 = vmul.f32 %v1364_v38, %v715_v11 }
 0x197   :  { %802 = vadd.xlane.f32.xlu1 %v801_v29  ;;  %v824_v48 = vmul.f32 %v791_v33, %v714_v21  ;;  %768 = vst [vmem:[%s1517_s5 + $0x18] sm:$0xff] %v921_v45  ;;  %v720_v58 = vadd.f32 %v708_v63, %v688_v28  ;;  %v689_v60 = vadd.f32 %v1317_v4, %v653_v61 }
 0x198   :  { %769 = vst [vmem:[%s1517_s5 + $0x20] sm:$0xf] %v922_v20  ;;  %v794_v57 = vmul.f32 %v1350_v32, %v717_v55  ;;  %v690_v0 = vadd.f32 %v1317_v4, %v654_v56  ;;  %v834_v13 = vadd.f32 %v833_v62, %v823_v34  ;;  %v804_v6 = vadd.f32 %v792_v46, %v791_v33 }
 0x199   :  { %v825_v9 = vmul.f32 %v792_v46, %v715_v11  ;;  %v721_v17 = vadd.f32 %v709_v5, %v689_v60  ;;  %v795_v10 = vmul.f32 %v1364_v38, %v718_v44  ;;  %v826_v18 = vmul.f32 %v793_v27, %v716_v50 }
 0x19a   :  { %v722_v2 = vadd.f32 %v710_v19, %v690_v0  ;;  %835 = vadd.xlane.f32.xlu0 %v834_v13  ;;  %v797_v23 = vmul.f32 %v1350_v32, %v720_v58  ;;  %v805_v16 = vadd.f32 %v804_v6, %v793_v27  ;;  %v827_v7 = vmul.f32 %v794_v57, %v717_v55 }
 0x19b   :  { %v837_v63 = vadd.f32 %v825_v9, %v824_v48  ;;  %v923_v52 = vpack.c.bf16 %v721_v17, %v720_v58  ;;  %v808_v31 = vadd.f32 %v795_v10, %v794_v57  ;;  %v798_v12 = vmul.f32 %v1364_v38, %v721_v17 }
 0x19c   :  { %v924_v4 = vpack.c.bf16 %v722_v2, %v722_v2  ;;  %v796_v36 = vmul.f32 %v1366_v39, %v719_v8  ;;  %v828_v37 = vmul.f32 %v795_v10, %v718_v44  ;;  %v799_v5 = vmul.f32 %v1366_v39, %v722_v2 }
 0x19d   :  { %v838_v30 = vadd.f32 %v837_v63, %v826_v18  ;;  %770 = vst [vmem:[%s1517_s5 + $0x24] sm:$0xff] %v923_v52  ;;  %v812_v32 = vadd.f32 %v798_v12, %v797_v23  ;;  %v830_v19 = vmul.f32 %v797_v23, %v720_v58  ;;  %v831_v50 = vmul.f32 %v798_v12, %v721_v17 }
 0x19e   :  { %771 = vst [vmem:[%s1517_s5 + $0x2c] sm:$0xf] %v924_v4  ;;  %806 = vadd.xlane.f32.xlu0 %v805_v16  ;;  %v809_v24 = vadd.f32 %v808_v31, %v796_v36  ;;  %v841_v38 = vadd.f32 %v828_v37, %v827_v7  ;;  %v829_v35 = vmul.f32 %v796_v36, %v719_v8 }
 0x19f   :  { %839 = vadd.xlane.f32.xlu1 %v838_v30  ;;  %v813_v49 = vadd.f32 %v812_v32, %v799_v5  ;;  %v845_v21 = vadd.f32 %v831_v50, %v830_v19  ;;  %v832_v22 = vmul.f32 %v799_v5, %v722_v2 }
 0x1a0   :  { %v842_v1 = vadd.f32 %v841_v38, %v829_v35 }
 0x1a1   :  { %v846_v11 = vadd.f32 %v845_v21, %v832_v22 }
 0x1a2   :  { %810 = vadd.xlane.f32.xlu0 %v809_v24 }
 0x1a3   :  { %814 = vadd.xlane.f32.xlu1 %v813_v49 }
 0x1a6   :  { %843 = vadd.xlane.f32.xlu0 %v842_v1 }
 0x1a7   :  { %847 = vadd.xlane.f32.xlu1 %v846_v11 }
 0x220   :  { %v803_v39 = vpop.xlane.xlu1 %802 }
 0x221   :  { %817 = vst.msk [vmem:[%s1518_s6] sm:$0xff] %vm816_vm3, %v803_v39 }
 0x223   :  { %v836_v59 = vpop.xlane.xlu0 %835 }
 0x224   :  { %849 = vst.msk [vmem:[%s1519_s7] sm:$0xff] %vm816_vm3, %v836_v59 }
 0x227   :  { %v807_v25 = vpop.xlane.xlu0 %806 }
 0x228   :  { %v840_v47 = vpop.xlane.xlu1 %839  ;;  %818 = vst.msk [vmem:[%s1518_s6 + $0x8] sm:$0xff] %vm816_vm3, %v807_v25 }
 0x229   :  { %850 = vst.msk [vmem:[%s1519_s7 + $0x8] sm:$0xff] %vm816_vm3, %v840_v47 }
 0x22b   :  { %v811_v42 = vpop.xlane.xlu0 %810 }
 0x22c   :  { %v815_v41 = vpop.xlane.xlu1 %814  ;;  %819 = vst.msk [vmem:[%s1518_s6 + $0x10] sm:$0xff] %vm816_vm3, %v811_v42 }
 0x22d   :  { %820 = vst.msk [vmem:[%s1518_s6 + $0x18] sm:$0xff] %vm816_vm3, %v815_v41 }
 0x22f   :  { %v844_v43 = vpop.xlane.xlu0 %843 }
 0x230   :  { %v848_v33 = vpop.xlane.xlu1 %847  ;;  %851 = vst.msk [vmem:[%s1519_s7 + $0x10] sm:$0xff] %vm816_vm3, %v844_v43 }
 0x231   :  { %852 = vst.msk [vmem:[%s1519_s7 + $0x18] sm:$0xff] %vm816_vm3, %v848_v33 }

// kernel: _lambda_.32
= control target key start
LH: loop header
LB: loop body
LE: loop exit
PB: predicated region body
PF: predicated region fallthrough
CT: control target
= control target key end

     0   :  { %13 = vsyncpa [#allocation3], 0  ;;  %v1106_v2 = vmov 0   ;;  %vm165_vm0 = vcmask 785408   ;;  %s1572_s0 = inlined_call_operand.vmem [shape: bf16[3,32,96], index: 0, kind: input, shape index: {}]   ;;  %s1573_s1 = inlined_call_operand.vmem [shape: bf16[96,384], index: 1, kind: input, shape index: {}]   ;;  %s1574_s2 = inlined_call_operand.vmem [shape: f32[32,1], index: 2, kind: input, shape index: {}]   ;;  %s1575_s3 = inlined_call_operand.vmem [shape: f32[1,384], index: 3, kind: input, shape index: {}]   ;;  %s1576_s4 = inlined_call_operand.vmem [shape: bf16[32,384], index: 4, kind: input, shape index: {}]   ;;  %s1577_s5 = inlined_call_operand.vmem [shape: bf16[32,384], index: 5, kind: output, shape index: {0}]   ;;  %s1578_s6 = inlined_call_operand.hbm [shape: f32[1,32,1], index: 6, kind: output, shape index: {1}]   ;;  %s1579_s7 = inlined_call_operand.hbm [shape: f32[1,32,1], index: 7, kind: output, shape index: {2}]  }
   0x1   :  { %v1156_v0 = vld [vmem:[%s1573_s1 + $0x7c] ss:$12 sps:$4 sm:$0xff]   ;;  %v1161_v1 = vld [vmem:[%s1573_s1 + $0x80] ss:$12 sps:$4 sm:$0xff]   ;;  %204 = vmatprep.mubr.bf16.mxu0 %v1106_v2  ;;  %1030 = vset.pattern.permute.xlu0 %v1106_v2  ;;  %v1169_v3 = vld [vmem:[%s1573_s1 + $0x78] ss:$12 sps:$4 sm:$0xff]  }
   0x2   :  { %176 = vmatprep.subr.bf16.mxu0 %v1156_v0  ;;  %1031 = vset.pattern.permute.xlu1 %v1106_v2  ;;  %v1176_v4 = vld [vmem:[%s1573_s1 + $0x64] ss:$12 sps:$4 sm:$0xff]   ;;  %v1183_v5 = vld [vmem:[%s1573_s1 + $0x68] ss:$12 sps:$4 sm:$0xff]   ;;  %v1188_v6 = vld [vmem:[%s1573_s1 + $0x60] ss:$12 sps:$4 sm:$0xff]  }
   0x3   :  { %975 = vmatprep.subr.bf16.mxu1 %v1161_v1  ;;  %177 = vmatpush1.bf16.msra.mxu0 %v1169_v3  ;;  %v1194_v7 = vld [vmem:[%s1573_s1 + $0x4c] ss:$12 sps:$4 sm:$0xff]   ;;  %v1200_v8 = vld [vmem:[%s1573_s1 + $0x50] ss:$12 sps:$4 sm:$0xff]   ;;  %v1205_v9 = vld [vmem:[%s1573_s1 + $0x48] ss:$12 sps:$4 sm:$0xff]  }
   0x4   :  { %976 = vmatpush3.bf16.msra.mxu1 %v1161_v1  ;;  %178 = vmatprep.subr.bf16.mxu0 %v1176_v4  ;;  %v1212_v10 = vld [vmem:[%s1573_s1 + $0x34] ss:$12 sps:$4 sm:$0xff]   ;;  %v1219_v11 = vld [vmem:[%s1573_s1 + $0x38] ss:$12 sps:$4 sm:$0xff]   ;;  %v1226_v12 = vld [vmem:[%s1573_s1 + $0x30] ss:$12 sps:$4 sm:$0xff]  }
   0x5   :  { %977 = vmatprep.subr.bf16.mxu1 %v1183_v5  ;;  %v1233_v13 = vld [vmem:[%s1573_s1 + $0x1c] ss:$12 sps:$4 sm:$0xff]   ;;  %v1238_v14 = vld [vmem:[%s1573_s1 + $0x20] ss:$12 sps:$4 sm:$0xff]   ;;  %v1056_v15 = vld [vmem:[%s1572_s0 + $0x10] sm:$0xff]  }
   0x6   :  { %v1246_v16 = vld [vmem:[%s1573_s1 + $0x18] ss:$12 sps:$4 sm:$0xff]   ;;  %v1260_v18 = vld [vmem:[%s1573_s1 + $0x8] ss:$12 sps:$4 sm:$0xff]   ;;  %987 = vmatprep.mubr.msk.bf16.mxu1 %vm165_vm0, %v1056_v15  ;;  %v1268_v19 = vld [vmem:[%s1573_s1] ss:$12 sps:$4 sm:$0xff]  }
   0x7   :  { %179 = vmatpush1.bf16.msra.mxu0 %v1188_v6  ;;  %v1253_v17 = vld [vmem:[%s1573_s1 + $0x4] ss:$12 sps:$4 sm:$0xff]   ;;  %v658_v21 = vld [vmem:[%s1574_s2 + $0x8] sm:$0xff] }
   0x8   :  { %978 = vmatpush3.bf16.msra.mxu1 %v1183_v5  ;;  %180 = vmatprep.subr.bf16.mxu0 %v1194_v7  ;;  %v657_v20 = vld [vmem:[%s1574_s2] sm:$0xff] }
   0x9   :  { %979 = vmatprep.subr.bf16.mxu1 %v1200_v8 }
   0xb   :  { %181 = vmatpush1.bf16.msra.mxu0 %v1205_v9 }
   0xc   :  { %980 = vmatpush3.bf16.msra.mxu1 %v1200_v8  ;;  %182 = vmatprep.subr.bf16.mxu0 %v1212_v10 }
   0xd   :  { %981 = vmatprep.subr.bf16.mxu1 %v1219_v11 }
   0xf   :  { %183 = vmatpush1.bf16.msra.mxu0 %v1226_v12 }
  0x10   :  { %982 = vmatpush3.bf16.msra.mxu1 %v1219_v11  ;;  %184 = vmatprep.subr.bf16.mxu0 %v1233_v13 }
  0x11   :  { %983 = vmatprep.subr.bf16.mxu1 %v1238_v14 }
  0x13   :  { %185 = vmatpush1.bf16.msra.mxu0 %v1246_v16 }
  0x14   :  { %984 = vmatpush3.bf16.msra.mxu1 %v1238_v14  ;;  %186 = vmatprep.subr.bf16.mxu0 %v1253_v17 }
  0x15   :  { %985 = vmatprep.subr.bf16.mxu1 %v1260_v18 }
  0x16   :  { %14 = vsyncpa [#allocation5], 0  ;;  %663 = vperm.xlu0 %1030, %v657_v20   ;;  %668 = vperm.xlu1 %1031, %v658_v21   ;;  %v1057_v22 = vld [vmem:[%s1572_s0 + $0x18] sm:$0xff]   ;;  %v659_v24 = vld [vmem:[%s1574_s2 + $0x10] sm:$0xff]  ;;  %s1107_s9 = smov 127   ;;  %vm310_vm1 = vcmask 1039360  }
  0x17   :  { %v660_v23 = vld [vmem:[%s1574_s2 + $0x18] sm:$0xff]  ;;  %187 = vmatpush1.bf16.msra.mxu0 %v1268_v19  ;;  %v1058_v25 = vld [vmem:[%s1572_s0] sm:$0xff]   ;;  %v1059_v26 = vld [vmem:[%s1572_s0 + $0x8] sm:$0xff]   ;;  %vm616_vm2 = vcmask 1031168   ;;  %vm818_vm3 = vcmask 7168   ;;  %s1110_s13 = smov [#allocation4]  }
  0x18   :  { %986 = vmatpush3.bf16.msra.mxu1 %v1260_v18  ;;  %359 = vmatprep.subr.bf16.mxu0 %v1156_v0  ;;  %v1060_v27 = vld [vmem:[%s1572_s0 + $0x20] sm:$0xff]   ;;  %v1061_v28 = vld [vmem:[%s1572_s0 + $0x28] sm:$0xff]   ;;  %s1108_s0 = smov 126   ;;  %s874_s14 = sshll.u32 %s1110_s13, 4  ;;  %s875_s14 = int_to_ptr.vmem [resolvable:$true] %s874_s14 }
  0x19   :  { %991 = vmatprep.subr.bf16.mxu1 %v1161_v1  ;;  %v1409_v21 = vld [vmem:[%s1576_s4 + $0x8] ss:$12 sps:$4 sm:$0xff]  }
  0x1a   :  { %678 = vperm.xlu0 %1030, %v660_v23   ;;  %673 = vperm.xlu1 %1031, %v659_v24  }
  0x1b   :  { %915 = vmatmul.mubr.msk.bf16.vlgmr.msra.gmra.mxu0 %vm165_vm0, %v1056_v15  ;;  %988 = vmatmul.mubr.msk.bf16.vlgmr.msra.gmra.mxu1 %vm165_vm0, %v1057_v22 }
  0x1c   :  { %360 = vmatpush1.bf16.msra.mxu0 %v1169_v3  ;;  %992 = vmatpush3.bf16.msra.mxu1 %v1161_v1 }
  0x1d   :  { %361 = vmatprep.subr.bf16.mxu0 %v1176_v4  ;;  %993 = vmatprep.subr.bf16.mxu1 %v1183_v5 }
  0x1e   :  { %214 = vmatprep.mubr.bf16.mxu0 %v1106_v2  ;;  %1003 = vmatprep.mubr.msk.bf16.mxu1 %vm165_vm0, %v1058_v25 }
  0x20   :  { %362 = vmatpush1.bf16.msra.mxu0 %v1188_v6  ;;  %994 = vmatpush3.bf16.msra.mxu1 %v1183_v5 }
  0x21   :  { %363 = vmatprep.subr.bf16.mxu0 %v1194_v7  ;;  %995 = vmatprep.subr.bf16.mxu1 %v1200_v8 }
  0x23   :  { %916 = vmatmul.mubr.msk.bf16.gmra.mxu0 %vm165_vm0, %v1057_v22  ;;  %v725_v22 = vld [vmem:[%s1575_s3] sm:$0x7] }
  0x24   :  { %364 = vmatpush1.bf16.msra.mxu0 %v1205_v9  ;;  %996 = vmatpush3.bf16.msra.mxu1 %v1200_v8 }
  0x25   :  { %365 = vmatprep.subr.bf16.mxu0 %v1212_v10  ;;  %997 = vmatprep.subr.bf16.mxu1 %v1219_v11 }
  0x26   :  { %387 = vmatprep.mubr.bf16.mxu0 %v1106_v2 }
  0x28   :  { %366 = vmatpush1.bf16.msra.mxu0 %v1226_v12  ;;  %998 = vmatpush3.bf16.msra.mxu1 %v1219_v11 }
  0x29   :  { %367 = vmatprep.subr.bf16.mxu0 %v1233_v13  ;;  %999 = vmatprep.subr.bf16.mxu1 %v1238_v14 }
  0x2c   :  { %368 = vmatpush1.bf16.msra.mxu0 %v1246_v16  ;;  %1000 = vmatpush3.bf16.msra.mxu1 %v1238_v14 }
  0x2d   :  { %369 = vmatprep.subr.bf16.mxu0 %v1253_v17  ;;  %1001 = vmatprep.subr.bf16.mxu1 %v1260_v18 }
  0x30   :  { %370 = vmatpush1.bf16.msra.mxu0 %v1268_v19  ;;  %1002 = vmatpush3.bf16.msra.mxu1 %v1260_v18 }
  0x31   :  { %482 = vmatprep.subr.bf16.mxu0 %v1156_v0  ;;  %1007 = vmatprep.subr.bf16.mxu1 %v1161_v1 }
  0x33   :  { %921 = vmatmul.mubr.msk.bf16.vlgmr.msra.gmra.mxu0 %vm165_vm0, %v1058_v25  ;;  %1004 = vmatmul.mubr.msk.bf16.vlgmr.msra.gmra.mxu1 %vm165_vm0, %v1059_v26 }
  0x34   :  { %483 = vmatpush1.bf16.msra.mxu0 %v1169_v3  ;;  %1008 = vmatpush3.bf16.msra.mxu1 %v1161_v1 }
  0x35   :  { %484 = vmatprep.subr.bf16.mxu0 %v1176_v4  ;;  %1009 = vmatprep.subr.bf16.mxu1 %v1183_v5 }
  0x36   :  { %397 = vmatprep.mubr.bf16.mxu0 %v1106_v2  ;;  %1019 = vmatprep.mubr.msk.bf16.mxu1 %vm165_vm0, %v1060_v27 }
  0x38   :  { %485 = vmatpush1.bf16.msra.mxu0 %v1188_v6  ;;  %1010 = vmatpush3.bf16.msra.mxu1 %v1183_v5 }
  0x39   :  { %486 = vmatprep.subr.bf16.mxu0 %v1194_v7  ;;  %1011 = vmatprep.subr.bf16.mxu1 %v1200_v8 }
  0x3b   :  { %922 = vmatmul.mubr.msk.bf16.gmra.mxu0 %vm165_vm0, %v1059_v26 }
  0x3c   :  { %487 = vmatpush1.bf16.msra.mxu0 %v1205_v9  ;;  %1012 = vmatpush3.bf16.msra.mxu1 %v1200_v8 }
  0x3d   :  { %488 = vmatprep.subr.bf16.mxu0 %v1212_v10  ;;  %1013 = vmatprep.subr.bf16.mxu1 %v1219_v11 }
  0x3e   :  { %510 = vmatprep.mubr.bf16.mxu0 %v1106_v2 }
  0x40   :  { %489 = vmatpush1.bf16.msra.mxu0 %v1226_v12  ;;  %1014 = vmatpush3.bf16.msra.mxu1 %v1219_v11 }
  0x41   :  { %490 = vmatprep.subr.bf16.mxu0 %v1233_v13  ;;  %1015 = vmatprep.subr.bf16.mxu1 %v1238_v14  ;;  %v775_v13 = vlaneseq }
  0x44   :  { %491 = vmatpush1.bf16.msra.mxu0 %v1246_v16  ;;  %1016 = vmatpush3.bf16.msra.mxu1 %v1238_v14  ;;  %v776_v16 = vshrl.u32 %v775_v13, 7 }
  0x45   :  { %492 = vmatprep.subr.bf16.mxu0 %v1253_v17  ;;  %1017 = vmatprep.subr.bf16.mxu1 %v1260_v18 }
  0x46   :  { %v781_v23 = vsub.s32 1, %v776_v16  ;;  %v785_v24 = vsub.s32 2, %v776_v16 }
  0x48   :  { %493 = vmatpush1.bf16.msra.mxu0 %v1268_v19  ;;  %1018 = vmatpush3.bf16.msra.mxu1 %v1260_v18  ;;  %v1404_v18 = vld [vmem:[%s1576_s4] sm:$0xff]  ;;  %v777_v19 = vsub.s32 0, %v776_v16 }
  0x4b   :  { %931 = vmatmul.mubr.msk.bf16.vlgmr.msra.gmra.mxu0 %vm165_vm0, %v1060_v27  ;;  %1020 = vmatmul.mubr.msk.bf16.vlgmr.msra.gmra.mxu1 %vm165_vm0, %v1061_v28  ;;  %v1418_v27 = vld [vmem:[%s1576_s4 + $0xc] sm:$0xff] }
  0x4c   :  { %520 = vmatprep.mubr.bf16.mxu0 %v1106_v2 }
  0x53   :  { %932 = vmatmul.mubr.msk.bf16.gmra.mxu0 %vm165_vm0, %v1061_v28  ;;  %v1423_v28 = vld [vmem:[%s1576_s4 + $0x18] sm:$0xff] }
  0x91   :  { %v1389_v1 = vpop.permute.xlu1 %668  ;;  %v1391_v2 = vpop.permute.xlu0 %663 }
  0x95   :  { %v1393_v3 = vpop.permute.xlu1 %673  ;;  %v1395_v4 = vpop.permute.xlu0 %678 }
  0xdb   :  { %v206_v29 = vpop.f32.mrf.mxu0  ;;  %v989_v30 = vpop.f32.mrf.mxu1 }
  0xdc   :  { %286 = vrot.lane.b32.xlu0 %v206_v29, %s1107_s9  ;;  %v701_v29 = vunpack.c.l.bf16 %v1404_v18 }
  0xdd   :  { %v208_v31 = vpop.f32.mrf.mxu0  ;;  %v259_v32 = vpop.f32.mrf.mxu1 }
  0xde   :  { %290 = vrot.lane.b32.xlu1 %v259_v32, %s1107_s9  ;;  %v1428_v32 = vrot.slane %v725_v22, %v777_v19 }
  0xdf   :  { %v210_v33 = vpop.f32.mrf.mxu0  ;;  %v990_v36 = vpop.f32.mrf.mxu1 }
  0xe0   :  { %302 = vrot.lane.b32.xlu0 %v989_v30, %s1107_s9  ;;  %v702_v30 = vunpack.c.h.bf16 %v1404_v18 }
  0xe1   :  { %v212_v34 = vpop.f32.mrf.mxu0  ;;  %v262_v38 = vpop.f32.mrf.mxu1 }
  0xe2   :  { %292 = vrot.lane.b32.xlu1 %v210_v33, %s1107_s9 }
  0xe3   :  { %v216_v35 = vpop.f32.mrf.mxu0 }
  0xe4   :  { %288 = vrot.lane.b32.xlu0 %v208_v31, %s1107_s9  ;;  %v703_v31 = vunpack.c.l.bf16 %v1409_v21 }
  0xe5   :  { %v218_v37 = vpop.f32.mrf.mxu0 }
  0xe6   :  { %308 = vrot.lane.b32.xlu1 %v990_v36, %s1107_s9  ;;  %v1435_v36 = vld [vmem:[%s1576_s4 + $0x20] ss:$12 sps:$4 sm:$0xff]  }
  0xe7   :  { %v220_v39 = vpop.f32.mrf.mxu0  ;;  %v712_v19 = vunpack.c.h.bf16 %v1435_v36 }
  0xe8   :  { %294 = vrot.lane.b32.xlu0 %v212_v34, %s1107_s9 }
  0xe9   :  { %v222_v40 = vpop.f32.mrf.mxu0 }
  0xea   :  { %296 = vrot.lane.b32.xlu1 %v262_v38, %s1107_s9  ;;  %v1442_v38 = vrot.slane %v725_v22, %v781_v23 }
  0xec   :  { %298 = vrot.lane.b32.xlu0 %v216_v35, %s1107_s9  ;;  %v706_v35 = vunpack.c.h.bf16 %v1409_v21 }
  0xee   :  { %300 = vrot.lane.b32.xlu1 %v218_v37, %s1107_s9  ;;  %v1440_v37 = vld [vmem:[%s1576_s4 + $0x24] sm:$0xff] }
  0xf0   :  { %306 = vrot.lane.b32.xlu0 %v222_v40, %s1107_s9 }
  0xf2   :  { %304 = vrot.lane.b32.xlu1 %v220_v39, %s1107_s9  ;;  %v1444_v39 = vrot.slane %v725_v22, %v785_v24 }
  0xf3   :  { %v1365_v41 = vpop.f32.mrf.mxu0  ;;  %v1373_v45 = vpop.f32.mrf.mxu1 }
  0xf5   :  { %v1367_v42 = vpop.f32.mrf.mxu0  ;;  %v1377_v47 = vpop.f32.mrf.mxu1 }
  0xf7   :  { %v1369_v43 = vpop.f32.mrf.mxu0  ;;  %v1381_v49 = vpop.f32.mrf.mxu1 }
  0xf9   :  { %v1371_v44 = vpop.f32.mrf.mxu0  ;;  %v1385_v51 = vpop.f32.mrf.mxu1 }
  0xfb   :  { %v1375_v46 = vpop.f32.mrf.mxu0 }
  0xfd   :  { %v1379_v48 = vpop.f32.mrf.mxu0 }
  0xff   :  { %v1383_v50 = vpop.f32.mrf.mxu0 }
 0x101   :  { %v1387_v52 = vpop.f32.mrf.mxu0 }
 0x10b   :  { %v512_v53 = vpop.f32.mrf.mxu0  ;;  %v1021_v54 = vpop.f32.mrf.mxu1 }
 0x10c   :  { %592 = vrot.lane.b32.xlu1 %v512_v53, %s1108_s0  ;;  %v705_v53 = vunpack.c.h.bf16 %v1418_v27 }
 0x10d   :  { %v514_v55 = vpop.f32.mrf.mxu0  ;;  %v565_v56 = vpop.f32.mrf.mxu1 }
 0x10e   :  { %594 = vrot.lane.b32.xlu0 %v514_v55, %s1108_s0 }
 0x10f   :  { %v516_v57 = vpop.f32.mrf.mxu0  ;;  %v1022_v58 = vpop.f32.mrf.mxu1 }
 0x110   :  { %608 = vrot.lane.b32.xlu1 %v1021_v54, %s1108_s0  ;;  %v708_v54 = vunpack.c.h.bf16 %v1423_v28 }
 0x111   :  { %v518_v59 = vpop.f32.mrf.mxu0  ;;  %v568_v61 = vpop.f32.mrf.mxu1 }
 0x112   :  { %598 = vrot.lane.b32.xlu0 %v516_v57, %s1108_s0 }
 0x113   :  { %v522_v60 = vpop.f32.mrf.mxu0 }
 0x114   :  { %596 = vrot.lane.b32.xlu1 %v565_v56, %s1108_s0 }
 0x115   :  { %v524_v62 = vpop.f32.mrf.mxu0 }
 0x116   :  { %602 = vrot.lane.b32.xlu0 %v568_v61, %s1108_s0  ;;  %v707_v61 = vunpack.c.l.bf16 %v1423_v28 }
 0x117   :  { %v526_v63 = vpop.f32.mrf.mxu0 }
 0x118   :  { %600 = vrot.lane.b32.xlu1 %v518_v59, %s1108_s0 }
 0x119   :  { %v528_v0 = vpop.f32.mrf.mxu0 }
 0x11a   :  { %606 = vrot.lane.b32.xlu0 %v524_v62, %s1108_s0  ;;  %v709_v62 = vunpack.c.l.bf16 %v1435_v36 }
 0x11c   :  { %604 = vrot.lane.b32.xlu1 %v522_v60, %s1108_s0 }
 0x11e   :  { %610 = vrot.lane.b32.xlu0 %v526_v63, %s1108_s0  ;;  %v710_v63 = vunpack.c.l.bf16 %v1440_v37 }
 0x120   :  { %612 = vrot.lane.b32.xlu1 %v528_v0, %s1108_s0 }
 0x122   :  { %614 = vrot.lane.b32.xlu0 %v1022_v58, %s1108_s0 }
 0x14e   :  { %v287_v6 = vpop.permute.xlu0 %286 }
 0x150   :  { %v291_v5 = vpop.permute.xlu1 %290 }
 0x151   :  { %v335_v55 = vsel %vm310_vm1, %v291_v5, %v287_v6 }
 0x152   :  { %v303_v8 = vpop.permute.xlu0 %302 }
 0x154   :  { %v293_v7 = vpop.permute.xlu1 %292 }
 0x156   :  { %v289_v10 = vpop.permute.xlu0 %288 }
 0x157   :  { %v311_v25 = vsel %vm310_vm1, %v287_v6, %v289_v10  ;;  %v312_v56 = vsel %vm310_vm1, %v289_v10, %v291_v5  ;;  %v711_v5 = vunpack.c.h.bf16 %v1440_v37  ;;  %v443_v10 = vadd.f32 %v1377_v47, %v335_v55 }
 0x158   :  { %v1397_v9 = vpop.permute.xlu1 %308  ;;  %v390_v33 = vadd.f32 %v1365_v41, %v311_v25  ;;  %v704_v41 = vunpack.c.l.bf16 %v1418_v27  ;;  %v392_v18 = vadd.f32 %v1367_v42, %v312_v56 }
 0x15a   :  { %v295_v12 = vpop.permute.xlu0 %294 }
 0x15b   :  { %v313_v57 = vsel %vm310_vm1, %v293_v7, %v295_v12 }
 0x15c   :  { %v297_v11 = vpop.permute.xlu1 %296 }
 0x15d   :  { %v314_v60 = vsel %vm310_vm1, %v295_v12, %v297_v11  ;;  %v336_v0 = vsel %vm310_vm1, %v297_v11, %v293_v7  ;;  %v394_v12 = vadd.f32 %v1369_v43, %v313_v57 }
 0x15e   :  { %v299_v15 = vpop.permute.xlu0 %298  ;;  %v396_v22 = vadd.f32 %v1371_v44, %v314_v60  ;;  %v446_v25 = vadd.f32 %v1385_v51, %v336_v0 }
 0x15f   :  { %v337_v13 = vsel %vm310_vm1, %v303_v8, %v299_v15 }
 0x160   :  { %v301_v14 = vpop.permute.xlu1 %300 }
 0x161   :  { %v315_v23 = vsel %vm310_vm1, %v299_v15, %v301_v14  ;;  %v316_v7 = vsel %vm310_vm1, %v301_v14, %v303_v8 }
 0x162   :  { %v307_v20 = vpop.permute.xlu0 %306  ;;  %v400_v8 = vadd.f32 %v1375_v46, %v315_v23  ;;  %v402_v14 = vadd.f32 %v1379_v48, %v316_v7 }
 0x163   :  { %v318_v43 = vsel %vm310_vm1, %v307_v20, %v1397_v9 }
 0x164   :  { %v1399_v17 = vpop.permute.xlu1 %304  ;;  %v406_v57 = vadd.f32 %v1387_v52, %v318_v43 }
 0x165   :  { %v317_v44 = vsel %vm310_vm1, %v1399_v17, %v307_v20 }
 0x166   :  { %v404_v46 = vadd.f32 %v1383_v50, %v317_v44 }
 0x17e   :  { %v593_v26 = vpop.permute.xlu1 %592 }
 0x180   :  { %v595_v34 = vpop.permute.xlu0 %594 }
 0x181   :  { %v617_v40 = vsel %vm616_vm2, %v593_v26, %v595_v34 }
 0x182   :  { %v645_v58 = vadd.f32 %v617_v40, %v390_v33  ;;  %v609_v59 = vpop.permute.xlu1 %608  ;;  %v451_v33 = vadd.f32 %v1373_v45, %v337_v13 }
 0x184   :  { %v681_v6 = vadd.f32 %v1391_v2, %v645_v58  ;;  %v599_v16 = vpop.permute.xlu0 %598 }
 0x186   :  { %v713_v11 = vadd.f32 %v701_v29, %v681_v6  ;;  %v597_v24 = vpop.permute.xlu1 %596 }
 0x187   :  { %v618_v47 = vsel %vm616_vm2, %v595_v34, %v597_v24  ;;  %v641_v42 = vsel %vm616_vm2, %v597_v24, %v593_v26  ;;  %v338_v26 = vsel %vm310_vm1, %v1397_v9, %v1399_v17 }
 0x188   :  { %v646_v40 = vadd.f32 %v618_v47, %v392_v18  ;;  %v647_v15 = vadd.f32 %v641_v42, %v443_v10  ;;  %v603_v55 = vpop.permute.xlu0 %602  ;;  %v790_v45 = vmul.f32 %v1428_v32, %v713_v11  ;;  %v454_v17 = vadd.f32 %v1381_v49, %v338_v26 }
 0x189   :  { %v642_v51 = vsel %vm616_vm2, %v603_v55, %v599_v16 }
 0x18a   :  { %v682_v29 = vadd.f32 %v1391_v2, %v646_v40  ;;  %v683_v34 = vadd.f32 %v1391_v2, %v647_v15  ;;  %v650_v20 = vadd.f32 %v642_v51, %v446_v25  ;;  %v601_v56 = vpop.permute.xlu1 %600  ;;  %v823_v18 = vmul.f32 %v790_v45, %v713_v11 }
 0x18b   :  { %v619_v48 = vsel %vm616_vm2, %v599_v16, %v601_v56  ;;  %v620_v58 = vsel %vm616_vm2, %v601_v56, %v603_v55 }
 0x18c   :  { %v714_v60 = vadd.f32 %v702_v30, %v682_v29  ;;  %v715_v0 = vadd.f32 %v703_v31, %v683_v34  ;;  %v686_v13 = vadd.f32 %v1389_v1, %v650_v20  ;;  %v648_v6 = vadd.f32 %v619_v48, %v394_v12  ;;  %v607_v9 = vpop.permute.xlu0 %606 }
 0x18d   :  { %v649_v10 = vadd.f32 %v620_v58, %v396_v22  ;;  %v622_v2 = vsel %vm616_vm2, %v607_v9, %v609_v59 }
 0x18e   :  { %v943_v23 = vpack.c.bf16 %v714_v60, %v713_v11  ;;  %v944_v52 = vpack.c.bf16 %v715_v0, %v715_v0  ;;  %v718_v50 = vadd.f32 %v706_v35, %v686_v13  ;;  %v684_v16 = vadd.f32 %v1389_v1, %v648_v6  ;;  %v605_v7 = vpop.permute.xlu1 %604 }
 0x18f   :  { %v685_v30 = vadd.f32 %v1389_v1, %v649_v10  ;;  %v652_v31 = vadd.f32 %v622_v2, %v402_v14  ;;  %v621_v12 = vsel %vm616_vm2, %v605_v7, %v607_v9  ;;  %v643_v24 = vsel %vm616_vm2, %v609_v59, %v605_v7 }
 0x190   :  { %766 = vst [vmem:[%s1577_s5] sm:$0xff] %v943_v23  ;;  %767 = vst [vmem:[%s1577_s5 + $0x8] sm:$0xf] %v944_v52  ;;  %v946_v49 = vpack.c.bf16 %v718_v50, %v718_v50  ;;  %v716_v21 = vadd.f32 %v704_v41, %v684_v16  ;;  %v651_v35 = vadd.f32 %v621_v12, %v400_v8  ;;  %v611_v1 = vpop.permute.xlu0 %610 }
 0x191   :  { %v653_v22 = vadd.f32 %v643_v24, %v451_v33  ;;  %v717_v11 = vadd.f32 %v705_v53, %v685_v30  ;;  %v688_v59 = vadd.f32 %v1393_v3, %v652_v31  ;;  %v791_v25 = vmul.f32 %v1442_v38, %v714_v60 }
 0x192   :  { %v792_v47 = vmul.f32 %v1444_v39, %v715_v0  ;;  %769 = vst [vmem:[%s1577_s5 + $0x14] sm:$0xf] %v946_v49  ;;  %v687_v42 = vadd.f32 %v1393_v3, %v651_v35  ;;  %v613_v43 = vpop.permute.xlu1 %612  ;;  %v793_v33 = vmul.f32 %v1428_v32, %v716_v21  ;;  %v795_v27 = vmul.f32 %v1444_v39, %v718_v50 }
 0x193   :  { %v689_v41 = vadd.f32 %v1393_v3, %v653_v22  ;;  %v945_v53 = vpack.c.bf16 %v717_v11, %v716_v21  ;;  %v720_v44 = vadd.f32 %v708_v54, %v688_v59  ;;  %v623_v40 = vsel %vm616_vm2, %v611_v1, %v613_v43 }
 0x194   :  { %v802_v15 = vadd.f32 %v791_v25, %v790_v45  ;;  %v719_v55 = vadd.f32 %v707_v61, %v687_v42  ;;  %v654_v14 = vadd.f32 %v623_v40, %v404_v46  ;;  %v615_v3 = vpop.permute.xlu0 %614  ;;  %v824_v51 = vmul.f32 %v791_v25, %v714_v60 }
 0x195   :  { %v721_v8 = vadd.f32 %v709_v62, %v689_v41  ;;  %768 = vst [vmem:[%s1577_s5 + $0xc] sm:$0xff] %v945_v53  ;;  %v624_v26 = vsel %vm616_vm2, %v613_v43, %v615_v3  ;;  %v644_v54 = vsel %vm616_vm2, %v615_v3, %v611_v1  ;;  %v825_v34 = vmul.f32 %v792_v47, %v715_v0 }
 0x196   :  { %v803_v29 = vadd.f32 %v802_v15, %v792_v47  ;;  %v947_v45 = vpack.c.bf16 %v720_v44, %v719_v55  ;;  %v690_v28 = vadd.f32 %v1395_v4, %v654_v14  ;;  %v655_v61 = vadd.f32 %v624_v26, %v406_v57 }
 0x197   :  { %v948_v20 = vpack.c.bf16 %v721_v8, %v721_v8  ;;  %v656_v56 = vadd.f32 %v644_v54, %v454_v17  ;;  %v835_v62 = vadd.f32 %v824_v51, %v823_v18  ;;  %v794_v46 = vmul.f32 %v1442_v38, %v717_v11 }
 0x198   :  { %804 = vadd.xlane.f32.xlu1 %v803_v29  ;;  %v826_v48 = vmul.f32 %v793_v33, %v716_v21  ;;  %770 = vst [vmem:[%s1577_s5 + $0x18] sm:$0xff] %v947_v45  ;;  %v722_v58 = vadd.f32 %v710_v63, %v690_v28  ;;  %v691_v60 = vadd.f32 %v1395_v4, %v655_v61 }
 0x199   :  { %771 = vst [vmem:[%s1577_s5 + $0x20] sm:$0xf] %v948_v20  ;;  %v796_v57 = vmul.f32 %v1428_v32, %v719_v55  ;;  %v692_v0 = vadd.f32 %v1395_v4, %v656_v56  ;;  %v836_v13 = vadd.f32 %v835_v62, %v825_v34  ;;  %v806_v6 = vadd.f32 %v794_v46, %v793_v33 }
 0x19a   :  { %v827_v9 = vmul.f32 %v794_v46, %v717_v11  ;;  %v723_v17 = vadd.f32 %v711_v5, %v691_v60  ;;  %v797_v10 = vmul.f32 %v1442_v38, %v720_v44  ;;  %v828_v18 = vmul.f32 %v795_v27, %v718_v50 }
 0x19b   :  { %v724_v2 = vadd.f32 %v712_v19, %v692_v0  ;;  %837 = vadd.xlane.f32.xlu0 %v836_v13  ;;  %v799_v23 = vmul.f32 %v1428_v32, %v722_v58  ;;  %v807_v16 = vadd.f32 %v806_v6, %v795_v27  ;;  %v829_v7 = vmul.f32 %v796_v57, %v719_v55 }
 0x19c   :  { %v839_v63 = vadd.f32 %v827_v9, %v826_v48  ;;  %v949_v52 = vpack.c.bf16 %v723_v17, %v722_v58  ;;  %v810_v31 = vadd.f32 %v797_v10, %v796_v57  ;;  %v800_v12 = vmul.f32 %v1442_v38, %v723_v17 }
 0x19d   :  { %v950_v4 = vpack.c.bf16 %v724_v2, %v724_v2  ;;  %v798_v36 = vmul.f32 %v1444_v39, %v721_v8  ;;  %v830_v37 = vmul.f32 %v797_v10, %v720_v44  ;;  %v801_v5 = vmul.f32 %v1444_v39, %v724_v2 }
 0x19e   :  { %v840_v30 = vadd.f32 %v839_v63, %v828_v18  ;;  %772 = vst [vmem:[%s1577_s5 + $0x24] sm:$0xff] %v949_v52  ;;  %v814_v32 = vadd.f32 %v800_v12, %v799_v23  ;;  %v832_v19 = vmul.f32 %v799_v23, %v722_v58  ;;  %v833_v50 = vmul.f32 %v800_v12, %v723_v17 }
 0x19f   :  { %773 = vst [vmem:[%s1577_s5 + $0x2c] sm:$0xf] %v950_v4  ;;  %808 = vadd.xlane.f32.xlu0 %v807_v16  ;;  %v811_v24 = vadd.f32 %v810_v31, %v798_v36  ;;  %v843_v38 = vadd.f32 %v830_v37, %v829_v7  ;;  %v831_v35 = vmul.f32 %v798_v36, %v721_v8  ;;  %s1109_s5 = smov [#allocation2]  }
 0x1a0   :  { %841 = vadd.xlane.f32.xlu1 %v840_v30  ;;  %v815_v49 = vadd.f32 %v814_v32, %v801_v5  ;;  %v847_v21 = vadd.f32 %v833_v50, %v832_v19  ;;  %v834_v22 = vmul.f32 %v801_v5, %v724_v2  ;;  %s862_s12 = sshll.u32 %s1109_s5, 4  ;;  %s863_s12 = int_to_ptr.vmem [resolvable:$true] %s862_s12 }
 0x1a1   :  { %v844_v1 = vadd.f32 %v843_v38, %v831_v35  ;;  %s1062_s15 = scalar_lea.vmem %s863_s12, 512  ;;  %p1067_p1 = scmp.lt.s32.totalorder %s863_s12, %s863_s12 }
 0x1a2   :  { %v848_v11 = vadd.f32 %v847_v21, %v834_v22  ;;  %p1063_p0 = scmp.ne.s32.totalorder %s863_s12, %s1062_s15  ;;  %p1068_p2 = scmp.lt.s32.totalorder %s1062_s15, %s1062_s15 }
 0x1a3   :  { %812 = vadd.xlane.f32.xlu0 %v811_v24 }
 0x1a4   :  { %816 = vadd.xlane.f32.xlu1 %v815_v49  ;;  %p1069_p3 = por %p1068_p2, %p1067_p1 }
 0x1a6   :  { %p1070_p4 = pnand %p1069_p3, %p1063_p0 }
 0x1a7   :  { %845 = vadd.xlane.f32.xlu0 %v844_v1 }
 0x1a8   :  { %849 = vadd.xlane.f32.xlu1 %v848_v11 }
 0x221   :  { %v805_v39 = vpop.xlane.xlu1 %804 }
 0x222   :  { %819 = vst.msk [vmem:[#allocation2] sm:$0xff] %vm818_vm3, %v805_v39 }
 0x224   :  { %v838_v59 = vpop.xlane.xlu0 %837 }
 0x225   :  { %851 = vst.msk [vmem:[#allocation4] sm:$0xff] %vm818_vm3, %v838_v59 }
 0x228   :  { %v809_v25 = vpop.xlane.xlu0 %808 }
 0x229   :  { %v842_v47 = vpop.xlane.xlu1 %841  ;;  %820 = vst.msk [vmem:[#allocation2 + $0x8] sm:$0xff] %vm818_vm3, %v809_v25 }
 0x22a   :  { %852 = vst.msk [vmem:[#allocation4 + $0x8] sm:$0xff] %vm818_vm3, %v842_v47 }
 0x22c   :  { %v813_v42 = vpop.xlane.xlu0 %812 }
 0x22d   :  { %v817_v41 = vpop.xlane.xlu1 %816  ;;  %821 = vst.msk [vmem:[#allocation2 + $0x10] sm:$0xff] %vm818_vm3, %v813_v42 }
 0x22e   :  { %822 = vst.msk [vmem:[#allocation2 + $0x18] sm:$0xff] %vm818_vm3, %v817_v41 }
 0x22f   :  { %1073 = shalt.err (!%p1070_p4)
}
 0x230   :  { %s1111_s16 = smov 128   ;;  %s1112_s17 = smov 8   ;;  %v846_v43 = vpop.xlane.xlu0 %845 }
 0x231   :  { %868 = dma.vmem_to_hbm [thread:$0]  %s863_s12, 512, %s1578_s6, [#allocation3], %s1111_s16, %s1111_s16, %s1112_s17   ;;  %v850_v33 = vpop.xlane.xlu1 %849  ;;  %853 = vst.msk [vmem:[#allocation4 + $0x10] sm:$0xff] %vm818_vm3, %v846_v43 }
 0x232   :  { %854 = vst.msk [vmem:[#allocation4 + $0x18] sm:$0xff] %vm818_vm3, %v850_v33  ;;  %s1082_s3 = scalar_lea.vmem %s875_s14, 512  ;;  %p1087_p6 = scmp.lt.s32.totalorder %s875_s14, %s875_s14 }
 0x233   :  { %p1083_p5 = scmp.ne.s32.totalorder %s875_s14, %s1082_s3  ;;  %p1088_p7 = scmp.lt.s32.totalorder %s1082_s3, %s1082_s3 }
 0x235   :  { %p1089_p8 = por %p1088_p7, %p1087_p6 }
 0x237   :  { %p1090_p9 = pnand %p1089_p8, %p1083_p5 }
 0x239   :  { %1093 = shalt.err (!%p1090_p9)
}
 0x23a   :  { %880 = dma.vmem_to_hbm [thread:$0]  %s875_s14, 512, %s1579_s7, [#allocation5], %s1111_s16, %s1111_s16, %s1112_s17  }
 0x23b   :  { %1102 = dma.done.wait [#allocation3], 512  }
 0x23c   :  { %1103 = vsyncadd [#allocation3], 4294966784 }
 0x23d   :  { %1104 = dma.done.wait [#allocation5], 512  }
 0x23e   :  { %1105 = vsyncadd [#allocation5], 4294966784 }
 0x23f   :  { %889 = vsyncpa [#allocation3], 1 }
 0x240   :  { %890 = vsyncpa [#allocation5], 1 }

// kernel: _lambda_.33
= control target key start
LH: loop header
LB: loop body
LE: loop exit
PB: predicated region body
PF: predicated region fallthrough
CT: control target
= control target key end

     0   :  { %v1519_v1 = vmov 0   ;;  %vm178_vm0 = vcmask 785408   ;;  %s1520_s22 = smov 127   ;;  %vm401_vm1 = vcmask 1039360   ;;  %vm879_vm2 = vcmask 1031168   ;;  %s2268_s1 = inlined_call_operand.vmem [shape: bf16[96,384], index: 1, kind: input, shape index: {}]   ;;  %s2269_s0 = inlined_call_operand.vmem [shape: bf16[3,64,96], index: 0, kind: input, shape index: {}]   ;;  %s2270_s2 = inlined_call_operand.vmem [shape: f32[64,1], index: 2, kind: input, shape index: {}]   ;;  %s2271_s3 = inlined_call_operand.vmem [shape: f32[1,384], index: 3, kind: input, shape index: {}]   ;;  %s2272_s4 = inlined_call_operand.vmem [shape: bf16[64,384], index: 4, kind: output, shape index: {0}]   ;;  %s2273_s5 = inlined_call_operand.vmem [shape: f32[1,64,1], index: 5, kind: output, shape index: {1}]   ;;  %s2274_s6 = inlined_call_operand.vmem [shape: f32[1,64,1], index: 6, kind: output, shape index: {2}]  }
   0x1   :  { %v1560_v0 = vld [vmem:[%s2268_s1 + $0x7c] ss:$12 sps:$4 sm:$0xff]   ;;  %223 = vmatprep.mubr.bf16.mxu0 %v1519_v1  ;;  %1482 = vset.pattern.permute.xlu1 %v1519_v1  ;;  %v1567_v2 = vld [vmem:[%s2268_s1 + $0x80] ss:$12 sps:$4 sm:$0xff]   ;;  %v1574_v3 = vld [vmem:[%s2268_s1 + $0x78] ss:$12 sps:$4 sm:$0xff]  }
   0x2   :  { %1481 = vset.pattern.permute.xlu0 %v1519_v1  ;;  %195 = vmatprep.subr.bf16.mxu0 %v1560_v0  ;;  %v1580_v4 = vld [vmem:[%s2268_s1 + $0x64] ss:$12 sps:$4 sm:$0xff]   ;;  %v1587_v5 = vld [vmem:[%s2268_s1 + $0x68] ss:$12 sps:$4 sm:$0xff]   ;;  %v1592_v6 = vld [vmem:[%s2268_s1 + $0x60] ss:$12 sps:$4 sm:$0xff]  }
   0x3   :  { %1418 = vmatprep.subr.bf16.mxu1 %v1567_v2  ;;  %196 = vmatpush1.bf16.msra.mxu0 %v1574_v3  ;;  %v1598_v7 = vld [vmem:[%s2268_s1 + $0x4c] ss:$12 sps:$4 sm:$0xff]   ;;  %v1604_v8 = vld [vmem:[%s2268_s1 + $0x50] ss:$12 sps:$4 sm:$0xff]   ;;  %v1609_v9 = vld [vmem:[%s2268_s1 + $0x48] ss:$12 sps:$4 sm:$0xff]  }
   0x4   :  { %1419 = vmatpush3.bf16.msra.mxu1 %v1567_v2  ;;  %197 = vmatprep.subr.bf16.mxu0 %v1580_v4  ;;  %v1616_v10 = vld [vmem:[%s2268_s1 + $0x34] ss:$12 sps:$4 sm:$0xff]   ;;  %v1623_v11 = vld [vmem:[%s2268_s1 + $0x38] ss:$12 sps:$4 sm:$0xff]   ;;  %v1630_v12 = vld [vmem:[%s2268_s1 + $0x30] ss:$12 sps:$4 sm:$0xff]  }
   0x5   :  { %1420 = vmatprep.subr.bf16.mxu1 %v1587_v5  ;;  %v1637_v13 = vld [vmem:[%s2268_s1 + $0x1c] ss:$12 sps:$4 sm:$0xff]   ;;  %v1642_v14 = vld [vmem:[%s2268_s1 + $0x20] ss:$12 sps:$4 sm:$0xff]   ;;  %v1650_v16 = vld [vmem:[%s2268_s1 + $0x18] ss:$12 sps:$4 sm:$0xff]  }
   0x6   :  { %v1507_v15 = vld [vmem:[%s2269_s0 + $0x20] sm:$0xff]   ;;  %v1664_v18 = vld [vmem:[%s2268_s1 + $0x8] ss:$12 sps:$4 sm:$0xff]   ;;  %v1510_v24 = vld [vmem:[%s2269_s0 + $0x38] sm:$0xff]   ;;  %vm1201_vm3 = vcmask 7168  }
   0x7   :  { %198 = vmatpush1.bf16.msra.mxu0 %v1592_v6  ;;  %v1657_v17 = vld [vmem:[%s2268_s1 + $0x4] ss:$12 sps:$4 sm:$0xff]   ;;  %1430 = vmatprep.mubr.msk.bf16.mxu1 %vm178_vm0, %v1507_v15  ;;  %v1672_v19 = vld [vmem:[%s2268_s1] ss:$12 sps:$4 sm:$0xff]   ;;  %v963_v26 = vld [vmem:[%s2270_s2 + $0x18] sm:$0xff] }
   0x8   :  { %1421 = vmatpush3.bf16.msra.mxu1 %v1587_v5  ;;  %199 = vmatprep.subr.bf16.mxu0 %v1598_v7  ;;  %v1508_v20 = vld [vmem:[%s2269_s0 + $0x28] sm:$0xff]   ;;  %v1509_v21 = vld [vmem:[%s2269_s0 + $0x30] sm:$0xff]   ;;  %v960_v23 = vld [vmem:[%s2270_s2] sm:$0xff] }
   0x9   :  { %1422 = vmatprep.subr.bf16.mxu1 %v1604_v8  ;;  %v961_v22 = vld [vmem:[%s2270_s2 + $0x8] sm:$0xff]  ;;  %970 = vperm.xlu0 %1481, %v960_v23   ;;  %v962_v25 = vld [vmem:[%s2270_s2 + $0x10] sm:$0xff]  ;;  %v964_v27 = vld [vmem:[%s2270_s2 + $0x20] sm:$0xff] }
   0xa   :  { %975 = vperm.xlu1 %1482, %v961_v22   ;;  %v965_v28 = vld [vmem:[%s2270_s2 + $0x28] sm:$0xff]  ;;  %v966_v29 = vld [vmem:[%s2270_s2 + $0x30] sm:$0xff]  ;;  %v1511_v30 = vld [vmem:[%s2269_s0] sm:$0xff]  }
   0xb   :  { %200 = vmatpush1.bf16.msra.mxu0 %v1609_v9  ;;  %v967_v31 = vld [vmem:[%s2270_s2 + $0x38] sm:$0xff]  ;;  %v1512_v32 = vld [vmem:[%s2269_s0 + $0x8] sm:$0xff]   ;;  %v1513_v33 = vld [vmem:[%s2269_s0 + $0x10] sm:$0xff]  }
   0xc   :  { %1423 = vmatpush3.bf16.msra.mxu1 %v1604_v8  ;;  %201 = vmatprep.subr.bf16.mxu0 %v1616_v10  ;;  %v1514_v34 = vld [vmem:[%s2269_s0 + $0x18] sm:$0xff]   ;;  %v1515_v35 = vld [vmem:[%s2269_s0 + $0x40] sm:$0xff]   ;;  %v1516_v36 = vld [vmem:[%s2269_s0 + $0x48] sm:$0xff]  }
   0xd   :  { %1424 = vmatprep.subr.bf16.mxu1 %v1623_v11  ;;  %985 = vperm.xlu0 %1481, %v963_v26   ;;  %v1517_v37 = vld [vmem:[%s2269_s0 + $0x50] sm:$0xff]   ;;  %v1518_v38 = vld [vmem:[%s2269_s0 + $0x58] sm:$0xff]   ;;  %s1521_s0 = smov 126  }
   0xe   :  { %980 = vperm.xlu1 %1482, %v962_v25  }
   0xf   :  { %202 = vmatpush1.bf16.msra.mxu0 %v1630_v12 }
  0x10   :  { %1425 = vmatpush3.bf16.msra.mxu1 %v1623_v11  ;;  %203 = vmatprep.subr.bf16.mxu0 %v1637_v13 }
  0x11   :  { %1426 = vmatprep.subr.bf16.mxu1 %v1642_v14  ;;  %995 = vperm.xlu0 %1481, %v965_v28  }
  0x12   :  { %990 = vperm.xlu1 %1482, %v964_v27  }
  0x13   :  { %204 = vmatpush1.bf16.msra.mxu0 %v1650_v16 }
  0x14   :  { %1427 = vmatpush3.bf16.msra.mxu1 %v1642_v14  ;;  %205 = vmatprep.subr.bf16.mxu0 %v1657_v17 }
  0x15   :  { %1428 = vmatprep.subr.bf16.mxu1 %v1664_v18  ;;  %1005 = vperm.xlu0 %1481, %v967_v31  }
  0x16   :  { %1000 = vperm.xlu1 %1482, %v966_v29  }
  0x17   :  { %206 = vmatpush1.bf16.msra.mxu0 %v1672_v19 }
  0x18   :  { %1429 = vmatpush3.bf16.msra.mxu1 %v1664_v18  ;;  %1438 = vmatprep.subr.bf16.mxu0 %v1567_v2 }
  0x19   :  { %494 = vmatprep.subr.bf16.mxu1 %v1560_v0 }
  0x1a   :  { %1316 = vmatmul.mubr.msk.bf16.vlgmr.msra.gmra.mxu0 %vm178_vm0, %v1507_v15 }
  0x1b   :  { %1431 = vmatmul.mubr.msk.bf16.vlgmr.msra.gmra.mxu1 %vm178_vm0, %v1508_v20  ;;  %1439 = vmatpush3.bf16.msra.mxu0 %v1567_v2 }
  0x1c   :  { %495 = vmatpush1.bf16.msra.mxu1 %v1574_v3  ;;  %1440 = vmatprep.subr.bf16.mxu0 %v1587_v5 }
  0x1d   :  { %496 = vmatprep.subr.bf16.mxu1 %v1580_v4  ;;  %233 = vmatprep.mubr.bf16.mxu0 %v1519_v1 }
  0x1e   :  { %1434 = vmatprep.mubr.msk.bf16.mxu1 %vm178_vm0, %v1509_v21 }
  0x1f   :  { %1441 = vmatpush3.bf16.msra.mxu0 %v1587_v5 }
  0x20   :  { %497 = vmatpush1.bf16.msra.mxu1 %v1592_v6  ;;  %1442 = vmatprep.subr.bf16.mxu0 %v1604_v8 }
  0x21   :  { %498 = vmatprep.subr.bf16.mxu1 %v1598_v7 }
  0x22   :  { %1317 = vmatmul.mubr.msk.bf16.gmra.mxu0 %vm178_vm0, %v1508_v20 }
  0x23   :  { %1435 = vmatmul.mubr.msk.bf16.gmra.mxu1 %vm178_vm0, %v1510_v24  ;;  %1443 = vmatpush3.bf16.msra.mxu0 %v1604_v8 }
  0x24   :  { %499 = vmatpush1.bf16.msra.mxu1 %v1609_v9  ;;  %243 = vmatprep.mubr.bf16.mxu0 %v1519_v1 }
  0x25   :  { %500 = vmatprep.subr.bf16.mxu1 %v1616_v10  ;;  %1444 = vmatprep.subr.bf16.mxu0 %v1623_v11 }
  0x26   :  { %522 = vmatprep.mubr.bf16.mxu1 %v1519_v1 }
  0x27   :  { %1445 = vmatpush3.bf16.msra.mxu0 %v1623_v11 }
  0x28   :  { %501 = vmatpush1.bf16.msra.mxu1 %v1630_v12  ;;  %1446 = vmatprep.subr.bf16.mxu0 %v1642_v14 }
  0x29   :  { %502 = vmatprep.subr.bf16.mxu1 %v1637_v13 }
  0x2a   :  { %1318 = vmatmul.mubr.msk.bf16.gmra.mxu0 %vm178_vm0, %v1509_v21 }
  0x2b   :  { %253 = vmatprep.mubr.bf16.mxu0 %v1519_v1  ;;  %1447 = vmatpush3.bf16.msra.mxu0 %v1642_v14 }
  0x2c   :  { %503 = vmatpush1.bf16.msra.mxu1 %v1650_v16  ;;  %1448 = vmatprep.subr.bf16.mxu0 %v1664_v18 }
  0x2d   :  { %504 = vmatprep.subr.bf16.mxu1 %v1657_v17 }
  0x2f   :  { %1449 = vmatpush3.bf16.msra.mxu0 %v1664_v18 }
  0x30   :  { %505 = vmatpush1.bf16.msra.mxu1 %v1672_v19  ;;  %673 = vmatprep.subr.bf16.mxu0 %v1560_v0 }
  0x31   :  { %1458 = vmatprep.subr.bf16.mxu1 %v1567_v2 }
  0x32   :  { %1319 = vmatmul.mubr.msk.bf16.gmra.mxu0 %vm178_vm0, %v1510_v24 }
  0x33   :  { %1328 = vmatmul.mubr.msk.bf16.vlgmr.msra.gmra.mxu1 %vm178_vm0, %v1511_v30  ;;  %1450 = vmatprep.mubr.msk.bf16.mxu0 %vm178_vm0, %v1511_v30 }
  0x34   :  { %1459 = vmatpush3.bf16.msra.mxu1 %v1567_v2  ;;  %532 = vmatprep.mubr.bf16.mxu1 %v1519_v1 }
  0x35   :  { %1460 = vmatprep.subr.bf16.mxu1 %v1587_v5 }
  0x38   :  { %1461 = vmatpush3.bf16.msra.mxu1 %v1587_v5 }
  0x39   :  { %1462 = vmatprep.subr.bf16.mxu1 %v1604_v8 }
  0x3a   :  { %1451 = vmatmul.mubr.msk.bf16.vlgmr.msra.gmra.mxu0 %vm178_vm0, %v1512_v32 }
  0x3b   :  { %1329 = vmatmul.mubr.msk.bf16.gmra.mxu1 %vm178_vm0, %v1512_v32  ;;  %674 = vmatpush1.bf16.msra.mxu0 %v1574_v3 }
  0x3c   :  { %542 = vmatprep.mubr.bf16.mxu1 %v1519_v1  ;;  %675 = vmatprep.subr.bf16.mxu0 %v1580_v4 }
  0x3d   :  { %1454 = vmatprep.mubr.msk.bf16.mxu0 %vm178_vm0, %v1513_v33  ;;  %1463 = vmatpush3.bf16.msra.mxu1 %v1604_v8 }
  0x3e   :  { %1464 = vmatprep.subr.bf16.mxu1 %v1623_v11 }
  0x3f   :  { %676 = vmatpush1.bf16.msra.mxu0 %v1592_v6 }
  0x40   :  { %677 = vmatprep.subr.bf16.mxu0 %v1598_v7 }
  0x41   :  { %1465 = vmatpush3.bf16.msra.mxu1 %v1623_v11 }
  0x42   :  { %1455 = vmatmul.mubr.msk.bf16.gmra.mxu0 %vm178_vm0, %v1514_v34  ;;  %1466 = vmatprep.subr.bf16.mxu1 %v1642_v14 }
  0x43   :  { %1330 = vmatmul.mubr.msk.bf16.gmra.mxu1 %vm178_vm0, %v1513_v33  ;;  %678 = vmatpush1.bf16.msra.mxu0 %v1609_v9 }
  0x44   :  { %552 = vmatprep.mubr.bf16.mxu1 %v1519_v1  ;;  %679 = vmatprep.subr.bf16.mxu0 %v1616_v10 }
  0x45   :  { %1467 = vmatpush3.bf16.msra.mxu1 %v1642_v14  ;;  %701 = vmatprep.mubr.bf16.mxu0 %v1519_v1 }
  0x46   :  { %1468 = vmatprep.subr.bf16.mxu1 %v1664_v18 }
  0x47   :  { %680 = vmatpush1.bf16.msra.mxu0 %v1630_v12 }
  0x48   :  { %681 = vmatprep.subr.bf16.mxu0 %v1637_v13 }
  0x49   :  { %1469 = vmatpush3.bf16.msra.mxu1 %v1664_v18 }
  0x4b   :  { %1331 = vmatmul.mubr.msk.bf16.gmra.mxu1 %vm178_vm0, %v1514_v34  ;;  %682 = vmatpush1.bf16.msra.mxu0 %v1650_v16 }
  0x4c   :  { %1470 = vmatprep.mubr.msk.bf16.mxu1 %vm178_vm0, %v1515_v35  ;;  %683 = vmatprep.subr.bf16.mxu0 %v1657_v17 }
  0x4f   :  { %684 = vmatpush1.bf16.msra.mxu0 %v1672_v19 }
  0x52   :  { %1348 = vmatmul.mubr.msk.bf16.vlgmr.msra.gmra.mxu0 %vm178_vm0, %v1515_v35 }
  0x53   :  { %1471 = vmatmul.mubr.msk.bf16.vlgmr.msra.gmra.mxu1 %vm178_vm0, %v1516_v36  ;;  %711 = vmatprep.mubr.bf16.mxu0 %v1519_v1 }
  0x54   :  { %1474 = vmatprep.mubr.msk.bf16.mxu1 %vm178_vm0, %v1517_v37 }
  0x5a   :  { %1349 = vmatmul.mubr.msk.bf16.gmra.mxu0 %vm178_vm0, %v1516_v36 }
  0x5b   :  { %1475 = vmatmul.mubr.msk.bf16.gmra.mxu1 %vm178_vm0, %v1518_v38  ;;  %721 = vmatprep.mubr.bf16.mxu0 %v1519_v1 }
  0x62   :  { %1350 = vmatmul.mubr.msk.bf16.gmra.mxu0 %vm178_vm0, %v1517_v37 }
  0x63   :  { %731 = vmatprep.mubr.bf16.mxu0 %v1519_v1 }
  0x6a   :  { %1351 = vmatmul.mubr.msk.bf16.gmra.mxu0 %vm178_vm0, %v1518_v38 }
  0xda   :  { %v225_v39 = vpop.f32.mrf.mxu0 }
  0xdb   :  { %v1432_v40 = vpop.f32.mrf.mxu1  ;;  %353 = vrot.lane.b32.xlu0 %v225_v39, %s1520_s22 }
  0xdc   :  { %v227_v41 = vpop.f32.mrf.mxu0 }
  0xdd   :  { %v298_v42 = vpop.f32.mrf.mxu1 }
  0xde   :  { %357 = vrot.lane.b32.xlu1 %v298_v42, %s1520_s22  ;;  %v229_v43 = vpop.f32.mrf.mxu0 }
  0xdf   :  { %v1433_v44 = vpop.f32.mrf.mxu1  ;;  %369 = vrot.lane.b32.xlu0 %v1432_v40, %s1520_s22 }
  0xe0   :  { %v231_v45 = vpop.f32.mrf.mxu0 }
  0xe1   :  { %v301_v46 = vpop.f32.mrf.mxu1 }
  0xe2   :  { %359 = vrot.lane.b32.xlu1 %v229_v43, %s1520_s22  ;;  %v235_v47 = vpop.f32.mrf.mxu0 }
  0xe3   :  { %v1436_v48 = vpop.f32.mrf.mxu1  ;;  %355 = vrot.lane.b32.xlu0 %v227_v41, %s1520_s22 }
  0xe4   :  { %v237_v49 = vpop.f32.mrf.mxu0 }
  0xe5   :  { %v314_v51 = vpop.f32.mrf.mxu1 }
  0xe6   :  { %375 = vrot.lane.b32.xlu1 %v1433_v44, %s1520_s22  ;;  %v239_v50 = vpop.f32.mrf.mxu0 }
  0xe7   :  { %361 = vrot.lane.b32.xlu0 %v231_v45, %s1520_s22  ;;  %v1437_v54 = vpop.f32.mrf.mxu1  ;;  %v1908_v45 = vpop.permute.xlu0 %970 }
  0xe8   :  { %v241_v52 = vpop.f32.mrf.mxu0 }
  0xe9   :  { %v317_v57 = vpop.f32.mrf.mxu1 }
  0xea   :  { %363 = vrot.lane.b32.xlu1 %v301_v46, %s1520_s22  ;;  %v245_v53 = vpop.f32.mrf.mxu0  ;;  %v1911_v46 = vpop.permute.xlu1 %975 }
  0xeb   :  { %365 = vrot.lane.b32.xlu0 %v235_v47, %s1520_s22 }
  0xec   :  { %v247_v55 = vpop.f32.mrf.mxu0 }
  0xee   :  { %367 = vrot.lane.b32.xlu1 %v237_v49, %s1520_s22  ;;  %v249_v56 = vpop.f32.mrf.mxu0 }
  0xef   :  { %393 = vrot.lane.b32.xlu0 %v1436_v48, %s1520_s22  ;;  %v1915_v48 = vpop.permute.xlu0 %985 }
  0xf0   :  { %v251_v58 = vpop.f32.mrf.mxu0 }
  0xf2   :  { %371 = vrot.lane.b32.xlu1 %v239_v50, %s1520_s22  ;;  %v255_v59 = vpop.f32.mrf.mxu0  ;;  %v1918_v50 = vpop.permute.xlu1 %980 }
  0xf3   :  { %v1829_v60 = vpop.f32.mrf.mxu1  ;;  %381 = vrot.lane.b32.xlu0 %v314_v51, %s1520_s22  ;;  %v1921_v51 = vpop.permute.xlu0 %995 }
  0xf4   :  { %v257_v61 = vpop.f32.mrf.mxu0  ;;  %2286 = vst [vmem:[#allocation6_spill] sm:$0xff] %v1921_v51 }
  0xf5   :  { %v1832_v62 = vpop.f32.mrf.mxu1 }
  0xf6   :  { %399 = vrot.lane.b32.xlu1 %v1437_v54, %s1520_s22  ;;  %v259_v63 = vpop.f32.mrf.mxu0 }
  0xf7   :  { %v1835_v0 = vpop.f32.mrf.mxu1  ;;  %373 = vrot.lane.b32.xlu0 %v241_v52, %s1520_s22  ;;  %v1923_v52 = vpop.permute.xlu1 %990 }
  0xf8   :  { %v261_v1 = vpop.f32.mrf.mxu0  ;;  %2287 = vst [vmem:[#allocation7_spill] sm:$0xff] %v1923_v52 }
  0xf9   :  { %v1838_v2 = vpop.f32.mrf.mxu1 }
  0xfa   :  { %387 = vrot.lane.b32.xlu1 %v317_v57, %s1520_s22  ;;  %v1843_v4 = vpop.f32.mrf.mxu0 }
  0xfb   :  { %v1841_v3 = vpop.f32.mrf.mxu1  ;;  %377 = vrot.lane.b32.xlu0 %v245_v53, %s1520_s22  ;;  %v1925_v53 = vpop.permute.xlu0 %1005 }
  0xfc   :  { %v1848_v6 = vpop.f32.mrf.mxu0  ;;  %2288 = vst [vmem:[#allocation8_spill] sm:$0xff] %v1925_v53  ;;  %v1927_v54 = vpop.permute.xlu1 %1000 }
  0xfd   :  { %v1846_v5 = vpop.f32.mrf.mxu1  ;;  %2289 = vst [vmem:[#allocation9_spill] sm:$0xff] %v1927_v54 }
  0xfe   :  { %379 = vrot.lane.b32.xlu1 %v247_v55, %s1520_s22  ;;  %v1853_v8 = vpop.f32.mrf.mxu0 }
  0xff   :  { %v1851_v7 = vpop.f32.mrf.mxu1  ;;  %385 = vrot.lane.b32.xlu0 %v251_v58, %s1520_s22 }
 0x100   :  { %v1858_v10 = vpop.f32.mrf.mxu0 }
 0x101   :  { %v1856_v9 = vpop.f32.mrf.mxu1 }
 0x102   :  { %383 = vrot.lane.b32.xlu1 %v249_v56, %s1520_s22  ;;  %v1866_v13 = vpop.f32.mrf.mxu0 }
 0x103   :  { %v1861_v11 = vpop.f32.mrf.mxu1  ;;  %389 = vrot.lane.b32.xlu0 %v255_v59, %s1520_s22 }
 0x104   :  { %v1872_v15 = vpop.f32.mrf.mxu0 }
 0x105   :  { %v1864_v12 = vpop.f32.mrf.mxu1 }
 0x106   :  { %391 = vrot.lane.b32.xlu1 %v257_v61, %s1520_s22  ;;  %v1879_v18 = vpop.f32.mrf.mxu0 }
 0x107   :  { %v1869_v14 = vpop.f32.mrf.mxu1  ;;  %397 = vrot.lane.b32.xlu0 %v261_v1, %s1520_s22  ;;  %2282 = vst [vmem:[#allocation2_spill] sm:$0xff] %v1879_v18 }
 0x108   :  { %v1885_v21 = vpop.f32.mrf.mxu0 }
 0x109   :  { %v1874_v16 = vpop.f32.mrf.mxu1 }
 0x10a   :  { %395 = vrot.lane.b32.xlu1 %v259_v63, %s1520_s22 }
 0x10b   :  { %v1877_v17 = vpop.f32.mrf.mxu1 }
 0x10d   :  { %v1881_v19 = vpop.f32.mrf.mxu1 }
 0x10e   :  { %2283 = vst [vmem:[#allocation3_spill] sm:$0xff] %v1881_v19 }
 0x10f   :  { %v1883_v20 = vpop.f32.mrf.mxu1 }
 0x110   :  { %2284 = vst [vmem:[#allocation4_spill] sm:$0xff] %v1883_v20 }
 0x111   :  { %v1887_v22 = vpop.f32.mrf.mxu1 }
 0x112   :  { %2285 = vst [vmem:[#allocation5_spill] sm:$0xff] %v1887_v22  ;;  %v703_v23 = vpop.f32.mrf.mxu0 }
 0x113   :  { %v1472_v24 = vpop.f32.mrf.mxu1  ;;  %831 = vrot.lane.b32.xlu1 %v703_v23, %s1521_s0 }
 0x114   :  { %v705_v25 = vpop.f32.mrf.mxu0 }
 0x115   :  { %833 = vrot.lane.b32.xlu0 %v705_v25, %s1521_s0  ;;  %v776_v26 = vpop.f32.mrf.mxu1 }
 0x116   :  { %v707_v27 = vpop.f32.mrf.mxu0 }
 0x117   :  { %847 = vrot.lane.b32.xlu1 %v1472_v24, %s1521_s0  ;;  %v1473_v29 = vpop.f32.mrf.mxu1 }
 0x118   :  { %v709_v28 = vpop.f32.mrf.mxu0 }
 0x119   :  { %837 = vrot.lane.b32.xlu0 %v707_v27, %s1521_s0  ;;  %v779_v32 = vpop.f32.mrf.mxu1 }
 0x11a   :  { %v713_v30 = vpop.f32.mrf.mxu0 }
 0x11b   :  { %835 = vrot.lane.b32.xlu1 %v776_v26, %s1521_s0  ;;  %v1476_v34 = vpop.f32.mrf.mxu1 }
 0x11c   :  { %v715_v31 = vpop.f32.mrf.mxu0 }
 0x11d   :  { %853 = vrot.lane.b32.xlu0 %v1473_v29, %s1521_s0  ;;  %v792_v37 = vpop.f32.mrf.mxu1 }
 0x11e   :  { %v717_v33 = vpop.f32.mrf.mxu0 }
 0x11f   :  { %839 = vrot.lane.b32.xlu1 %v709_v28, %s1521_s0  ;;  %v1477_v39 = vpop.f32.mrf.mxu1 }
 0x120   :  { %v719_v35 = vpop.f32.mrf.mxu0 }
 0x121   :  { %841 = vrot.lane.b32.xlu0 %v779_v32, %s1521_s0  ;;  %v795_v41 = vpop.f32.mrf.mxu1 }
 0x122   :  { %v723_v36 = vpop.f32.mrf.mxu0 }
 0x123   :  { %843 = vrot.lane.b32.xlu1 %v713_v30, %s1521_s0 }
 0x124   :  { %v725_v38 = vpop.f32.mrf.mxu0 }
 0x125   :  { %845 = vrot.lane.b32.xlu0 %v715_v31, %s1521_s0 }
 0x126   :  { %v727_v40 = vpop.f32.mrf.mxu0 }
 0x127   :  { %871 = vrot.lane.b32.xlu1 %v1476_v34, %s1521_s0 }
 0x128   :  { %v729_v42 = vpop.f32.mrf.mxu0 }
 0x129   :  { %849 = vrot.lane.b32.xlu0 %v717_v33, %s1521_s0 }
 0x12a   :  { %v733_v43 = vpop.f32.mrf.mxu0 }
 0x12b   :  { %859 = vrot.lane.b32.xlu1 %v792_v37, %s1521_s0 }
 0x12c   :  { %v735_v44 = vpop.f32.mrf.mxu0 }
 0x12d   :  { %865 = vrot.lane.b32.xlu0 %v795_v41, %s1521_s0 }
 0x12e   :  { %v737_v47 = vpop.f32.mrf.mxu0 }
 0x12f   :  { %851 = vrot.lane.b32.xlu1 %v719_v35, %s1521_s0 }
 0x130   :  { %v739_v49 = vpop.f32.mrf.mxu0 }
 0x131   :  { %857 = vrot.lane.b32.xlu0 %v725_v38, %s1521_s0 }
 0x133   :  { %855 = vrot.lane.b32.xlu1 %v723_v36, %s1521_s0  ;;  %v1130_v36 = vlaneseq }
 0x135   :  { %861 = vrot.lane.b32.xlu0 %v727_v40, %s1521_s0  ;;  %v1131_v38 = vshrl.u32 %v1130_v36, 7 }
 0x137   :  { %863 = vrot.lane.b32.xlu1 %v729_v42, %s1521_s0  ;;  %v1132_v41 = vsub.s32 0, %v1131_v38 }
 0x139   :  { %869 = vrot.lane.b32.xlu0 %v735_v44, %s1521_s0 }
 0x13b   :  { %867 = vrot.lane.b32.xlu1 %v733_v43, %s1521_s0  ;;  %v1032_v43 = vld [vmem:[%s2271_s3] sm:$0x7] }
 0x13c   :  { %v1952_v52 = vrot.slane %v1032_v43, %v1132_v41 }
 0x13d   :  { %873 = vrot.lane.b32.xlu0 %v737_v47, %s1521_s0  ;;  %v1136_v47 = vsub.s32 1, %v1131_v38 }
 0x13f   :  { %875 = vrot.lane.b32.xlu1 %v739_v49, %s1521_s0  ;;  %v1140_v49 = vsub.s32 2, %v1131_v38 }
 0x141   :  { %877 = vrot.lane.b32.xlu0 %v1477_v39, %s1521_s0 }
 0x14d   :  { %v354_v55 = vpop.permute.xlu0 %353 }
 0x150   :  { %v358_v56 = vpop.permute.xlu1 %357 }
 0x151   :  { %v370_v57 = vpop.permute.xlu0 %369  ;;  %v450_v53 = vsel %vm401_vm1, %v358_v56, %v354_v55 }
 0x154   :  { %v360_v58 = vpop.permute.xlu1 %359 }
 0x155   :  { %v356_v59 = vpop.permute.xlu0 %355 }
 0x156   :  { %v402_v42 = vsel %vm401_vm1, %v354_v55, %v356_v59  ;;  %v403_v36 = vsel %vm401_vm1, %v356_v59, %v358_v56  ;;  %v598_v59 = vadd.f32 %v1848_v6, %v450_v53 }
 0x157   :  { %v525_v54 = vadd.f32 %v1829_v60, %v402_v42  ;;  %v1965_v42 = vrot.slane %v1032_v43, %v1136_v47 }
 0x158   :  { %v376_v61 = vpop.permute.xlu1 %375 }
 0x159   :  { %v362_v63 = vpop.permute.xlu0 %361 }
 0x15a   :  { %v404_v18 = vsel %vm401_vm1, %v360_v58, %v362_v63 }
 0x15c   :  { %v364_v1 = vpop.permute.xlu1 %363 }
 0x15d   :  { %v366_v23 = vpop.permute.xlu0 %365  ;;  %v405_v20 = vsel %vm401_vm1, %v362_v63, %v364_v1  ;;  %v451_v22 = vsel %vm401_vm1, %v364_v1, %v360_v58  ;;  %v1967_v63 = vrot.slane %v1032_v43, %v1140_v49  ;;  %v527_v58 = vadd.f32 %v1832_v62, %v403_v36 }
 0x15e   :  { %v529_v1 = vadd.f32 %v1835_v0, %v404_v18 }
 0x160   :  { %v368_v24 = vpop.permute.xlu1 %367 }
 0x161   :  { %v1929_v25 = vpop.permute.xlu0 %393  ;;  %v406_v38 = vsel %vm401_vm1, %v366_v23, %v368_v24  ;;  %v407_v55 = vsel %vm401_vm1, %v368_v24, %v370_v57 }
 0x162   :  { %v1978_v6 = vadd.f32 %v1846_v5, %v407_v55 }
 0x164   :  { %v372_v26 = vpop.permute.xlu1 %371 }
 0x165   :  { %v382_v27 = vpop.permute.xlu0 %381  ;;  %v453_v56 = vsel %vm401_vm1, %v376_v61, %v372_v26 }
 0x168   :  { %v1931_v28 = vpop.permute.xlu1 %399 }
 0x169   :  { %2290 = vst [vmem:[#allocation10_spill] sm:$0xff] %v1931_v28  ;;  %v374_v29 = vpop.permute.xlu0 %373  ;;  %v1975_v28 = vadd.f32 %v1841_v3, %v406_v38 }
 0x16a   :  { %v408_v62 = vsel %vm401_vm1, %v372_v26, %v374_v29  ;;  %v409_v0 = vsel %vm401_vm1, %v374_v29, %v376_v61 }
 0x16b   :  { %v1998_v26 = vadd.f32 %v1851_v7, %v408_v62 }
 0x16c   :  { %v1933_v30 = vpop.permute.xlu1 %387 }
 0x16d   :  { %v378_v32 = vpop.permute.xlu0 %377 }
 0x170   :  { %v380_v31 = vpop.permute.xlu1 %379 }
 0x171   :  { %v386_v34 = vpop.permute.xlu0 %385 }
 0x174   :  { %v1935_v33 = vpop.permute.xlu1 %383 }
 0x175   :  { %v1939_v37 = vpop.permute.xlu0 %389 }
 0x178   :  { %v1937_v35 = vpop.permute.xlu1 %391 }
 0x179   :  { %v1943_v40 = vpop.permute.xlu0 %397 }
 0x17a   :  { %2292 = vst [vmem:[#allocation12_spill] sm:$0xff] %v1943_v40  ;;  %v531_v40 = vadd.f32 %v1838_v2, %v405_v20  ;;  %v454_v2 = vsel %vm401_vm1, %v382_v27, %v378_v32 }
 0x17c   :  { %v1941_v39 = vpop.permute.xlu1 %395 }
 0x17d   :  { %2291 = vst [vmem:[#allocation11_spill] sm:$0xff] %v1941_v39  ;;  %v452_v39 = vsel %vm401_vm1, %v370_v57, %v366_v23  ;;  %v601_v23 = vadd.f32 %v1858_v10, %v451_v22  ;;  %v410_v10 = vsel %vm401_vm1, %v378_v32, %v380_v31  ;;  %v412_v22 = vsel %vm401_vm1, %v1935_v33, %v386_v34 }
 0x17e   :  { %v606_v24 = vadd.f32 %v1843_v4, %v452_v39  ;;  %v411_v4 = vsel %vm401_vm1, %v380_v31, %v382_v27  ;;  %v2001_v27 = vadd.f32 %v1856_v9, %v409_v0  ;;  %v2007_v29 = vadd.f32 %v1861_v11, %v410_v10 }
 0x17f   :  { %v2010_v31 = vadd.f32 %v1864_v12, %v411_v4  ;;  %v455_v32 = vsel %vm401_vm1, %v1933_v30, %v1935_v33 }
 0x180   :  { %v2027_v33 = vadd.f32 %v1885_v21, %v455_v32 }
 0x185   :  { %v832_v44 = vpop.permute.xlu1 %831 }
 0x187   :  { %v834_v51 = vpop.permute.xlu0 %833 }
 0x188   :  { %v880_v19 = vsel %vm879_vm2, %v832_v44, %v834_v51 }
 0x189   :  { %v1962_v60 = vpop.permute.xlu1 %847  ;;  %v936_v41 = vadd.f32 %v880_v19, %v525_v54  ;;  %v1981_v19 = vadd.f32 %v1853_v8, %v453_v56  ;;  %v413_v8 = vsel %vm401_vm1, %v386_v34, %v1933_v30 }
 0x18a   :  { %v2018_v9 = vadd.f32 %v1874_v16, %v413_v8 }
 0x18b   :  { %v838_v57 = vpop.permute.xlu0 %837  ;;  %v1008_v3 = vadd.f32 %v1908_v45, %v936_v41 }
 0x18d   :  { %v836_v18 = vpop.permute.xlu1 %835  ;;  %v1145_v12 = vmul.f32 %v1952_v52, %v1008_v3 }
 0x18e   :  { %v881_v20 = vsel %vm879_vm2, %v834_v51, %v836_v18  ;;  %v928_v5 = vsel %vm879_vm2, %v836_v18, %v832_v44  ;;  %v2004_v51 = vadd.f32 %v1872_v15, %v454_v2  ;;  %v2021_v15 = vadd.f32 %v1869_v14, %v412_v22 }
 0x18f   :  { %v937_v53 = vadd.f32 %v881_v20, %v527_v58  ;;  %v938_v54 = vadd.f32 %v928_v5, %v598_v59  ;;  %v1995_v61 = vpop.permute.xlu0 %853  ;;  %v1210_v41 = vmul.f32 %v1145_v12, %v1008_v3 }
 0x191   :  { %v1009_v34 = vadd.f32 %v1908_v45, %v937_v53  ;;  %v1010_v7 = vadd.f32 %v1908_v45, %v938_v54  ;;  %v840_v39 = vpop.permute.xlu1 %839 }
 0x192   :  { %v882_v11 = vsel %vm879_vm2, %v838_v57, %v840_v39 }
 0x193   :  { %v1372_v43 = vpack.c.bf16 %v1009_v34, %v1008_v3  ;;  %v1373_v44 = vpack.c.bf16 %v1010_v7, %v1010_v7  ;;  %v939_v47 = vadd.f32 %v882_v11, %v529_v1  ;;  %v842_v49 = vpop.permute.xlu0 %841  ;;  %v1146_v30 = vmul.f32 %v1965_v42, %v1009_v34 }
 0x194   :  { %v883_v45 = vsel %vm879_vm2, %v840_v39, %v842_v49  ;;  %v929_v16 = vsel %vm879_vm2, %v842_v49, %v838_v57  ;;  %v1147_v14 = vmul.f32 %v1967_v63, %v1010_v7 }
 0x195   :  { %1113 = vst [vmem:[%s2272_s4] sm:$0xff] %v1372_v43  ;;  %1114 = vst [vmem:[%s2272_s4 + $0x8] sm:$0xf] %v1373_v44  ;;  %v1011_v36 = vadd.f32 %v1911_v46, %v939_v47  ;;  %v940_v38 = vadd.f32 %v883_v45, %v531_v40  ;;  %v941_v55 = vadd.f32 %v929_v16, %v601_v23  ;;  %v844_v21 = vpop.permute.xlu1 %843 }
 0x196   :  { %v1169_v56 = vadd.f32 %v1146_v30, %v1145_v12  ;;  %v930_v59 = vsel %vm879_vm2, %v1962_v60, %v844_v21  ;;  %v1211_v58 = vmul.f32 %v1146_v30, %v1009_v34  ;;  %v1212_v1 = vmul.f32 %v1147_v14, %v1010_v7 }
 0x197   :  { %v1012_v57 = vadd.f32 %v1911_v46, %v940_v38  ;;  %v1013_v62 = vadd.f32 %v1911_v46, %v941_v55  ;;  %v944_v0 = vadd.f32 %v930_v59, %v606_v24  ;;  %v846_v2 = vpop.permute.xlu0 %845  ;;  %v1148_v4 = vmul.f32 %v1952_v52, %v1011_v36 }
 0x198   :  { %v1170_v10 = vadd.f32 %v1169_v56, %v1147_v14  ;;  %v884_v18 = vsel %vm879_vm2, %v844_v21, %v846_v2  ;;  %v885_v40 = vsel %vm879_vm2, %v846_v2, %v1962_v60  ;;  %v1234_v23 = vadd.f32 %v1211_v58, %v1210_v41  ;;  %v2293_v58 = vld [vmem:[#allocation10_spill] sm:$0xff] }
 0x199   :  { %v1374_v20 = vpack.c.bf16 %v1012_v57, %v1011_v36  ;;  %v1375_v5 = vpack.c.bf16 %v1013_v62, %v1013_v62  ;;  %v1016_v3 = vadd.f32 %v1918_v50, %v944_v0  ;;  %v942_v8 = vadd.f32 %v884_v18, %v1975_v28  ;;  %v2049_v22 = vpop.permute.xlu1 %871 }
 0x19a   :  { %1171 = vadd.xlane.f32.xlu1 %v1170_v10  ;;  %v943_v46 = vadd.f32 %v885_v40, %v1978_v6  ;;  %v1235_v24 = vadd.f32 %v1234_v23, %v1212_v1  ;;  %v1149_v53 = vmul.f32 %v1965_v42, %v1012_v57  ;;  %v1150_v54 = vmul.f32 %v1967_v63, %v1013_v62  ;;  %v2294_v1 = vld [vmem:[#allocation12_spill] sm:$0xff] }
 0x19b   :  { %v456_v60 = vsel %vm401_vm1, %v1929_v25, %v1939_v37  ;;  %1115 = vst [vmem:[%s2272_s4 + $0xc] sm:$0xff] %v1374_v20  ;;  %1116 = vst [vmem:[%s2272_s4 + $0x14] sm:$0xf] %v1375_v5  ;;  %v1377_v28 = vpack.c.bf16 %v1016_v3, %v1016_v3  ;;  %v1014_v6 = vadd.f32 %v1918_v50, %v942_v8  ;;  %v850_v32 = vpop.permute.xlu0 %849 }
 0x19c   :  { %v1213_v34 = vmul.f32 %v1148_v4, %v1011_v36  ;;  %v1015_v7 = vadd.f32 %v1918_v50, %v943_v46  ;;  %v931_v39 = vsel %vm879_vm2, %v1995_v61, %v850_v32  ;;  %1236 = vadd.xlane.f32.xlu0 %v1235_v24  ;;  %v1173_v11 = vadd.f32 %v1149_v53, %v1148_v4  ;;  %v2297_v46 = vld [vmem:[#allocation5_spill] sm:$0xff] }
 0x19d   :  { %v1214_v12 = vmul.f32 %v1149_v53, %v1012_v57  ;;  %v414_v43 = vsel %vm401_vm1, %v1939_v37, %v1937_v35  ;;  %1118 = vst [vmem:[%s2272_s4 + $0x20] sm:$0xf] %v1377_v28  ;;  %v947_v44 = vadd.f32 %v931_v39, %v1981_v19  ;;  %v860_v47 = vpop.permute.xlu1 %859  ;;  %v1215_v49 = vmul.f32 %v1150_v54, %v1013_v62 }
 0x19e   :  { %v1151_v50 = vmul.f32 %v1952_v52, %v1014_v6  ;;  %v1376_v30 = vpack.c.bf16 %v1015_v7, %v1014_v6  ;;  %v1174_v45 = vadd.f32 %v1173_v11, %v1150_v54  ;;  %v1152_v14 = vmul.f32 %v1965_v42, %v1015_v7 }
 0x19f   :  { %v1238_v16 = vadd.f32 %v1214_v12, %v1213_v34  ;;  %v2077_v36 = vadd.f32 %v1866_v13, %v456_v60  ;;  %v415_v37 = vsel %vm401_vm1, %v1937_v35, %v1929_v25  ;;  %v1019_v38 = vadd.f32 %v1915_v48, %v947_v44  ;;  %v866_v55 = vpop.permute.xlu0 %865  ;;  %v2295_v35 = vld [vmem:[#allocation11_spill] sm:$0xff]  ;;  %v2298_v60 = vld [vmem:[#allocation4_spill] sm:$0xff]  ;;  %v2299_v34 = vld [vmem:[#allocation2_spill] sm:$0xff] }
 0x1a0   :  { %v1216_v19 = vmul.f32 %v1151_v50, %v1014_v6  ;;  %1117 = vst [vmem:[%s2272_s4 + $0x18] sm:$0xff] %v1376_v30  ;;  %1175 = vadd.xlane.f32.xlu0 %v1174_v45  ;;  %v1153_v56 = vmul.f32 %v1967_v63, %v1016_v3  ;;  %v1177_v59 = vadd.f32 %v1152_v14, %v1151_v50 }
 0x1a1   :  { %v1239_v21 = vadd.f32 %v1238_v16, %v1215_v49  ;;  %v1217_v41 = vmul.f32 %v1152_v14, %v1015_v7  ;;  %v2088_v13 = vadd.f32 %v1877_v17, %v414_v43  ;;  %v417_v25 = vsel %vm401_vm1, %v2294_v1, %v2293_v58  ;;  %v852_v0 = vpop.permute.xlu1 %851  ;;  %v2296_v17 = vld [vmem:[#allocation3_spill] sm:$0xff] }
 0x1a2   :  { %v416_v57 = vsel %vm401_vm1, %v2295_v35, %v2294_v1  ;;  %v1379_v62 = vpack.c.bf16 %v1019_v38, %v1019_v38  ;;  %v886_v2 = vsel %vm879_vm2, %v850_v32, %v852_v0  ;;  %v887_v10 = vsel %vm879_vm2, %v852_v0, %v1995_v61  ;;  %v2300_v43 = vld [vmem:[#allocation7_spill] sm:$0xff] }
 0x1a3   :  { %1240 = vadd.xlane.f32.xlu1 %v1239_v21  ;;  %v1178_v18 = vadd.f32 %v1177_v59, %v1153_v56  ;;  %v1242_v40 = vadd.f32 %v1217_v41, %v1216_v19  ;;  %v557_v23 = vadd.f32 %v2296_v17, %v415_v37  ;;  %v457_v4 = vsel %vm401_vm1, %v2293_v58, %v2295_v35  ;;  %v858_v8 = vpop.permute.xlu0 %857  ;;  %v2301_v58 = vld [vmem:[#allocation6_spill] sm:$0xff] }
 0x1a4   :  { %1120 = vst [vmem:[%s2272_s4 + $0x2c] sm:$0xf] %v1379_v62  ;;  %v945_v20 = vadd.f32 %v886_v2, %v1998_v26  ;;  %v946_v5 = vadd.f32 %v887_v10, %v2001_v27  ;;  %v2109_v61 = vadd.f32 %v2297_v46, %v417_v25  ;;  %v889_v24 = vsel %vm879_vm2, %v858_v8, %v860_v47 }
 0x1a5   :  { %1179 = vadd.xlane.f32.xlu0 %v1178_v18  ;;  %v1218_v53 = vmul.f32 %v1153_v56, %v1016_v3  ;;  %v1156_v54 = vmul.f32 %v1967_v63, %v1019_v38  ;;  %v2114_v28 = vadd.f32 %v2298_v60, %v416_v57  ;;  %v949_v26 = vadd.f32 %v889_v24, %v2010_v31  ;;  %v856_v27 = vpop.permute.xlu1 %855 }
 0x1a6   :  { %v1017_v6 = vadd.f32 %v1915_v48, %v945_v20  ;;  %v1018_v32 = vadd.f32 %v1915_v48, %v946_v5  ;;  %v2120_v7 = vadd.f32 %v2299_v34, %v457_v4  ;;  %v888_v39 = vsel %vm879_vm2, %v856_v27, %v858_v8  ;;  %v2302_v20 = vld [vmem:[#allocation9_spill] sm:$0xff] }
 0x1a7   :  { %v932_v11 = vsel %vm879_vm2, %v860_v47, %v856_v27  ;;  %v1243_v3 = vadd.f32 %v1242_v40, %v1218_v53  ;;  %v1021_v44 = vadd.f32 %v2300_v43, %v949_v26  ;;  %v948_v49 = vadd.f32 %v888_v39, %v2007_v29  ;;  %v862_v30 = vpop.permute.xlu0 %861 }
 0x1a8   :  { %v1378_v12 = vpack.c.bf16 %v1018_v32, %v1017_v6  ;;  %v950_v50 = vadd.f32 %v932_v11, %v2004_v51  ;;  %v933_v48 = vsel %vm879_vm2, %v866_v55, %v862_v30  ;;  %v1154_v31 = vmul.f32 %v1952_v52, %v1017_v6 }
 0x1a9   :  { %1244 = vadd.xlane.f32.xlu0 %v1243_v3  ;;  %v1155_v45 = vmul.f32 %v1965_v42, %v1018_v32  ;;  %v1221_v16 = vmul.f32 %v1156_v54, %v1019_v38  ;;  %v1020_v47 = vadd.f32 %v2300_v43, %v948_v49  ;;  %v953_v29 = vadd.f32 %v933_v48, %v2027_v33  ;;  %v864_v51 = vpop.permute.xlu1 %863 }
 0x1aa   :  { %1119 = vst [vmem:[%s2272_s4 + $0x24] sm:$0xff] %v1378_v12  ;;  %v1022_v14 = vadd.f32 %v2300_v43, %v950_v50  ;;  %v1158_v37 = vmul.f32 %v1965_v42, %v1021_v44  ;;  %v890_v19 = vsel %vm879_vm2, %v862_v30, %v864_v51  ;;  %v891_v21 = vsel %vm879_vm2, %v864_v51, %v866_v55 }
 0x1ab   :  { %v1181_v56 = vadd.f32 %v1155_v45, %v1154_v31  ;;  %v1219_v59 = vmul.f32 %v1154_v31, %v1017_v6  ;;  %v1380_v38 = vpack.c.bf16 %v1021_v44, %v1020_v47  ;;  %v2140_v1 = vadd.f32 %v2301_v58, %v953_v29  ;;  %v870_v35 = vpop.permute.xlu0 %869 }
 0x1ac   :  { %v1381_v41 = vpack.c.bf16 %v1022_v14, %v1022_v14  ;;  %v951_v25 = vadd.f32 %v890_v19, %v2021_v15  ;;  %v952_v57 = vadd.f32 %v891_v21, %v2018_v9  ;;  %v893_v33 = vsel %vm879_vm2, %v870_v35, %v2049_v22 }
 0x1ad   :  { %v1182_v62 = vadd.f32 %v1181_v56, %v1156_v54  ;;  %v1157_v0 = vmul.f32 %v1952_v52, %v1020_v47  ;;  %1121 = vst [vmem:[%s2272_s4 + $0x30] sm:$0xff] %v1380_v38  ;;  %v1383_v15 = vpack.c.bf16 %v2140_v1, %v2140_v1  ;;  %v955_v9 = vadd.f32 %v893_v33, %v557_v23  ;;  %v868_v2 = vpop.permute.xlu1 %867 }
 0x1ae   :  { %1122 = vst [vmem:[%s2272_s4 + $0x38] sm:$0xf] %v1381_v41  ;;  %v1023_v55 = vadd.f32 %v2301_v58, %v951_v25  ;;  %v1159_v10 = vmul.f32 %v1967_v63, %v1022_v14  ;;  %v1024_v18 = vadd.f32 %v2301_v58, %v952_v57  ;;  %v892_v40 = vsel %vm879_vm2, %v868_v2, %v870_v35 }
 0x1af   :  { %v934_v17 = vsel %vm879_vm2, %v2049_v22, %v868_v2  ;;  %1183 = vadd.xlane.f32.xlu1 %v1182_v62  ;;  %v1185_v4 = vadd.f32 %v1158_v37, %v1157_v0  ;;  %1124 = vst [vmem:[%s2272_s4 + $0x44] sm:$0xf] %v1383_v15  ;;  %v1027_v5 = vadd.f32 %v2302_v20, %v955_v9  ;;  %v874_v46 = vpop.permute.xlu0 %873 }
 0x1b0   :  { %v954_v23 = vadd.f32 %v892_v40, %v2088_v13  ;;  %v956_v8 = vadd.f32 %v934_v17, %v2077_v36  ;;  %v1220_v24 = vmul.f32 %v1155_v45, %v1018_v32  ;;  %v1382_v53 = vpack.c.bf16 %v1024_v18, %v1023_v55 }
 0x1b1   :  { %v1186_v54 = vadd.f32 %v1185_v4, %v1159_v10  ;;  %v1222_v60 = vmul.f32 %v1157_v0, %v1020_v47  ;;  %v1223_v6 = vmul.f32 %v1158_v37, %v1021_v44  ;;  %v876_v27 = vpop.permute.xlu1 %875  ;;  %v1224_v39 = vmul.f32 %v1159_v10, %v1022_v14  ;;  %v2303_v47 = vld [vmem:[#allocation8_spill] sm:$0xff] }
 0x1b2   :  { %v1026_v22 = vadd.f32 %v2302_v20, %v954_v23  ;;  %v1028_v26 = vadd.f32 %v2302_v20, %v956_v8  ;;  %v1246_v34 = vadd.f32 %v1220_v24, %v1219_v59  ;;  %1123 = vst [vmem:[%s2272_s4 + $0x3c] sm:$0xff] %v1382_v53  ;;  %v894_v13 = vsel %vm879_vm2, %v874_v46, %v876_v27 }
 0x1b3   :  { %1187 = vadd.xlane.f32.xlu0 %v1186_v54  ;;  %v1250_v36 = vadd.f32 %v1223_v6, %v1222_v60  ;;  %v1160_v32 = vmul.f32 %v1952_v52, %v1023_v55  ;;  %v1161_v11 = vmul.f32 %v1965_v42, %v1024_v18  ;;  %v957_v43 = vadd.f32 %v894_v13, %v2114_v28  ;;  %v878_v49 = vpop.permute.xlu0 %877 }
 0x1b4   :  { %v1384_v3 = vpack.c.bf16 %v1027_v5, %v1026_v22  ;;  %v1385_v12 = vpack.c.bf16 %v1028_v26, %v1028_v26  ;;  %v1247_v44 = vadd.f32 %v1246_v34, %v1221_v16  ;;  %v895_v50 = vsel %vm879_vm2, %v876_v27, %v878_v49 }
 0x1b5   :  { %v935_v30 = vsel %vm879_vm2, %v878_v49, %v874_v46  ;;  %v1251_v48 = vadd.f32 %v1250_v36, %v1224_v39  ;;  %v958_v31 = vadd.f32 %v895_v50, %v2109_v61  ;;  %v1162_v45 = vmul.f32 %v1967_v63, %v2140_v1 }
 0x1b6   :  { %1125 = vst [vmem:[%s2272_s4 + $0x48] sm:$0xff] %v1384_v3  ;;  %1126 = vst [vmem:[%s2272_s4 + $0x50] sm:$0xf] %v1385_v12  ;;  %1248 = vadd.xlane.f32.xlu1 %v1247_v44  ;;  %v959_v28 = vadd.f32 %v935_v30, %v2120_v7  ;;  %v1189_v16 = vadd.f32 %v1161_v11, %v1160_v32  ;;  %v1029_v14 = vadd.f32 %v2303_v47, %v957_v43 }
 0x1b7   :  { %1252 = vadd.xlane.f32.xlu0 %v1251_v48  ;;  %v1163_v29 = vmul.f32 %v1952_v52, %v1026_v22  ;;  %v1164_v51 = vmul.f32 %v1965_v42, %v1027_v5  ;;  %v1225_v37 = vmul.f32 %v1160_v32, %v1023_v55  ;;  %v1030_v19 = vadd.f32 %v2303_v47, %v958_v31 }
 0x1b8   :  { %v1031_v21 = vadd.f32 %v2303_v47, %v959_v28  ;;  %v1190_v56 = vadd.f32 %v1189_v16, %v1162_v45  ;;  %v1226_v61 = vmul.f32 %v1161_v11, %v1024_v18  ;;  %v1165_v7 = vmul.f32 %v1967_v63, %v1028_v26 }
 0x1b9   :  { %v1193_v59 = vadd.f32 %v1164_v51, %v1163_v29  ;;  %v1228_v38 = vmul.f32 %v1163_v29, %v1026_v22  ;;  %v1229_v41 = vmul.f32 %v1164_v51, %v1027_v5  ;;  %v1386_v58 = vpack.c.bf16 %v1030_v19, %v1029_v14 }
 0x1ba   :  { %v1387_v25 = vpack.c.bf16 %v1031_v21, %v1031_v21  ;;  %1191 = vadd.xlane.f32.xlu1 %v1190_v56  ;;  %v1227_v35 = vmul.f32 %v1162_v45, %v2140_v1  ;;  %v1254_v57 = vadd.f32 %v1226_v61, %v1225_v37  ;;  %v1166_v0 = vmul.f32 %v1952_v52, %v1029_v14 }
 0x1bb   :  { %v1194_v33 = vadd.f32 %v1193_v59, %v1165_v7  ;;  %v1258_v62 = vadd.f32 %v1229_v41, %v1228_v38  ;;  %v1167_v15 = vmul.f32 %v1965_v42, %v1030_v19  ;;  %1127 = vst [vmem:[%s2272_s4 + $0x54] sm:$0xff] %v1386_v58  ;;  %v1230_v9 = vmul.f32 %v1165_v7, %v1028_v26 }
 0x1bc   :  { %1128 = vst [vmem:[%s2272_s4 + $0x5c] sm:$0xf] %v1387_v25  ;;  %v1255_v55 = vadd.f32 %v1254_v57, %v1227_v35  ;;  %v1168_v1 = vmul.f32 %v1967_v63, %v1031_v21  ;;  %v1231_v18 = vmul.f32 %v1166_v0, %v1029_v14 }
 0x1bd   :  { %1195 = vadd.xlane.f32.xlu0 %v1194_v33  ;;  %v1197_v2 = vadd.f32 %v1167_v15, %v1166_v0  ;;  %v1232_v10 = vmul.f32 %v1167_v15, %v1030_v19  ;;  %v1259_v52 = vadd.f32 %v1258_v62, %v1230_v9 }
 0x1be   :  { %1256 = vadd.xlane.f32.xlu1 %v1255_v55  ;;  %v1233_v17 = vmul.f32 %v1168_v1, %v1031_v21 }
 0x1bf   :  { %v1198_v40 = vadd.f32 %v1197_v2, %v1168_v1  ;;  %v1262_v42 = vadd.f32 %v1232_v10, %v1231_v18 }
 0x1c1   :  { %1260 = vadd.xlane.f32.xlu0 %v1259_v52  ;;  %v1263_v4 = vadd.f32 %v1262_v42, %v1233_v17 }
 0x1c2   :  { %1199 = vadd.xlane.f32.xlu1 %v1198_v40 }
 0x1c6   :  { %1264 = vadd.xlane.f32.xlu1 %v1263_v4 }
 0x223   :  { %v1172_v20 = vpop.xlane.xlu1 %1171 }
 0x224   :  { %1202 = vst.msk [vmem:[%s2273_s5] sm:$0xff] %vm1201_vm3, %v1172_v20 }
 0x225   :  { %v1237_v63 = vpop.xlane.xlu0 %1236 }
 0x226   :  { %1266 = vst.msk [vmem:[%s2274_s6] sm:$0xff] %vm1201_vm3, %v1237_v63 }
 0x229   :  { %v1176_v5 = vpop.xlane.xlu0 %1175 }
 0x22a   :  { %1203 = vst.msk [vmem:[%s2273_s5 + $0x8] sm:$0xff] %vm1201_vm3, %v1176_v5 }
 0x22c   :  { %v1241_v23 = vpop.xlane.xlu1 %1240 }
 0x22d   :  { %1267 = vst.msk [vmem:[%s2274_s6 + $0x8] sm:$0xff] %vm1201_vm3, %v1241_v23 }
 0x22e   :  { %v1180_v8 = vpop.xlane.xlu0 %1179 }
 0x22f   :  { %1204 = vst.msk [vmem:[%s2273_s5 + $0x10] sm:$0xff] %vm1201_vm3, %v1180_v8 }
 0x232   :  { %v1245_v46 = vpop.xlane.xlu0 %1244 }
 0x233   :  { %1268 = vst.msk [vmem:[%s2274_s6 + $0x10] sm:$0xff] %vm1201_vm3, %v1245_v46 }
 0x238   :  { %v1184_v24 = vpop.xlane.xlu1 %1183 }
 0x239   :  { %1205 = vst.msk [vmem:[%s2273_s5 + $0x18] sm:$0xff] %vm1201_vm3, %v1184_v24 }
 0x23c   :  { %v1188_v53 = vpop.xlane.xlu0 %1187 }
 0x23d   :  { %1206 = vst.msk [vmem:[%s2273_s5 + $0x20] sm:$0xff] %vm1201_vm3, %v1188_v53 }
 0x23f   :  { %v1249_v54 = vpop.xlane.xlu1 %1248 }
 0x240   :  { %1269 = vst.msk [vmem:[%s2274_s6 + $0x18] sm:$0xff] %vm1201_vm3, %v1249_v54  ;;  %v1253_v60 = vpop.xlane.xlu0 %1252 }
 0x241   :  { %1270 = vst.msk [vmem:[%s2274_s6 + $0x20] sm:$0xff] %vm1201_vm3, %v1253_v60 }
 0x243   :  { %v1192_v6 = vpop.xlane.xlu1 %1191 }
 0x244   :  { %1207 = vst.msk [vmem:[%s2273_s5 + $0x28] sm:$0xff] %vm1201_vm3, %v1192_v6 }
 0x246   :  { %v1196_v22 = vpop.xlane.xlu0 %1195 }
 0x247   :  { %1208 = vst.msk [vmem:[%s2273_s5 + $0x30] sm:$0xff] %vm1201_vm3, %v1196_v22  ;;  %v1257_v26 = vpop.xlane.xlu1 %1256 }
 0x248   :  { %1271 = vst.msk [vmem:[%s2274_s6 + $0x28] sm:$0xff] %vm1201_vm3, %v1257_v26 }
 0x24a   :  { %v1261_v27 = vpop.xlane.xlu0 %1260 }
 0x24b   :  { %1272 = vst.msk [vmem:[%s2274_s6 + $0x30] sm:$0xff] %vm1201_vm3, %v1261_v27  ;;  %v1200_v34 = vpop.xlane.xlu1 %1199 }
 0x24c   :  { %1209 = vst.msk [vmem:[%s2273_s5 + $0x38] sm:$0xff] %vm1201_vm3, %v1200_v34 }
 0x24f   :  { %v1265_v39 = vpop.xlane.xlu1 %1264 }
 0x250   :  { %1273 = vst.msk [vmem:[%s2274_s6 + $0x38] sm:$0xff] %vm1201_vm3, %v1265_v39 }

// kernel: _lambda_.35
= control target key start
LH: loop header
LB: loop body
LE: loop exit
PB: predicated region body
PF: predicated region fallthrough
CT: control target
= control target key end

     0   :  { %v1279_v1 = vmov 0   ;;  %vm136_vm0 = vcmask 392192   ;;  %s1280_s21 = smov 127   ;;  %vm358_vm1 = vcmask 1039360   ;;  %vm810_vm2 = vcmask 1031168   ;;  %s1934_s1 = inlined_call_operand.vmem [shape: bf16[48,640], index: 1, kind: input, shape index: {}]   ;;  %s1935_s0 = inlined_call_operand.vmem [shape: bf16[3,32,48], index: 0, kind: input, shape index: {}]   ;;  %s1936_s2 = inlined_call_operand.vmem [shape: f32[32,1], index: 2, kind: input, shape index: {}]   ;;  %s1937_s3 = inlined_call_operand.vmem [shape: f32[1,640], index: 3, kind: input, shape index: {}]   ;;  %s1938_s4 = inlined_call_operand.vmem [shape: bf16[32,640], index: 4, kind: output, shape index: {0}]   ;;  %s1939_s5 = inlined_call_operand.vmem [shape: f32[1,32,1], index: 5, kind: output, shape index: {1}]   ;;  %s1940_s6 = inlined_call_operand.vmem [shape: f32[1,32,1], index: 6, kind: output, shape index: {2}]  }
   0x1   :  { %v1320_v0 = vld [vmem:[%s1934_s1 + $0x54] ss:$20 sps:$4 sm:$0xff]   ;;  %175 = vmatprep.mubr.bf16.mxu0 %v1279_v1  ;;  %228 = vmatprep.mubr.bf16.mxu1 %v1279_v1  ;;  %v1327_v2 = vld [vmem:[%s1934_s1 + $0x5c] ss:$20 sps:$4 sm:$0xff]   ;;  %v1340_v4 = vld [vmem:[%s1934_s1 + $0x58] ss:$20 sps:$4 sm:$0xff]  }
   0x2   :  { %1251 = vset.pattern.permute.xlu1 %v1279_v1  ;;  %1250 = vset.pattern.permute.xlu0 %v1279_v1  ;;  %v1335_v3 = vld [vmem:[%s1934_s1 + $0x50] ss:$20 sps:$4 sm:$0xff]   ;;  %v1346_v5 = vld [vmem:[%s1934_s1 + $0x2c] ss:$20 sps:$4 sm:$0xff]   ;;  %v1353_v6 = vld [vmem:[%s1934_s1 + $0x34] ss:$20 sps:$4 sm:$0xff]  }
   0x3   :  { %153 = vmatprep.subr.bf16.mxu0 %v1320_v0  ;;  %206 = vmatprep.subr.bf16.mxu1 %v1327_v2  ;;  %v1358_v7 = vld [vmem:[%s1934_s1 + $0x28] ss:$20 sps:$4 sm:$0xff]   ;;  %v1364_v8 = vld [vmem:[%s1934_s1 + $0x30] ss:$20 sps:$4 sm:$0xff]   ;;  %v1375_v10 = vld [vmem:[%s1934_s1 + $0xc] ss:$20 sps:$4 sm:$0xff]  }
   0x4   :  { %154 = vmatpush1.bf16.msra.mxu0 %v1335_v3  ;;  %207 = vmatpush1.bf16.msra.mxu1 %v1340_v4  ;;  %v1370_v9 = vld [vmem:[%s1934_s1 + $0x4] ss:$20 sps:$4 sm:$0xff]   ;;  %v1380_v11 = vld [vmem:[%s1934_s1] ss:$20 sps:$4 sm:$0xff]   ;;  %v1387_v12 = vld [vmem:[%s1934_s1 + $0x8] ss:$20 sps:$4 sm:$0xff]  }
   0x5   :  { %155 = vmatprep.subr.bf16.mxu0 %v1346_v5  ;;  %208 = vmatprep.subr.bf16.mxu1 %v1353_v6  ;;  %v1394_v13 = vld [vmem:[%s1934_s1 + $0x60] ss:$20 sps:$4 sm:$0xff]   ;;  %v1406_v15 = vld [vmem:[%s1934_s1 + $0x38] ss:$20 sps:$4 sm:$0xff]   ;;  %v1417_v16 = vld [vmem:[%s1934_s1 + $0x10] ss:$20 sps:$4 sm:$0xff]  }
   0x6   :  { %v1270_v14 = vld [vmem:[%s1935_s0 + $0x10] sm:$0xff]   ;;  %v876_v17 = vld [vmem:[%s1936_s2 + $0x8] sm:$0xff]  ;;  %v875_v18 = vld [vmem:[%s1936_s2] sm:$0xff]  ;;  %vm1066_vm3 = vcmask 7168  }
   0x7   :  { %v1273_v19 = vld [vmem:[%s1935_s0 + $0x18] sm:$0xff]   ;;  %886 = vperm.xlu1 %1251, %v876_v17   ;;  %881 = vperm.xlu0 %1250, %v875_v18   ;;  %v877_v20 = vld [vmem:[%s1936_s2 + $0x10] sm:$0xff]  ;;  %v1275_v22 = vld [vmem:[%s1935_s0] sm:$0xff]  }
   0x8   :  { %156 = vmatpush1.bf16.msra.mxu0 %v1358_v7  ;;  %209 = vmatpush1.bf16.msra.mxu1 %v1364_v8  ;;  %v878_v21 = vld [vmem:[%s1936_s2 + $0x18] sm:$0xff]  ;;  %v1276_v23 = vld [vmem:[%s1935_s0 + $0x8] sm:$0xff]   ;;  %v1277_v24 = vld [vmem:[%s1935_s0 + $0x20] sm:$0xff]  }
   0x9   :  { %157 = vmatprep.subr.bf16.mxu0 %v1370_v9  ;;  %210 = vmatprep.subr.bf16.mxu1 %v1375_v10  ;;  %v1278_v25 = vld [vmem:[%s1935_s0 + $0x28] sm:$0xff]   ;;  %s1281_s0 = smov 126  }
   0xb   :  { %891 = vperm.xlu1 %1251, %v877_v20   ;;  %896 = vperm.xlu0 %1250, %v878_v21  }
   0xc   :  { %158 = vmatpush1.bf16.msra.mxu0 %v1380_v11  ;;  %211 = vmatpush1.bf16.msra.mxu1 %v1387_v12 }
   0xd   :  { %1217 = vmatprep.subr.bf16.mxu0 %v1394_v13  ;;  %429 = vmatprep.subr.bf16.mxu1 %v1320_v0 }
   0xf   :  { %1152 = vmatmul.mubr.msk.bf16.vlgmr.msra.gmra.mxu0 %vm136_vm0, %v1270_v14  ;;  %1154 = vmatmul.mubr.msk.bf16.vlgmr.msra.gmra.mxu1 %vm136_vm0, %v1270_v14 }
  0x10   :  { %1218 = vmatpush3.bf16.msra.mxu0 %v1394_v13  ;;  %430 = vmatpush1.bf16.msra.mxu1 %v1335_v3 }
  0x11   :  { %1219 = vmatprep.subr.bf16.mxu0 %v1406_v15  ;;  %185 = vmatprep.mubr.bf16.mxu0 %v1279_v1 }
  0x12   :  { %238 = vmatprep.mubr.bf16.mxu1 %v1279_v1  ;;  %431 = vmatprep.subr.bf16.mxu1 %v1346_v5 }
  0x14   :  { %1220 = vmatpush3.bf16.msra.mxu0 %v1406_v15  ;;  %432 = vmatpush1.bf16.msra.mxu1 %v1358_v7 }
  0x15   :  { %1221 = vmatprep.subr.bf16.mxu0 %v1417_v16  ;;  %433 = vmatprep.subr.bf16.mxu1 %v1370_v9 }
  0x17   :  { %1153 = vmatmul.mubr.msk.bf16.gmra.mxu0 %vm136_vm0, %v1273_v19  ;;  %1155 = vmatmul.mubr.msk.bf16.gmra.mxu1 %vm136_vm0, %v1273_v19 }
  0x18   :  { %1222 = vmatpush3.bf16.msra.mxu0 %v1417_v16  ;;  %434 = vmatpush1.bf16.msra.mxu1 %v1380_v11 }
  0x19   :  { %1223 = vmatprep.mubr.msk.bf16.mxu0 %vm136_vm0, %v1270_v14  ;;  %451 = vmatprep.mubr.bf16.mxu1 %v1279_v1 }
  0x1a   :  { %482 = vmatprep.subr.bf16.mxu0 %v1327_v2  ;;  %1227 = vmatprep.subr.bf16.mxu1 %v1394_v13 }
  0x1f   :  { %1224 = vmatmul.mubr.msk.bf16.vlgmr.msra.gmra.mxu0 %vm136_vm0, %v1273_v19  ;;  %1160 = vmatmul.mubr.msk.bf16.vlgmr.msra.gmra.mxu1 %vm136_vm0, %v1275_v22 }
  0x20   :  { %483 = vmatpush1.bf16.msra.mxu0 %v1340_v4  ;;  %1228 = vmatpush3.bf16.msra.mxu1 %v1394_v13 }
  0x21   :  { %484 = vmatprep.subr.bf16.mxu0 %v1353_v6  ;;  %461 = vmatprep.mubr.bf16.mxu1 %v1279_v1 }
  0x22   :  { %1229 = vmatprep.subr.bf16.mxu1 %v1406_v15  ;;  %504 = vmatprep.mubr.bf16.mxu0 %v1279_v1 }
  0x24   :  { %485 = vmatpush1.bf16.msra.mxu0 %v1364_v8  ;;  %1230 = vmatpush3.bf16.msra.mxu1 %v1406_v15 }
  0x25   :  { %486 = vmatprep.subr.bf16.mxu0 %v1375_v10  ;;  %1231 = vmatprep.subr.bf16.mxu1 %v1417_v16 }
  0x27   :  { %1161 = vmatmul.mubr.msk.bf16.gmra.mxu1 %vm136_vm0, %v1276_v23 }
  0x28   :  { %487 = vmatpush1.bf16.msra.mxu0 %v1387_v12  ;;  %1232 = vmatpush3.bf16.msra.mxu1 %v1417_v16 }
  0x29   :  { %605 = vmatprep.subr.bf16.mxu0 %v1320_v0  ;;  %1233 = vmatprep.mubr.msk.bf16.mxu1 %vm136_vm0, %v1275_v22 }
  0x2a   :  { %658 = vmatprep.subr.bf16.mxu1 %v1327_v2 }
  0x2b   :  { %1162 = vmatmul.mubr.msk.bf16.vlgmr.msra.gmra.mxu0 %vm136_vm0, %v1275_v22 }
  0x2c   :  { %606 = vmatpush1.bf16.msra.mxu0 %v1335_v3  ;;  %514 = vmatprep.mubr.bf16.mxu0 %v1279_v1 }
  0x2d   :  { %607 = vmatprep.subr.bf16.mxu0 %v1346_v5 }
  0x2f   :  { %1234 = vmatmul.mubr.msk.bf16.vlgmr.msra.gmra.mxu1 %vm136_vm0, %v1276_v23 }
  0x30   :  { %659 = vmatpush1.bf16.msra.mxu1 %v1340_v4  ;;  %608 = vmatpush1.bf16.msra.mxu0 %v1358_v7 }
  0x31   :  { %660 = vmatprep.subr.bf16.mxu1 %v1353_v6  ;;  %609 = vmatprep.subr.bf16.mxu0 %v1370_v9 }
  0x32   :  { %680 = vmatprep.mubr.bf16.mxu1 %v1279_v1 }
  0x33   :  { %1163 = vmatmul.mubr.msk.bf16.gmra.mxu0 %vm136_vm0, %v1276_v23 }
  0x34   :  { %661 = vmatpush1.bf16.msra.mxu1 %v1364_v8  ;;  %610 = vmatpush1.bf16.msra.mxu0 %v1380_v11 }
  0x35   :  { %662 = vmatprep.subr.bf16.mxu1 %v1375_v10  ;;  %627 = vmatprep.mubr.bf16.mxu0 %v1279_v1 }
  0x36   :  { %1237 = vmatprep.subr.bf16.mxu0 %v1394_v13 }
  0x38   :  { %663 = vmatpush1.bf16.msra.mxu1 %v1387_v12 }
  0x3b   :  { %1172 = vmatmul.mubr.msk.bf16.vlgmr.msra.gmra.mxu0 %vm136_vm0, %v1277_v24  ;;  %1174 = vmatmul.mubr.msk.bf16.vlgmr.msra.gmra.mxu1 %vm136_vm0, %v1277_v24 }
  0x3c   :  { %637 = vmatprep.mubr.bf16.mxu0 %v1279_v1  ;;  %690 = vmatprep.mubr.bf16.mxu1 %v1279_v1 }
  0x3d   :  { %1238 = vmatpush3.bf16.msra.mxu0 %v1394_v13 }
  0x3e   :  { %1239 = vmatprep.subr.bf16.mxu0 %v1406_v15 }
  0x41   :  { %1240 = vmatpush3.bf16.msra.mxu0 %v1406_v15 }
  0x42   :  { %1241 = vmatprep.subr.bf16.mxu0 %v1417_v16 }
  0x43   :  { %1173 = vmatmul.mubr.msk.bf16.gmra.mxu0 %vm136_vm0, %v1278_v25  ;;  %1175 = vmatmul.mubr.msk.bf16.gmra.mxu1 %vm136_vm0, %v1278_v25 }
  0x44   :  { %1243 = vmatprep.mubr.msk.bf16.mxu0 %vm136_vm0, %v1277_v24 }
  0x45   :  { %1242 = vmatpush3.bf16.msra.mxu0 %v1417_v16 }
  0x4b   :  { %1244 = vmatmul.mubr.msk.bf16.vlgmr.msra.gmra.mxu0 %vm136_vm0, %v1278_v25 }
  0x82   :  { %v1588_v22 = vpop.permute.xlu1 %886  ;;  %v1590_v23 = vpop.permute.xlu0 %881 }
  0x86   :  { %v1592_v24 = vpop.permute.xlu1 %891  ;;  %v1594_v25 = vpop.permute.xlu0 %896 }
  0xcf   :  { %v177_v26 = vpop.f32.mrf.mxu0  ;;  %v230_v27 = vpop.f32.mrf.mxu1 }
  0xd0   :  { %322 = vrot.lane.b32.xlu1 %v230_v27, %s1280_s21  ;;  %318 = vrot.lane.b32.xlu0 %v177_v26, %s1280_s21 }
  0xd1   :  { %v179_v28 = vpop.f32.mrf.mxu0  ;;  %v232_v29 = vpop.f32.mrf.mxu1 }
  0xd3   :  { %v181_v30 = vpop.f32.mrf.mxu0  ;;  %v234_v31 = vpop.f32.mrf.mxu1 }
  0xd4   :  { %324 = vrot.lane.b32.xlu1 %v232_v29, %s1280_s21  ;;  %320 = vrot.lane.b32.xlu0 %v179_v28, %s1280_s21 }
  0xd5   :  { %v183_v32 = vpop.f32.mrf.mxu0  ;;  %v236_v33 = vpop.f32.mrf.mxu1 }
  0xd7   :  { %v187_v34 = vpop.f32.mrf.mxu0  ;;  %v240_v35 = vpop.f32.mrf.mxu1 }
  0xd8   :  { %328 = vrot.lane.b32.xlu1 %v181_v30, %s1280_s21  ;;  %330 = vrot.lane.b32.xlu0 %v183_v32, %s1280_s21 }
  0xd9   :  { %v189_v36 = vpop.f32.mrf.mxu0  ;;  %v242_v37 = vpop.f32.mrf.mxu1 }
  0xdb   :  { %v191_v38 = vpop.f32.mrf.mxu0  ;;  %v244_v39 = vpop.f32.mrf.mxu1 }
  0xdc   :  { %332 = vrot.lane.b32.xlu1 %v234_v31, %s1280_s21  ;;  %334 = vrot.lane.b32.xlu0 %v236_v33, %s1280_s21 }
  0xdd   :  { %v193_v40 = vpop.f32.mrf.mxu0  ;;  %v246_v41 = vpop.f32.mrf.mxu1 }
  0xdf   :  { %v1225_v42 = vpop.f32.mrf.mxu0  ;;  %v1516_v43 = vpop.f32.mrf.mxu1 }
  0xe0   :  { %338 = vrot.lane.b32.xlu0 %v187_v34, %s1280_s21  ;;  %340 = vrot.lane.b32.xlu1 %v189_v36, %s1280_s21 }
  0xe1   :  { %v283_v44 = vpop.f32.mrf.mxu0  ;;  %v1520_v45 = vpop.f32.mrf.mxu1 }
  0xe3   :  { %v1522_v46 = vpop.f32.mrf.mxu1  ;;  %v1226_v47 = vpop.f32.mrf.mxu0 }
  0xe4   :  { %342 = vrot.lane.b32.xlu0 %v240_v35, %s1280_s21  ;;  %344 = vrot.lane.b32.xlu1 %v242_v37, %s1280_s21 }
  0xe5   :  { %v1526_v48 = vpop.f32.mrf.mxu1  ;;  %v286_v50 = vpop.f32.mrf.mxu0 }
  0xe7   :  { %v1528_v49 = vpop.f32.mrf.mxu1 }
  0xe8   :  { %348 = vrot.lane.b32.xlu1 %v191_v38, %s1280_s21  ;;  %350 = vrot.lane.b32.xlu0 %v193_v40, %s1280_s21 }
  0xe9   :  { %v1532_v51 = vpop.f32.mrf.mxu1 }
  0xeb   :  { %v1534_v52 = vpop.f32.mrf.mxu0  ;;  %v1536_v53 = vpop.f32.mrf.mxu1 }
  0xec   :  { %352 = vrot.lane.b32.xlu1 %v244_v39, %s1280_s21  ;;  %354 = vrot.lane.b32.xlu0 %v246_v41, %s1280_s21 }
  0xed   :  { %v1540_v54 = vpop.f32.mrf.mxu0  ;;  %v1542_v55 = vpop.f32.mrf.mxu1 }
  0xef   :  { %v1544_v56 = vpop.f32.mrf.mxu0  ;;  %v1546_v57 = vpop.f32.mrf.mxu1 }
  0xf0   :  { %346 = vrot.lane.b32.xlu1 %v1225_v42, %s1280_s21  ;;  %356 = vrot.lane.b32.xlu0 %v1226_v47, %s1280_s21 }
  0xf1   :  { %v1550_v58 = vpop.f32.mrf.mxu0  ;;  %v1552_v59 = vpop.f32.mrf.mxu1 }
  0xf3   :  { %v1554_v60 = vpop.f32.mrf.mxu0  ;;  %v1560_v62 = vpop.f32.mrf.mxu1 }
  0xf4   :  { %326 = vrot.lane.b32.xlu1 %v283_v44, %s1280_s21  ;;  %336 = vrot.lane.b32.xlu0 %v286_v50, %s1280_s21 }
  0xf5   :  { %v1558_v61 = vpop.f32.mrf.mxu0  ;;  %v1566_v1 = vpop.f32.mrf.mxu1 }
  0xf7   :  { %v1562_v63 = vpop.f32.mrf.mxu0 }
  0xf9   :  { %v1564_v0 = vpop.f32.mrf.mxu0 }
  0xfb   :  { %v629_v2 = vpop.f32.mrf.mxu0  ;;  %v682_v3 = vpop.f32.mrf.mxu1 }
  0xfc   :  { %770 = vrot.lane.b32.xlu1 %v629_v2, %s1281_s0  ;;  %v997_v2 = vlaneseq }
  0xfd   :  { %v631_v4 = vpop.f32.mrf.mxu0  ;;  %v684_v6 = vpop.f32.mrf.mxu1 }
  0xfe   :  { %772 = vrot.lane.b32.xlu0 %v631_v4, %s1281_s0 }
  0xff   :  { %v633_v5 = vpop.f32.mrf.mxu0  ;;  %v686_v9 = vpop.f32.mrf.mxu1 }
 0x100   :  { %774 = vrot.lane.b32.xlu1 %v682_v3, %s1281_s0 }
 0x101   :  { %v635_v7 = vpop.f32.mrf.mxu0  ;;  %v688_v11 = vpop.f32.mrf.mxu1 }
 0x102   :  { %780 = vrot.lane.b32.xlu0 %v633_v5, %s1281_s0 }
 0x103   :  { %v639_v8 = vpop.f32.mrf.mxu0  ;;  %v692_v13 = vpop.f32.mrf.mxu1 }
 0x104   :  { %776 = vrot.lane.b32.xlu1 %v684_v6, %s1281_s0 }
 0x105   :  { %v641_v10 = vpop.f32.mrf.mxu0  ;;  %v694_v15 = vpop.f32.mrf.mxu1 }
 0x106   :  { %784 = vrot.lane.b32.xlu0 %v686_v9, %s1281_s0 }
 0x107   :  { %v643_v12 = vpop.f32.mrf.mxu0  ;;  %v696_v17 = vpop.f32.mrf.mxu1 }
 0x108   :  { %782 = vrot.lane.b32.xlu1 %v635_v7, %s1281_s0  ;;  %v998_v7 = vshrl.u32 %v997_v2, 7 }
 0x109   :  { %v645_v14 = vpop.f32.mrf.mxu0  ;;  %v698_v19 = vpop.f32.mrf.mxu1 }
 0x10a   :  { %786 = vrot.lane.b32.xlu0 %v688_v11, %s1281_s0 }
 0x10b   :  { %v1245_v16 = vpop.f32.mrf.mxu0 }
 0x10c   :  { %790 = vrot.lane.b32.xlu1 %v639_v8, %s1281_s0 }
 0x10d   :  { %v735_v18 = vpop.f32.mrf.mxu0 }
 0x10e   :  { %792 = vrot.lane.b32.xlu0 %v641_v10, %s1281_s0 }
 0x10f   :  { %v1246_v20 = vpop.f32.mrf.mxu0 }
 0x110   :  { %794 = vrot.lane.b32.xlu1 %v692_v13, %s1281_s0 }
 0x111   :  { %v738_v21 = vpop.f32.mrf.mxu0 }
 0x112   :  { %800 = vrot.lane.b32.xlu0 %v643_v12, %s1281_s0 }
 0x114   :  { %796 = vrot.lane.b32.xlu1 %v694_v15, %s1281_s0 }
 0x116   :  { %804 = vrot.lane.b32.xlu0 %v696_v17, %s1281_s0  ;;  %v1003_v17 = vsub.s32 1, %v998_v7 }
 0x118   :  { %802 = vrot.lane.b32.xlu1 %v645_v14, %s1281_s0  ;;  %v999_v14 = vsub.s32 0, %v998_v7 }
 0x11a   :  { %806 = vrot.lane.b32.xlu0 %v698_v19, %s1281_s0 }
 0x11c   :  { %778 = vrot.lane.b32.xlu1 %v735_v18, %s1281_s0 }
 0x11e   :  { %788 = vrot.lane.b32.xlu0 %v738_v21, %s1281_s0  ;;  %v1015_v21 = vsub.s32 4, %v998_v7 }
 0x120   :  { %798 = vrot.lane.b32.xlu1 %v1245_v16, %s1281_s0  ;;  %v919_v16 = vld [vmem:[%s1937_s3] sm:$0x1f] }
 0x122   :  { %808 = vrot.lane.b32.xlu0 %v1246_v20, %s1281_s0  ;;  %v1011_v20 = vsub.s32 3, %v998_v7 }
 0x142   :  { %v323_v26 = vpop.permute.xlu1 %322  ;;  %v1596_v27 = vpop.permute.xlu0 %318 }
 0x146   :  { %v1598_v28 = vpop.permute.xlu1 %324  ;;  %v321_v29 = vpop.permute.xlu0 %320 }
 0x147   :  { %v361_v30 = vsel %vm358_vm1, %v323_v26, %v1598_v28  ;;  %v359_v4 = vsel %vm358_vm1, %v1596_v27, %v321_v29  ;;  %v360_v6 = vsel %vm358_vm1, %v321_v29, %v323_v26 }
 0x148   :  { %v454_v8 = vadd.f32 %v1516_v43, %v359_v4  ;;  %v456_v11 = vadd.f32 %v1520_v45, %v360_v6  ;;  %v1007_v43 = vsub.s32 2, %v998_v7  ;;  %v1652_v6 = vrot.slane %v919_v16, %v999_v14 }
 0x14a   :  { %v1602_v31 = vpop.permute.xlu1 %328  ;;  %v331_v32 = vpop.permute.xlu0 %330 }
 0x14b   :  { %v363_v2 = vsel %vm358_vm1, %v1602_v31, %v331_v32 }
 0x14c   :  { %v458_v14 = vadd.f32 %v1522_v46, %v363_v2 }
 0x14e   :  { %v333_v33 = vpop.permute.xlu1 %332  ;;  %v1604_v34 = vpop.permute.xlu0 %334 }
 0x14f   :  { %v364_v4 = vsel %vm358_vm1, %v331_v32, %v333_v33  ;;  %v1667_v32 = vrot.slane %v919_v16, %v1015_v21 }
 0x152   :  { %v1606_v35 = vpop.permute.xlu0 %338  ;;  %v341_v36 = vpop.permute.xlu1 %340 }
 0x156   :  { %v343_v37 = vpop.permute.xlu0 %342  ;;  %v1608_v38 = vpop.permute.xlu1 %344 }
 0x15a   :  { %v1610_v39 = vpop.permute.xlu1 %348  ;;  %v1612_v40 = vpop.permute.xlu0 %350 }
 0x15e   :  { %v1614_v41 = vpop.permute.xlu1 %352  ;;  %v1616_v42 = vpop.permute.xlu0 %354 }
 0x162   :  { %v1618_v44 = vpop.permute.xlu1 %346  ;;  %v1620_v47 = vpop.permute.xlu0 %356 }
 0x166   :  { %v1622_v50 = vpop.permute.xlu1 %326  ;;  %v1624_v3 = vpop.permute.xlu0 %336 }
 0x16e   :  { %v1628_v5 = vpop.permute.xlu1 %770 }
 0x16f   :  { %1942 = vst [vmem:[#allocation2_spill] sm:$0xff] %v1628_v5 }
 0x170   :  { %v773_v9 = vpop.permute.xlu0 %772 }
 0x171   :  { %v811_v10 = vsel %vm810_vm2, %v1628_v5, %v773_v9  ;;  %v368_v5 = vsel %vm358_vm1, %v341_v36, %v343_v37 }
 0x172   :  { %v855_v12 = vadd.f32 %v811_v10, %v454_v8  ;;  %v775_v13 = vpop.permute.xlu1 %774  ;;  %v365_v8 = vsel %vm358_vm1, %v333_v33, %v1604_v34  ;;  %v460_v33 = vadd.f32 %v1526_v48, %v364_v4  ;;  %v373_v4 = vsel %vm358_vm1, %v1614_v41, %v1616_v42 }
 0x173   :  { %v812_v15 = vsel %vm810_vm2, %v773_v9, %v775_v13  ;;  %v1656_v9 = vrot.slane %v919_v16, %v1003_v17  ;;  %v367_v17 = vsel %vm358_vm1, %v1606_v35, %v341_v36 }
 0x174   :  { %v856_v18 = vadd.f32 %v812_v15, %v456_v11  ;;  %v1639_v19 = vpop.permute.xlu0 %780  ;;  %v1642_v26 = vadd.f32 %v1590_v23, %v855_v12  ;;  %v1660_v11 = vrot.slane %v919_v16, %v1007_v43  ;;  %v507_v12 = vadd.f32 %v1534_v52, %v361_v30 }
 0x175   :  { %v511_v30 = vadd.f32 %v1544_v56, %v365_v8  ;;  %v464_v2 = vadd.f32 %v1528_v49, %v367_v17  ;;  %v466_v56 = vadd.f32 %v1532_v51, %v368_v5  ;;  %v370_v8 = vsel %vm358_vm1, %v1608_v38, %v1618_v44 }
 0x176   :  { %v1645_v45 = vadd.f32 %v1590_v23, %v856_v18  ;;  %v1647_v29 = vpop.permute.xlu1 %776  ;;  %v1665_v18 = vrot.slane %v919_v16, %v1011_v20  ;;  %v371_v16 = vsel %vm358_vm1, %v1610_v39, %v1612_v40  ;;  %v1722_v17 = vadd.f32 %v1558_v61, %v370_v8 }
 0x177   :  { %v813_v15 = vsel %vm810_vm2, %v775_v13, %v1647_v29  ;;  %v369_v13 = vsel %vm358_vm1, %v343_v37, %v1608_v38  ;;  %v372_v37 = vsel %vm358_vm1, %v1612_v40, %v1614_v41  ;;  %v468_v40 = vadd.f32 %v1536_v53, %v371_v16 }
 0x178   :  { %v1190_v7 = vpack.c.bf16 %v1645_v45, %v1642_v26  ;;  %v785_v10 = vpop.permute.xlu0 %784  ;;  %v857_v36 = vadd.f32 %v813_v15, %v507_v12  ;;  %v517_v5 = vadd.f32 %v1554_v60, %v369_v13  ;;  %v401_v41 = vsel %vm358_vm1, %v1618_v44, %v1606_v35 }
 0x179   :  { %v374_v38 = vsel %vm358_vm1, %v1616_v42, %v1620_v47  ;;  %v470_v15 = vadd.f32 %v1542_v55, %v372_v37  ;;  %v521_v53 = vadd.f32 %v1562_v63, %v373_v4  ;;  %v1727_v55 = vadd.f32 %v1546_v57, %v401_v41 }
 0x17a   :  { %984 = vst [vmem:[%s1938_s4] sm:$0xff] %v1190_v7  ;;  %v783_v52 = vpop.permute.xlu1 %782  ;;  %v1730_v44 = vadd.f32 %v1564_v0, %v374_v38  ;;  %v362_v57 = vsel %vm358_vm1, %v1598_v28, %v1622_v50  ;;  %v1022_v0 = vmul.f32 %v1652_v6, %v1642_v26  ;;  %v366_v13 = vsel %vm358_vm1, %v1604_v34, %v1624_v3 }
 0x17b   :  { %v815_v46 = vsel %vm810_vm2, %v1639_v19, %v783_v52  ;;  %v816_v48 = vsel %vm810_vm2, %v783_v52, %v785_v10  ;;  %v400_v28 = vsel %vm358_vm1, %v1624_v3, %v1602_v31  ;;  %v513_v31 = vadd.f32 %v1550_v58, %v366_v13 }
 0x17c   :  { %v860_v43 = vadd.f32 %v815_v46, %v458_v14  ;;  %v861_v20 = vadd.f32 %v816_v48, %v460_v33  ;;  %v1686_v21 = vpop.permute.xlu0 %786  ;;  %v1718_v14 = vadd.f32 %v1590_v23, %v857_v36  ;;  %v1071_v3 = vmul.f32 %v1022_v0, %v1642_v26 }
 0x17d   :  { %v817_v49 = vsel %vm810_vm2, %v785_v10, %v1686_v21  ;;  %v402_v10 = vsel %vm358_vm1, %v1620_v47, %v1610_v39  ;;  %v1023_v39 = vmul.f32 %v1656_v9, %v1645_v45 }
 0x17e   :  { %v904_v7 = vadd.f32 %v1588_v22, %v860_v43  ;;  %v905_v12 = vadd.f32 %v1588_v22, %v861_v20  ;;  %v1703_v51 = vpop.permute.xlu1 %790  ;;  %v862_v35 = vadd.f32 %v817_v49, %v511_v30  ;;  %v1738_v47 = vadd.f32 %v1560_v62, %v402_v10 }
 0x17f   :  { %v399_v30 = vsel %vm358_vm1, %v1622_v50, %v1596_v27  ;;  %v1024_v48 = vmul.f32 %v1660_v11, %v1718_v14  ;;  %v509_v50 = vadd.f32 %v1540_v54, %v362_v57  ;;  %v1072_v34 = vmul.f32 %v1023_v39, %v1645_v45 }
 0x180   :  { %v1193_v60 = vpack.c.bf16 %v905_v12, %v904_v7  ;;  %v793_v33 = vpop.permute.xlu0 %792  ;;  %v1027_v16 = vmul.f32 %v1652_v6, %v904_v7  ;;  %v1028_v36 = vmul.f32 %v1656_v9, %v905_v12  ;;  %v1762_v27 = vadd.f32 %v1588_v22, %v862_v35 }
 0x181   :  { %v819_v42 = vsel %vm810_vm2, %v1703_v51, %v793_v33  ;;  %v1042_v41 = vadd.f32 %v1023_v39, %v1022_v0  ;;  %v1073_v54 = vmul.f32 %v1024_v48, %v1718_v14 }
 0x182   :  { %987 = vst [vmem:[%s1938_s4 + $0x14] sm:$0xff] %v1193_v60  ;;  %v865_v63 = vadd.f32 %v819_v42, %v464_v2  ;;  %v795_v61 = vpop.permute.xlu1 %794  ;;  %v1076_v45 = vmul.f32 %v1027_v16, %v904_v7  ;;  %v1077_v38 = vmul.f32 %v1028_v36, %v905_v12  ;;  %v1029_v10 = vmul.f32 %v1660_v11, %v1762_v27 }
 0x183   :  { %v820_v52 = vsel %vm810_vm2, %v793_v33, %v795_v61  ;;  %v1048_v60 = vadd.f32 %v1028_v36, %v1027_v16  ;;  %v1091_v33 = vadd.f32 %v1072_v34, %v1071_v3  ;;  %v1787_v42 = vadd.f32 %v1042_v41, %v1024_v48  ;;  %v1943_v3 = vld [vmem:[#allocation2_spill] sm:$0xff] }
 0x184   :  { %v866_v46 = vadd.f32 %v820_v52, %v466_v56  ;;  %v1752_v62 = vpop.permute.xlu0 %800  ;;  %v909_v43 = vadd.f32 %v1592_v24, %v865_v63  ;;  %v560_v56 = vadd.f32 %v1552_v59, %v399_v30  ;;  %v563_v59 = vadd.f32 %v1566_v1, %v400_v28 }
 0x185   :  { %v1793_v57 = vadd.f32 %v1091_v33, %v1073_v54  ;;  %v1797_v52 = vmul.f32 %v1029_v10, %v1762_v27  ;;  %v1799_v30 = vadd.f32 %v1077_v38, %v1076_v45  ;;  %v1801_v13 = vadd.f32 %v1048_v60, %v1029_v10 }
 0x186   :  { %v910_v20 = vadd.f32 %v1592_v24, %v866_v46  ;;  %v797_v2 = vpop.permute.xlu1 %796  ;;  %v1032_v7 = vmul.f32 %v1652_v6, %v909_v43 }
 0x187   :  { %v821_v37 = vsel %vm810_vm2, %v795_v61, %v797_v2 }
 0x188   :  { %v1196_v4 = vpack.c.bf16 %v910_v20, %v909_v43  ;;  %v867_v8 = vadd.f32 %v821_v37, %v517_v5  ;;  %v805_v49 = vpop.permute.xlu0 %804  ;;  %v1033_v58 = vmul.f32 %v1656_v9, %v910_v20  ;;  %v1805_v16 = vmul.f32 %v1032_v7, %v909_v43 }
 0x18a   :  { %990 = vst [vmem:[%s1938_s4 + $0x28] sm:$0xff] %v1196_v4  ;;  %v1781_v26 = vadd.f32 %v1592_v24, %v867_v8  ;;  %v803_v5 = vpop.permute.xlu1 %802  ;;  %v1054_v28 = vadd.f32 %v1033_v58, %v1032_v7  ;;  %v1807_v36 = vmul.f32 %v1033_v58, %v910_v20 }
 0x18b   :  { %v823_v12 = vsel %vm810_vm2, %v1752_v62, %v803_v5  ;;  %v824_v35 = vsel %vm810_vm2, %v803_v5, %v805_v49 }
 0x18c   :  { %v870_v1 = vadd.f32 %v823_v12, %v468_v40  ;;  %v871_v39 = vadd.f32 %v824_v35, %v470_v15  ;;  %v807_v63 = vpop.permute.xlu0 %806  ;;  %v1791_v61 = vmul.f32 %v1660_v11, %v1781_v26 }
 0x18d   :  { %v825_v0 = vsel %vm810_vm2, %v805_v49, %v807_v63 }
 0x18e   :  { %v914_v46 = vadd.f32 %v1594_v25, %v870_v1  ;;  %v915_v40 = vadd.f32 %v1594_v25, %v871_v39  ;;  %v872_v15 = vadd.f32 %v825_v0, %v521_v53  ;;  %v779_v48 = vpop.permute.xlu1 %778  ;;  %v1055_v53 = vadd.f32 %v1054_v28, %v1791_v61 }
 0x18f   :  { %v814_v34 = vsel %vm810_vm2, %v1647_v29, %v779_v48  ;;  %v851_v37 = vsel %vm810_vm2, %v779_v48, %v1943_v3 }
 0x190   :  { %v1199_v4 = vpack.c.bf16 %v915_v40, %v914_v46  ;;  %v1037_v8 = vmul.f32 %v1652_v6, %v914_v46  ;;  %v1038_v49 = vmul.f32 %v1656_v9, %v915_v40  ;;  %v789_v41 = vpop.permute.xlu0 %788  ;;  %v858_v54 = vadd.f32 %v814_v34, %v509_v50 }
 0x191   :  { %v859_v45 = vadd.f32 %v851_v37, %v560_v56  ;;  %v818_v43 = vsel %vm810_vm2, %v1686_v21, %v789_v41  ;;  %v852_v20 = vsel %vm810_vm2, %v789_v41, %v1639_v19  ;;  %v916_v6 = vadd.f32 %v1594_v25, %v872_v15 }
 0x192   :  { %993 = vst [vmem:[%s1938_s4 + $0x3c] sm:$0xff] %v1199_v4  ;;  %v1823_v29 = vmul.f32 %v1037_v8, %v914_v46  ;;  %v863_v9 = vadd.f32 %v818_v43, %v513_v31  ;;  %v864_v38 = vadd.f32 %v852_v20, %v563_v59  ;;  %v799_v10 = vpop.permute.xlu1 %798  ;;  %v902_v50 = vadd.f32 %v1590_v23, %v858_v54 }
 0x193   :  { %v903_v56 = vadd.f32 %v1590_v23, %v859_v45  ;;  %v822_v21 = vsel %vm810_vm2, %v797_v2, %v799_v10  ;;  %v853_v19 = vsel %vm810_vm2, %v799_v10, %v1703_v51  ;;  %v1039_v0 = vmul.f32 %v1660_v11, %v916_v6 }
 0x194   :  { %v907_v60 = vadd.f32 %v1588_v22, %v863_v9  ;;  %v1833_v58 = vadd.f32 %v1588_v22, %v864_v38  ;;  %v868_v5 = vadd.f32 %v822_v21, %v1722_v17  ;;  %v869_v31 = vadd.f32 %v853_v19, %v1727_v55  ;;  %v809_v59 = vpop.permute.xlu0 %808 }
 0x195   :  { %v1191_v33 = vpack.c.bf16 %v902_v50, %v1718_v14  ;;  %v1192_v7 = vpack.c.bf16 %v903_v56, %v903_v56  ;;  %v826_v23 = vsel %vm810_vm2, %v807_v63, %v809_v59  ;;  %v854_v2 = vsel %vm810_vm2, %v809_v59, %v1752_v62 }
 0x196   :  { %v1194_v51 = vpack.c.bf16 %v907_v60, %v1762_v27  ;;  %v1195_v12 = vpack.c.bf16 %v1833_v58, %v1833_v58  ;;  %v912_v22 = vadd.f32 %v1592_v24, %v868_v5  ;;  %v1846_v17 = vadd.f32 %v1592_v24, %v869_v31 }
 0x197   :  { %v1087_v55 = vmul.f32 %v1038_v49, %v915_v40  ;;  %985 = vst [vmem:[%s1938_s4 + $0x8] sm:$0xff] %v1191_v33  ;;  %986 = vst [vmem:[%s1938_s4 + $0x10] sm:$0xf] %v1192_v7  ;;  %v873_v14 = vadd.f32 %v826_v23, %v1730_v44  ;;  %v874_v62 = vadd.f32 %v854_v2, %v1738_v47 }
 0x198   :  { %v1025_v27 = vmul.f32 %v1665_v18, %v902_v50  ;;  %988 = vst [vmem:[%s1938_s4 + $0x1c] sm:$0xff] %v1194_v51  ;;  %989 = vst [vmem:[%s1938_s4 + $0x24] sm:$0xf] %v1195_v12  ;;  %v1197_v24 = vpack.c.bf16 %v912_v22, %v1781_v26  ;;  %v1198_v35 = vpack.c.bf16 %v1846_v17, %v1846_v17 }
 0x199   :  { %v1026_v1 = vmul.f32 %v1667_v32, %v903_v56  ;;  %v1035_v44 = vmul.f32 %v1665_v18, %v912_v22  ;;  %v917_v47 = vadd.f32 %v1594_v25, %v873_v14  ;;  %v918_v39 = vadd.f32 %v1594_v25, %v874_v62 }
 0x19a   :  { %v1044_v63 = vadd.f32 %v1787_v42, %v1025_v27  ;;  %991 = vst [vmem:[%s1938_s4 + $0x30] sm:$0xff] %v1197_v24  ;;  %992 = vst [vmem:[%s1938_s4 + $0x38] sm:$0xf] %v1198_v35  ;;  %v1036_v46 = vmul.f32 %v1667_v32, %v1846_v17  ;;  %v1060_v15 = vadd.f32 %v1038_v49, %v1037_v8 }
 0x19b   :  { %v1056_v40 = vadd.f32 %v1055_v53, %v1035_v44  ;;  %v1074_v48 = vmul.f32 %v1025_v27, %v902_v50  ;;  %v1200_v28 = vpack.c.bf16 %v917_v47, %v916_v6  ;;  %v1201_v25 = vpack.c.bf16 %v918_v39, %v918_v39 }
 0x19c   :  { %v1045_v34 = vadd.f32 %v1044_v63, %v1026_v1  ;;  %v1040_v42 = vmul.f32 %v1665_v18, %v917_v47  ;;  %v1061_v3 = vadd.f32 %v1060_v15, %v1039_v0  ;;  %v1075_v37 = vmul.f32 %v1026_v1, %v903_v56 }
 0x19d   :  { %v1057_v11 = vadd.f32 %v1056_v40, %v1036_v46  ;;  %v1093_v4 = vadd.f32 %v1793_v57, %v1074_v48  ;;  %994 = vst [vmem:[%s1938_s4 + $0x44] sm:$0xff] %v1200_v28  ;;  %995 = vst [vmem:[%s1938_s4 + $0x4c] sm:$0xf] %v1201_v25  ;;  %v1041_v8 = vmul.f32 %v1667_v32, %v918_v39 }
 0x19e   :  { %1046 = vadd.xlane.f32.xlu1 %v1045_v34  ;;  %v1030_v49 = vmul.f32 %v1665_v18, %v907_v60  ;;  %v1031_v41 = vmul.f32 %v1667_v32, %v1833_v58  ;;  %v1083_v53 = vmul.f32 %v1791_v61, %v1781_v26  ;;  %v1062_v57 = vadd.f32 %v1061_v3, %v1040_v42 }
 0x19f   :  { %1058 = vadd.xlane.f32.xlu0 %v1057_v11  ;;  %v1094_v54 = vadd.f32 %v1093_v4, %v1075_v37  ;;  %v1088_v45 = vmul.f32 %v1039_v0, %v916_v6  ;;  %v1109_v43 = vadd.f32 %v1087_v55, %v1823_v29  ;;  %v1098_v9 = vadd.f32 %v1799_v30, %v1797_v52 }
 0x1a0   :  { %v1079_v20 = vmul.f32 %v1030_v49, %v907_v60  ;;  %v1103_v38 = vadd.f32 %v1807_v36, %v1805_v16  ;;  %v1063_v18 = vadd.f32 %v1062_v57, %v1041_v8  ;;  %v1050_v10 = vadd.f32 %v1801_v13, %v1030_v49 }
 0x1a1   :  { %v1089_v32 = vmul.f32 %v1040_v42, %v917_v47  ;;  %v1084_v50 = vmul.f32 %v1035_v44, %v912_v22  ;;  %v1080_v26 = vmul.f32 %v1031_v41, %v1833_v58  ;;  %v1110_v61 = vadd.f32 %v1109_v43, %v1088_v45 }
 0x1a2   :  { %v1099_v56 = vadd.f32 %v1098_v9, %v1079_v20  ;;  %1064 = vadd.xlane.f32.xlu1 %v1063_v18  ;;  %v1104_v6 = vadd.f32 %v1103_v38, %v1083_v53  ;;  %v1051_v21 = vadd.f32 %v1050_v10, %v1031_v41  ;;  %v1090_v52 = vmul.f32 %v1041_v8, %v918_v39 }
 0x1a3   :  { %1095 = vadd.xlane.f32.xlu0 %v1094_v54  ;;  %v1111_v19 = vadd.f32 %v1110_v61, %v1089_v32  ;;  %v1085_v30 = vmul.f32 %v1036_v46, %v1846_v17 }
 0x1a4   :  { %v1100_v29 = vadd.f32 %v1099_v56, %v1080_v26  ;;  %v1105_v60 = vadd.f32 %v1104_v6, %v1084_v50 }
 0x1a5   :  { %v1112_v16 = vadd.f32 %v1111_v19, %v1090_v52 }
 0x1a6   :  { %1101 = vadd.xlane.f32.xlu1 %v1100_v29  ;;  %v1106_v13 = vadd.f32 %v1105_v60, %v1085_v30 }
 0x1a7   :  { %1052 = vadd.xlane.f32.xlu0 %v1051_v21 }
 0x1aa   :  { %1113 = vadd.xlane.f32.xlu1 %v1112_v16 }
 0x1ab   :  { %1107 = vadd.xlane.f32.xlu0 %v1106_v13 }
 0x227   :  { %v1047_v36 = vpop.xlane.xlu1 %1046 }
 0x228   :  { %1067 = vst.msk [vmem:[%s1939_s5] sm:$0xff] %vm1066_vm3, %v1047_v36  ;;  %v1059_v58 = vpop.xlane.xlu0 %1058 }
 0x229   :  { %1069 = vst.msk [vmem:[%s1939_s5 + $0x10] sm:$0xff] %vm1066_vm3, %v1059_v58 }
 0x22b   :  { %v1065_v5 = vpop.xlane.xlu1 %1064 }
 0x22c   :  { %v1096_v31 = vpop.xlane.xlu0 %1095  ;;  %1070 = vst.msk [vmem:[%s1939_s5 + $0x18] sm:$0xff] %vm1066_vm3, %v1065_v5 }
 0x22d   :  { %1115 = vst.msk [vmem:[%s1940_s6] sm:$0xff] %vm1066_vm3, %v1096_v31 }
 0x22f   :  { %v1102_v59 = vpop.xlane.xlu1 %1101 }
 0x230   :  { %v1053_v33 = vpop.xlane.xlu0 %1052  ;;  %1116 = vst.msk [vmem:[%s1940_s6 + $0x8] sm:$0xff] %vm1066_vm3, %v1102_v59 }
 0x231   :  { %1068 = vst.msk [vmem:[%s1939_s5 + $0x8] sm:$0xff] %vm1066_vm3, %v1053_v33 }
 0x233   :  { %v1114_v7 = vpop.xlane.xlu1 %1113 }
 0x234   :  { %v1108_v23 = vpop.xlane.xlu0 %1107  ;;  %1118 = vst.msk [vmem:[%s1940_s6 + $0x18] sm:$0xff] %vm1066_vm3, %v1114_v7 }
 0x235   :  { %1117 = vst.msk [vmem:[%s1940_s6 + $0x10] sm:$0xff] %vm1066_vm3, %v1108_v23 }

// kernel: _lambda_.37
= control target key start
LH: loop header
LB: loop body
LE: loop exit
PB: predicated region body
PF: predicated region fallthrough
CT: control target
= control target key end

     0   :  { %s4707_s0 = inlined_call_operand.vmem [shape: bf16[7,1,56], index: 0, kind: input, shape index: {}]   ;;  %s4708_s1 = inlined_call_operand.vmem [shape: bf16[56,1408], index: 1, kind: input, shape index: {}]   ;;  %s4709_s2 = inlined_call_operand.<no memory space> [shape: f32[1,1], index: 2, kind: input, shape index: {}]   ;;  %s4710_s3 = inlined_call_operand.vmem [shape: f32[1,1408], index: 3, kind: input, shape index: {}]   ;;  %s4711_s4 = inlined_call_operand.vmem [shape: bf16[1,1408], index: 4, kind: output, shape index: {0}]   ;;  %s4712_s5 = inlined_call_operand.hbm [shape: f32[1,1,1], index: 5, kind: output, shape index: {1}]   ;;  %s4713_s6 = inlined_call_operand.hbm [shape: f32[1,1,1], index: 6, kind: output, shape index: {2}]  }
   0x1   :  { %v12_v0 = vstv %s4709_s2 }
   0x2   :  { %13 = vst [vmem:[#allocation2] sm:$0x1] %v12_v0 }
   0x3   :  { %14 = vsyncpa [#allocation4], 0  ;;  %v61_v1 = vld [vmem:[%s4708_s1 + $0x108] sm:$0xff]  ;;  %vm270_vm0 = vcmask 1043456   ;;  %v62_v2 = vld [vmem:[%s4708_s1 + $0x110] sm:$0xff]  ;;  %v3285_v8 = vmov 0  }
   0x4   :  { %v3341_v3 = vcombine.high %v61_v1, %v61_v1  ;;  %v3343_v4 = vcombine.high %v62_v2, %v62_v2  ;;  %v2905_v5 = vcombine.low %v61_v1, %v61_v1  ;;  %v2907_v6 = vcombine.low %v62_v2, %v62_v2  ;;  %v3348_v7 = vld [vmem:[%s4708_s1 + $0xb4] ss:$44 sps:$4 sm:$0xff]   ;;  %336 = vmatprep.mubr.bf16.mxu0 %v3285_v8  ;;  %v3354_v9 = vld [vmem:[%s4708_s1 + $0xbc] ss:$44 sps:$4 sm:$0xff]   ;;  %v3378_v13 = vld [vmem:[%s4708_s1 + $0xb8] ss:$44 sps:$4 sm:$0xff]  }
   0x5   :  { %377 = vmatprep.mubr.bf16.mxu1 %v3285_v8  ;;  %3134 = vset.pattern.permute.xlu0 %v3285_v8  ;;  %v3371_v12 = vld [vmem:[%s4708_s1 + $0xb0] ss:$44 sps:$4 sm:$0xff]   ;;  %v3397_v16 = vld [vmem:[%s4708_s1 + $0x58] ss:$44 sps:$4 sm:$0xff]   ;;  %v3402_v17 = vld [vmem:[%s4708_s1 + $0x60] ss:$44 sps:$4 sm:$0xff]  }
   0x6   :  { %2916 = vmatprep.subr.msk.bf16.mxu0 %vm270_vm0, %v3341_v3  ;;  %2918 = vmatprep.subr.msk.bf16.mxu1 %vm270_vm0, %v3343_v4  ;;  %v3363_v10 = vsel %vm270_vm0, %v2905_v5, 0  ;;  %v3366_v11 = vsel %vm270_vm0, %v2907_v6, 0  ;;  %v3385_v14 = vld [vmem:[%s4708_s1 + $0x5c] ss:$44 sps:$4 sm:$0xff]   ;;  %v3390_v15 = vld [vmem:[%s4708_s1 + $0x64] ss:$44 sps:$4 sm:$0xff]  }
   0x7   :  { %313 = vmatpush1.bf16.msra.mxu0 %v3363_v10  ;;  %354 = vmatpush1.bf16.msra.mxu1 %v3366_v11  ;;  %v3407_v18 = vld [vmem:[%s4708_s1 + $0x4] ss:$44 sps:$4 sm:$0xff]   ;;  %v3414_v19 = vld [vmem:[%s4708_s1 + $0xc] ss:$44 sps:$4 sm:$0xff]   ;;  %v3432_v23 = vld [vmem:[%s4708_s1 + $0x8] ss:$44 sps:$4 sm:$0xff]  }
   0x8   :  { %314 = vmatprep.subr.bf16.mxu0 %v3348_v7  ;;  %355 = vmatprep.subr.bf16.mxu1 %v3354_v9  ;;  %v63_v20 = vld [vmem:[%s4708_s1 + $0x118] sm:$0xff]  ;;  %v64_v21 = vld [vmem:[%s4708_s1 + $0x120] sm:$0xff]  ;;  %vm266_vm1 = vcmask 457728   ;;  %v3479_v34 = vld [vmem:[%s4708_s1 + $0xc8] ss:$44 sps:$4 sm:$0xff]  }
   0x9   :  { %v3425_v22 = vld [vmem:[%s4708_s1] ss:$44 sps:$4 sm:$0xff]   ;;  %v3434_v24 = vcombine.high %v63_v20, %v63_v20  ;;  %v3438_v25 = vcombine.high %v64_v21, %v64_v21  ;;  %v2909_v26 = vcombine.low %v63_v20, %v63_v20  ;;  %v2911_v27 = vcombine.low %v64_v21, %v64_v21  ;;  %v3460_v31 = vld [vmem:[%s4708_s1 + $0xc4] ss:$44 sps:$4 sm:$0xff]   ;;  %v3500_v37 = vld [vmem:[%s4708_s1 + $0x68] ss:$44 sps:$4 sm:$0xff]  }
   0xa   :  { %v3445_v28 = vld [vmem:[%s4707_s0 + $0x1] sm:$0x1]  ;;  %v3465_v32 = vld [vmem:[%s4708_s1 + $0xcc] ss:$44 sps:$4 sm:$0xff]   ;;  %v3507_v38 = vld [vmem:[%s4708_s1 + $0x70] ss:$44 sps:$4 sm:$0xff]  }
   0xb   :  { %315 = vmatpush1.bf16.msra.mxu0 %v3371_v12  ;;  %356 = vmatpush1.bf16.msra.mxu1 %v3378_v13  ;;  %v3452_v29 = vsel %vm270_vm0, %v2909_v26, 0  ;;  %v3455_v30 = vsel %vm270_vm0, %v2911_v27, 0  ;;  %v3474_v33 = vld [vmem:[%s4708_s1 + $0xc0] ss:$44 sps:$4 sm:$0xff]   ;;  %v3519_v40 = vld [vmem:[%s4708_s1 + $0x1c] ss:$44 sps:$4 sm:$0xff]  }
   0xc   :  { %316 = vmatprep.subr.bf16.mxu0 %v3385_v14  ;;  %357 = vmatprep.subr.bf16.mxu1 %v3390_v15  ;;  %v3486_v35 = vld [vmem:[%s4708_s1 + $0x6c] ss:$44 sps:$4 sm:$0xff]   ;;  %v3493_v36 = vld [vmem:[%s4708_s1 + $0x74] ss:$44 sps:$4 sm:$0xff]  }
   0xd   :  { %v3512_v39 = vld [vmem:[%s4708_s1 + $0x14] ss:$44 sps:$4 sm:$0xff]   ;;  %v65_v41 = vld [vmem:[%s4708_s1 + $0x128] sm:$0xff] }
   0xf   :  { %317 = vmatpush1.bf16.msra.mxu0 %v3397_v16  ;;  %358 = vmatpush1.bf16.msra.mxu1 %v3402_v17 }
  0x10   :  { %318 = vmatprep.subr.bf16.mxu0 %v3407_v18  ;;  %359 = vmatprep.subr.bf16.mxu1 %v3414_v19 }
  0x13   :  { %319 = vmatpush1.bf16.msra.mxu0 %v3425_v22  ;;  %360 = vmatpush1.bf16.msra.mxu1 %v3432_v23 }
  0x14   :  { %2920 = vmatprep.subr.msk.bf16.mxu0 %vm270_vm0, %v3434_v24  ;;  %2922 = vmatprep.subr.msk.bf16.mxu1 %vm270_vm0, %v3438_v25 }
  0x16   :  { %2917 = vmatmul.mubr.msk.bf16.vlgmr.msra.gmra.mxu0 %vm266_vm1, %v3445_v28  ;;  %2919 = vmatmul.mubr.msk.bf16.vlgmr.msra.gmra.mxu1 %vm266_vm1, %v3445_v28 }
  0x17   :  { %395 = vmatpush1.bf16.msra.mxu0 %v3452_v29  ;;  %436 = vmatpush1.bf16.msra.mxu1 %v3455_v30 }
  0x18   :  { %396 = vmatprep.subr.bf16.mxu0 %v3460_v31  ;;  %437 = vmatprep.subr.bf16.mxu1 %v3465_v32 }
  0x19   :  { %418 = vmatprep.mubr.bf16.mxu0 %v3285_v8  ;;  %459 = vmatprep.mubr.bf16.mxu1 %v3285_v8 }
  0x1b   :  { %397 = vmatpush1.bf16.msra.mxu0 %v3474_v33  ;;  %438 = vmatpush1.bf16.msra.mxu1 %v3479_v34 }
  0x1c   :  { %398 = vmatprep.subr.bf16.mxu0 %v3486_v35  ;;  %439 = vmatprep.subr.bf16.mxu1 %v3493_v36 }
  0x1d   :  { %15 = vsyncpa [#allocation6], 0  ;;  %v3529_v42 = vld [vmem:[%s4708_s1 + $0x10] ss:$44 sps:$4 sm:$0xff]   ;;  %v3534_v43 = vld [vmem:[%s4708_s1 + $0x18] ss:$44 sps:$4 sm:$0xff]   ;;  %v3538_v44 = vcombine.high %v65_v41, %v65_v41  ;;  %v2913_v45 = vcombine.low %v65_v41, %v65_v41 }
  0x1e   :  { %v3181_v46 = vld [vmem:[%s4708_s1 + $0x130] ss:$0 sps:$4 sm:$0xff]   ;;  %v3286_v47 = vmov 0.0   ;;  %v3557_v50 = vld [vmem:[%s4708_s1 + $0xd4] ss:$44 sps:$4 sm:$0xff]   ;;  %vm3287_vm2 = vmmov 0  }
  0x1f   :  { %399 = vmatpush1.bf16.msra.mxu0 %v3500_v37  ;;  %440 = vmatpush1.bf16.msra.mxu1 %v3507_v38  ;;  %v3549_v48 = vsel %vm270_vm0, %v2913_v45, 0  ;;  %v3552_v49 = vsel %vm270_vm0, %v3181_v46, 0  ;;  %v3568_v51 = vld [vmem:[%s4708_s1 + $0xd0] ss:$44 sps:$4 sm:$0xff]   ;;  %v3573_v52 = vld [vmem:[%s4708_s1 + $0xd8] ss:$44 sps:$4 sm:$0xff]  }
  0x20   :  { %400 = vmatprep.subr.bf16.mxu0 %v3512_v39  ;;  %441 = vmatprep.subr.bf16.mxu1 %v3519_v40  ;;  %v3580_v53 = vld [vmem:[%s4708_s1 + $0x7c] ss:$44 sps:$4 sm:$0xff]   ;;  %v3590_v54 = vld [vmem:[%s4708_s1 + $0x78] ss:$44 sps:$4 sm:$0xff]   ;;  %v3595_v55 = vld [vmem:[%s4708_s1 + $0x80] ss:$44 sps:$4 sm:$0xff]  }
  0x21   :  { %v3602_v56 = vld [vmem:[%s4708_s1 + $0x24] ss:$44 sps:$4 sm:$0xff]   ;;  %v3609_v57 = vld [vmem:[%s4708_s1 + $0x20] ss:$44 sps:$4 sm:$0xff]   ;;  %v3614_v58 = vld [vmem:[%s4708_s1 + $0x28] ss:$44 sps:$4 sm:$0xff]  }
  0x22   :  { %v67_v59 = vld [vmem:[%s4707_s0] sm:$0x1]  ;;  %v2938_v61 = vld [vmem:[%s4707_s0 + $0x2] sm:$0x1]  ;;  %v2950_v62 = vld [vmem:[%s4707_s0 + $0x3] sm:$0x1] }
  0x23   :  { %401 = vmatpush1.bf16.msra.mxu0 %v3529_v42  ;;  %442 = vmatpush1.bf16.msra.mxu1 %v3534_v43  ;;  %v2444_v60 = vld [vmem:[#allocation2] sm:$0x1]  ;;  %v3854_v63 = vld [vmem:[%s4707_s0 + $0x4] sm:$0x1]  ;;  %s3288_s11 = smov 127   ;;  %vm582_vm3 = vcmask 1039360  }
  0x24   :  { %2924 = vmatprep.subr.msk.bf16.mxu0 %vm270_vm0, %v3538_v44  ;;  %3038 = vmatprep.subr.bf16.mxu1 %v3286_v47  ;;  %s3291_s22 = smov 124   ;;  %vm1137_vm4 = vcmask 1031168   ;;  %s3292_s23 = smov 123   ;;  %vm1455_vm5 = vcmask 1022976   ;;  %vm1773_vm6 = vcmask 1014784   ;;  %vm2091_vm7 = vcmask 1006592  }
  0x25   :  { %2447 = vperm.xlu0 %3134, %v2444_v60   ;;  %s3293_s24 = smov 122   ;;  %vm2409_vm8 = vcmask 998400   ;;  %vm2673_vm11 = vcmask 1040384   ;;  %vm2674_vm13 = vsmask.f32 256  ;;  %vm2676_vm14 = vcmask 1041409  }
  0x26   :  { %2921 = vmatmul.mubr.msk.bf16.vlgmr.msra.gmra.mxu0 %vm266_vm1, %v3445_v28  ;;  %2923 = vmatmul.mubr.msk.bf16.vlgmr.msra.gmra.mxu1 %vm266_vm1, %v3445_v28  ;;  %vm2677_vm15 = vsmask.f32 1280  ;;  %s3296_s13 = smov [#allocation5]  }
  0x27   :  { %477 = vmatpush1.bf16.msra.mxu0 %v3549_v48  ;;  %3039 = vmatpush3.bf16.msra.mxu1 %v3552_v49  ;;  %s2857_s14 = sshll.u32 %s3296_s13, 4  ;;  %s2858_s14 = int_to_ptr.vmem [resolvable:$true] %s2857_s14 }
  0x28   :  { %478 = vmatprep.subr.bf16.mxu0 %v3557_v50  ;;  %3040 = vmatprep.subr.bf16.mxu1 %v3286_v47 }
  0x29   :  { %500 = vmatprep.mubr.bf16.mxu0 %v3285_v8  ;;  %3046 = vmatprep.mubr.msk.bf16.mxu1 %vm3287_vm2, %v3286_v47 }
  0x2b   :  { %479 = vmatpush1.bf16.msra.mxu0 %v3568_v51  ;;  %3041 = vmatpush3.bf16.msra.mxu1 %v3573_v52 }
  0x2c   :  { %480 = vmatprep.subr.bf16.mxu0 %v3580_v53  ;;  %3042 = vmatprep.subr.bf16.mxu1 %v3286_v47 }
  0x2f   :  { %481 = vmatpush1.bf16.msra.mxu0 %v3590_v54  ;;  %3043 = vmatpush3.bf16.msra.mxu1 %v3595_v55 }
  0x30   :  { %482 = vmatprep.subr.bf16.mxu0 %v3602_v56  ;;  %3044 = vmatprep.subr.bf16.mxu1 %v3286_v47 }
  0x33   :  { %483 = vmatpush1.bf16.msra.mxu0 %v3609_v57  ;;  %3045 = vmatpush3.bf16.msra.mxu1 %v3614_v58 }
  0x34   :  { %2927 = vmatprep.subr.msk.bf16.mxu0 %vm270_vm0, %v3341_v3  ;;  %2929 = vmatprep.subr.msk.bf16.mxu1 %vm270_vm0, %v3343_v4 }
  0x36   :  { %2925 = vmatmul.mubr.msk.bf16.vlgmr.msra.gmra.mxu0 %vm266_vm1, %v3445_v28  ;;  %3047 = vmatmul.mubr.msk.bf16.vlgmr.msra.gmra.mxu1 %vm266_vm1, %v3445_v28 }
  0x37   :  { %618 = vmatpush1.bf16.msra.mxu0 %v3363_v10  ;;  %659 = vmatpush1.bf16.msra.mxu1 %v3366_v11 }
  0x38   :  { %619 = vmatprep.subr.bf16.mxu0 %v3348_v7  ;;  %660 = vmatprep.subr.bf16.mxu1 %v3354_v9 }
  0x39   :  { %641 = vmatprep.mubr.bf16.mxu0 %v3285_v8  ;;  %682 = vmatprep.mubr.bf16.mxu1 %v3285_v8 }
  0x3b   :  { %620 = vmatpush1.bf16.msra.mxu0 %v3371_v12  ;;  %661 = vmatpush1.bf16.msra.mxu1 %v3378_v13 }
  0x3c   :  { %621 = vmatprep.subr.bf16.mxu0 %v3385_v14  ;;  %662 = vmatprep.subr.bf16.mxu1 %v3390_v15 }
  0x3f   :  { %622 = vmatpush1.bf16.msra.mxu0 %v3397_v16  ;;  %663 = vmatpush1.bf16.msra.mxu1 %v3402_v17 }
  0x40   :  { %623 = vmatprep.subr.bf16.mxu0 %v3407_v18  ;;  %664 = vmatprep.subr.bf16.mxu1 %v3414_v19 }
  0x43   :  { %624 = vmatpush1.bf16.msra.mxu0 %v3425_v22  ;;  %665 = vmatpush1.bf16.msra.mxu1 %v3432_v23 }
  0x44   :  { %2931 = vmatprep.subr.msk.bf16.mxu0 %vm270_vm0, %v3434_v24  ;;  %2933 = vmatprep.subr.msk.bf16.mxu1 %vm270_vm0, %v3438_v25 }
  0x46   :  { %2928 = vmatmul.mubr.msk.bf16.vlgmr.msra.gmra.mxu0 %vm266_vm1, %v67_v59  ;;  %2930 = vmatmul.mubr.msk.bf16.vlgmr.msra.gmra.mxu1 %vm266_vm1, %v67_v59 }
  0x47   :  { %700 = vmatpush1.bf16.msra.mxu0 %v3452_v29  ;;  %741 = vmatpush1.bf16.msra.mxu1 %v3455_v30 }
  0x48   :  { %701 = vmatprep.subr.bf16.mxu0 %v3460_v31  ;;  %742 = vmatprep.subr.bf16.mxu1 %v3465_v32 }
  0x49   :  { %723 = vmatprep.mubr.bf16.mxu0 %v3285_v8  ;;  %764 = vmatprep.mubr.bf16.mxu1 %v3285_v8 }
  0x4b   :  { %702 = vmatpush1.bf16.msra.mxu0 %v3474_v33  ;;  %743 = vmatpush1.bf16.msra.mxu1 %v3479_v34 }
  0x4c   :  { %703 = vmatprep.subr.bf16.mxu0 %v3486_v35  ;;  %744 = vmatprep.subr.bf16.mxu1 %v3493_v36 }
  0x4f   :  { %704 = vmatpush1.bf16.msra.mxu0 %v3500_v37  ;;  %745 = vmatpush1.bf16.msra.mxu1 %v3507_v38 }
  0x50   :  { %705 = vmatprep.subr.bf16.mxu0 %v3512_v39  ;;  %746 = vmatprep.subr.bf16.mxu1 %v3519_v40 }
  0x53   :  { %706 = vmatpush1.bf16.msra.mxu0 %v3529_v42  ;;  %747 = vmatpush1.bf16.msra.mxu1 %v3534_v43 }
  0x54   :  { %2935 = vmatprep.subr.msk.bf16.mxu0 %vm270_vm0, %v3538_v44  ;;  %3050 = vmatprep.subr.bf16.mxu1 %v3286_v47 }
  0x56   :  { %2932 = vmatmul.mubr.msk.bf16.vlgmr.msra.gmra.mxu0 %vm266_vm1, %v67_v59  ;;  %2934 = vmatmul.mubr.msk.bf16.vlgmr.msra.gmra.mxu1 %vm266_vm1, %v67_v59 }
  0x57   :  { %782 = vmatpush1.bf16.msra.mxu0 %v3549_v48  ;;  %3051 = vmatpush3.bf16.msra.mxu1 %v3552_v49 }
  0x58   :  { %783 = vmatprep.subr.bf16.mxu0 %v3557_v50  ;;  %3052 = vmatprep.subr.bf16.mxu1 %v3286_v47 }
  0x59   :  { %805 = vmatprep.mubr.bf16.mxu0 %v3285_v8  ;;  %3058 = vmatprep.mubr.msk.bf16.mxu1 %vm3287_vm2, %v3286_v47 }
  0x5b   :  { %784 = vmatpush1.bf16.msra.mxu0 %v3568_v51  ;;  %3053 = vmatpush3.bf16.msra.mxu1 %v3573_v52 }
  0x5c   :  { %785 = vmatprep.subr.bf16.mxu0 %v3580_v53  ;;  %3054 = vmatprep.subr.bf16.mxu1 %v3286_v47 }
  0x5f   :  { %786 = vmatpush1.bf16.msra.mxu0 %v3590_v54  ;;  %3055 = vmatpush3.bf16.msra.mxu1 %v3595_v55 }
  0x60   :  { %787 = vmatprep.subr.bf16.mxu0 %v3602_v56  ;;  %3056 = vmatprep.subr.bf16.mxu1 %v3286_v47 }
  0x63   :  { %788 = vmatpush1.bf16.msra.mxu0 %v3609_v57  ;;  %3057 = vmatpush3.bf16.msra.mxu1 %v3614_v58 }
  0x64   :  { %2939 = vmatprep.subr.msk.bf16.mxu0 %vm270_vm0, %v3341_v3  ;;  %2941 = vmatprep.subr.msk.bf16.mxu1 %vm270_vm0, %v3343_v4 }
  0x66   :  { %2936 = vmatmul.mubr.msk.bf16.vlgmr.msra.gmra.mxu0 %vm266_vm1, %v67_v59  ;;  %3059 = vmatmul.mubr.msk.bf16.vlgmr.msra.gmra.mxu1 %vm266_vm1, %v67_v59 }
  0x67   :  { %868 = vmatpush1.bf16.msra.mxu0 %v3363_v10  ;;  %909 = vmatpush1.bf16.msra.mxu1 %v3366_v11 }
  0x68   :  { %869 = vmatprep.subr.bf16.mxu0 %v3348_v7  ;;  %910 = vmatprep.subr.bf16.mxu1 %v3354_v9 }
  0x69   :  { %891 = vmatprep.mubr.bf16.mxu0 %v3285_v8  ;;  %932 = vmatprep.mubr.bf16.mxu1 %v3285_v8 }
  0x6b   :  { %870 = vmatpush1.bf16.msra.mxu0 %v3371_v12  ;;  %911 = vmatpush1.bf16.msra.mxu1 %v3378_v13 }
  0x6c   :  { %871 = vmatprep.subr.bf16.mxu0 %v3385_v14  ;;  %912 = vmatprep.subr.bf16.mxu1 %v3390_v15 }
  0x6f   :  { %872 = vmatpush1.bf16.msra.mxu0 %v3397_v16  ;;  %913 = vmatpush1.bf16.msra.mxu1 %v3402_v17 }
  0x70   :  { %873 = vmatprep.subr.bf16.mxu0 %v3407_v18  ;;  %914 = vmatprep.subr.bf16.mxu1 %v3414_v19 }
  0x73   :  { %874 = vmatpush1.bf16.msra.mxu0 %v3425_v22  ;;  %915 = vmatpush1.bf16.msra.mxu1 %v3432_v23 }
  0x74   :  { %2943 = vmatprep.subr.msk.bf16.mxu0 %vm270_vm0, %v3434_v24  ;;  %2945 = vmatprep.subr.msk.bf16.mxu1 %vm270_vm0, %v3438_v25 }
  0x76   :  { %2940 = vmatmul.mubr.msk.bf16.vlgmr.msra.gmra.mxu0 %vm266_vm1, %v2938_v61  ;;  %2942 = vmatmul.mubr.msk.bf16.vlgmr.msra.gmra.mxu1 %vm266_vm1, %v2938_v61 }
  0x77   :  { %950 = vmatpush1.bf16.msra.mxu0 %v3452_v29  ;;  %991 = vmatpush1.bf16.msra.mxu1 %v3455_v30 }
  0x78   :  { %951 = vmatprep.subr.bf16.mxu0 %v3460_v31  ;;  %992 = vmatprep.subr.bf16.mxu1 %v3465_v32 }
  0x79   :  { %973 = vmatprep.mubr.bf16.mxu0 %v3285_v8  ;;  %1014 = vmatprep.mubr.bf16.mxu1 %v3285_v8 }
  0x7b   :  { %952 = vmatpush1.bf16.msra.mxu0 %v3474_v33  ;;  %993 = vmatpush1.bf16.msra.mxu1 %v3479_v34 }
  0x7c   :  { %953 = vmatprep.subr.bf16.mxu0 %v3486_v35  ;;  %994 = vmatprep.subr.bf16.mxu1 %v3493_v36 }
  0x7f   :  { %954 = vmatpush1.bf16.msra.mxu0 %v3500_v37  ;;  %995 = vmatpush1.bf16.msra.mxu1 %v3507_v38 }
  0x80   :  { %955 = vmatprep.subr.bf16.mxu0 %v3512_v39  ;;  %996 = vmatprep.subr.bf16.mxu1 %v3519_v40 }
  0x83   :  { %956 = vmatpush1.bf16.msra.mxu0 %v3529_v42  ;;  %997 = vmatpush1.bf16.msra.mxu1 %v3534_v43 }
  0x84   :  { %2947 = vmatprep.subr.msk.bf16.mxu0 %vm270_vm0, %v3538_v44  ;;  %3062 = vmatprep.subr.bf16.mxu1 %v3286_v47 }
  0x86   :  { %2944 = vmatmul.mubr.msk.bf16.vlgmr.msra.gmra.mxu0 %vm266_vm1, %v2938_v61  ;;  %2946 = vmatmul.mubr.msk.bf16.vlgmr.msra.gmra.mxu1 %vm266_vm1, %v2938_v61 }
  0x87   :  { %1032 = vmatpush1.bf16.msra.mxu0 %v3549_v48  ;;  %3063 = vmatpush3.bf16.msra.mxu1 %v3552_v49 }
  0x88   :  { %1033 = vmatprep.subr.bf16.mxu0 %v3557_v50  ;;  %3064 = vmatprep.subr.bf16.mxu1 %v3286_v47 }
  0x89   :  { %1055 = vmatprep.mubr.bf16.mxu0 %v3285_v8  ;;  %3070 = vmatprep.mubr.msk.bf16.mxu1 %vm3287_vm2, %v3286_v47 }
  0x8b   :  { %1034 = vmatpush1.bf16.msra.mxu0 %v3568_v51  ;;  %3065 = vmatpush3.bf16.msra.mxu1 %v3573_v52 }
  0x8c   :  { %1035 = vmatprep.subr.bf16.mxu0 %v3580_v53  ;;  %3066 = vmatprep.subr.bf16.mxu1 %v3286_v47 }
  0x8f   :  { %1036 = vmatpush1.bf16.msra.mxu0 %v3590_v54  ;;  %3067 = vmatpush3.bf16.msra.mxu1 %v3595_v55 }
  0x90   :  { %1037 = vmatprep.subr.bf16.mxu0 %v3602_v56  ;;  %3068 = vmatprep.subr.bf16.mxu1 %v3286_v47 }
  0x93   :  { %1038 = vmatpush1.bf16.msra.mxu0 %v3609_v57  ;;  %3069 = vmatpush3.bf16.msra.mxu1 %v3614_v58 }
  0x94   :  { %2951 = vmatprep.subr.msk.bf16.mxu0 %vm270_vm0, %v3341_v3  ;;  %2953 = vmatprep.subr.msk.bf16.mxu1 %vm270_vm0, %v3343_v4 }
  0x96   :  { %2948 = vmatmul.mubr.msk.bf16.vlgmr.msra.gmra.mxu0 %vm266_vm1, %v2938_v61  ;;  %3071 = vmatmul.mubr.msk.bf16.vlgmr.msra.gmra.mxu1 %vm266_vm1, %v2938_v61 }
  0x97   :  { %1186 = vmatpush1.bf16.msra.mxu0 %v3363_v10  ;;  %1227 = vmatpush1.bf16.msra.mxu1 %v3366_v11 }
  0x98   :  { %1187 = vmatprep.subr.bf16.mxu0 %v3348_v7  ;;  %1228 = vmatprep.subr.bf16.mxu1 %v3354_v9 }
  0x99   :  { %1209 = vmatprep.mubr.bf16.mxu0 %v3285_v8  ;;  %1250 = vmatprep.mubr.bf16.mxu1 %v3285_v8 }
  0x9b   :  { %1188 = vmatpush1.bf16.msra.mxu0 %v3371_v12  ;;  %1229 = vmatpush1.bf16.msra.mxu1 %v3378_v13 }
  0x9c   :  { %1189 = vmatprep.subr.bf16.mxu0 %v3385_v14  ;;  %1230 = vmatprep.subr.bf16.mxu1 %v3390_v15 }
  0x9f   :  { %1190 = vmatpush1.bf16.msra.mxu0 %v3397_v16  ;;  %1231 = vmatpush1.bf16.msra.mxu1 %v3402_v17 }
  0xa0   :  { %1191 = vmatprep.subr.bf16.mxu0 %v3407_v18  ;;  %1232 = vmatprep.subr.bf16.mxu1 %v3414_v19 }
  0xa3   :  { %1192 = vmatpush1.bf16.msra.mxu0 %v3425_v22  ;;  %1233 = vmatpush1.bf16.msra.mxu1 %v3432_v23 }
  0xa4   :  { %2955 = vmatprep.subr.msk.bf16.mxu0 %vm270_vm0, %v3434_v24  ;;  %2957 = vmatprep.subr.msk.bf16.mxu1 %vm270_vm0, %v3438_v25 }
  0xa6   :  { %2952 = vmatmul.mubr.msk.bf16.vlgmr.msra.gmra.mxu0 %vm266_vm1, %v2950_v62  ;;  %2954 = vmatmul.mubr.msk.bf16.vlgmr.msra.gmra.mxu1 %vm266_vm1, %v2950_v62 }
  0xa7   :  { %1268 = vmatpush1.bf16.msra.mxu0 %v3452_v29  ;;  %1309 = vmatpush1.bf16.msra.mxu1 %v3455_v30 }
  0xa8   :  { %1269 = vmatprep.subr.bf16.mxu0 %v3460_v31  ;;  %1310 = vmatprep.subr.bf16.mxu1 %v3465_v32 }
  0xa9   :  { %1291 = vmatprep.mubr.bf16.mxu0 %v3285_v8  ;;  %1332 = vmatprep.mubr.bf16.mxu1 %v3285_v8 }
  0xab   :  { %1270 = vmatpush1.bf16.msra.mxu0 %v3474_v33  ;;  %1311 = vmatpush1.bf16.msra.mxu1 %v3479_v34 }
  0xac   :  { %1271 = vmatprep.subr.bf16.mxu0 %v3486_v35  ;;  %1312 = vmatprep.subr.bf16.mxu1 %v3493_v36 }
  0xaf   :  { %1272 = vmatpush1.bf16.msra.mxu0 %v3500_v37  ;;  %1313 = vmatpush1.bf16.msra.mxu1 %v3507_v38 }
  0xb0   :  { %1273 = vmatprep.subr.bf16.mxu0 %v3512_v39  ;;  %1314 = vmatprep.subr.bf16.mxu1 %v3519_v40 }
  0xb3   :  { %1274 = vmatpush1.bf16.msra.mxu0 %v3529_v42  ;;  %1315 = vmatpush1.bf16.msra.mxu1 %v3534_v43 }
  0xb4   :  { %2959 = vmatprep.subr.msk.bf16.mxu0 %vm270_vm0, %v3538_v44  ;;  %3074 = vmatprep.subr.bf16.mxu1 %v3286_v47 }
  0xb6   :  { %2956 = vmatmul.mubr.msk.bf16.vlgmr.msra.gmra.mxu0 %vm266_vm1, %v2950_v62  ;;  %2958 = vmatmul.mubr.msk.bf16.vlgmr.msra.gmra.mxu1 %vm266_vm1, %v2950_v62 }
  0xb7   :  { %1350 = vmatpush1.bf16.msra.mxu0 %v3549_v48  ;;  %3075 = vmatpush3.bf16.msra.mxu1 %v3552_v49 }
  0xb8   :  { %1351 = vmatprep.subr.bf16.mxu0 %v3557_v50  ;;  %3076 = vmatprep.subr.bf16.mxu1 %v3286_v47 }
  0xb9   :  { %1373 = vmatprep.mubr.bf16.mxu0 %v3285_v8  ;;  %3082 = vmatprep.mubr.msk.bf16.mxu1 %vm3287_vm2, %v3286_v47 }
  0xbb   :  { %1352 = vmatpush1.bf16.msra.mxu0 %v3568_v51  ;;  %3077 = vmatpush3.bf16.msra.mxu1 %v3573_v52 }
  0xbc   :  { %1353 = vmatprep.subr.bf16.mxu0 %v3580_v53  ;;  %3078 = vmatprep.subr.bf16.mxu1 %v3286_v47 }
  0xbf   :  { %1354 = vmatpush1.bf16.msra.mxu0 %v3590_v54  ;;  %3079 = vmatpush3.bf16.msra.mxu1 %v3595_v55 }
  0xc0   :  { %1355 = vmatprep.subr.bf16.mxu0 %v3602_v56  ;;  %3080 = vmatprep.subr.bf16.mxu1 %v3286_v47 }
  0xc3   :  { %1356 = vmatpush1.bf16.msra.mxu0 %v3609_v57  ;;  %3081 = vmatpush3.bf16.msra.mxu1 %v3614_v58 }
  0xc4   :  { %2963 = vmatprep.subr.msk.bf16.mxu0 %vm270_vm0, %v3341_v3  ;;  %2965 = vmatprep.subr.msk.bf16.mxu1 %vm270_vm0, %v3343_v4 }
  0xc6   :  { %2960 = vmatmul.mubr.msk.bf16.vlgmr.msra.gmra.mxu0 %vm266_vm1, %v2950_v62  ;;  %3083 = vmatmul.mubr.msk.bf16.vlgmr.msra.gmra.mxu1 %vm266_vm1, %v2950_v62 }
  0xc7   :  { %1504 = vmatpush1.bf16.msra.mxu0 %v3363_v10  ;;  %1545 = vmatpush1.bf16.msra.mxu1 %v3366_v11 }
  0xc8   :  { %1505 = vmatprep.subr.bf16.mxu0 %v3348_v7  ;;  %1546 = vmatprep.subr.bf16.mxu1 %v3354_v9 }
  0xc9   :  { %1527 = vmatprep.mubr.bf16.mxu0 %v3285_v8  ;;  %1568 = vmatprep.mubr.bf16.mxu1 %v3285_v8 }
  0xcb   :  { %1506 = vmatpush1.bf16.msra.mxu0 %v3371_v12  ;;  %1547 = vmatpush1.bf16.msra.mxu1 %v3378_v13 }
  0xcc   :  { %1507 = vmatprep.subr.bf16.mxu0 %v3385_v14  ;;  %1548 = vmatprep.subr.bf16.mxu1 %v3390_v15 }
  0xcf   :  { %1508 = vmatpush1.bf16.msra.mxu0 %v3397_v16  ;;  %1549 = vmatpush1.bf16.msra.mxu1 %v3402_v17 }
  0xd0   :  { %1509 = vmatprep.subr.bf16.mxu0 %v3407_v18  ;;  %1550 = vmatprep.subr.bf16.mxu1 %v3414_v19 }
  0xd3   :  { %1510 = vmatpush1.bf16.msra.mxu0 %v3425_v22  ;;  %1551 = vmatpush1.bf16.msra.mxu1 %v3432_v23 }
  0xd4   :  { %2967 = vmatprep.subr.msk.bf16.mxu0 %vm270_vm0, %v3434_v24  ;;  %2969 = vmatprep.subr.msk.bf16.mxu1 %vm270_vm0, %v3438_v25 }
  0xd6   :  { %v338_v0 = vpop.f32.mrf.mxu0  ;;  %v379_v1 = vpop.f32.mrf.mxu1  ;;  %2964 = vmatmul.mubr.msk.bf16.vlgmr.msra.gmra.mxu0 %vm266_vm1, %v3854_v63  ;;  %2966 = vmatmul.mubr.msk.bf16.vlgmr.msra.gmra.mxu1 %vm266_vm1, %v3854_v63 }
  0xd7   :  { %1627 = vmatpush1.bf16.msra.mxu1 %v3455_v30  ;;  %564 = vrot.lane.b32.xlu1 %v379_v1, %s3288_s11 }
  0xd8   :  { %1586 = vmatpush1.bf16.msra.mxu0 %v3452_v29  ;;  %560 = vrot.lane.b32.xlu0 %v338_v0, %s3288_s11  ;;  %v340_v2 = vpop.f32.mrf.mxu0  ;;  %v381_v5 = vpop.f32.mrf.mxu1 }
  0xd9   :  { %1587 = vmatprep.subr.bf16.mxu0 %v3460_v31  ;;  %1628 = vmatprep.subr.bf16.mxu1 %v3465_v32 }
  0xda   :  { %v342_v6 = vpop.f32.mrf.mxu0  ;;  %v383_v20 = vpop.f32.mrf.mxu1  ;;  %1609 = vmatprep.mubr.bf16.mxu0 %v3285_v8  ;;  %1650 = vmatprep.mubr.bf16.mxu1 %v3285_v8 }
  0xdb   :  { %1629 = vmatpush1.bf16.msra.mxu1 %v3479_v34  ;;  %566 = vrot.lane.b32.xlu1 %v381_v5, %s3288_s11 }
  0xdc   :  { %1588 = vmatpush1.bf16.msra.mxu0 %v3474_v33  ;;  %562 = vrot.lane.b32.xlu0 %v340_v2, %s3288_s11  ;;  %v343_v21 = vpop.f32.mrf.mxu0  ;;  %v384_v26 = vpop.f32.mrf.mxu1 }
  0xdd   :  { %1589 = vmatprep.subr.bf16.mxu0 %v3486_v35  ;;  %1630 = vmatprep.subr.bf16.mxu1 %v3493_v36 }
  0xdf   :  { %1631 = vmatpush1.bf16.msra.mxu1 %v3507_v38 }
  0xe0   :  { %1590 = vmatpush1.bf16.msra.mxu0 %v3500_v37  ;;  %1632 = vmatprep.subr.bf16.mxu1 %v3519_v40 }
  0xe1   :  { %1591 = vmatprep.subr.bf16.mxu0 %v3512_v39 }
  0xe3   :  { %1633 = vmatpush1.bf16.msra.mxu1 %v3534_v43 }
  0xe4   :  { %1592 = vmatpush1.bf16.msra.mxu0 %v3529_v42  ;;  %3086 = vmatprep.subr.bf16.mxu1 %v3286_v47 }
  0xe5   :  { %2971 = vmatprep.subr.msk.bf16.mxu0 %vm270_vm0, %v3538_v44 }
  0xe6   :  { %v420_v27 = vpop.f32.mrf.mxu0  ;;  %v461_v28 = vpop.f32.mrf.mxu1  ;;  %2970 = vmatmul.mubr.msk.bf16.vlgmr.msra.gmra.mxu1 %vm266_vm1, %v3854_v63 }
  0xe7   :  { %2968 = vmatmul.mubr.msk.bf16.vlgmr.msra.gmra.mxu0 %vm266_vm1, %v3854_v63  ;;  %3087 = vmatpush3.bf16.msra.mxu1 %v3552_v49 }
  0xe8   :  { %1668 = vmatpush1.bf16.msra.mxu0 %v3549_v48  ;;  %568 = vrot.lane.b32.xlu1 %v420_v27, %s3288_s11  ;;  %v422_v41 = vpop.f32.mrf.mxu0  ;;  %v463_v45 = vpop.f32.mrf.mxu1 }
  0xe9   :  { %570 = vrot.lane.b32.xlu0 %v422_v41, %s3288_s11  ;;  %1669 = vmatprep.subr.bf16.mxu0 %v3557_v50 }
  0xea   :  { %v424_v46 = vpop.f32.mrf.mxu0  ;;  %3088 = vmatprep.subr.bf16.mxu1 %v3286_v47  ;;  %v465_v59 = vpop.f32.mrf.mxu1  ;;  %1691 = vmatprep.mubr.bf16.mxu0 %v3285_v8 }
  0xeb   :  { %3089 = vmatpush3.bf16.msra.mxu1 %v3573_v52  ;;  %3094 = vmatprep.mubr.msk.bf16.mxu1 %vm3287_vm2, %v3286_v47 }
  0xec   :  { %1670 = vmatpush1.bf16.msra.mxu0 %v3568_v51  ;;  %572 = vrot.lane.b32.xlu1 %v461_v28, %s3288_s11  ;;  %v425_v60 = vpop.f32.mrf.mxu0  ;;  %v466_v61 = vpop.f32.mrf.mxu1 }
  0xed   :  { %1671 = vmatprep.subr.bf16.mxu0 %v3580_v53  ;;  %3090 = vmatprep.subr.bf16.mxu1 %v3286_v47 }
  0xef   :  { %3091 = vmatpush3.bf16.msra.mxu1 %v3595_v55 }
  0xf0   :  { %1672 = vmatpush1.bf16.msra.mxu0 %v3590_v54  ;;  %574 = vrot.lane.b32.xlu1 %v463_v45, %s3288_s11 }
  0xf1   :  { %1673 = vmatprep.subr.bf16.mxu0 %v3602_v56  ;;  %3092 = vmatprep.subr.bf16.mxu1 %v3286_v47 }
  0xf3   :  { %3093 = vmatpush3.bf16.msra.mxu1 %v3614_v58 }
  0xf4   :  { %1674 = vmatpush1.bf16.msra.mxu0 %v3609_v57  ;;  %2977 = vmatprep.subr.msk.bf16.mxu1 %vm270_vm0, %v3343_v4 }
  0xf5   :  { %2975 = vmatprep.subr.msk.bf16.mxu0 %vm270_vm0, %v3341_v3 }
  0xf6   :  { %v502_v62 = vpop.f32.mrf.mxu0  ;;  %3095 = vmatmul.mubr.msk.bf16.vlgmr.msra.gmra.mxu1 %vm266_vm1, %v3854_v63  ;;  %v543_v0 = vpop.f32.mrf.mxu1 }
  0xf7   :  { %2972 = vmatmul.mubr.msk.bf16.vlgmr.msra.gmra.mxu0 %vm266_vm1, %v3854_v63  ;;  %1863 = vmatpush1.bf16.msra.mxu1 %v3366_v11 }
  0xf8   :  { %1822 = vmatpush1.bf16.msra.mxu0 %v3363_v10  ;;  %576 = vrot.lane.b32.xlu1 %v502_v62, %s3288_s11  ;;  %v504_v1 = vpop.f32.mrf.mxu0  ;;  %v3048_v2 = vpop.f32.mrf.mxu1 }
  0xf9   :  { %1823 = vmatprep.subr.bf16.mxu0 %v3348_v7  ;;  %1864 = vmatprep.subr.bf16.mxu1 %v3354_v9  ;;  %v3941_v7 = vld [vmem:[%s4707_s0 + $0x5] sm:$0x1] }
  0xfa   :  { %v506_v5 = vpop.f32.mrf.mxu0  ;;  %v546_v6 = vpop.f32.mrf.mxu1  ;;  %1845 = vmatprep.mubr.bf16.mxu0 %v3285_v8  ;;  %1886 = vmatprep.mubr.bf16.mxu1 %v3285_v8 }
  0xfb   :  { %1865 = vmatpush1.bf16.msra.mxu1 %v3378_v13 }
  0xfc   :  { %1824 = vmatpush1.bf16.msra.mxu0 %v3371_v12  ;;  %580 = vrot.lane.b32.xlu1 %v543_v0, %s3288_s11  ;;  %v507_v63 = vpop.f32.mrf.mxu0  ;;  %v3049_v20 = vpop.f32.mrf.mxu1 }
  0xfd   :  { %1825 = vmatprep.subr.bf16.mxu0 %v3385_v14  ;;  %1866 = vmatprep.subr.bf16.mxu1 %v3390_v15  ;;  %v3239_v20 = vld [vmem:[%s4708_s1 + $0xb4] ss:$44 sps:$4 sm:$0xff]  }
  0xff   :  { %1867 = vmatpush1.bf16.msra.mxu1 %v3402_v17 }
 0x100   :  { %1826 = vmatpush1.bf16.msra.mxu0 %v3397_v16  ;;  %578 = vrot.lane.b32.xlu1 %v504_v1, %s3288_s11  ;;  %s3295_s11 = smov [#allocation3]  }
 0x101   :  { %1827 = vmatprep.subr.bf16.mxu0 %v3407_v18  ;;  %1868 = vmatprep.subr.bf16.mxu1 %v3414_v19  ;;  %s2847_s12 = sshll.u32 %s3295_s11, 4  ;;  %s2848_s12 = int_to_ptr.vmem [resolvable:$true] %s2847_s12 }
 0x102   :  { %s3241_s15 = scalar_lea.vmem %s2848_s12, 16  ;;  %s3245_s16 = scalar_lea.vmem %s2848_s12, 32 }
 0x103   :  { %1869 = vmatpush1.bf16.msra.mxu1 %v3432_v23  ;;  %p3242_p0 = scmp.ne.s32.totalorder %s2848_s12, %s3241_s15  ;;  %p3246_p1 = scmp.lt.s32.totalorder %s2848_s12, %s2848_s12 }
 0x104   :  { %1828 = vmatpush1.bf16.msra.mxu0 %v3425_v22  ;;  %2981 = vmatprep.subr.msk.bf16.mxu1 %vm270_vm0, %v3438_v25  ;;  %p3247_p2 = scmp.lt.s32.totalorder %s3245_s16, %s3241_s15 }
 0x105   :  { %2979 = vmatprep.subr.msk.bf16.mxu0 %vm270_vm0, %v3434_v24 }
 0x106   :  { %v3948_v9 = vpop.f32.mrf.mxu0  ;;  %v3950_v12 = vpop.f32.mrf.mxu1  ;;  %2978 = vmatmul.mubr.msk.bf16.vlgmr.msra.gmra.mxu1 %vm266_vm1, %v3941_v7  ;;  %p3248_p3 = por %p3247_p2, %p3246_p1 }
 0x107   :  { %2976 = vmatmul.mubr.msk.bf16.vlgmr.msra.gmra.mxu0 %vm266_vm1, %v3941_v7  ;;  %1945 = vmatpush1.bf16.msra.mxu1 %v3455_v30 }
 0x108   :  { %1904 = vmatpush1.bf16.msra.mxu0 %v3452_v29  ;;  %v3958_v21 = vpop.f32.mrf.mxu0  ;;  %v3960_v26 = vpop.f32.mrf.mxu1  ;;  %1946 = vmatprep.subr.bf16.mxu1 %v3465_v32  ;;  %p3249_p4 = pnand %p3248_p3, %p3242_p0 }
 0x109   :  { %1905 = vmatprep.subr.bf16.mxu0 %v3460_v31  ;;  %1927 = vmatprep.mubr.bf16.mxu0 %v3285_v8 }
 0x10a   :  { %v647_v27 = vpop.f32.mrf.mxu0  ;;  %v688_v28 = vpop.f32.mrf.mxu1  ;;  %1968 = vmatprep.mubr.bf16.mxu1 %v3285_v8 }
 0x10b   :  { %1947 = vmatpush1.bf16.msra.mxu1 %v3479_v34 }
 0x10c   :  { %1906 = vmatpush1.bf16.msra.mxu0 %v3474_v33  ;;  %v648_v41 = vpop.f32.mrf.mxu0  ;;  %v689_v45 = vpop.f32.mrf.mxu1  ;;  %1948 = vmatprep.subr.bf16.mxu1 %v3493_v36 }
 0x10d   :  { %1907 = vmatprep.subr.bf16.mxu0 %v3486_v35 }
 0x10f   :  { %1949 = vmatpush1.bf16.msra.mxu1 %v3507_v38 }
 0x110   :  { %1908 = vmatpush1.bf16.msra.mxu0 %v3500_v37  ;;  %1950 = vmatprep.subr.bf16.mxu1 %v3519_v40 }
 0x111   :  { %1909 = vmatprep.subr.bf16.mxu0 %v3512_v39 }
 0x113   :  { %1951 = vmatpush1.bf16.msra.mxu1 %v3534_v43 }
 0x114   :  { %1910 = vmatpush1.bf16.msra.mxu0 %v3529_v42  ;;  %3098 = vmatprep.subr.bf16.mxu1 %v3286_v47 }
 0x115   :  { %2983 = vmatprep.subr.msk.bf16.mxu0 %vm270_vm0, %v3538_v44 }
 0x116   :  { %v3979_v46 = vpop.f32.mrf.mxu0  ;;  %v3981_v59 = vpop.f32.mrf.mxu1  ;;  %2982 = vmatmul.mubr.msk.bf16.vlgmr.msra.gmra.mxu1 %vm266_vm1, %v3941_v7 }
 0x117   :  { %2980 = vmatmul.mubr.msk.bf16.vlgmr.msra.gmra.mxu0 %vm266_vm1, %v3941_v7  ;;  %3099 = vmatpush3.bf16.msra.mxu1 %v3552_v49 }
 0x118   :  { %1986 = vmatpush1.bf16.msra.mxu0 %v3549_v48  ;;  %v3989_v60 = vpop.f32.mrf.mxu0  ;;  %v3991_v61 = vpop.f32.mrf.mxu1  ;;  %3100 = vmatprep.subr.bf16.mxu1 %v3286_v47 }
 0x119   :  { %1987 = vmatprep.subr.bf16.mxu0 %v3557_v50  ;;  %2009 = vmatprep.mubr.bf16.mxu0 %v3285_v8 }
 0x11a   :  { %v729_v62 = vpop.f32.mrf.mxu0  ;;  %v770_v0 = vpop.f32.mrf.mxu1  ;;  %3106 = vmatprep.mubr.msk.bf16.mxu1 %vm3287_vm2, %v3286_v47 }
 0x11b   :  { %3101 = vmatpush3.bf16.msra.mxu1 %v3573_v52 }
 0x11c   :  { %1988 = vmatpush1.bf16.msra.mxu0 %v3568_v51  ;;  %v730_v1 = vpop.f32.mrf.mxu0  ;;  %v771_v2 = vpop.f32.mrf.mxu1  ;;  %3102 = vmatprep.subr.bf16.mxu1 %v3286_v47 }
 0x11d   :  { %1989 = vmatprep.subr.bf16.mxu0 %v3580_v53 }
 0x11f   :  { %3103 = vmatpush3.bf16.msra.mxu1 %v3595_v55 }
 0x120   :  { %1990 = vmatpush1.bf16.msra.mxu0 %v3590_v54  ;;  %3104 = vmatprep.subr.bf16.mxu1 %v3286_v47 }
 0x121   :  { %1991 = vmatprep.subr.bf16.mxu0 %v3602_v56 }
 0x123   :  { %3105 = vmatpush3.bf16.msra.mxu1 %v3614_v58 }
 0x124   :  { %1992 = vmatpush1.bf16.msra.mxu0 %v3609_v57  ;;  %2989 = vmatprep.subr.msk.bf16.mxu1 %vm270_vm0, %v3343_v4 }
 0x125   :  { %2987 = vmatprep.subr.msk.bf16.mxu0 %vm270_vm0, %v3341_v3  ;;  %v3238_v3 = vld [vmem:[%s4708_s1 + $0xbc] ss:$44 sps:$4 sm:$0xff]  }
 0x126   :  { %v4012_v5 = vpop.f32.mrf.mxu0  ;;  %v4014_v6 = vpop.f32.mrf.mxu1  ;;  %3107 = vmatmul.mubr.msk.bf16.vlgmr.msra.gmra.mxu1 %vm266_vm1, %v3941_v7 }
 0x127   :  { %2984 = vmatmul.mubr.msk.bf16.vlgmr.msra.gmra.mxu0 %vm266_vm1, %v3941_v7  ;;  %2181 = vmatpush1.bf16.msra.mxu1 %v3366_v11 }
 0x128   :  { %2140 = vmatpush1.bf16.msra.mxu0 %v3363_v10  ;;  %v4022_v63 = vpop.f32.mrf.mxu0  ;;  %v3060_v4 = vpop.f32.mrf.mxu1  ;;  %2182 = vmatprep.subr.bf16.mxu1 %v3238_v3  ;;  %v3240_v10 = vld [vmem:[%s4708_s1 + $0xb0] ss:$44 sps:$4 sm:$0xff]   ;;  %s3290_s1 = smov 125  }
 0x129   :  { %2141 = vmatprep.subr.bf16.mxu0 %v3239_v20  ;;  %2163 = vmatprep.mubr.bf16.mxu0 %v3285_v8 }
 0x12a   :  { %v811_v7 = vpop.f32.mrf.mxu0  ;;  %v851_v27 = vpop.f32.mrf.mxu1  ;;  %2204 = vmatprep.mubr.bf16.mxu1 %v3285_v8 }
 0x12b   :  { %2183 = vmatpush1.bf16.msra.mxu1 %v3378_v13  ;;  %v4046_v13 = vld [vmem:[%s4707_s0 + $0x6] sm:$0x1]  ;;  %s3289_s0 = smov 126  }
 0x12c   :  { %2142 = vmatpush1.bf16.msra.mxu0 %v3240_v10  ;;  %v812_v11 = vpop.f32.mrf.mxu0  ;;  %v3061_v28 = vpop.f32.mrf.mxu1  ;;  %2184 = vmatprep.subr.bf16.mxu1 %v3390_v15 }
 0x12d   :  { %2143 = vmatprep.subr.bf16.mxu0 %v3385_v14 }
 0x12f   :  { %2185 = vmatpush1.bf16.msra.mxu1 %v3402_v17 }
 0x130   :  { %2144 = vmatpush1.bf16.msra.mxu0 %v3397_v16  ;;  %2186 = vmatprep.subr.bf16.mxu1 %v3414_v19 }
 0x131   :  { %2145 = vmatprep.subr.bf16.mxu0 %v3407_v18 }
 0x133   :  { %2187 = vmatpush1.bf16.msra.mxu1 %v3432_v23 }
 0x134   :  { %2146 = vmatpush1.bf16.msra.mxu0 %v3425_v22  ;;  %2993 = vmatprep.subr.msk.bf16.mxu1 %vm270_vm0, %v3438_v25 }
 0x135   :  { %2991 = vmatprep.subr.msk.bf16.mxu0 %vm270_vm0, %v3434_v24  ;;  %v4077_v24 = vpop.permute.xlu0 %2447 }
 0x136   :  { %v893_v14 = vpop.f32.mrf.mxu0  ;;  %v934_v15 = vpop.f32.mrf.mxu1  ;;  %2990 = vmatmul.mubr.msk.bf16.vlgmr.msra.gmra.mxu1 %vm266_vm1, %v4046_v13 }
 0x137   :  { %2988 = vmatmul.mubr.msk.bf16.vlgmr.msra.gmra.mxu0 %vm266_vm1, %v4046_v13  ;;  %2263 = vmatpush1.bf16.msra.mxu1 %v3455_v30 }
 0x138   :  { %2222 = vmatpush1.bf16.msra.mxu0 %v3452_v29  ;;  %1115 = vrot.lane.b32.xlu0 %v893_v14, %s3289_s0  ;;  %v895_v16 = vpop.f32.mrf.mxu0  ;;  %v936_v17 = vpop.f32.mrf.mxu1 }
 0x139   :  { %1117 = vrot.lane.b32.xlu1 %v895_v16, %s3289_s0  ;;  %2223 = vmatprep.subr.bf16.mxu0 %v3460_v31 }
 0x13a   :  { %v897_v18 = vpop.f32.mrf.mxu0  ;;  %2264 = vmatprep.subr.bf16.mxu1 %v3465_v32  ;;  %v938_v19 = vpop.f32.mrf.mxu1  ;;  %2245 = vmatprep.mubr.bf16.mxu0 %v3285_v8 }
 0x13b   :  { %2265 = vmatpush1.bf16.msra.mxu1 %v3479_v34  ;;  %2286 = vmatprep.mubr.bf16.mxu1 %v3285_v8 }
 0x13c   :  { %2224 = vmatpush1.bf16.msra.mxu0 %v3474_v33  ;;  %1119 = vrot.lane.b32.xlu0 %v934_v15, %s3289_s0  ;;  %v898_v22 = vpop.f32.mrf.mxu0  ;;  %v939_v23 = vpop.f32.mrf.mxu1 }
 0x13d   :  { %2225 = vmatprep.subr.bf16.mxu0 %v3486_v35  ;;  %2266 = vmatprep.subr.bf16.mxu1 %v3493_v36 }
 0x13f   :  { %2267 = vmatpush1.bf16.msra.mxu1 %v3507_v38 }
 0x140   :  { %2226 = vmatpush1.bf16.msra.mxu0 %v3500_v37  ;;  %1121 = vrot.lane.b32.xlu0 %v936_v17, %s3289_s0 }
 0x141   :  { %2227 = vmatprep.subr.bf16.mxu0 %v3512_v39  ;;  %2268 = vmatprep.subr.bf16.mxu1 %v3519_v40 }
 0x143   :  { %2269 = vmatpush1.bf16.msra.mxu1 %v3534_v43 }
 0x144   :  { %2228 = vmatpush1.bf16.msra.mxu0 %v3529_v42  ;;  %3110 = vmatprep.subr.bf16.mxu1 %v3286_v47 }
 0x145   :  { %2995 = vmatprep.subr.msk.bf16.mxu0 %vm270_vm0, %v3538_v44  ;;  %vm4532_vm0 = vmand %vm2673_vm11, %vm2674_vm13 }
 0x146   :  { %v975_v25 = vpop.f32.mrf.mxu0  ;;  %v1016_v29 = vpop.f32.mrf.mxu1  ;;  %2994 = vmatmul.mubr.msk.bf16.vlgmr.msra.gmra.mxu1 %vm266_vm1, %v4046_v13 }
 0x147   :  { %2992 = vmatmul.mubr.msk.bf16.vlgmr.msra.gmra.mxu0 %vm266_vm1, %v4046_v13  ;;  %3111 = vmatpush3.bf16.msra.mxu1 %v3552_v49 }
 0x148   :  { %2304 = vmatpush1.bf16.msra.mxu0 %v3549_v48  ;;  %1127 = vrot.lane.b32.xlu0 %v1016_v29, %s3289_s0  ;;  %v977_v30 = vpop.f32.mrf.mxu0  ;;  %v1018_v31 = vpop.f32.mrf.mxu1 }
 0x149   :  { %1123 = vrot.lane.b32.xlu1 %v975_v25, %s3289_s0  ;;  %v565_v32 = vpop.permute.xlu1 %564  ;;  %2305 = vmatprep.subr.bf16.mxu0 %v3557_v50 }
 0x14a   :  { %v561_v33 = vpop.permute.xlu0 %560  ;;  %v979_v34 = vpop.f32.mrf.mxu0  ;;  %3112 = vmatprep.subr.bf16.mxu1 %v3286_v47  ;;  %2327 = vmatprep.mubr.bf16.mxu0 %v3285_v8 }
 0x14b   :  { %v1020_v35 = vpop.f32.mrf.mxu1  ;;  %3113 = vmatpush3.bf16.msra.mxu1 %v3573_v52  ;;  %3118 = vmatprep.mubr.msk.bf16.mxu1 %vm3287_vm2, %v3286_v47  ;;  %vm2680_vm2 = vcmask 1042434  }
 0x14c   :  { %2306 = vmatpush1.bf16.msra.mxu0 %v3568_v51  ;;  %1129 = vrot.lane.b32.xlu0 %v1018_v31, %s3289_s0  ;;  %v980_v36 = vpop.f32.mrf.mxu0 }
 0x14d   :  { %1125 = vrot.lane.b32.xlu1 %v977_v30, %s3289_s0  ;;  %v567_v37 = vpop.permute.xlu1 %566  ;;  %v1021_v38 = vpop.f32.mrf.mxu1  ;;  %2307 = vmatprep.subr.bf16.mxu0 %v3580_v53 }
 0x14e   :  { %v4101_v8 = vsel %vm582_vm3, %v565_v32, %v567_v37  ;;  %v563_v39 = vpop.permute.xlu0 %562  ;;  %3114 = vmatprep.subr.bf16.mxu1 %v3286_v47 }
 0x14f   :  { %v4105_v40 = vsel %vm582_vm3, %v561_v33, %v563_v39  ;;  %v4108_v42 = vsel %vm582_vm3, %v563_v39, %v565_v32  ;;  %3115 = vmatpush3.bf16.msra.mxu1 %v3595_v55 }
 0x150   :  { %2308 = vmatpush1.bf16.msra.mxu0 %v3590_v54  ;;  %3116 = vmatprep.subr.bf16.mxu1 %v3286_v47 }
 0x151   :  { %2309 = vmatprep.subr.bf16.mxu0 %v3602_v56 }
 0x153   :  { %3117 = vmatpush3.bf16.msra.mxu1 %v3614_v58 }
 0x154   :  { %2310 = vmatpush1.bf16.msra.mxu0 %v3609_v57 }
 0x156   :  { %v1057_v43 = vpop.f32.mrf.mxu0  ;;  %v1098_v44 = vpop.f32.mrf.mxu1  ;;  %3119 = vmatmul.mubr.msk.bf16.vlgmr.msra.gmra.mxu1 %vm266_vm1, %v4046_v13 }
 0x157   :  { %2996 = vmatmul.mubr.msk.bf16.vlgmr.msra.gmra.mxu0 %vm266_vm1, %v4046_v13  ;;  %1135 = vrot.lane.b32.xlu1 %v1098_v44, %s3289_s0  ;;  %vm4543_vm1 = vmand %vm2676_vm14, %vm2677_vm15  ;;  %vm2688_vm15 = vcmask 1044484  }
 0x158   :  { %1131 = vrot.lane.b32.xlu0 %v1057_v43, %s3289_s0  ;;  %v1059_v48 = vpop.f32.mrf.mxu0  ;;  %v3072_v47 = vpop.f32.mrf.mxu1 }
 0x15a   :  { %v4122_v49 = vpop.permute.xlu1 %568  ;;  %v1061_v50 = vpop.f32.mrf.mxu0 }
 0x15b   :  { %v4126_v51 = vsel %vm582_vm3, %v567_v37, %v4122_v49  ;;  %v1101_v52 = vpop.f32.mrf.mxu1  ;;  %v571_v47 = vpop.permute.xlu0 %570 }
 0x15c   :  { %1133 = vrot.lane.b32.xlu0 %v1059_v48, %s3289_s0  ;;  %v1062_v53 = vpop.f32.mrf.mxu0 }
 0x15d   :  { %v3073_v54 = vpop.f32.mrf.mxu1 }
 0x15e   :  { %v4129_v55 = vpop.permute.xlu1 %572 }
 0x162   :  { %v575_v56 = vpop.permute.xlu1 %574 }
 0x163   :  { %v4133_v57 = vsel %vm582_vm3, %v4129_v55, %v575_v56 }
 0x166   :  { %v1211_v58 = vpop.f32.mrf.mxu0  ;;  %v1252_v41 = vpop.f32.mrf.mxu1 }
 0x167   :  { %1433 = vrot.lane.b32.xlu1 %v1211_v58, %s3290_s1 }
 0x168   :  { %v1213_v45 = vpop.f32.mrf.mxu0  ;;  %v1254_v62 = vpop.f32.mrf.mxu1 }
 0x169   :  { %1435 = vrot.lane.b32.xlu0 %v1213_v45, %s3290_s1 }
 0x16a   :  { %v577_v0 = vpop.permute.xlu1 %576  ;;  %v1215_v1 = vpop.f32.mrf.mxu0 }
 0x16b   :  { %v4138_v2 = vsel %vm582_vm3, %v575_v56, %v577_v0  ;;  %v1256_v4 = vpop.f32.mrf.mxu1  ;;  %1437 = vrot.lane.b32.xlu1 %v1252_v41, %s3290_s1  ;;  %v644_v41 = vadd.f32 %v3948_v9, %v4105_v40  ;;  %v685_v9 = vadd.f32 %v3950_v12, %v4101_v8  ;;  %v687_v12 = vadd.f32 %v3960_v26, %v4126_v51 }
 0x16c   :  { %v1216_v3 = vpop.f32.mrf.mxu0 }
 0x16d   :  { %v1257_v20 = vpop.f32.mrf.mxu1  ;;  %1439 = vrot.lane.b32.xlu0 %v1254_v62, %s3290_s1 }
 0x16e   :  { %v581_v7 = vpop.permute.xlu1 %580  ;;  %v646_v20 = vadd.f32 %v3958_v21, %v4108_v42 }
 0x16f   :  { %v4143_v27 = vsel %vm582_vm3, %v581_v7, %v561_v33 }
 0x172   :  { %v579_v10 = vpop.permute.xlu1 %578 }
 0x173   :  { %v4146_v11 = vsel %vm582_vm3, %v577_v0, %v579_v10  ;;  %v4149_v28 = vsel %vm582_vm3, %v579_v10, %v581_v7 }
 0x176   :  { %v1293_v13 = vpop.f32.mrf.mxu0  ;;  %v1334_v14 = vpop.f32.mrf.mxu1 }
 0x177   :  { %1445 = vrot.lane.b32.xlu1 %v1334_v14, %s3290_s1  ;;  %1441 = vrot.lane.b32.xlu0 %v1293_v13, %s3290_s1 }
 0x178   :  { %v1295_v15 = vpop.f32.mrf.mxu0  ;;  %v1336_v16 = vpop.f32.mrf.mxu1 }
 0x17a   :  { %v1297_v17 = vpop.f32.mrf.mxu0  ;;  %v1338_v18 = vpop.f32.mrf.mxu1 }
 0x17b   :  { %1443 = vrot.lane.b32.xlu1 %v1295_v15, %s3290_s1 }
 0x17c   :  { %v1298_v19 = vpop.f32.mrf.mxu0  ;;  %v1339_v22 = vpop.f32.mrf.mxu1 }
 0x17f   :  { %1447 = vrot.lane.b32.xlu1 %v1336_v16, %s3290_s1 }
 0x186   :  { %v1375_v23 = vpop.f32.mrf.mxu0  ;;  %v1416_v25 = vpop.f32.mrf.mxu1 }
 0x187   :  { %1453 = vrot.lane.b32.xlu0 %v1416_v25, %s3290_s1  ;;  %1449 = vrot.lane.b32.xlu1 %v1375_v23, %s3290_s1  ;;  %v587_v23 = vsel %vm582_vm3, %v4122_v49, %v571_v47  ;;  %v588_v25 = vsel %vm582_vm3, %v571_v47, %v4129_v55 }
 0x188   :  { %v1377_v29 = vpop.f32.mrf.mxu0  ;;  %v3084_v30 = vpop.f32.mrf.mxu1  ;;  %v726_v51 = vadd.f32 %v3979_v46, %v587_v23 }
 0x18a   :  { %v1379_v31 = vpop.f32.mrf.mxu0  ;;  %v1419_v32 = vpop.f32.mrf.mxu1 }
 0x18b   :  { %1451 = vrot.lane.b32.xlu0 %v1377_v29, %s3290_s1 }
 0x18c   :  { %v1380_v33 = vpop.f32.mrf.mxu0  ;;  %v3085_v34 = vpop.f32.mrf.mxu1 }
 0x18d   :  { %v767_v33 = vadd.f32 %v3981_v59, %v4133_v57  ;;  %v728_v34 = vadd.f32 %v3989_v60, %v588_v25  ;;  %v849_v60 = vadd.f32 %v4014_v6, %v4143_v27 }
 0x196   :  { %v1529_v35 = vpop.f32.mrf.mxu0  ;;  %v1570_v36 = vpop.f32.mrf.mxu1 }
 0x197   :  { %1751 = vrot.lane.b32.xlu1 %v1529_v35, %s3291_s22 }
 0x198   :  { %v1531_v37 = vpop.f32.mrf.mxu0  ;;  %v1572_v38 = vpop.f32.mrf.mxu1 }
 0x199   :  { %1753 = vrot.lane.b32.xlu0 %v1531_v37, %s3291_s22 }
 0x19a   :  { %v1533_v39 = vpop.f32.mrf.mxu0  ;;  %v1574_v43 = vpop.f32.mrf.mxu1 }
 0x19b   :  { %1755 = vrot.lane.b32.xlu1 %v1570_v36, %s3291_s22 }
 0x19c   :  { %v1534_v44 = vpop.f32.mrf.mxu0  ;;  %v1575_v48 = vpop.f32.mrf.mxu1 }
 0x19d   :  { %v769_v48 = vadd.f32 %v3991_v61, %v4138_v2  ;;  %v810_v61 = vadd.f32 %v4022_v63, %v4149_v28 }
 0x19f   :  { %1757 = vrot.lane.b32.xlu1 %v1572_v38, %s3291_s22 }
 0x1a6   :  { %v1652_v50 = vpop.f32.mrf.mxu1 }
 0x1a7   :  { %v1611_v52 = vpop.f32.mrf.mxu0 }
 0x1a8   :  { %1759 = vrot.lane.b32.xlu0 %v1611_v52, %s3291_s22  ;;  %v1654_v53 = vpop.f32.mrf.mxu1 }
 0x1a9   :  { %v1613_v54 = vpop.f32.mrf.mxu0 }
 0x1aa   :  { %v1116_v56 = vpop.permute.xlu0 %1115  ;;  %v1656_v58 = vpop.f32.mrf.mxu1 }
 0x1ab   :  { %v1615_v45 = vpop.f32.mrf.mxu0  ;;  %v1118_v62 = vpop.permute.xlu1 %1117 }
 0x1ac   :  { %v1138_v0 = vsel %vm1137_vm4, %v1116_v56, %v1118_v62  ;;  %1763 = vrot.lane.b32.xlu0 %v1652_v50, %s3291_s22  ;;  %v1657_v1 = vpop.f32.mrf.mxu1  ;;  %v808_v45 = vadd.f32 %v4012_v5, %v4146_v11 }
 0x1ad   :  { %v4167_v4 = vadd.f32 %v1138_v0, %v644_v41  ;;  %v1616_v3 = vpop.f32.mrf.mxu0 }
 0x1ae   :  { %v1120_v7 = vpop.permute.xlu0 %1119 }
 0x1af   :  { %v1139_v10 = vsel %vm1137_vm4, %v1118_v62, %v1120_v7 }
 0x1b0   :  { %v4172_v13 = vadd.f32 %v1139_v10, %v646_v20  ;;  %1761 = vrot.lane.b32.xlu0 %v1613_v54, %s3291_s22 }
 0x1b2   :  { %v1122_v40 = vpop.permute.xlu0 %1121 }
 0x1b3   :  { %v1140_v14 = vsel %vm1137_vm4, %v1120_v7, %v1122_v40 }
 0x1b4   :  { %v4178_v15 = vadd.f32 %v1140_v14, %v685_v9  ;;  %1765 = vrot.lane.b32.xlu0 %v1654_v53, %s3291_s22 }
 0x1b6   :  { %v1734_v16 = vpop.f32.mrf.mxu1 }
 0x1b7   :  { %v1693_v17 = vpop.f32.mrf.mxu0 }
 0x1b8   :  { %1771 = vrot.lane.b32.xlu0 %v1734_v16, %s3291_s22  ;;  %1767 = vrot.lane.b32.xlu1 %v1693_v17, %s3291_s22  ;;  %v3096_v21 = vpop.f32.mrf.mxu1 }
 0x1b9   :  { %v1695_v42 = vpop.f32.mrf.mxu0 }
 0x1ba   :  { %v1128_v18 = vpop.permute.xlu0 %1127  ;;  %v1737_v19 = vpop.f32.mrf.mxu1 }
 0x1bb   :  { %v1124_v8 = vpop.permute.xlu1 %1123  ;;  %v1697_v22 = vpop.f32.mrf.mxu0 }
 0x1bc   :  { %v1141_v29 = vsel %vm1137_vm4, %v1122_v40, %v1124_v8  ;;  %1769 = vrot.lane.b32.xlu1 %v1695_v42, %s3291_s22  ;;  %v3097_v30 = vpop.f32.mrf.mxu1 }
 0x1bd   :  { %v4191_v31 = vadd.f32 %v1141_v29, %v687_v12  ;;  %v1698_v32 = vpop.f32.mrf.mxu0 }
 0x1be   :  { %v1130_v26 = vpop.permute.xlu0 %1129 }
 0x1bf   :  { %v1144_v49 = vsel %vm1137_vm4, %v1128_v18, %v1130_v26  ;;  %v1126_v35 = vpop.permute.xlu1 %1125 }
 0x1c0   :  { %v4198_v55 = vadd.f32 %v1144_v49, %v767_v33  ;;  %v1142_v36 = vsel %vm1137_vm4, %v1124_v8, %v1126_v35  ;;  %v1143_v37 = vsel %vm1137_vm4, %v1126_v35, %v1128_v18 }
 0x1c1   :  { %v4202_v38 = vadd.f32 %v1142_v36, %v726_v51  ;;  %v4204_v39 = vadd.f32 %v1143_v37, %v728_v34 }
 0x1c6   :  { %v1888_v43 = vpop.f32.mrf.mxu1 }
 0x1c7   :  { %v1847_v59 = vpop.f32.mrf.mxu0 }
 0x1c8   :  { %2069 = vrot.lane.b32.xlu0 %v1847_v59, %s3292_s23  ;;  %v1890_v46 = vpop.f32.mrf.mxu1 }
 0x1c9   :  { %v1849_v57 = vpop.f32.mrf.mxu0  ;;  %v1136_v44 = vpop.permute.xlu1 %1135 }
 0x1ca   :  { %v1160_v47 = vsel %vm1137_vm4, %v1136_v44, %v1116_v56  ;;  %v1132_v50 = vpop.permute.xlu0 %1131  ;;  %2071 = vrot.lane.b32.xlu1 %v1849_v57, %s3292_s23  ;;  %v1892_v52 = vpop.f32.mrf.mxu1 }
 0x1cb   :  { %v1171_v53 = vadd.f32 %v1160_v47, %v849_v60  ;;  %v1145_v54 = vsel %vm1137_vm4, %v1130_v26, %v1132_v50  ;;  %v1851_v58 = vpop.f32.mrf.mxu0 }
 0x1cc   :  { %v4214_v41 = vadd.f32 %v1145_v54, %v769_v48  ;;  %2073 = vrot.lane.b32.xlu0 %v1888_v43, %s3292_s23  ;;  %v1893_v6 = vpop.f32.mrf.mxu1 }
 0x1cd   :  { %v1852_v27 = vpop.f32.mrf.mxu0 }
 0x1ce   :  { %v1134_v2 = vpop.permute.xlu0 %1133  ;;  %2075 = vrot.lane.b32.xlu1 %v1890_v46, %s3292_s23 }
 0x1cf   :  { %v1146_v56 = vsel %vm1137_vm4, %v1132_v50, %v1134_v2  ;;  %v1147_v62 = vsel %vm1137_vm4, %v1134_v2, %v1136_v44  ;;  %vm2681_vm4 = vsmask.f32 2304 }
 0x1d0   :  { %v4224_v0 = vadd.f32 %v1146_v56, %v808_v45  ;;  %v1170_v1 = vadd.f32 %v1147_v62, %v810_v61 }
 0x1d6   :  { %v1970_v3 = vpop.f32.mrf.mxu1 }
 0x1d7   :  { %v1929_v20 = vpop.f32.mrf.mxu0 }
 0x1d8   :  { %2077 = vrot.lane.b32.xlu1 %v1929_v20, %s3292_s23  ;;  %v1972_v7 = vpop.f32.mrf.mxu1 }
 0x1d9   :  { %v1931_v10 = vpop.f32.mrf.mxu0  ;;  %v1434_v5 = vpop.permute.xlu1 %1433  ;;  %2083 = vrot.lane.b32.xlu0 %v1972_v7, %s3292_s23 }
 0x1da   :  { %v1974_v63 = vpop.f32.mrf.mxu1 }
 0x1db   :  { %v1933_v11 = vpop.f32.mrf.mxu0  ;;  %v1436_v28 = vpop.permute.xlu0 %1435 }
 0x1dc   :  { %v1456_v9 = vsel %vm1455_vm5, %v1434_v5, %v1436_v28  ;;  %2081 = vrot.lane.b32.xlu1 %v1970_v3, %s3292_s23  ;;  %v1975_v40 = vpop.f32.mrf.mxu1 }
 0x1dd   :  { %v4231_v14 = vadd.f32 %v1456_v9, %v4167_v4  ;;  %v1934_v16 = vpop.f32.mrf.mxu0  ;;  %v4233_v17 = vpop.permute.xlu1 %1437 }
 0x1de   :  { %v1457_v21 = vsel %vm1455_vm5, %v1436_v28, %v4233_v17 }
 0x1df   :  { %v4238_v42 = vadd.f32 %v1457_v21, %v4172_v13  ;;  %v4241_v18 = vpop.permute.xlu0 %1439 }
 0x1e0   :  { %2079 = vrot.lane.b32.xlu1 %v1931_v10, %s3292_s23 }
 0x1e6   :  { %v2052_v19 = vpop.f32.mrf.mxu1 }
 0x1e7   :  { %v2011_v12 = vpop.f32.mrf.mxu0 }
 0x1e8   :  { %2085 = vrot.lane.b32.xlu0 %v2011_v12, %s3292_s23  ;;  %v3108_v8 = vpop.f32.mrf.mxu1 }
 0x1e9   :  { %v2013_v4 = vpop.f32.mrf.mxu0  ;;  %v4244_v22 = vpop.permute.xlu0 %1441 }
 0x1ea   :  { %2087 = vrot.lane.b32.xlu1 %v2013_v4, %s3292_s23  ;;  %v2055_v23 = vpop.f32.mrf.mxu1  ;;  %v1459_v13 = vsel %vm1455_vm5, %v4241_v18, %v4244_v22  ;;  %v4274_v3 = vpop.permute.xlu1 %1445 }
 0x1eb   :  { %v2015_v25 = vpop.f32.mrf.mxu0  ;;  %v4251_v29 = vadd.f32 %v1459_v13, %v4191_v31 }
 0x1ec   :  { %v3109_v30 = vpop.f32.mrf.mxu1 }
 0x1ed   :  { %v2016_v32 = vpop.f32.mrf.mxu0 }
 0x1ee   :  { %v4276_v20 = vpop.permute.xlu1 %1443 }
 0x1f2   :  { %v4278_v7 = vpop.permute.xlu1 %1447 }
 0x1f6   :  { %v2206_v33 = vpop.f32.mrf.mxu1 }
 0x1f7   :  { %v2165_v26 = vpop.f32.mrf.mxu0 }
 0x1f8   :  { %2387 = vrot.lane.b32.xlu0 %v2165_v26, %s3293_s24  ;;  %v2208_v51 = vpop.f32.mrf.mxu1 }
 0x1f9   :  { %v2167_v34 = vpop.f32.mrf.mxu0  ;;  %v1454_v49 = vpop.permute.xlu0 %1453 }
 0x1fa   :  { %v1478_v35 = vsel %vm1455_vm5, %v1454_v49, %v1434_v5  ;;  %2389 = vrot.lane.b32.xlu1 %v2167_v34, %s3293_s24  ;;  %v2210_v36 = vpop.f32.mrf.mxu1  ;;  %v4280_v10 = vpop.permute.xlu1 %1449 }
 0x1fb   :  { %v4256_v37 = vadd.f32 %v1478_v35, %v1171_v53  ;;  %v2169_v43 = vpop.f32.mrf.mxu0 }
 0x1fc   :  { %2391 = vrot.lane.b32.xlu0 %v2206_v33, %s3293_s24  ;;  %v2211_v31 = vpop.f32.mrf.mxu1  ;;  %v2450_v33 = vlaneseq }
 0x1fd   :  { %v2170_v59 = vpop.f32.mrf.mxu0  ;;  %v4259_v46 = vpop.permute.xlu0 %1451 }
 0x1fe   :  { %v1465_v60 = vsel %vm1455_vm5, %v4259_v46, %v1454_v49  ;;  %v4308_v34 = vshrl.u32 %v2450_v33, 7 }
 0x1ff   :  { %v4263_v57 = vadd.f32 %v1465_v60, %v1170_v1 }
 0x200   :  { %2393 = vrot.lane.b32.xlu0 %v2208_v51, %s3293_s24  ;;  %v4320_v59 = vsub.s32 0, %v4308_v34 }
 0x206   :  { %v2288_v44 = vpop.f32.mrf.mxu1 }
 0x207   :  { %v2247_v48 = vpop.f32.mrf.mxu0  ;;  %2399 = vrot.lane.b32.xlu1 %v2288_v44, %s3293_s24 }
 0x208   :  { %2395 = vrot.lane.b32.xlu0 %v2247_v48, %s3293_s24  ;;  %v2290_v47 = vpop.f32.mrf.mxu1  ;;  %v1458_v48 = vsel %vm1455_vm5, %v4233_v17, %v4241_v18 }
 0x209   :  { %v2249_v50 = vpop.f32.mrf.mxu0  ;;  %v4282_v5 = vpop.permute.xlu1 %1751 }
 0x20a   :  { %v2292_v52 = vpop.f32.mrf.mxu1 }
 0x20b   :  { %v2251_v53 = vpop.f32.mrf.mxu0  ;;  %2401 = vrot.lane.b32.xlu1 %v2290_v47, %s3293_s24  ;;  %v1754_v63 = vpop.permute.xlu0 %1753 }
 0x20c   :  { %2397 = vrot.lane.b32.xlu0 %v2249_v50, %s3293_s24  ;;  %v2293_v54 = vpop.f32.mrf.mxu1  ;;  %v1774_v35 = vsel %vm1773_vm6, %v4282_v5, %v1754_v63 }
 0x20d   :  { %v2252_v58 = vpop.f32.mrf.mxu0  ;;  %v1756_v11 = vpop.permute.xlu1 %1755  ;;  %v1797_v60 = vadd.f32 %v1774_v35, %v4231_v14  ;;  %v4335_v14 = vrot.slane %v4077_v24, %v4320_v59 }
 0x20e   :  { %v1775_v43 = vsel %vm1773_vm6, %v1754_v63, %v1756_v11 }
 0x20f   :  { %2089 = vrot.lane.b32.xlu1 %v2052_v19, %s3292_s23  ;;  %v1798_v50 = vadd.f32 %v1775_v43, %v4238_v42  ;;  %v1461_v43 = vsel %vm1455_vm5, %v4276_v20, %v4274_v3 }
 0x211   :  { %v1758_v9 = vpop.permute.xlu1 %1757 }
 0x212   :  { %v1776_v54 = vsel %vm1773_vm6, %v1756_v11, %v1758_v9 }
 0x216   :  { %v2370_v6 = vpop.f32.mrf.mxu1 }
 0x217   :  { %v2329_v27 = vpop.f32.mrf.mxu0  ;;  %2407 = vrot.lane.b32.xlu1 %v2370_v6, %s3293_s24  ;;  %v1481_v6 = vadd.f32 %v1458_v48, %v4178_v15  ;;  %v1460_v15 = vsel %vm1455_vm5, %v4244_v22, %v4276_v20 }
 0x218   :  { %2403 = vrot.lane.b32.xlu0 %v2329_v27, %s3293_s24  ;;  %v3120_v45 = vpop.f32.mrf.mxu1 }
 0x219   :  { %v2331_v61 = vpop.f32.mrf.mxu0 }
 0x21a   :  { %v2373_v2 = vpop.f32.mrf.mxu1  ;;  %v4284_v28 = vpop.permute.xlu0 %1759 }
 0x21b   :  { %v2333_v56 = vpop.f32.mrf.mxu0 }
 0x21c   :  { %2405 = vrot.lane.b32.xlu0 %v2331_v61, %s3293_s24  ;;  %v3121_v62 = vpop.f32.mrf.mxu1  ;;  %v1799_v61 = vadd.f32 %v1776_v54, %v1481_v6 }
 0x21d   :  { %v2334_v1 = vpop.f32.mrf.mxu0 }
 0x21e   :  { %v4286_v40 = vpop.permute.xlu0 %1763 }
 0x222   :  { %v4290_v21 = vpop.permute.xlu0 %1761 }
 0x223   :  { %v1778_v20 = vsel %vm1773_vm6, %v4284_v28, %v4290_v21 }
 0x226   :  { %v4294_v12 = vpop.permute.xlu0 %1765 }
 0x22a   :  { %v4288_v16 = vpop.permute.xlu1 %1767  ;;  %v4296_v4 = vpop.permute.xlu0 %1771 }
 0x22e   :  { %v4292_v19 = vpop.permute.xlu1 %1769 }
 0x23a   :  { %v4298_v13 = vpop.permute.xlu0 %2069 }
 0x23c   :  { %v2072_v8 = vpop.permute.xlu1 %2071 }
 0x23d   :  { %v2092_v31 = vsel %vm2091_vm7, %v4298_v13, %v2072_v8 }
 0x23e   :  { %v2074_v30 = vpop.permute.xlu0 %2073  ;;  %v2115_v52 = vadd.f32 %v2092_v31, %v1797_v60  ;;  %v1462_v31 = vsel %vm1455_vm5, %v4274_v3, %v4278_v7  ;;  %v1780_v3 = vsel %vm1773_vm6, %v4286_v40, %v4294_v12 }
 0x23f   :  { %v2093_v47 = vsel %vm2091_vm7, %v2072_v8, %v2074_v30  ;;  %v1777_v8 = vsel %vm1773_vm6, %v1758_v9, %v4284_v28  ;;  %v1483_v9 = vadd.f32 %v1460_v15, %v4202_v38  ;;  %v1485_v54 = vadd.f32 %v1462_v31, %v4198_v55 }
 0x240   :  { %v2076_v23 = vpop.permute.xlu1 %2075  ;;  %v2116_v27 = vadd.f32 %v2093_v47, %v1798_v50  ;;  %v1800_v50 = vadd.f32 %v1777_v8, %v4251_v29  ;;  %v1779_v38 = vsel %vm1773_vm6, %v4290_v21, %v4286_v40  ;;  %v1464_v31 = vsel %vm1455_vm5, %v4280_v10, %v4259_v46 }
 0x241   :  { %v2094_v18 = vsel %vm2091_vm7, %v2074_v30, %v2076_v23  ;;  %v1781_v46 = vsel %vm1773_vm6, %v4294_v12, %v4288_v16 }
 0x242   :  { %v2117_v62 = vadd.f32 %v2094_v18, %v1799_v61 }
 0x24a   :  { %v4300_v25 = vpop.permute.xlu1 %2077 }
 0x24b   :  { %v4304_v26 = vpop.permute.xlu0 %2083  ;;  %v2095_v22 = vsel %vm2091_vm7, %v2076_v23, %v4300_v25 }
 0x24c   :  { %v2118_v29 = vadd.f32 %v2095_v22, %v1800_v50  ;;  %v1796_v50 = vsel %vm1773_vm6, %v4296_v4, %v4282_v5 }
 0x24e   :  { %v4302_v32 = vpop.permute.xlu1 %2081 }
 0x24f   :  { %v2098_v28 = vsel %vm2091_vm7, %v4302_v32, %v4304_v26 }
 0x252   :  { %v4306_v51 = vpop.permute.xlu1 %2079 }
 0x253   :  { %v2096_v6 = vsel %vm2091_vm7, %v4300_v25, %v4306_v51  ;;  %v2097_v55 = vsel %vm2091_vm7, %v4306_v51, %v4302_v32  ;;  %v1463_v51 = vsel %vm1455_vm5, %v4278_v7, %v4280_v10  ;;  %vm2684_vm5 = vcmask 1043459  }
 0x254   :  { %v1486_v7 = vadd.f32 %v1463_v51, %v4214_v41  ;;  %v1782_v41 = vsel %vm1773_vm6, %v4288_v16, %v4292_v19 }
 0x25a   :  { %v4310_v49 = vpop.permute.xlu0 %2085 }
 0x25c   :  { %v4314_v36 = vpop.permute.xlu1 %2087 }
 0x26a   :  { %v4323_v44 = vpop.permute.xlu0 %2387 }
 0x26c   :  { %v2390_v53 = vpop.permute.xlu1 %2389 }
 0x26d   :  { %v2410_v58 = vsel %vm2409_vm8, %v4323_v44, %v2390_v53 }
 0x26e   :  { %v2433_v45 = vadd.f32 %v2410_v58, %v2115_v52  ;;  %v2392_v17 = vpop.permute.xlu0 %2391 }
 0x26f   :  { %v2411_v42 = vsel %vm2409_vm8, %v2390_v53, %v2392_v17  ;;  %v1484_v53 = vadd.f32 %v1461_v43, %v4204_v39  ;;  %v1801_v39 = vadd.f32 %v1778_v20, %v1483_v9 }
 0x270   :  { %v4341_v2 = vadd.f32 %v4335_v14, %v2433_v45  ;;  %v2434_v56 = vadd.f32 %v2411_v42, %v2116_v27 }
 0x271   :  { %v1802_v21 = vadd.f32 %v1779_v38, %v1484_v53  ;;  %v1487_v53 = vadd.f32 %v1464_v31, %v4224_v0  ;;  %v2099_v0 = vsel %vm2091_vm7, %v4304_v26, %v4310_v49  ;;  %v2718_v31 = vsub.s32 1, %v4308_v34 }
 0x272   :  { %v2465_v1 = vand.u32 2147483647, %v4341_v2  ;;  %v4345_v24 = vadd.f32 %v4335_v14, %v2434_v56  ;;  %v2394_v63 = vpop.permute.xlu0 %2393  ;;  %v2119_v56 = vadd.f32 %v2096_v6, %v1801_v39  ;;  %v1804_v6 = vadd.f32 %v1781_v46, %v1486_v7 }
 0x273   :  { %v2412_v11 = vsel %vm2409_vm8, %v2392_v17, %v2394_v63  ;;  %v1803_v17 = vadd.f32 %v1780_v3, %v1485_v54  ;;  %v1783_v39 = vsel %vm1773_vm6, %v4292_v19, %v4296_v4  ;;  %vm2509_vm9 = vcmp.ge.f32.partialorder %v4341_v2, 0.0 }
 0x274   :  { %v2476_v30 = vsub.f32 0.0, %v2465_v1  ;;  %v2466_v33 = vand.u32 2147483647, %v4345_v24  ;;  %v2435_v35 = vadd.f32 %v2412_v11, %v2117_v62  ;;  %v2120_v1 = vadd.f32 %v2097_v55, %v1802_v21 }
 0x275   :  { %v2121_v61 = vadd.f32 %v2098_v28, %v1803_v17  ;;  %v1807_v28 = vadd.f32 %v1796_v50, %v4256_v37  ;;  %v1805_v17 = vadd.f32 %v1782_v41, %v1487_v53  ;;  %v2122_v37 = vadd.f32 %v2099_v0, %v1804_v6 }
 0x276   :  { %v2487_v60 = vmul.f32 1.442695, %v2476_v30  ;;  %v2477_v48 = vsub.f32 0.0, %v2466_v33  ;;  %v4363_v47 = vadd.f32 %v4335_v14, %v2435_v35  ;;  %v2100_v21 = vsel %vm2091_vm7, %v4310_v49, %v4314_v36 }
 0x277   :  { %v3294_v41 = vmov 1966171168   ;;  %vm2510_vm10 = vcmp.ge.f32.partialorder %v4345_v24, 0.0  ;;  %vm2685_vm6 = vsmask.f32 3328 }
 0x278   :  { %3194 = vpow2.f32 %v2487_v60  ;;  %v2489_v52 = vmul.f32 1.442695, %v2477_v48  ;;  %v2467_v23 = vand.u32 2147483647, %v4363_v47  ;;  %vm2511_vm12 = vcmp.ge.f32.partialorder %v4363_v47, 0.0  ;;  %vm4598_vm14 = vmand %vm2684_vm5, %vm2685_vm6 }
 0x279   :  { %v2400_v58 = vpop.permute.xlu1 %2399 }
 0x27a   :  { %3196 = vpow2.f32 %v2489_v52  ;;  %v2478_v27 = vsub.f32 0.0, %v2467_v23  ;;  %v2396_v45 = vpop.permute.xlu0 %2395 }
 0x27b   :  { %v2413_v40 = vsel %vm2409_vm8, %v2394_v63, %v2396_v45 }
 0x27c   :  { %v2491_v18 = vmul.f32 1.442695, %v2478_v27  ;;  %v2436_v42 = vadd.f32 %v2413_v40, %v2118_v29 }
 0x27d   :  { %v2402_v62 = vpop.permute.xlu1 %2401 }
 0x27e   :  { %3198 = vpow2.f32 %v2491_v18  ;;  %v4390_v25 = vadd.f32 %v4335_v14, %v2436_v42  ;;  %v2416_v15 = vsel %vm2409_vm8, %v2400_v58, %v2402_v62  ;;  %v2398_v11 = vpop.permute.xlu0 %2397 }
 0x27f   :  { %v2439_v8 = vadd.f32 %v2416_v15, %v2121_v61  ;;  %v2414_v30 = vsel %vm2409_vm8, %v2396_v45, %v2398_v11  ;;  %v2415_v32 = vsel %vm2409_vm8, %v2398_v11, %v2400_v58 }
 0x280   :  { %v2468_v63 = vand.u32 2147483647, %v4390_v25  ;;  %v2437_v33 = vadd.f32 %v2414_v30, %v2119_v56  ;;  %v2438_v35 = vadd.f32 %v2415_v32, %v2120_v1  ;;  %v1806_v56 = vadd.f32 %v1783_v39, %v4263_v57 }
 0x281   :  { %v4400_v43 = vadd.f32 %v4335_v14, %v2439_v8  ;;  %v2090_v9 = vpop.permute.xlu1 %2089  ;;  %vm2512_vm3 = vcmp.ge.f32.partialorder %v4390_v25, 0.0 }
 0x282   :  { %v2479_v22 = vsub.f32 0.0, %v2468_v63  ;;  %v4406_v60 = vadd.f32 %v4335_v14, %v2437_v33  ;;  %v4409_v48 = vadd.f32 %v4335_v14, %v2438_v35  ;;  %v2114_v54 = vsel %vm2091_vm7, %v2090_v9, %v4298_v13  ;;  %v4465_v33 = vld [vmem:[%s4710_s3] sm:$0xff] }
 0x283   :  { %v2471_v20 = vand.u32 2147483647, %v4400_v43  ;;  %v2125_v55 = vadd.f32 %v2114_v54, %v1807_v28  ;;  %v2101_v19 = vsel %vm2091_vm7, %v4314_v36, %v2090_v9  ;;  %v2715_v46 = vrot.slane %v4465_v33, %v4320_v59  ;;  %vm2679_vm7 = vmor %vm4543_vm1, %vm4532_vm0 }
 0x284   :  { %v2493_v10 = vmul.f32 1.442695, %v2479_v22  ;;  %v2469_v3 = vand.u32 2147483647, %v4406_v60  ;;  %v2470_v52 = vand.u32 2147483647, %v4409_v48  ;;  %v2124_v11 = vadd.f32 %v2101_v19, %v1806_v56 }
 0x285   :  { %v4421_v23 = vpop.eup %3194  ;;  %v2482_v5 = vsub.f32 0.0, %v2471_v20  ;;  %v2722_v28 = vsub.s32 2, %v4308_v34 }
 0x286   :  { %v2520_v38 = vadd.f32 1.0, %v4421_v23  ;;  %3200 = vpow2.f32 %v2493_v10  ;;  %v2480_v12 = vsub.f32 0.0, %v2469_v3  ;;  %v2481_v29 = vsub.f32 0.0, %v2470_v52 }
 0x287   :  { %v4430_v58 = vpop.eup %3196  ;;  %v2499_v27 = vmul.f32 1.442695, %v2482_v5  ;;  %v2604_v5 = vunpack.c.l.s4 %v3294_v41 }
 0x288   :  { %3202 = vrcp.f32 %v2520_v38  ;;  %v2521_v16 = vadd.f32 1.0, %v4430_v58  ;;  %v2495_v45 = vmul.f32 1.442695, %v2480_v12  ;;  %v2497_v13 = vmul.f32 1.442695, %v2481_v29 }
 0x289   :  { %3204 = vpow2.f32 %v2499_v27  ;;  %v2408_v40 = vpop.permute.xlu1 %2407 }
 0x28a   :  { %3206 = vrcp.f32 %v2521_v16  ;;  %v2432_v26 = vsel %vm2409_vm8, %v2408_v40, %v4323_v44  ;;  %v2404_v18 = vpop.permute.xlu0 %2403  ;;  %v2123_v44 = vadd.f32 %v2100_v21, %v1805_v17 }
 0x28b   :  { %v4445_v42 = vpop.eup %3198  ;;  %3208 = vpow2.f32 %v2495_v45  ;;  %v2443_v4 = vadd.f32 %v2432_v26, %v2125_v55  ;;  %v2417_v61 = vsel %vm2409_vm8, %v2402_v62, %v2404_v18 }
 0x28c   :  { %v2522_v1 = vadd.f32 1.0, %v4445_v42  ;;  %3210 = vpow2.f32 %v2497_v13  ;;  %v2440_v49 = vadd.f32 %v2417_v61, %v2122_v37  ;;  %v2726_v61 = vsub.s32 3, %v4308_v34 }
 0x28d   :  { %v4453_v15 = vadd.f32 %v4335_v14, %v2443_v4  ;;  %v2605_v4 = vunpack.c.0.s8 %v2604_v5 }
 0x28e   :  { %3212 = vrcp.f32 %v2522_v1  ;;  %v4456_v8 = vadd.f32 %v4335_v14, %v2440_v49  ;;  %v2406_v30 = vpop.permute.xlu0 %2405 }
 0x28f   :  { %v2475_v36 = vand.u32 2147483647, %v4453_v15  ;;  %v2418_v62 = vsel %vm2409_vm8, %v2404_v18, %v2406_v30  ;;  %v2419_v57 = vsel %vm2409_vm8, %v2406_v30, %v2408_v40  ;;  %vm2515_vm8 = vcmp.ge.f32.partialorder %v4400_v43, 0.0 }
 0x290   :  { %v2472_v32 = vand.u32 2147483647, %v4456_v8  ;;  %v2441_v51 = vadd.f32 %v2418_v62, %v2123_v44  ;;  %v2442_v63 = vadd.f32 %v2419_v57, %v2124_v11  ;;  %v2738_v11 = vsub.s32 6, %v4308_v34 }
 0x291   :  { %v2486_v35 = vsub.f32 0.0, %v2475_v36 }
 0x292   :  { %v2483_v22 = vsub.f32 0.0, %v2472_v32  ;;  %v4469_v9 = vadd.f32 %v4335_v14, %v2441_v51  ;;  %v4472_v7 = vadd.f32 %v4335_v14, %v2442_v63  ;;  %v2719_v14 = vrot.slane %v4465_v33, %v2718_v31 }
 0x293   :  { %v4474_v50 = vpop.eup %3200  ;;  %v2507_v20 = vmul.f32 1.442695, %v2486_v35  ;;  %v4524_v35 = vsub.s32 %v2605_v4, %v4308_v34 }
 0x294   :  { %v2523_v10 = vadd.f32 1.0, %v4474_v50  ;;  %v2501_v3 = vmul.f32 1.442695, %v2483_v22  ;;  %v2473_v52 = vand.u32 2147483647, %v4469_v9  ;;  %v2734_v22 = vsub.s32 5, %v4308_v34 }
 0x295   :  { %v3203_v53 = vpop.eup %3202  ;;  %3214 = vpow2.f32 %v2507_v20  ;;  %v2474_v54 = vand.u32 2147483647, %v4472_v7 }
 0x296   :  { %v4484_v38 = vpop.eup %3204  ;;  %v2553_v12 = vmul.f32 %v3203_v53, %v4421_v23  ;;  %3216 = vrcp.f32 %v2523_v10  ;;  %v2484_v29 = vsub.f32 0.0, %v2473_v52  ;;  %v2727_v10 = vrot.slane %v4465_v33, %v2726_v61 }
 0x297   :  { %v3207_v6 = vpop.eup %3206  ;;  %v2526_v0 = vadd.f32 1.0, %v4484_v38  ;;  %3218 = vpow2.f32 %v2501_v3  ;;  %v2485_v27 = vsub.f32 0.0, %v2474_v54  ;;  %v2739_v3 = vrot.slane %v4465_v33, %v2738_v11 }
 0x298   :  { %v4490_v16 = vpop.eup %3208  ;;  %v4492_v45 = vsel %vm2509_vm9, %v3203_v53, %v2553_v12  ;;  %v2554_v13 = vmul.f32 %v3207_v6, %v4430_v58  ;;  %v2503_v23 = vmul.f32 1.442695, %v2484_v29  ;;  %v2723_v58 = vrot.slane %v4465_v33, %v2722_v28 }
 0x299   :  { %v4496_v39 = vpop.eup %3210  ;;  %v2767_v17 = vmul.f32 %v2715_v46, %v4492_v45  ;;  %3220 = vrcp.f32 %v2526_v0  ;;  %v2524_v2 = vadd.f32 1.0, %v4490_v16  ;;  %v2505_v55 = vmul.f32 1.442695, %v2485_v27 }
 0x29a   :  { %v4500_v40 = vsel %vm2510_vm10, %v3207_v6, %v2554_v13  ;;  %v2525_v37 = vadd.f32 1.0, %v4496_v39  ;;  %3222 = vpow2.f32 %v2503_v23  ;;  %vm2513_vm9 = vcmp.ge.f32.partialorder %v4406_v60, 0.0 }
 0x29b   :  { %v3213_v21 = vpop.eup %3212  ;;  %v2998_v24 = vpack.c.bf16 %v4500_v40, %v4492_v45  ;;  %3224 = vrcp.f32 %v2524_v2  ;;  %v2804_v26 = vmul.f32 %v2767_v17, %v4492_v45  ;;  %v2768_v19 = vmul.f32 %v2719_v14, %v4500_v40 }
 0x29c   :  { %v2555_v18 = vmul.f32 %v3213_v21, %v4445_v42  ;;  %3226 = vrcp.f32 %v2525_v37  ;;  %v2779_v56 = vsel %vm2673_vm11, %v2767_v17, 0.0  ;;  %v2730_v42 = vsub.s32 4, %v4308_v34 }
 0x29d   :  { %3228 = vpow2.f32 %v2505_v55  ;;  %v2780_v49 = vsel %vm2673_vm11, %v2768_v19, 0.0  ;;  %v2805_v44 = vmul.f32 %v2768_v19, %v4500_v40  ;;  %v2815_v62 = vsel %vm2673_vm11, %v2804_v26, 0.0 }
 0x29e   :  { %v2566_v1 = vsel %vm2511_vm12, %v3213_v21, %v2555_v18  ;;  %v2781_v36 = vadd.f32 %v2780_v49, %v2779_v56  ;;  %v2731_v14 = vrot.slane %v4465_v33, %v2730_v42  ;;  %vm2514_vm10 = vcmp.ge.f32.partialorder %v4409_v48, 0.0  ;;  %vm2682_vm12 = vmand %vm2680_vm2, %vm2681_vm4 }
 0x29f   :  { %v2769_v30 = vmul.f32 %v2723_v58, %v2566_v1  ;;  %v2816_v47 = vsel %vm2673_vm11, %v2805_v44, 0.0  ;;  %vm4588_vm13 = vmor %vm2682_vm12, %vm2679_vm7  ;;  %vm2689_vm2 = vsmask.f32 4352  ;;  %vm2693_vm4 = vsmask.f32 5376 }
 0x2a0   :  { %v2817_v51 = vadd.f32 %v2816_v47, %v2815_v62  ;;  %vm2687_vm0 = vmor %vm4598_vm14, %vm4588_vm13  ;;  %v2742_v62 = vsub.s32 7, %v4308_v34  ;;  %vm2696_vm7 = vcmask 1046534   ;;  %vm2700_vm12 = vcmask 1047559  }
 0x2a1   :  { %v2782_v57 = vsel %vm2673_vm11, %v2769_v30, 0.0  ;;  %v2806_v32 = vmul.f32 %v2769_v30, %v2566_v1  ;;  %vm2690_vm1 = vmand %vm2688_vm15, %vm2689_vm2  ;;  %vm2519_vm14 = vcmp.ge.f32.partialorder %v4453_v15, 0.0  ;;  %vm2517_vm2 = vcmp.ge.f32.partialorder %v4469_v9, 0.0 }
 0x2a2   :  { %v4521_v63 = vpop.eup %3214  ;;  %v2783_v20 = vadd.f32 %v2782_v57, %v2781_v36  ;;  %vm4612_vm5 = vmor %vm2690_vm1, %vm2687_vm0  ;;  %vm2701_vm0 = vsmask.f32 7424  ;;  %vm2518_vm1 = vcmp.ge.f32.partialorder %v4472_v7, 0.0 }
 0x2a3   :  { %v3217_v46 = vpop.eup %3216  ;;  %v2530_v52 = vadd.f32 1.0, %v4521_v63  ;;  %v2818_v41 = vsel %vm2673_vm11, %v2806_v32, 0.0 }
 0x2a4   :  { %v4537_v5 = vpop.eup %3218  ;;  %v2556_v54 = vmul.f32 %v3217_v46, %v4474_v50  ;;  %v2819_v29 = vadd.f32 %v2818_v41, %v2817_v51  ;;  %v2735_v50 = vrot.slane %v4465_v33, %v2734_v22  ;;  %v2576_v41 = vld [vmem:[%s4710_s3 + $0x8] sm:$0x7] }
 0x2a5   :  { %3230 = vrcp.f32 %v2530_v52  ;;  %v2527_v6 = vadd.f32 1.0, %v4537_v5  ;;  %v2751_v9 = vrot.slane %v2576_v41, %v2718_v31 }
 0x2a6   :  { %v3221_v0 = vpop.eup %3220  ;;  %v2567_v27 = vsel %vm2512_vm3, %v3217_v46, %v2556_v54  ;;  %vm2692_vm3 = vcmask 1045509  }
 0x2a7   :  { %v4550_v13 = vpop.eup %3222  ;;  %v2999_v23 = vpack.c.bf16 %v2567_v27, %v2566_v1  ;;  %v2770_v17 = vmul.f32 %v2727_v10, %v2567_v27  ;;  %v2559_v2 = vmul.f32 %v3221_v0, %v4484_v38  ;;  %3232 = vrcp.f32 %v2527_v6  ;;  %vm4622_vm6 = vmand %vm2692_vm3, %vm2693_vm4 }
 0x2a8   :  { %v3225_v25 = vpop.eup %3224  ;;  %v2528_v55 = vadd.f32 1.0, %v4550_v13  ;;  %v4567_v38 = vrot.slane %v2998_v24, %v4524_v35  ;;  %vm4660_vm4 = vmand %vm2700_vm12, %vm2701_vm0 }
 0x2a9   :  { %v3227_v37 = vpop.eup %3226  ;;  %v4570_v21 = vrot.slane %v2999_v23, %v4524_v35  ;;  %v2784_v43 = vsel %vm2673_vm11, %v2770_v17, 0.0  ;;  %v2807_v58 = vmul.f32 %v2770_v17, %v2567_v27  ;;  %v4575_v18 = vsel %vm2515_vm8, %v3221_v0, %v2559_v2 }
 0x2aa   :  { %v4573_v26 = vpop.eup %3228  ;;  %v2557_v19 = vmul.f32 %v3225_v25, %v4490_v16  ;;  %v2558_v4 = vmul.f32 %v3227_v37, %v4496_v39  ;;  %3234 = vrcp.f32 %v2528_v55  ;;  %v2785_v16 = vadd.f32 %v2784_v43, %v2783_v20 }
 0x2ab   :  { %v2631_v45 = vcombine.low %v4567_v38, %v4570_v21  ;;  %v2820_v40 = vsel %vm2673_vm11, %v2807_v58, 0.0  ;;  %v2529_v24 = vadd.f32 1.0, %v4573_v26  ;;  %v2773_v49 = vmul.f32 %v2739_v3, %v4575_v18 }
 0x2ac   :  { %v2568_v39 = vsel %vm2513_vm9, %v3225_v25, %v2557_v19  ;;  %v2569_v56 = vsel %vm2514_vm10, %v3227_v37, %v2558_v4  ;;  %v2821_v30 = vadd.f32 %v2820_v40, %v2819_v29  ;;  %vm2697_vm8 = vsmask.f32 6400  ;;  %vm2695_vm10 = vmor %vm4622_vm6, %vm4612_vm5 }
 0x2ad   :  { %v3000_v44 = vpack.c.bf16 %v2569_v56, %v2568_v39  ;;  %v2771_v11 = vmul.f32 %v2731_v14, %v2568_v39  ;;  %v2772_v42 = vmul.f32 %v2735_v50, %v2569_v56  ;;  %3236 = vrcp.f32 %v2529_v24  ;;  %vm2698_vm15 = vmand %vm2696_vm7, %vm2697_vm8 }
 0x2ae   :  { %v2810_v57 = vmul.f32 %v2773_v49, %v4575_v18  ;;  %v2790_v3 = vsel %vm2673_vm11, %v2773_v49, 0.0  ;;  %v2743_v14 = vrot.slane %v4465_v33, %v2742_v62  ;;  %vm2516_vm9 = vcmp.ge.f32.partialorder %v4456_v8, 0.0  ;;  %vm4652_vm3 = vmor %vm2698_vm15, %vm2695_vm10 }
 0x2af   :  { %v2786_v60 = vsel %vm2673_vm11, %v2771_v11, 0.0  ;;  %v2808_v36 = vmul.f32 %v2771_v11, %v2568_v39  ;;  %v2809_v48 = vmul.f32 %v2772_v42, %v2569_v56  ;;  %v2788_v51 = vsel %vm2673_vm11, %v2772_v42, 0.0  ;;  %vm2703_vm5 = vmor %vm4660_vm4, %vm4652_vm3  ;;  %v2704_v42 = vld [vmem:[%s4711_s4] sm:$0xff] }
 0x2b0   :  { %v2787_v47 = vadd.f32 %v2786_v60, %v2785_v16  ;;  %v2826_v27 = vsel %vm2673_vm11, %v2810_v57, 0.0  ;;  %v2747_v33 = vrot.slane %v2576_v41, %v4320_v59  ;;  %v2623_v25 = vrot.slane %v3000_v44, %v4524_v35 }
 0x2b1   :  { %v2822_v32 = vsel %vm2673_vm11, %v2808_v36, 0.0  ;;  %v2824_v52 = vsel %vm2673_vm11, %v2809_v48, 0.0  ;;  %v2639_v34 = vrot.slane %v2631_v45, %v4524_v35  ;;  %vm2802_vm6 = vcmask 0  }
 0x2b2   :  { %v3231_v22 = vpop.eup %3230  ;;  %v2789_v20 = vadd.f32 %v2788_v51, %v2787_v47  ;;  %v2823_v46 = vadd.f32 %v2822_v32, %v2821_v30 }
 0x2b3   :  { %v2563_v0 = vmul.f32 %v3231_v22, %v4521_v63 }
 0x2b4   :  { %v3233_v53 = vpop.eup %3232  ;;  %v2791_v12 = vadd.f32 %v2790_v3, %v2789_v20  ;;  %v2825_v29 = vadd.f32 %v2824_v52, %v2823_v46  ;;  %v2707_v20 = vld [vmem:[%s4711_s4 + $0x8] sm:$0x7] }
 0x2b5   :  { %v2560_v6 = vmul.f32 %v3233_v53, %v4537_v5  ;;  %v2755_v5 = vrot.slane %v2576_v41, %v2722_v28  ;;  %v2574_v55 = vsel %vm2519_vm14, %v3231_v22, %v2563_v0 }
 0x2b6   :  { %v2827_v50 = vadd.f32 %v2826_v27, %v2825_v29  ;;  %v2587_v40 = vpack.c.bf16 %v2574_v55, %v2574_v55 }
 0x2b7   :  { %v3235_v23 = vpop.eup %3234  ;;  %v2571_v17 = vsel %vm2516_vm9, %v3233_v53, %v2560_v6  ;;  %v2777_v39 = vmul.f32 %v2755_v5, %v2574_v55 }
 0x2b8   :  { %v3001_v63 = vpack.c.bf16 %v2571_v17, %v4575_v18  ;;  %v2561_v8 = vmul.f32 %v3235_v23, %v4550_v13  ;;  %v2774_v2 = vmul.f32 %v2743_v14, %v2571_v17  ;;  %v2662_v45 = vrot.slane %v2587_v40, %v4524_v35 }
 0x2b9   :  { %v2814_v62 = vmul.f32 %v2777_v39, %v2574_v55  ;;  %v2798_v51 = vsel %vm2673_vm11, %v2777_v39, 0.0 }
 0x2ba   :  { %v2630_v59 = vrot.slane %v3001_v63, %v4524_v35  ;;  %v2572_v37 = vsel %vm2517_vm2, %v3235_v23, %v2561_v8  ;;  %v2792_v28 = vsel %vm2673_vm11, %v2774_v2, 0.0  ;;  %v2811_v43 = vmul.f32 %v2774_v2, %v2571_v17  ;;  %v3237_v15 = vpop.eup %3236 }
 0x2bb   :  { %v2775_v58 = vmul.f32 %v2747_v33, %v2572_v37  ;;  %v2793_v18 = vadd.f32 %v2792_v28, %v2791_v12  ;;  %v2562_v4 = vmul.f32 %v3237_v15, %v4573_v26  ;;  %v2834_v52 = vsel %vm2673_vm11, %v2814_v62, 0.0 }
 0x2bc   :  { %v2632_v19 = vcombine.low %v2623_v25, %v2630_v59  ;;  %v2828_v16 = vsel %vm2673_vm11, %v2811_v43, 0.0 }
 0x2bd   :  { %v2794_v56 = vsel %vm2673_vm11, %v2775_v58, 0.0  ;;  %v2812_v1 = vmul.f32 %v2775_v58, %v2572_v37  ;;  %v2829_v49 = vadd.f32 %v2828_v16, %v2827_v50  ;;  %v2573_v26 = vsel %vm2518_vm1, %v3237_v15, %v2562_v4 }
 0x2be   :  { %v2646_v31 = vrot.slane %v2632_v19, %v4524_v35  ;;  %v2795_v44 = vadd.f32 %v2794_v56, %v2793_v18  ;;  %v3002_v11 = vpack.c.bf16 %v2573_v26, %v2572_v37  ;;  %v2776_v30 = vmul.f32 %v2751_v9, %v2573_v26 }
 0x2bf   :  { %v2830_v38 = vsel %vm2673_vm11, %v2812_v1, 0.0 }
 0x2c0   :  { %v2647_v21 = vcombine.low %v2639_v34, %v2646_v31  ;;  %v2831_v60 = vadd.f32 %v2830_v38, %v2829_v49  ;;  %v2655_v7 = vrot.slane %v3002_v11, %v4524_v35  ;;  %v2796_v36 = vsel %vm2673_vm11, %v2776_v30, 0.0 }
 0x2c1   :  { %v2813_v48 = vmul.f32 %v2776_v30, %v2573_v26  ;;  %v2797_v47 = vadd.f32 %v2796_v36, %v2795_v44 }
 0x2c2   :  { %v2705_v57 = vsel %vm2703_vm5, %v2647_v21, %v2704_v42  ;;  %v2663_v32 = vcombine.low %v2655_v7, %v2662_v45 }
 0x2c3   :  { %2706 = vst [vmem:[%s4711_s4] sm:$0xff] %v2705_v57  ;;  %v2832_v22 = vsel %vm2673_vm11, %v2813_v48, 0.0  ;;  %v2799_v46 = vadd.f32 %v2798_v51, %v2797_v47 }
 0x2c4   :  { %v2833_v10 = vadd.f32 %v2832_v22, %v2831_v60  ;;  %v2670_v3 = vrot.slane %v2663_v32, %v4524_v35 }
 0x2c5   :  { %2800 = vadd.xlane.f32.xlu0 %v2799_v46 }
 0x2c6   :  { %v2835_v53 = vadd.f32 %v2834_v52, %v2833_v10  ;;  %v2708_v41 = vsel %vm4588_vm13, %v2670_v3, %v2707_v20 }
 0x2c7   :  { %2709 = vst [vmem:[%s4711_s4 + $0x8] sm:$0x7] %v2708_v41 }
 0x2c8   :  { %2836 = vadd.xlane.f32.xlu1 %v2835_v53 }
 0x34e   :  { %v2801_v54 = vpop.xlane.xlu0 %2800 }
 0x34f   :  { %2803 = vst.msk [vmem:[#allocation3] sm:$0x1] %vm2802_vm6, %v2801_v54 }
 0x351   :  { %v2837_v35 = vpop.xlane.xlu1 %2836 }
 0x352   :  { %3252 = shalt.err (!%p3249_p4)
}
 0x353   :  { %2850 = dma.vmem_to_hbm [thread:$0]  %s2848_s12, 16, %s4712_s5, [#allocation4]   ;;  %2838 = vst.msk [vmem:[#allocation5] sm:$0x1] %vm2802_vm6, %v2837_v35 }
 0x354   :  { %s3261_s18 = scalar_lea.vmem %s2858_s14, 16  ;;  %s3265_s19 = scalar_lea.vmem %s2858_s14, 32 }
 0x355   :  { %p3262_p5 = scmp.ne.s32.totalorder %s2858_s14, %s3261_s18  ;;  %p3266_p6 = scmp.lt.s32.totalorder %s2858_s14, %s2858_s14 }
 0x356   :  { %p3267_p7 = scmp.lt.s32.totalorder %s3265_s19, %s3261_s18 }
 0x358   :  { %p3268_p8 = por %p3267_p7, %p3266_p6 }
 0x35a   :  { %p3269_p9 = pnand %p3268_p8, %p3262_p5 }
 0x35c   :  { %3272 = shalt.err (!%p3269_p9)
}
 0x35d   :  { %2860 = dma.vmem_to_hbm [thread:$0]  %s2858_s14, 16, %s4713_s6, [#allocation6]  }
 0x35e   :  { %3281 = dma.done.wait [#allocation4], 16  }
 0x35f   :  { %3282 = vsyncadd [#allocation4], 4294967280 }
 0x360   :  { %3283 = dma.done.wait [#allocation6], 16  }
 0x361   :  { %3284 = vsyncadd [#allocation6], 4294967280 }
 0x362   :  { %2869 = vsyncpa [#allocation4], 1 }
 0x363   :  { %2870 = vsyncpa [#allocation6], 1 }

</bundles_post_ra>
